<compile_context>
chip_gen: v7x
topology: tpu7x:2x2x1
jax: 0.10.0
libtpu: 0.0.40
codegen_flags: <defaults>
</compile_context>

<pallas_src>
import math
from functools import lru_cache

import jax
import jax.numpy as jnp
from jax.experimental import pallas as pl
from jax.experimental.pallas import tpu as pltpu

LATENT = 512

_VMEM_LIMIT = 48 * 1024 * 1024          # scoped VMEM limit (safe on v5e/v6e/v7x)
_TILE_BUDGET = 26 * 1024 * 1024         # double-buffered per-step footprint cap


def _round_up(x, m):
    return (x + m - 1) // m * m


# --------------------------------------------------------------------------
# Tile selection
# --------------------------------------------------------------------------

def _tile_footprint(tm, tk, tn, out_bytes, gk):
    a = 2 * tm * tk * 2                  # A blocks, bf16, double-buffered
    b = 2 * tk * tn * 2                  # B blocks, bf16, double-buffered
    o = 2 * tm * tn * out_bytes          # output blocks, double-buffered
    acc = tm * tn * 4 if gk > 1 else 0   # f32 accumulator scratch
    return a + b + o + acc


def _pick_tiles(M, K, Np, out_bytes):
    # lane-dense N tiles where possible; tiny N (3/32/64) keeps the full dim
    if Np % 256 == 0:
        tn = 256
    elif Np % 128 == 0:
        tn = 128
    else:
        tn = Np
    # K tiling: single step (weights resident) unless K is huge
    if K <= 4096:
        tk = K
    else:
        tk = K
        for cand in (4096, 2048, 1024, 512, 256, 128):
            if K % cand == 0:
                tk = cand
                break
    gk = K // tk
    # M tiling: biggest power-of-two tile that fits the VMEM budget
    m_cap = _round_up(M, 8)
    tm = 8
    for cand in (4096, 2048, 1024, 512, 256, 128, 64, 32, 16, 8):
        if cand <= m_cap and _tile_footprint(cand, tk, tn, out_bytes, gk) <= _TILE_BUDGET:
            tm = cand
            break
    Mp = _round_up(M, tm)
    return Mp, tm, tn, tk, gk


# --------------------------------------------------------------------------
# Pallas matmul kernel: relu(A @ B + bias) with optional fused BN statistics
# --------------------------------------------------------------------------

@lru_cache(maxsize=None)
def _matmul_call(Mp, K, Np, tm, tn, tk, relu, with_stats, m_valid, out_dtype):
    gi, gj, gk = Mp // tm, Np // tn, K // tk

    def epilogue(r, o_ref, sum_ref, sq_ref, row0):
        if relu:
            r = jnp.maximum(r, 0.0)
        o_ref[...] = r.astype(o_ref.dtype)
        if with_stats:
            rr = r
            if m_valid != Mp:            # keep padded rows out of the BN stats
                rows = jax.lax.broadcasted_iota(jnp.int32, (tm, 1), 0) + row0
                rr = jnp.where(rows < m_valid, r, 0.0)
            s = jnp.sum(rr, axis=0, keepdims=True)
            q = jnp.sum(rr * rr, axis=0, keepdims=True)
            sum_ref[...] = jnp.broadcast_to(s, (8, tn))
            sq_ref[...] = jnp.broadcast_to(q, (8, tn))

    if gk == 1:
        # Single K step: no accumulator scratch, no pl.when epilogue.
        def kernel(a_ref, b_ref, bias_ref, *out_refs):
            if with_stats:
                o_ref, sum_ref, sq_ref = out_refs
            else:
                (o_ref,) = out_refs
                sum_ref = sq_ref = None
            # program_id is only read at the kernel top level (never inside a
            # pl.when body) so both the TPU and interpret lowerings handle it.
            row0 = pl.program_id(0) * tm if (with_stats and m_valid != Mp) else 0
            r = jnp.dot(a_ref[...], b_ref[...],
                        preferred_element_type=jnp.float32) + bias_ref[...]
            epilogue(r, o_ref, sum_ref, sq_ref, row0)

        scratch = ()
    else:
        def kernel(a_ref, b_ref, bias_ref, *refs):
            if with_stats:
                o_ref, sum_ref, sq_ref, acc_ref = refs
            else:
                o_ref, acc_ref = refs
                sum_ref = sq_ref = None
            k_id = pl.program_id(2)                       # hoisted: top level
            row0 = pl.program_id(0) * tm if (with_stats and m_valid != Mp) else 0

            @pl.when(k_id == 0)
            def _init():
                acc_ref[...] = jnp.zeros_like(acc_ref)

            acc_ref[...] += jnp.dot(a_ref[...], b_ref[...],
                                    preferred_element_type=jnp.float32)

            @pl.when(k_id == gk - 1)
            def _fin():
                epilogue(acc_ref[...] + bias_ref[...], o_ref, sum_ref, sq_ref, row0)

        scratch = (pltpu.VMEM((tm, tn), jnp.float32),)

    out_shape = [jax.ShapeDtypeStruct((Mp, Np), out_dtype)]
    out_specs = [pl.BlockSpec((tm, tn), lambda i, j, k: (i, j))]
    if with_stats:
        out_shape += [jax.ShapeDtypeStruct((gi * 8, Np), jnp.float32)] * 2
        out_specs += [pl.BlockSpec((8, tn), lambda i, j, k: (i, j))] * 2

    return pl.pallas_call(
        kernel,
        out_shape=tuple(out_shape) if with_stats else out_shape[0],
        grid_spec=pltpu.PrefetchScalarGridSpec(
            num_scalar_prefetch=0,
            grid=(gi, gj, gk),
            in_specs=[
                pl.BlockSpec((tm, tk), lambda i, j, k: (i, k)),
                pl.BlockSpec((tk, tn), lambda i, j, k: (k, j)),
                pl.BlockSpec((1, tn), lambda i, j, k: (0, j)),
            ],
            out_specs=tuple(out_specs) if with_stats else out_specs[0],
            scratch_shapes=scratch,
        ),
        compiler_params=pltpu.CompilerParams(
            dimension_semantics=("parallel", "parallel", "arbitrary"),
            vmem_limit_bytes=_VMEM_LIMIT),
    )


def pallas_matmul(a, wmat, bias2d, relu, with_stats=False, out_dtype=jnp.bfloat16):
    """a:(M,K) @ wmat:(K,Np) + bias, bf16 operands / f32 accumulation."""
    M, K = a.shape
    Kb, Np = wmat.shape
    assert K == Kb
    out_bytes = jnp.dtype(out_dtype).itemsize
    Mp, tm, tn, tk, _gk = _pick_tiles(M, K, Np, out_bytes)
    if a.dtype != jnp.bfloat16:
        a = a.astype(jnp.bfloat16)
    if Mp != M:
        a = jnp.pad(a, ((0, Mp - M), (0, 0)))
    call = _matmul_call(Mp, K, Np, tm, tn, tk, bool(relu), bool(with_stats),
                        M, out_dtype)
    if with_stats:
        out, s, q = call(a, wmat, bias2d)
        gi = Mp // tm
        s = s.reshape(gi, 8, Np)[:, 0, :].sum(axis=0)
        q = q.reshape(gi, 8, Np)[:, 0, :].sum(axis=0)
        if Mp != M:
            out = out[:M]
        return out, s, q
    out = call(a, wmat, bias2d)
    return out[:M] if Mp != M else out


# --------------------------------------------------------------------------
# BatchNorm helpers (stats fused in the matmul; affine is plain jnp so XLA can
# fuse it into the next layer's pad / im2col gather)
# --------------------------------------------------------------------------

def finish_bn(sums, sqs, count, gamma, beta, phases=1, eps=1e-5):
    # Training-mode batch statistics (biased variance), matching the PyTorch
    # module's default (train-mode) forward.
    if phases > 1:
        C = gamma.shape[0]
        sums = sums.reshape(phases, C).sum(axis=0)
        sqs = sqs.reshape(phases, C).sum(axis=0)
        count = count * phases
    mean = sums / count
    var = jnp.maximum(sqs / count - mean * mean, 0.0)
    scale = gamma * jax.lax.rsqrt(var + eps)
    shift = beta - mean * scale
    if phases > 1:
        scale = jnp.tile(scale, phases)
        shift = jnp.tile(shift, phases)
    return scale, shift


def bn_affine(y2d, scale, shift, out_dtype=jnp.bfloat16):
    return (y2d.astype(jnp.float32) * scale[None, :] + shift[None, :]).astype(out_dtype)


# --------------------------------------------------------------------------
# Layer glue (im2col / sub-pixel conv-transpose around the Pallas matmul)
# --------------------------------------------------------------------------

def _im2col(x, K, stride):
    N, H, W, C = x.shape
    Ho = (H - K) // stride + 1
    Wo = (W - K) // stride + 1
    cols = []
    for kh in range(K):
        for kw in range(K):
            cols.append(x[:, kh:kh + stride * Ho:stride,
                          kw:kw + stride * Wo:stride, :])
    patches = jnp.concatenate(cols, axis=-1)          # column order (kh, kw, cin)
    return patches.reshape(N * Ho * Wo, K * K * C), Ho, Wo


def conv_bn_relu(x, wmat, bias2d, gamma, beta, *, ksize, stride, padding, cout):
    N = x.shape[0]
    xp = jnp.pad(x, ((0, 0), (padding, padding), (padding, padding), (0, 0)))
    patches, Ho, Wo = _im2col(xp, ksize, stride)
    y, s, q = pallas_matmul(patches, wmat, bias2d, relu=True, with_stats=True)
    if s.shape[0] != cout:
        s, q = s[:cout], q[:cout]
        y = y[:, :cout]
    scale, shift = finish_bn(s, q, N * Ho * Wo, gamma, beta)
    y = bn_affine(y, scale, shift)
    return y.reshape(N, Ho, Wo, cout)


def convT_bn_relu(x, wmat, bias2d, gamma, beta, *, cout):
    # ConvTranspose2d(k=4, s=2, p=1) as a 4-phase sub-pixel conv: one matmul over
    # 3x3 stride-1 windows producing 4*cout columns, then depth-to-space.
    N, H, W, _ = x.shape
    xp = jnp.pad(x, ((0, 0), (1, 1), (1, 1), (0, 0)))
    patches, Ho, Wo = _im2col(xp, 3, 1)               # Ho == H, Wo == W
    y, s, q = pallas_matmul(patches, wmat, bias2d, relu=True, with_stats=True)
    scale, shift = finish_bn(s, q, N * Ho * Wo, gamma, beta, phases=4)
    y = bn_affine(y, scale, shift)                    # (N*H*W, 4*cout), lane-dense
    y = y.reshape(N, Ho, Wo, 2, 2, cout).transpose(0, 1, 3, 2, 4, 5)
    return y.reshape(N, 2 * Ho, 2 * Wo, cout)


def conv_plain(x, wmat, bias2d, *, ksize, stride, padding, cout, relu):
    N = x.shape[0]
    xp = jnp.pad(x, ((0, 0), (padding, padding), (padding, padding), (0, 0)))
    patches, Ho, Wo = _im2col(xp, ksize, stride)
    y = pallas_matmul(patches, wmat, bias2d, relu=relu, out_dtype=jnp.float32)
    if y.shape[1] != cout:
        y = y[:, :cout]
    return y.reshape(N, Ho, Wo, cout)


def reparameterize(mu, logvar, eps):
    return mu + eps * jnp.exp(0.5 * logvar)


# --------------------------------------------------------------------------
# Model definition (mirrors Colon.__init__); weights prepared once at init.
# --------------------------------------------------------------------------

ENC_CONVS = [
    (3, 32, 3, 1), (32, 32, 4, 2),
    (32, 64, 3, 1), (64, 64, 4, 2),
    (64, 128, 3, 1), (128, 128, 4, 2),
    (128, 256, 3, 1), (256, 256, 4, 2),
    (256, 512, 3, 1), (512, 512, 4, 2),
    (512, 1024, 3, 1), (1024, 1024, 4, 2),
    (1024, 2048, 3, 1), (2048, 2048, 4, 2),
]

DEC_BLOCKS = [
    ("conv", 2048, 1024), ("convT", 1024, 1024),
    ("conv", 1024, 512),  ("convT", 512, 512),
    ("conv", 512, 256),   ("convT", 256, 256),
    ("conv", 256, 128),   ("convT", 128, 128),
    ("conv", 128, 64),    ("convT", 64, 64),
    ("conv", 64, 32),     ("convT", 32, 32),
    ("conv", 32, 32),     ("convT", 32, 32),
]


def _prep_conv(w, b):
    # w: (Cout, Cin, KH, KW) PyTorch Conv2d layout -> (KH*KW*Cin, Np) bf16
    cout, cin, kh, kw = w.shape
    wmat = jnp.transpose(w, (2, 3, 1, 0)).reshape(kh * kw * cin, cout)
    npad = _round_up(cout, 128) if cout >= 128 else cout
    if npad != cout:
        wmat = jnp.pad(wmat, ((0, 0), (0, npad - cout)))
        b = jnp.pad(b, (0, npad - cout))
    return wmat.astype(jnp.bfloat16), b.reshape(1, -1).astype(jnp.float32)


def _prep_convT(w, b):
    # w: (Cin, Cout, 4, 4) PyTorch ConvTranspose2d layout -> sub-pixel matrix
    # (9*Cin, 4*Cout); column order is (phase_row, phase_col, cout).
    cin, cout = w.shape[0], w.shape[1]
    zero = jnp.zeros((cin, cout), jnp.float32)
    kmap = ((3, 1, -1), (-1, 2, 0))   # kmap[phase][window offset] -> kernel tap or -1
    blocks = []
    for dr in range(3):
        for dc in range(3):
            phases = []
            for a in (0, 1):
                row = []
                for bb in (0, 1):
                    kr, kc = kmap[a][dr], kmap[bb][dc]
                    row.append(w[:, :, kr, kc] if (kr >= 0 and kc >= 0) else zero)
                phases.append(jnp.stack(row, axis=1))        # (cin, 2, cout)
            blocks.append(jnp.stack(phases, axis=1))          # (cin, 2, 2, cout)
    wm = jnp.stack(blocks, axis=0)                            # (9, cin, 2, 2, cout)
    wmat = wm.reshape(9 * cin, 4 * cout).astype(jnp.bfloat16)
    bias = jnp.tile(b, 4).reshape(1, -1).astype(jnp.float32)
    return wmat, bias


def _prep_linear(w, b):
    # w: (out_features, in_features) PyTorch Linear layout
    outf, _ = w.shape
    wmat = jnp.transpose(w)
    npad = _round_up(outf, 128) if outf >= 128 else outf
    if npad != outf:
        wmat = jnp.pad(wmat, ((0, 0), (0, npad - outf)))
        b = jnp.pad(b, (0, npad - outf))
    return wmat.astype(jnp.bfloat16), b.reshape(1, -1).astype(jnp.float32)


def init_params(key):
    keys = iter(jax.random.split(key, 128))

    def nk():
        return next(keys)

    def wgt(shape, fan_in):
        return jax.random.normal(nk(), shape, jnp.float32) / math.sqrt(fan_in)

    def bias(c):
        return jax.random.normal(nk(), (c,), jnp.float32) * 0.01

    def bn(c):
        return jnp.ones((c,), jnp.float32), jnp.zeros((c,), jnp.float32)

    p = {"enc": [], "dec": []}
    for cin, cout, k, _s in ENC_CONVS:
        w = wgt((cout, cin, k, k), cin * k * k)
        p["enc"].append(_prep_conv(w, bias(cout)) + bn(cout))
    p["fc1"] = _prep_linear(wgt((2 * LATENT, 2048 * 4), 2048 * 4), bias(2 * LATENT))
    p["fc2"] = _prep_linear(wgt((2 * LATENT, 2 * LATENT), 2 * LATENT), bias(2 * LATENT))
    p["dec_fc"] = _prep_linear(wgt((2048 * 4, LATENT), LATENT), bias(2048 * 4))
    p["dec_bn"] = bn(2048 * 4)
    for kind, cin, cout in DEC_BLOCKS:
        if kind == "conv":
            w = wgt((cout, cin, 3, 3), cin * 9)
            p["dec"].append(_prep_conv(w, bias(cout)) + bn(cout))
        else:
            w = wgt((cin, cout, 4, 4), cin * 16)
            p["dec"].append(_prep_convT(w, bias(cout)) + bn(cout))
    p["final"] = _prep_conv(wgt((3, 32, 3, 3), 32 * 9), bias(3))
    return p


def colon_forward(params, x_nchw, eps_key):
    x = jnp.transpose(x_nchw, (0, 2, 3, 1)).astype(jnp.bfloat16)   # NCHW -> NHWC

    # ----- encoder -----
    for (cin, cout, k, s), (wmat, b2, g, bt) in zip(ENC_CONVS, params["enc"]):
        x = conv_bn_relu(x, wmat, b2, g, bt, ksize=k, stride=s, padding=1, cout=cout)
    n = x.shape[0]
    x = jnp.transpose(x, (0, 3, 1, 2)).reshape(n, -1)             # Flatten (NCHW order)
    x = pallas_matmul(x, *params["fc1"], relu=True)
    x = pallas_matmul(x, *params["fc2"], relu=False, out_dtype=jnp.float32)

    mu, logvar = x[:, :LATENT], x[:, LATENT:]
    eps = jax.random.normal(eps_key, mu.shape, jnp.float32)       # torch.randn_like(std)
    z = reparameterize(mu, logvar, eps)

    # ----- decoder -----
    h, s_, q_ = pallas_matmul(z, *params["dec_fc"], relu=True, with_stats=True)
    g, bt = params["dec_bn"]
    scale, shift = finish_bn(s_, q_, z.shape[0], g, bt)
    h = bn_affine(h, scale, shift)
    h = h.reshape(n, 2048, 2, 2).transpose(0, 2, 3, 1)            # View -> NHWC
    for (kind, cin, cout), (wmat, b2, g, bt) in zip(DEC_BLOCKS, params["dec"]):
        if kind == "conv":
            h = conv_bn_relu(h, wmat, b2, g, bt, ksize=3, stride=1, padding=1, cout=cout)
        else:
            h = convT_bn_relu(h, wmat, b2, g, bt, cout=cout)
    wmat, b2 = params["final"]
    h = conv_plain(h, wmat, b2, ksize=3, stride=1, padding=1, cout=3, relu=False)
    recon = jnp.transpose(h, (0, 3, 1, 2)).astype(jnp.float32)    # back to NCHW
    return recon, mu, logvar


if __name__ == "__main__":
    root = jax.random.PRNGKey(0)
    pkey, xkey, ekey = jax.random.split(root, 3)
    params = init_params(pkey)

    # spatial 256 is forced by Flatten -> Linear(2048*2*2, ...); batch kept small (2).
    x = jax.random.normal(xkey, (2, 3, 256, 256), jnp.float32)

    recon, mu, logvar = colon_forward(params, x, ekey)
    jax.block_until_ready((recon, mu, logvar))
    assert recon.shape == (2, 3, 256, 256)
    assert mu.shape == (2, LATENT) and logvar.shape == (2, LATENT)
    assert bool(jnp.isfinite(recon).all()) and bool(jnp.isfinite(mu).all())
    print("KERNEL_OK")
</pallas_src>

<mosaic_0001>
module attributes {stable_mosaic.version = 11 : i64} {
  func.func @kernel(%arg0: i32, %arg1: i32, %arg2: i32, %arg3: memref<4096x27xbf16, #tpu.memory_space<vmem>>, %arg4: memref<27x32xbf16, #tpu.memory_space<vmem>>, %arg5: memref<1x32xf32, #tpu.memory_space<vmem>>, %arg6: memref<4096x32xbf16, #tpu.memory_space<vmem>>, %arg7: memref<8x32xf32, #tpu.memory_space<vmem>>, %arg8: memref<8x32xf32, #tpu.memory_space<vmem>>) attributes {dimension_semantics = [#tpu.dimension_semantics<parallel>, #tpu.dimension_semantics<parallel>, #tpu.dimension_semantics<arbitrary>], iteration_bounds = array<i64: 32, 1, 1>, scalar_prefetch = 0 : i64, scratch_operands = 0 : i64, tpu.core_type = #tpu.core_type<tc>, window_params = [{transform_indices = @transform_0, window_bounds = array<i64: 4096, 27>}, {transform_indices = @transform_1, window_bounds = array<i64: 27, 32>}, {transform_indices = @transform_2, window_bounds = array<i64: 1, 32>}, {transform_indices = @transform_3, window_bounds = array<i64: 4096, 32>}, {transform_indices = @transform_4, window_bounds = array<i64: 8, 32>}, {transform_indices = @transform_5, window_bounds = array<i64: 8, 32>}]} {
    %c0 = arith.constant 0 : index
    %c0_0 = arith.constant 0 : index
    %0 = vector.load %arg3[%c0, %c0_0] : memref<4096x27xbf16, #tpu.memory_space<vmem>>, vector<4096x27xbf16>
    %c0_1 = arith.constant 0 : index
    %c0_2 = arith.constant 0 : index
    %1 = vector.load %arg4[%c0_1, %c0_2] : memref<27x32xbf16, #tpu.memory_space<vmem>>, vector<27x32xbf16>
    %cst = arith.constant dense<0.000000e+00> : vector<4096x32xf32>
    %2 = tpu.matmul %0, %1, %cst {dimension_numbers = #tpu.dot_dimension_numbers<[1], [0], [0], [1], [0, 0, 1, 1], [], []>} : vector<4096x27xbf16>, vector<27x32xbf16>, vector<4096x32xf32> -> vector<4096x32xf32>
    %c0_3 = arith.constant 0 : index
    %c0_4 = arith.constant 0 : index
    %3 = vector.load %arg5[%c0_3, %c0_4] : memref<1x32xf32, #tpu.memory_space<vmem>>, vector<1x32xf32>
    %4 = vector.broadcast %3 : vector<1x32xf32> to vector<4096x32xf32>
    %5 = arith.addf %2, %4 : vector<4096x32xf32>
    %cst_5 = arith.constant 0.000000e+00 : f32
    %6 = vector.broadcast %cst_5 : f32 to vector<4096x32xf32>
    %7 = arith.maximumf %5, %6 : vector<4096x32xf32>
    %8 = arith.truncf %7 : vector<4096x32xf32> to vector<4096x32xbf16>
    %c0_6 = arith.constant 0 : index
    %c0_7 = arith.constant 0 : index
    %9 = vector.load %arg6[%c0_6, %c0_7] : memref<4096x32xbf16, #tpu.memory_space<vmem>>, vector<4096x32xbf16>
    tpu.vector_store %arg6[%c0_6, %c0_7], %8 {strides = array<i32>} : memref<4096x32xbf16, #tpu.memory_space<vmem>>, vector<4096x32xbf16>,
    %cst_8 = arith.constant dense<0.000000e+00> : vector<32xf32>
    %10 = vector.multi_reduction <add>, %7, %cst_8 [0] : vector<4096x32xf32> to vector<32xf32>
    %11 = vector.shape_cast %10 : vector<32xf32> to vector<1x32xf32>
    %12 = arith.mulf %7, %7 : vector<4096x32xf32>
    %cst_9 = arith.constant dense<0.000000e+00> : vector<32xf32>
    %13 = vector.multi_reduction <add>, %12, %cst_9 [0] : vector<4096x32xf32> to vector<32xf32>
    %14 = vector.shape_cast %13 : vector<32xf32> to vector<1x32xf32>
    %15 = vector.shape_cast %11 : vector<1x32xf32> to vector<1x32xf32>
    %16 = vector.broadcast %15 : vector<1x32xf32> to vector<8x32xf32>
    %c0_10 = arith.constant 0 : index
    %c0_11 = arith.constant 0 : index
    %17 = vector.load %arg7[%c0_10, %c0_11] : memref<8x32xf32, #tpu.memory_space<vmem>>, vector<8x32xf32>
    tpu.vector_store %arg7[%c0_10, %c0_11], %16 {strides = array<i32>} : memref<8x32xf32, #tpu.memory_space<vmem>>, vector<8x32xf32>,
    %18 = vector.shape_cast %14 : vector<1x32xf32> to vector<1x32xf32>
    %19 = vector.broadcast %18 : vector<1x32xf32> to vector<8x32xf32>
    %c0_12 = arith.constant 0 : index
    %c0_13 = arith.constant 0 : index
    %20 = vector.load %arg8[%c0_12, %c0_13] : memref<8x32xf32, #tpu.memory_space<vmem>>, vector<8x32xf32>
    tpu.vector_store %arg8[%c0_12, %c0_13], %19 {strides = array<i32>} : memref<8x32xf32, #tpu.memory_space<vmem>>, vector<8x32xf32>,
    return
  }
  func.func @transform_0(%arg0: i32, %arg1: i32, %arg2: i32) -> (i32, i32) {
    %c0_i32 = arith.constant 0 : i32
    return %arg0, %arg2 : i32, i32
  }
  func.func @transform_1(%arg0: i32, %arg1: i32, %arg2: i32) -> (i32, i32) {
    %c0_i32 = arith.constant 0 : i32
    return %arg2, %arg1 : i32, i32
  }
  func.func @transform_2(%arg0: i32, %arg1: i32, %arg2: i32) -> (i32, i32) {
    %c0_i32 = arith.constant 0 : i32
    %c0_i32_0 = arith.constant 0 : i32
    return %c0_i32, %arg1 : i32, i32
  }
  func.func @transform_3(%arg0: i32, %arg1: i32, %arg2: i32) -> (i32, i32) {
    %c0_i32 = arith.constant 0 : i32
    return %arg0, %arg1 : i32, i32
  }
  func.func @transform_4(%arg0: i32, %arg1: i32, %arg2: i32) -> (i32, i32) {
    %c0_i32 = arith.constant 0 : i32
    return %arg0, %arg1 : i32, i32
  }
  func.func @transform_5(%arg0: i32, %arg1: i32, %arg2: i32) -> (i32, i32) {
    %c0_i32 = arith.constant 0 : i32
    return %arg0, %arg1 : i32, i32
  }
}

</mosaic_0001>

<bundles_post_ra>
// kernel: tpu_custom_call.1
= control target key start
LH: loop header
LB: loop body
LE: loop exit
PB: predicated region body
PF: predicated region fallthrough
CT: control target
= control target key end

     0   :  { %11 = vsyncpa [#allocation3], 0  ;;  %s17803_s0 = inlined_call_operand.hbm [shape: bf16[131072,27], index: 0, kind: input, shape index: {}]   ;;  %s17804_s1 = inlined_call_operand.vmem [shape: bf16[27,32], index: 1, kind: input, shape index: {}]   ;;  %s17805_s2 = inlined_call_operand.vmem [shape: f32[1,32], index: 2, kind: input, shape index: {}]   ;;  %s17806_s3 = inlined_call_operand.hbm [shape: bf16[131072,32], index: 3, kind: output, shape index: {0}]   ;;  %s17807_s4 = inlined_call_operand.vmem [shape: f32[256,32], index: 4, kind: output, shape index: {1}]   ;;  %s17808_s5 = inlined_call_operand.vmem [shape: f32[256,32], index: 5, kind: output, shape index: {2}]  }
   0x1   :  { %13 = vsyncpa [#allocation3 + $0x1], 0 }
   0x2   :  { %14 = vsyncpa [#allocation4], 0 }
   0x3   :  { %16 = vsyncpa [#allocation4 + $0x1], 0  ;;  %s13710_s18 = smov 0   ;;  %s13712_s19 = smov 0  }
   0x4   :  { %s13714_s20 = smov 0   ;;  %s13716_s21 = smov 0  }
   0x5   :  { %s13718_s22 = smov 0   ;;  %s13720_s23 = smov 0  }
   0x6 LB: > { %s10886_s24 = sadd.s32 4294967295, %s13671_s23   ;;  %s10887_s25 = sadd.s32 4294967294, %s13671_s23   ;;  %s13671_s23 = sphi %s13720_s23, %s22_s23   ;;  %s13667_s22 = sphi %s13718_s22, %s18014_s22   ;;  %s13663_s21 = sphi %s13716_s21, %s18013_s21   ;;  %s13659_s20 = sphi %s13714_s20, %s18012_s20   ;;  %s13655_s19 = sphi %s13712_s19, %s18011_s19   ;;  %s13651_s18 = sphi %s13710_s18, %s18010_s18  }
   0x7   : > { %s41_s26 = sadd.s32 1, %s13667_s22  ;;  %s50_s27 = sadd.s32 1, %s13659_s20 }
   0x8   : > { %p43_p0 = scmp.ge.s32.totalorder %s41_s26, 32  ;;  %p57_p1 = scmp.ne.s32.totalorder %s13659_s20, %s13655_s19 }
   0x9   : > { %p58_p2 = scmp.eq.s32.totalorder %s13671_s23, 0  ;;  %p63_p3 = scmp.ne.s32.totalorder %s13655_s19, %s13651_s18 }
   0xa   : > { %s18016_s26 = smov (%p43_p0, %s41_s26), 0  ;;  %p64_p5 = scmp.eq.s32.totalorder %s10886_s24, 0 }
   0xb   : > { %p13751_p4 = por %p58_p2, %p57_p1  ;;  %s45_s29 = ssub.s32 %s13667_s22, %s18016_s26 }
   0xc   : > { %p143_p6 = scmp.eq.s32.totalorder %s10886_s24, 31  ;;  %p48_p7 = scmp.eq.s32.totalorder %s45_s29, 0 }
   0xd   : > { %p13757_p8 = por %p64_p5, %p63_p3  ;;  %p149_p10 = scmp.eq.s32.totalorder %s10887_s25, 31 }
   0xe   : > { %p13761_p9 = por %p143_p6, %p57_p1  ;;  %p13236_p12 = scmp.lt.s32.totalorder %s13671_s23, 32 }
   0xf   : > { %s13766_s7 = scalar_select %p48_p7, %s13659_s20, %s50_s27  }
  0x10   : > { %s17812_s6 = scalar_select %p13761_p9, 1, 0 }
  0x11   : > { %p13768_p11 = por %p149_p10, %p63_p3  ;;  %s243_s9 = sand.u32 1, %s13659_s20  }
  0x12   : > { %s10892_s10 = sshll.u32 %s243_s9, 11  ;;  %s11932_s11 = sshll.u32 %s13667_s22, 15 }
  0x13   : > { %s17813_s8 = scalar_select %p13768_p11, 1, 0 }
  0x14   : > { %s13778_s14 = scalar_lea.hbm %s17803_s0, %s11932_s11  ;;  %s247_s15 = scalar_lea.vmem [#allocation2], %s10892_s10 }
  0x15   : > { %s255_s16 = sshll.u32 %s247_s15, 4  ;;  %p13784_p13 = pnand %p13236_p12, %p13751_p4  ;;  %s13780_s16 = int_to_ptr.vmem [resolvable:$true] %s255_s16 }
  0x16   : > { %s13789_s24 = scalar_lea.sflag [#allocation3], %s243_s9  ;;  %s13559_s25 = scalar_lea.hbm %s13778_s14, 32768 }
  0x17   : > { %p13560_p1 = scmp.ne.s32.totalorder %s13778_s14, %s13559_s25  ;;  %p13561_p2 = pneg %p13784_p13 }
  0x18   : > { %s13564_s28 = scalar_lea.hbm %s17803_s0, 1048576  ;;  %p13565_p4 = scmp.lt.u32.totalorder %s13778_s14, %s17803_s0 }
  0x19   : > { %p13562_p3 = pnand %p13561_p2, %p13560_p1  ;;  %p13566_p6 = scmp.lt.u32.totalorder %s13564_s28, %s13559_s25 }
  0x1a   : > { %p13568_p10 = scmp.lt.u32.totalorder %s13559_s25, %s13778_s14 }
  0x1b   : > { %p13563_p5 = pneg %p13562_p3  ;;  %p13567_p7 = por %p13566_p6, %p13565_p4 }
  0x1d   : > { %p13569_p12 = por %p13568_p10, %p13567_p7 }
  0x1f   : > { %p13570_p0 = pnand %p13569_p12, %p13563_p5 }
  0x21   : > { %13573 = shalt.err (!%p13570_p0)
}
  0x22   : > { %s13574_s9 = scalar_lea.vmem %s13780_s16, 32768  ;;  %s13673_s12 = smov [#allocation2]  }
  0x23   : > { %p13575_p1 = scmp.ne.s32.totalorder %s13780_s16, %s13574_s9  ;;  %s13579_s13 = sshll.u32 %s13673_s12, 4  ;;  %s13580_s13 = int_to_ptr.vmem [resolvable:$false] %s13579_s13 }
  0x24   : > { %s13581_s15 = scalar_lea.vmem %s13580_s13, 65536  ;;  %p13582_p9 = scmp.lt.s32.totalorder %s13780_s16, %s13580_s13 }
  0x25   : > { %p13577_p3 = pnand %p13575_p1, %p13561_p2  ;;  %p13583_p4 = scmp.lt.s32.totalorder %s13581_s15, %s13574_s9 }
  0x27   : > { %p13578_p11 = pneg %p13577_p3  ;;  %p13584_p6 = por %p13583_p4, %p13582_p9 }
  0x29   : > { %p13585_p7 = pnand %p13584_p6, %p13578_p11 }
  0x2b   : > { %13588 = shalt.err (!%p13585_p7)
}
  0x2c   : > { %s13674_s25 = smov 64   ;;  %s13675_s27 = smov 4  }
  0x2d   : > { %13231 = dma.hbm_to_vmem [thread:$0]  (!%p13784_p13), %s13778_s14, 32768, %s13780_s16, %s13789_s24, %s13674_s25, %s13674_s25, %s13675_s27  }
  0x2e   : > { %p263_p0 = scmp.lt.s32.totalorder %s13671_s23, 33  ;;  %p17815_p2 = scmp.ge.s32.totalorder %s13671_s23, 1 }
  0x30   : > { %p264_p5 = pnand %p17815_p2, %p263_p0 }
  0x32   : > { %267 = sbr.rel (%p264_p5) target bundleno = 1341 (0x53d), region = 32 }
  0x39   : > { %s13821_s29 = sand.u32 1, %s13655_s19  }
  0x3a   : > { %s10896_s28 = sshll.u32 %s13821_s29, 11  ;;  %s270_s10 = scalar_lea.sflag [#allocation3], %s13821_s29 }
  0x3b   : > { %s13827_s11 = scalar_lea.vmem [#allocation2], %s10896_s28 }
  0x3c   : > { %13642 = dma.done.wait (%p13757_p8), %s270_s10, 32768  }
  0x3d   : > { %13644 = vsyncadd (%p13757_p8), %s270_s10, 4294934528  ;;  %vm2937_vm0 = vcmask 1044480   ;;  %vm2938_vm1 = vcmask 1045504   ;;  %v13676_v0 = vmov 65535   ;;  %vm2168_vm2 = vcmask 220160   ;;  %v13291_v2 = vld [vmem:[%s17804_s1] sm:$0xff]  }
  0x3e   : > { %v2939_v1 = vsel %vm2937_vm0, 4294967295, %v13676_v0  ;;  %v13292_v4 = vld [vmem:[%s17804_s1 + $0x8] sm:$0x3f]   ;;  %12704 = vmatprep.subr.bf16.mxu0 %v13291_v2  ;;  %v13293_v5 = vld [vmem:[%s13827_s11] sm:$0xff]   ;;  %13220 = vmatprep.subr.bf16.mxu1 %v13291_v2  ;;  %v13295_v8 = vld [vmem:[%s13827_s11 + $0x10] sm:$0xff]   ;;  %vm7585_vm3 = vcmask 257024  }
  0x3f   : > { %v2940_v3 = vsel %vm2938_vm1, %v2939_v1, 0  ;;  %12705 = vmatpush3.bf16.msra.mxu0 %v13291_v2  ;;  %13222 = vmatpush3.bf16.msra.mxu1 %v13291_v2  ;;  %v13294_v7 = vld [vmem:[%s13827_s11 + $0x8] sm:$0xff]   ;;  %v13296_v9 = vld [vmem:[%s13827_s11 + $0x18] sm:$0xff]   ;;  %v13297_v10 = vld [vmem:[%s13827_s11 + $0x20] sm:$0xff]   ;;  %vm8098_vm4 = vcmask 261120   ;;  %s13964_s12 = scalar_lea.vmem [#allocation5], %s10896_s28 }
  0x40   : > { %v2942_v6 = vand.u32 %v13292_v4, %v2940_v3  ;;  %12708 = vmatprep.mubr.msk.bf16.mxu0 %vm2168_vm2, %v13293_v5  ;;  %v13298_v11 = vld [vmem:[%s13827_s11 + $0x28] sm:$0xff]   ;;  %v13299_v12 = vld [vmem:[%s13827_s11 + $0x30] sm:$0xff]   ;;  %v13300_v13 = vld [vmem:[%s13827_s11 + $0x38] sm:$0xff]   ;;  %s12445_s16 = sshll.u32 %s13663_s21, 15  ;;  %s10700_s17 = sshll.u32 %s13964_s12, 4  ;;  %s17735_s17 = int_to_ptr.vmem [resolvable:$true] %s10700_s17 }
  0x41   : > { %v13301_v14 = vld [vmem:[%s13827_s11 + $0x40] sm:$0xff]   ;;  %v13302_v15 = vld [vmem:[%s13827_s11 + $0x48] sm:$0xff]   ;;  %v13303_v16 = vld [vmem:[%s13827_s11 + $0x50] sm:$0xff]   ;;  %s17733_s9 = scalar_lea.hbm %s17806_s3, %s12445_s16  ;;  %s10672_s13 = scalar_lea.sflag [#allocation4], %s13821_s29 }
  0x42   : > { %12706 = vmatprep.subr.bf16.mxu0 %v2942_v6  ;;  %13221 = vmatprep.subr.bf16.mxu1 %v2942_v6  ;;  %v13304_v17 = vld [vmem:[%s13827_s11 + $0x58] sm:$0xff]   ;;  %v13305_v18 = vld [vmem:[%s13827_s11 + $0x60] sm:$0xff]   ;;  %v13306_v19 = vld [vmem:[%s13827_s11 + $0x68] sm:$0xff]   ;;  %s13589_s15 = scalar_lea.vmem %s17735_s17, 32768  ;;  %p18008_p9 = scmp.ne.s32.totalorder %s17812_s6, 0 }
  0x43   : > { %12707 = vmatpush3.bf16.msra.mxu0 %v2942_v6  ;;  %13223 = vmatpush3.bf16.msra.mxu1 %v2942_v6  ;;  %v13307_v20 = vld [vmem:[%s13827_s11 + $0x70] sm:$0xff]   ;;  %v13308_v21 = vld [vmem:[%s13827_s11 + $0x78] sm:$0xff]   ;;  %v13309_v22 = vld [vmem:[%s13827_s11 + $0x80] sm:$0xff]   ;;  %p13590_p8 = scmp.ne.s32.totalorder %s17735_s17, %s13589_s15 }
  0x44   : > { %v13310_v23 = vld [vmem:[%s13827_s11 + $0x88] sm:$0xff]   ;;  %v13311_v24 = vld [vmem:[%s13827_s11 + $0x90] sm:$0xff]   ;;  %v13312_v25 = vld [vmem:[%s13827_s11 + $0x98] sm:$0xff]  }
  0x45   : > { %v13313_v26 = vld [vmem:[%s13827_s11 + $0xa0] sm:$0xff]   ;;  %v13314_v27 = vld [vmem:[%s13827_s11 + $0xa8] sm:$0xff]   ;;  %v13315_v28 = vld [vmem:[%s13827_s11 + $0xb0] sm:$0xff]   ;;  %p13591_p11 = pnand %p13590_p8, %p18008_p9 }
  0x46   : > { %12709 = vmatmul.mubr.msk.bf16.vlgmr.msra.gmra.mrb[0].mxu0 %vm2168_vm2, %v13294_v7  ;;  %v13316_v29 = vld [vmem:[%s13827_s11 + $0xb8] sm:$0xff]   ;;  %v13317_v30 = vld [vmem:[%s13827_s11 + $0xc0] sm:$0xff]   ;;  %v13318_v31 = vld [vmem:[%s13827_s11 + $0xc8] sm:$0xff]  }
  0x47   : > { %12712 = vmatprep.mubr.msk.bf16.mxu0 %vm2168_vm2, %v13295_v8  ;;  %v13319_v32 = vld [vmem:[%s13827_s11 + $0xd0] sm:$0xff]   ;;  %v13320_v33 = vld [vmem:[%s13827_s11 + $0xd8] sm:$0xff]   ;;  %v13321_v34 = vld [vmem:[%s13827_s11 + $0xe0] sm:$0xff]   ;;  %p13592_p13 = pneg %p13591_p11 }
  0x48   : > { %v13322_v35 = vld [vmem:[%s13827_s11 + $0xe8] sm:$0xff]   ;;  %v13323_v36 = vld [vmem:[%s13827_s11 + $0xf0] sm:$0xff]   ;;  %v13324_v37 = vld [vmem:[%s13827_s11 + $0xf8] sm:$0xff]  }
  0x49   : > { %v13325_v38 = vld [vmem:[%s13827_s11 + $0x100] sm:$0xff]   ;;  %v13326_v39 = vld [vmem:[%s13827_s11 + $0x108] sm:$0xff]   ;;  %v13327_v40 = vld [vmem:[%s13827_s11 + $0x110] sm:$0xff]  }
  0x4a   : > { %v13328_v41 = vld [vmem:[%s13827_s11 + $0x118] sm:$0xff]   ;;  %v13329_v42 = vld [vmem:[%s13827_s11 + $0x120] sm:$0xff]   ;;  %v13330_v43 = vld [vmem:[%s13827_s11 + $0x128] sm:$0xff]  }
  0x4b   : > { %v13331_v44 = vld [vmem:[%s13827_s11 + $0x130] sm:$0xff]   ;;  %v13332_v45 = vld [vmem:[%s13827_s11 + $0x138] sm:$0xff]   ;;  %v13333_v46 = vld [vmem:[%s13827_s11 + $0x140] sm:$0xff]  }
  0x4c   : > { %v13334_v47 = vld [vmem:[%s13827_s11 + $0x148] sm:$0xff]   ;;  %v13335_v48 = vld [vmem:[%s13827_s11 + $0x150] sm:$0xff]   ;;  %v13336_v49 = vld [vmem:[%s13827_s11 + $0x158] sm:$0xff]  }
  0x4d   : > { %v13337_v50 = vld [vmem:[%s13827_s11 + $0x160] sm:$0xff]   ;;  %v13338_v51 = vld [vmem:[%s13827_s11 + $0x168] sm:$0xff]   ;;  %v13339_v52 = vld [vmem:[%s13827_s11 + $0x170] sm:$0xff]  }
  0x4e   : > { %12713 = vmatmul.mubr.msk.bf16.gmra.mrb[4].mxu0 %vm2168_vm2, %v13296_v9  ;;  %v13340_v53 = vld [vmem:[%s13827_s11 + $0x178] sm:$0xff]   ;;  %v13341_v54 = vld [vmem:[%s13827_s11 + $0x180] sm:$0xff]   ;;  %v13342_v55 = vld [vmem:[%s13827_s11 + $0x188] sm:$0xff]  }
  0x4f   : > { %12716 = vmatprep.mubr.msk.bf16.mxu0 %vm2168_vm2, %v13297_v10  ;;  %v13343_v56 = vld [vmem:[%s13827_s11 + $0x190] sm:$0xff]   ;;  %v13344_v57 = vld [vmem:[%s13827_s11 + $0x198] sm:$0xff]   ;;  %v13345_v58 = vld [vmem:[%s13827_s11 + $0x1a0] sm:$0xff]  }
  0x50   : > { %v13346_v59 = vld [vmem:[%s13827_s11 + $0x1a8] sm:$0xff]   ;;  %v13347_v60 = vld [vmem:[%s13827_s11 + $0x1b0] sm:$0xff]   ;;  %v13951_v61 = vld [vmem:[%s17805_s2] ss:$0 sm:$0xff] }
  0x51   : > { %v13348_v1 = vld [vmem:[%s13827_s11 + $0x1b8] sm:$0xff]   ;;  %v13349_v4 = vld [vmem:[%s13827_s11 + $0x1c0] sm:$0xff]  }
  0x56   : > { %12717 = vmatmul.mubr.msk.bf16.gmra.mrb[8].mxu0 %vm2168_vm2, %v13298_v11 }
  0x57   : > { %12720 = vmatprep.mubr.msk.bf16.mxu0 %vm2168_vm2, %v13299_v12 }
  0x5e   : > { %12721 = vmatmul.mubr.msk.bf16.gmra.mrb[12].mxu0 %vm2168_vm2, %v13300_v13 }
  0x5f   : > { %12724 = vmatprep.mubr.msk.bf16.mxu0 %vm2168_vm2, %v13301_v14 }
  0x66   : > { %12725 = vmatmul.mubr.msk.bf16.gmra.mrb[16].mxu0 %vm2168_vm2, %v13302_v15 }
  0x67   : > { %12728 = vmatprep.mubr.msk.bf16.mxu0 %vm2168_vm2, %v13303_v16 }
  0x6e   : > { %12729 = vmatmul.mubr.msk.bf16.gmra.mrb[20].mxu0 %vm2168_vm2, %v13304_v17 }
  0x6f   : > { %12732 = vmatprep.mubr.msk.bf16.mxu0 %vm2168_vm2, %v13305_v18 }
  0x76   : > { %12733 = vmatmul.mubr.msk.bf16.gmra.mrb[24].mxu0 %vm2168_vm2, %v13306_v19 }
  0x77   : > { %12736 = vmatprep.mubr.msk.bf16.mxu0 %vm2168_vm2, %v13307_v20 }
  0x7e   : > { %12737 = vmatmul.mubr.msk.bf16.gmra.mrb[28].mxu0 %vm2168_vm2, %v13308_v21 }
  0x7f   : > { %12740 = vmatprep.mubr.msk.bf16.mxu0 %vm2168_vm2, %v13309_v22 }
  0x86   : > { %12741 = vmatmul.mubr.msk.bf16.gmra.mrb[32].mxu0 %vm2168_vm2, %v13310_v23 }
  0x87   : > { %12744 = vmatprep.mubr.msk.bf16.mxu0 %vm2168_vm2, %v13311_v24 }
  0x8e   : > { %12745 = vmatmul.mubr.msk.bf16.gmra.mrb[36].mxu0 %vm2168_vm2, %v13312_v25 }
  0x8f   : > { %12748 = vmatprep.mubr.msk.bf16.mxu0 %vm2168_vm2, %v13313_v26  ;;  %v13350_v26 = vld [vmem:[%s13827_s11 + $0x1c8] sm:$0xff]  }
  0x96   : > { %12749 = vmatmul.mubr.msk.bf16.gmra.mrb[40].mxu0 %vm2168_vm2, %v13314_v27 }
  0x97   : > { %12752 = vmatprep.mubr.msk.bf16.mxu0 %vm2168_vm2, %v13315_v28 }
  0x9e   : > { %12753 = vmatmul.mubr.msk.bf16.gmra.mrb[44].mxu0 %vm2168_vm2, %v13316_v29 }
  0x9f   : > { %12756 = vmatprep.mubr.msk.bf16.mxu0 %vm2168_vm2, %v13317_v30 }
  0xa6   : > { %12757 = vmatmul.mubr.msk.bf16.gmra.mrb[48].mxu0 %vm2168_vm2, %v13318_v31 }
  0xa7   : > { %12760 = vmatprep.mubr.msk.bf16.mxu0 %vm2168_vm2, %v13319_v32  ;;  %v13351_v32 = vld [vmem:[%s13827_s11 + $0x1d0] sm:$0xff]  }
  0xae   : > { %12761 = vmatmul.mubr.msk.bf16.gmra.mrb[52].mxu0 %vm2168_vm2, %v13320_v33 }
  0xaf   : > { %12764 = vmatprep.mubr.msk.bf16.mxu0 %vm2168_vm2, %v13321_v34 }
  0xb6   : > { %12765 = vmatmul.mubr.msk.bf16.gmra.mrb[56].mxu0 %vm2168_vm2, %v13322_v35 }
  0xb7   : > { %12768 = vmatprep.mubr.msk.bf16.mxu0 %vm2168_vm2, %v13323_v36 }
  0xbe   : > { %12769 = vmatmul.mubr.msk.bf16.gmra.mrb[60].mxu0 %vm2168_vm2, %v13324_v37 }
  0xbf   : > { %12772 = vmatprep.mubr.msk.bf16.mxu0 %vm2168_vm2, %v13325_v38 }
  0xc6   : > { %12773 = vmatmul.mubr.msk.bf16.gmra.mrb[64].mxu0 %vm2168_vm2, %v13326_v39 }
  0xc7   : > { %12776 = vmatprep.mubr.msk.bf16.mxu0 %vm2168_vm2, %v13327_v40 }
  0xce   : > { %12777 = vmatmul.mubr.msk.bf16.gmra.mrb[68].mxu0 %vm2168_vm2, %v13328_v41 }
  0xcf   : > { %12780 = vmatprep.mubr.msk.bf16.mxu0 %vm2168_vm2, %v13329_v42 }
  0xd6   : > { %12781 = vmatmul.mubr.msk.bf16.gmra.mrb[72].mxu0 %vm2168_vm2, %v13330_v43 }
  0xd7   : > { %12784 = vmatprep.mubr.msk.bf16.mxu0 %vm2168_vm2, %v13331_v44 }
  0xde   : > { %12785 = vmatmul.mubr.msk.bf16.gmra.mrb[76].mxu0 %vm2168_vm2, %v13332_v45 }
  0xdf   : > { %12788 = vmatprep.mubr.msk.bf16.mxu0 %vm2168_vm2, %v13333_v46 }
  0xe6   : > { %12789 = vmatmul.mubr.msk.bf16.gmra.mrb[80].mxu0 %vm2168_vm2, %v13334_v47 }
  0xe7   : > { %12792 = vmatprep.mubr.msk.bf16.mxu0 %vm2168_vm2, %v13335_v48 }
  0xee   : > { %12793 = vmatmul.mubr.msk.bf16.gmra.mrb[84].mxu0 %vm2168_vm2, %v13336_v49 }
  0xef   : > { %12796 = vmatprep.mubr.msk.bf16.mxu0 %vm2168_vm2, %v13337_v50 }
  0xf6   : > { %12797 = vmatmul.mubr.msk.bf16.gmra.mrb[88].mxu0 %vm2168_vm2, %v13338_v51 }
  0xf7   : > { %12800 = vmatprep.mubr.msk.bf16.mxu0 %vm2168_vm2, %v13339_v52 }
  0xfe   : > { %12801 = vmatmul.mubr.msk.bf16.gmra.mrb[92].mxu0 %vm2168_vm2, %v13340_v53 }
  0xff   : > { %12804 = vmatprep.mubr.msk.bf16.mxu0 %vm2168_vm2, %v13341_v54 }
 0x106   : > { %12805 = vmatmul.mubr.msk.bf16.gmra.mrb[96].mxu0 %vm2168_vm2, %v13342_v55 }
 0x107   : > { %12808 = vmatprep.mubr.msk.bf16.mxu0 %vm2168_vm2, %v13343_v56 }
 0x10e   : > { %12809 = vmatmul.mubr.msk.bf16.gmra.mrb[100].mxu0 %vm2168_vm2, %v13344_v57 }
 0x10f   : > { %12812 = vmatprep.mubr.msk.bf16.mxu0 %vm2168_vm2, %v13345_v58 }
 0x116   : > { %12813 = vmatmul.mubr.msk.bf16.gmra.mrb[104].mxu0 %vm2168_vm2, %v13346_v59  ;;  %v13352_v59 = vld [vmem:[%s13827_s11 + $0x1d8] sm:$0xff]  }
 0x117   : > { %12816 = vmatprep.mubr.msk.bf16.mxu0 %vm2168_vm2, %v13347_v60 }
 0x119   : > { %v12710_v62 = vpop.f32.mrb[0].mxu0 }
 0x11a   : > { %v2987_v63 = vadd.f32 %v12710_v62, %v13951_v61  ;;  %v2978_v0 = vpop.f32.mrb[1].mxu0 }
 0x11b   : > { %v2979_v2 = vadd.f32 %v13951_v61, %v2978_v0  ;;  %v12711_v3 = vpop.f32.mrb[2].mxu0 }
 0x11c   : > { %v5027_v5 = vmax.f32 %v2987_v63, 0.0  ;;  %v2990_v6 = vadd.f32 %v12711_v3, %v13951_v61  ;;  %v2981_v7 = vpop.f32.mrb[3].mxu0 }
 0x11d   : > { %v5025_v8 = vmax.f32 %v2979_v2, 0.0  ;;  %v2982_v9 = vadd.f32 %v13951_v61, %v2981_v7  ;;  %v13353_v2 = vld [vmem:[%s13827_s11 + $0x1e0] sm:$0xff]  }
 0x11e   : > { %v11935_v10 = vpack.c.bf16 %v5027_v5, %v5027_v5  ;;  %v5028_v11 = vmax.f32 %v2990_v6, 0.0  ;;  %12817 = vmatmul.mubr.msk.bf16.gmra.mrb[108].mxu0 %vm2168_vm2, %v13348_v1  ;;  %v9130_v15 = vmul.f32 %v5027_v5, %v5027_v5  ;;  %v8102_v22 = vsel %vm8098_vm4, %v5027_v5, 0.0 }
 0x11f   : > { %v11933_v12 = vpack.c.bf16 %v5025_v8, %v5025_v8  ;;  %v9128_v13 = vmul.f32 %v5025_v8, %v5025_v8  ;;  %v5026_v14 = vmax.f32 %v2982_v9, 0.0  ;;  %12820 = vmatprep.mubr.msk.bf16.mxu0 %vm2168_vm2, %v13349_v4  ;;  %v8099_v17 = vsel %vm8098_vm4, %v5025_v8, 0.0 }
 0x120   : > { %7588 = vst.msk [vmem:[%s13964_s12 + $0x8] sm:$0xf] %vm7585_vm3, %v11935_v10  ;;  %v11936_v16 = vpack.c.bf16 %v5028_v11, %v5028_v11  ;;  %v9131_v28 = vmul.f32 %v5028_v11, %v5028_v11  ;;  %v9643_v38 = vsel %vm8098_vm4, %v9130_v15, 0.0  ;;  %v8104_v39 = vsel %vm8098_vm4, %v5028_v11, 0.0 }
 0x121   : > { %7586 = vst.msk [vmem:[%s13964_s12] sm:$0xf] %vm7585_vm3, %v11933_v12  ;;  %v11934_v18 = vpack.c.bf16 %v5026_v14, %v5026_v14  ;;  %v8100_v19 = vsel %vm8098_vm4, %v5026_v14, 0.0  ;;  %v9129_v20 = vmul.f32 %v5026_v14, %v5026_v14  ;;  %v12714_v21 = vpop.f32.mrb[4].mxu0  ;;  %v9640_v27 = vsel %vm8098_vm4, %v9128_v13, 0.0 }
 0x122   : > { %7589 = vst.msk [vmem:[%s13964_s12 + $0xc] sm:$0xf] %vm7585_vm3, %v11936_v16  ;;  %v8101_v23 = vadd.f32 %v8100_v19, %v8099_v17  ;;  %v3003_v24 = vadd.f32 %v12714_v21, %v13951_v61  ;;  %v2994_v25 = vpop.f32.mrb[5].mxu0  ;;  %v9645_v45 = vsel %vm8098_vm4, %v9131_v28, 0.0 }
 0x123   : > { %7587 = vst.msk [vmem:[%s13964_s12 + $0x4] sm:$0xf] %vm7585_vm3, %v11934_v18  ;;  %v9641_v29 = vsel %vm8098_vm4, %v9129_v20, 0.0  ;;  %v2995_v30 = vadd.f32 %v13951_v61, %v2994_v25  ;;  %v12715_v31 = vpop.f32.mrb[6].mxu0 }
 0x124   : > { %v8103_v33 = vadd.f32 %v8102_v22, %v8101_v23  ;;  %v9642_v34 = vadd.f32 %v9641_v29, %v9640_v27  ;;  %v5031_v35 = vmax.f32 %v3003_v24, 0.0  ;;  %v3006_v36 = vadd.f32 %v12715_v31, %v13951_v61  ;;  %v2997_v37 = vpop.f32.mrb[7].mxu0 }
 0x125   : > { %v5029_v40 = vmax.f32 %v2995_v30, 0.0  ;;  %v2998_v41 = vadd.f32 %v13951_v61, %v2997_v37 }
 0x126   : > { %v8105_v42 = vadd.f32 %v8104_v39, %v8103_v33  ;;  %v9644_v43 = vadd.f32 %v9643_v38, %v9642_v34  ;;  %v11939_v44 = vpack.c.bf16 %v5031_v35, %v5031_v35  ;;  %12821 = vmatmul.mubr.msk.bf16.gmra.mrb[112].mxu0 %vm2168_vm2, %v13350_v26  ;;  %v5032_v51 = vmax.f32 %v3006_v36, 0.0  ;;  %v13354_v33 = vld [vmem:[%s13827_s11 + $0x1e8] sm:$0xff]   ;;  %v13355_v39 = vld [vmem:[%s13827_s11 + $0x1f0] sm:$0xff]  }
 0x127   : > { %v11937_v46 = vpack.c.bf16 %v5029_v40, %v5029_v40  ;;  %v8106_v47 = vsel %vm8098_vm4, %v5029_v40, 0.0  ;;  %v9132_v48 = vmul.f32 %v5029_v40, %v5029_v40  ;;  %12824 = vmatprep.mubr.msk.bf16.mxu0 %vm2168_vm2, %v13351_v32  ;;  %v5030_v52 = vmax.f32 %v2998_v41, 0.0 }
 0x128   : > { %v9646_v49 = vadd.f32 %v9645_v45, %v9644_v43  ;;  %7592 = vst.msk [vmem:[%s13964_s12 + $0x18] sm:$0xf] %vm7585_vm3, %v11939_v44  ;;  %v8107_v50 = vadd.f32 %v8106_v47, %v8105_v42  ;;  %v9134_v55 = vmul.f32 %v5031_v35, %v5031_v35  ;;  %v11940_v57 = vpack.c.bf16 %v5032_v51, %v5032_v51 }
 0x129   : > { %7590 = vst.msk [vmem:[%s13964_s12 + $0x10] sm:$0xf] %vm7585_vm3, %v11937_v46  ;;  %v9647_v53 = vsel %vm8098_vm4, %v9132_v48, 0.0  ;;  %v12718_v54 = vpop.f32.mrb[8].mxu0  ;;  %v11938_v60 = vpack.c.bf16 %v5030_v52, %v5030_v52  ;;  %v8108_v62 = vsel %vm8098_vm4, %v5030_v52, 0.0  ;;  %v9133_v63 = vmul.f32 %v5030_v52, %v5030_v52 }
 0x12a   : > { %v9648_v56 = vadd.f32 %v9647_v53, %v9646_v49  ;;  %v3010_v58 = vpop.f32.mrb[9].mxu0  ;;  %v3019_v0 = vadd.f32 %v12718_v54, %v13951_v61  ;;  %v8110_v3 = vsel %vm8098_vm4, %v5031_v35, 0.0  ;;  %7593 = vst.msk [vmem:[%s13964_s12 + $0x1c] sm:$0xf] %vm7585_vm3, %v11940_v57  ;;  %v8109_v4 = vadd.f32 %v8108_v62, %v8107_v50 }
 0x12b   : > { %v12719_v1 = vpop.f32.mrb[10].mxu0  ;;  %v3011_v5 = vadd.f32 %v13951_v61, %v3010_v58  ;;  %v9135_v8 = vmul.f32 %v5032_v51, %v5032_v51  ;;  %7591 = vst.msk [vmem:[%s13964_s12 + $0x14] sm:$0xf] %vm7585_vm3, %v11938_v60  ;;  %v9649_v9 = vsel %vm8098_vm4, %v9133_v63, 0.0  ;;  %v9651_v16 = vsel %vm8098_vm4, %v9134_v55, 0.0 }
 0x12c   : > { %v3022_v6 = vadd.f32 %v12719_v1, %v13951_v61  ;;  %v3013_v7 = vpop.f32.mrb[11].mxu0  ;;  %v5035_v10 = vmax.f32 %v3019_v0, 0.0  ;;  %v8111_v12 = vadd.f32 %v8110_v3, %v8109_v4  ;;  %v9650_v13 = vadd.f32 %v9649_v9, %v9648_v56 }
 0x12d   : > { %v3014_v11 = vadd.f32 %v13951_v61, %v3013_v7  ;;  %v5033_v14 = vmax.f32 %v3011_v5, 0.0  ;;  %v8112_v17 = vsel %vm8098_vm4, %v5032_v51, 0.0  ;;  %v9653_v24 = vsel %vm8098_vm4, %v9135_v8, 0.0 }
 0x12e   : > { %v5036_v15 = vmax.f32 %v3022_v6, 0.0  ;;  %12825 = vmatmul.mubr.msk.bf16.gmra.mrb[116].mxu0 %vm2168_vm2, %v13352_v59  ;;  %v11943_v18 = vpack.c.bf16 %v5035_v10, %v5035_v10  ;;  %v8113_v20 = vadd.f32 %v8112_v17, %v8111_v12  ;;  %v9652_v21 = vadd.f32 %v9651_v16, %v9650_v13  ;;  %v13356_v6 = vld [vmem:[%s13827_s11 + $0x1f8] sm:$0xff]   ;;  %v13357_v12 = vld [vmem:[%s13827_s11 + $0x200] sm:$0xff]  }
 0x12f   : > { %v5034_v19 = vmax.f32 %v3014_v11, 0.0  ;;  %12828 = vmatprep.mubr.msk.bf16.mxu0 %vm2168_vm2, %v13353_v2  ;;  %v11941_v22 = vpack.c.bf16 %v5033_v14, %v5033_v14  ;;  %v8114_v23 = vsel %vm8098_vm4, %v5033_v14, 0.0  ;;  %v9136_v25 = vmul.f32 %v5033_v14, %v5033_v14 }
 0x130   : > { %7596 = vst.msk [vmem:[%s13964_s12 + $0x28] sm:$0xf] %vm7585_vm3, %v11943_v18  ;;  %v11944_v26 = vpack.c.bf16 %v5036_v15, %v5036_v15  ;;  %v9654_v28 = vadd.f32 %v9653_v24, %v9652_v21  ;;  %v9138_v29 = vmul.f32 %v5035_v10, %v5035_v10  ;;  %v8115_v30 = vadd.f32 %v8114_v23, %v8113_v20 }
 0x131   : > { %v12722_v27 = vpop.f32.mrb[12].mxu0  ;;  %7594 = vst.msk [vmem:[%s13964_s12 + $0x20] sm:$0xf] %vm7585_vm3, %v11941_v22  ;;  %v11942_v31 = vpack.c.bf16 %v5034_v19, %v5034_v19  ;;  %v9655_v34 = vsel %vm8098_vm4, %v9136_v25, 0.0  ;;  %v8116_v35 = vsel %vm8098_vm4, %v5034_v19, 0.0  ;;  %v9137_v36 = vmul.f32 %v5034_v19, %v5034_v19 }
 0x132   : > { %v3026_v32 = vpop.f32.mrb[13].mxu0  ;;  %7597 = vst.msk [vmem:[%s13964_s12 + $0x2c] sm:$0xf] %vm7585_vm3, %v11944_v26  ;;  %v3035_v37 = vadd.f32 %v12722_v27, %v13951_v61  ;;  %v8118_v40 = vsel %vm8098_vm4, %v5035_v10, 0.0  ;;  %v9656_v41 = vadd.f32 %v9655_v34, %v9654_v28  ;;  %v8117_v42 = vadd.f32 %v8116_v35, %v8115_v30 }
 0x133   : > { %v12723_v38 = vpop.f32.mrb[14].mxu0  ;;  %7595 = vst.msk [vmem:[%s13964_s12 + $0x24] sm:$0xf] %vm7585_vm3, %v11942_v31  ;;  %v3027_v43 = vadd.f32 %v13951_v61, %v3026_v32  ;;  %v9139_v45 = vmul.f32 %v5036_v15, %v5036_v15  ;;  %v9657_v46 = vsel %vm8098_vm4, %v9137_v36, 0.0  ;;  %v9659_v53 = vsel %vm8098_vm4, %v9138_v29, 0.0 }
 0x134   : > { %v3029_v44 = vpop.f32.mrb[15].mxu0  ;;  %v5039_v47 = vmax.f32 %v3035_v37, 0.0  ;;  %v3038_v48 = vadd.f32 %v12723_v38, %v13951_v61  ;;  %v8119_v49 = vadd.f32 %v8118_v40, %v8117_v42  ;;  %v9658_v50 = vadd.f32 %v9657_v46, %v9656_v41  ;;  %v13358_v42 = vld [vmem:[%s13827_s11 + $0x208] sm:$0xff]  }
 0x135   : > { %v5037_v51 = vmax.f32 %v3027_v43, 0.0  ;;  %v3030_v52 = vadd.f32 %v13951_v61, %v3029_v44  ;;  %v8120_v54 = vsel %vm8098_vm4, %v5036_v15, 0.0  ;;  %v9661_v62 = vsel %vm8098_vm4, %v9139_v45, 0.0 }
 0x136   : > { %12829 = vmatmul.mubr.msk.bf16.gmra.mrb[120].mxu0 %vm2168_vm2, %v13354_v33  ;;  %v11947_v55 = vpack.c.bf16 %v5039_v47, %v5039_v47  ;;  %v5040_v56 = vmax.f32 %v3038_v48, 0.0  ;;  %v8121_v57 = vadd.f32 %v8120_v54, %v8119_v49  ;;  %v9660_v58 = vadd.f32 %v9659_v53, %v9658_v50  ;;  %v13359_v48 = vld [vmem:[%s13827_s11 + $0x210] sm:$0xff]  }
 0x137   : > { %12832 = vmatprep.mubr.msk.bf16.mxu0 %vm2168_vm2, %v13355_v39  ;;  %v11945_v59 = vpack.c.bf16 %v5037_v51, %v5037_v51  ;;  %v8122_v60 = vsel %vm8098_vm4, %v5037_v51, 0.0  ;;  %v9140_v63 = vmul.f32 %v5037_v51, %v5037_v51  ;;  %v5038_v4 = vmax.f32 %v3030_v52, 0.0 }
 0x138   : > { %7600 = vst.msk [vmem:[%s13964_s12 + $0x38] sm:$0xf] %vm7585_vm3, %v11947_v55  ;;  %v11948_v0 = vpack.c.bf16 %v5040_v56, %v5040_v56  ;;  %v9662_v2 = vadd.f32 %v9661_v62, %v9660_v58  ;;  %v8123_v3 = vadd.f32 %v8122_v60, %v8121_v57  ;;  %v9142_v7 = vmul.f32 %v5039_v47, %v5039_v47 }
 0x139   : > { %v12726_v1 = vpop.f32.mrb[16].mxu0  ;;  %7598 = vst.msk [vmem:[%s13964_s12 + $0x30] sm:$0xf] %vm7585_vm3, %v11945_v59  ;;  %v9663_v8 = vsel %vm8098_vm4, %v9140_v63, 0.0  ;;  %v11946_v14 = vpack.c.bf16 %v5038_v4, %v5038_v4  ;;  %v8124_v15 = vsel %vm8098_vm4, %v5038_v4, 0.0  ;;  %v9141_v18 = vmul.f32 %v5038_v4, %v5038_v4 }
 0x13a   : > { %v3042_v5 = vpop.f32.mrb[17].mxu0  ;;  %7601 = vst.msk [vmem:[%s13964_s12 + $0x3c] sm:$0xf] %vm7585_vm3, %v11948_v0  ;;  %v3051_v9 = vadd.f32 %v12726_v1, %v13951_v61  ;;  %v9664_v13 = vadd.f32 %v9663_v8, %v9662_v2  ;;  %v8125_v17 = vadd.f32 %v8124_v15, %v8123_v3  ;;  %v8126_v21 = vsel %vm8098_vm4, %v5039_v47, 0.0  ;;  %v13360_v15 = vld [vmem:[%s13827_s11 + $0x218] sm:$0xff]  }
 0x13b   : > { %v3043_v10 = vadd.f32 %v13951_v61, %v3042_v5  ;;  %v12727_v11 = vpop.f32.mrb[18].mxu0  ;;  %v9143_v22 = vmul.f32 %v5040_v56, %v5040_v56  ;;  %7599 = vst.msk [vmem:[%s13964_s12 + $0x34] sm:$0xf] %vm7585_vm3, %v11946_v14  ;;  %v9667_v25 = vsel %vm8098_vm4, %v9142_v7, 0.0  ;;  %v9665_v27 = vsel %vm8098_vm4, %v9141_v18, 0.0 }
 0x13c   : > { %v3045_v16 = vpop.f32.mrb[19].mxu0  ;;  %v5043_v19 = vmax.f32 %v3051_v9, 0.0  ;;  %v3054_v23 = vadd.f32 %v12727_v11, %v13951_v61  ;;  %v8127_v26 = vadd.f32 %v8126_v21, %v8125_v17  ;;  %v8128_v29 = vsel %vm8098_vm4, %v5040_v56, 0.0  ;;  %v13361_v21 = vld [vmem:[%s13827_s11 + $0x220] sm:$0xff]  }
 0x13d   : > { %v5041_v20 = vmax.f32 %v3043_v10, 0.0  ;;  %v3046_v24 = vadd.f32 %v13951_v61, %v3045_v16  ;;  %v9666_v30 = vadd.f32 %v9665_v27, %v9664_v13  ;;  %v9669_v38 = vsel %vm8098_vm4, %v9143_v22, 0.0 }
 0x13e   : > { %12833 = vmatmul.mubr.msk.bf16.gmra.mrb[124].mxu0 %vm2168_vm2, %v13356_v6  ;;  %v11951_v28 = vpack.c.bf16 %v5043_v19, %v5043_v19  ;;  %v8129_v33 = vadd.f32 %v8128_v29, %v8127_v26  ;;  %v5044_v35 = vmax.f32 %v3054_v23, 0.0  ;;  %v8134_v43 = vsel %vm8098_vm4, %v5043_v19, 0.0 }
 0x13f   : > { %12836 = vmatprep.mubr.msk.bf16.mxu0 %vm2168_vm2, %v13357_v12  ;;  %v11949_v31 = vpack.c.bf16 %v5041_v20, %v5041_v20  ;;  %v8130_v32 = vsel %vm8098_vm4, %v5041_v20, 0.0  ;;  %v9144_v34 = vmul.f32 %v5041_v20, %v5041_v20  ;;  %v5042_v36 = vmax.f32 %v3046_v24, 0.0 }
 0x140   : > { %7604 = vst.msk [vmem:[%s13964_s12 + $0x48] sm:$0xf] %vm7585_vm3, %v11951_v28  ;;  %v9668_v39 = vadd.f32 %v9667_v25, %v9666_v30  ;;  %v8131_v44 = vadd.f32 %v8130_v32, %v8129_v33  ;;  %v11952_v46 = vpack.c.bf16 %v5044_v35, %v5044_v35  ;;  %v9146_v50 = vmul.f32 %v5043_v19, %v5043_v19 }
 0x141   : > { %v12730_v37 = vpop.f32.mrb[20].mxu0  ;;  %7602 = vst.msk [vmem:[%s13964_s12 + $0x40] sm:$0xf] %vm7585_vm3, %v11949_v31  ;;  %v9671_v45 = vsel %vm8098_vm4, %v9144_v34, 0.0  ;;  %v11950_v51 = vpack.c.bf16 %v5042_v36, %v5042_v36  ;;  %v8132_v52 = vsel %vm8098_vm4, %v5042_v36, 0.0  ;;  %v9145_v55 = vmul.f32 %v5042_v36, %v5042_v36 }
 0x142   : > { %v3067_v40 = vadd.f32 %v12730_v37, %v13951_v61  ;;  %v3058_v41 = vpop.f32.mrb[21].mxu0  ;;  %v9670_v49 = vadd.f32 %v9669_v38, %v9668_v39  ;;  %7605 = vst.msk [vmem:[%s13964_s12 + $0x4c] sm:$0xf] %vm7585_vm3, %v11952_v46  ;;  %v8133_v54 = vadd.f32 %v8132_v52, %v8131_v44  ;;  %v9147_v59 = vmul.f32 %v5044_v35, %v5044_v35  ;;  %v13362_v52 = vld [vmem:[%s13827_s11 + $0x228] sm:$0xff]  }
 0x143   : > { %v12731_v47 = vpop.f32.mrb[22].mxu0  ;;  %v3059_v57 = vadd.f32 %v13951_v61, %v3058_v41  ;;  %7603 = vst.msk [vmem:[%s13964_s12 + $0x44] sm:$0xf] %vm7585_vm3, %v11950_v51  ;;  %v9673_v0 = vsel %vm8098_vm4, %v9145_v55, 0.0  ;;  %v8136_v2 = vsel %vm8098_vm4, %v5044_v35, 0.0  ;;  %v9675_v6 = vsel %vm8098_vm4, %v9146_v50, 0.0 }
 0x144   : > { %v3061_v53 = vpop.f32.mrb[23].mxu0  ;;  %v5047_v56 = vmax.f32 %v3067_v40, 0.0  ;;  %v9672_v58 = vadd.f32 %v9671_v45, %v9670_v49  ;;  %v3070_v60 = vadd.f32 %v12731_v47, %v13951_v61  ;;  %v8135_v63 = vadd.f32 %v8134_v43, %v8133_v54 }
 0x145   : > { %v3062_v62 = vadd.f32 %v13951_v61, %v3061_v53  ;;  %v5045_v4 = vmax.f32 %v3059_v57, 0.0  ;;  %v9677_v10 = vsel %vm8098_vm4, %v9147_v59, 0.0  ;;  %v13363_v57 = vld [vmem:[%s13827_s11 + $0x230] sm:$0xff]  }
 0x146   : > { %12837 = vmatmul.mubr.msk.bf16.gmra.mrb[128].mxu0 %vm2168_vm2, %v13358_v42  ;;  %v11955_v1 = vpack.c.bf16 %v5047_v56, %v5047_v56  ;;  %v9674_v3 = vadd.f32 %v9673_v0, %v9672_v58  ;;  %v5048_v5 = vmax.f32 %v3070_v60, 0.0  ;;  %v8137_v7 = vadd.f32 %v8136_v2, %v8135_v63 }
 0x147   : > { %12840 = vmatprep.mubr.msk.bf16.mxu0 %vm2168_vm2, %v13359_v48  ;;  %v5046_v8 = vmax.f32 %v3062_v62, 0.0  ;;  %v11953_v12 = vpack.c.bf16 %v5045_v4, %v5045_v4  ;;  %v8138_v13 = vsel %vm8098_vm4, %v5045_v4, 0.0  ;;  %v8142_v16 = vsel %vm8098_vm4, %v5047_v56, 0.0 }
 0x148   : > { %7608 = vst.msk [vmem:[%s13964_s12 + $0x58] sm:$0xf] %vm7585_vm3, %v11955_v1  ;;  %v9676_v11 = vadd.f32 %v9675_v6, %v9674_v3  ;;  %v8139_v17 = vadd.f32 %v8138_v13, %v8137_v7  ;;  %v9148_v18 = vmul.f32 %v5045_v4, %v5045_v4  ;;  %v11956_v19 = vpack.c.bf16 %v5048_v5, %v5048_v5 }
 0x149   : > { %v12734_v9 = vpop.f32.mrb[24].mxu0  ;;  %v9150_v23 = vmul.f32 %v5047_v56, %v5047_v56  ;;  %7606 = vst.msk [vmem:[%s13964_s12 + $0x50] sm:$0xf] %vm7585_vm3, %v11953_v12  ;;  %v11954_v24 = vpack.c.bf16 %v5046_v8, %v5046_v8  ;;  %v8140_v25 = vsel %vm8098_vm4, %v5046_v8, 0.0  ;;  %v9149_v29 = vmul.f32 %v5046_v8, %v5046_v8 }
 0x14a   : > { %v3074_v14 = vpop.f32.mrb[25].mxu0  ;;  %v9678_v22 = vadd.f32 %v9677_v10, %v9676_v11  ;;  %v9679_v27 = vsel %vm8098_vm4, %v9148_v18, 0.0  ;;  %7609 = vst.msk [vmem:[%s13964_s12 + $0x5c] sm:$0xf] %vm7585_vm3, %v11956_v19  ;;  %v8141_v28 = vadd.f32 %v8140_v25, %v8139_v17  ;;  %v3083_v30 = vadd.f32 %v12734_v9, %v13951_v61 }
 0x14b   : > { %v12735_v20 = vpop.f32.mrb[26].mxu0  ;;  %v8144_v32 = vsel %vm8098_vm4, %v5048_v5, 0.0  ;;  %7607 = vst.msk [vmem:[%s13964_s12 + $0x54] sm:$0xf] %vm7585_vm3, %v11954_v24  ;;  %v3075_v33 = vadd.f32 %v13951_v61, %v3074_v14  ;;  %v9151_v35 = vmul.f32 %v5048_v5, %v5048_v5  ;;  %v9681_v37 = vsel %vm8098_vm4, %v9149_v29, 0.0  ;;  %v13364_v24 = vld [vmem:[%s13827_s11 + $0x238] sm:$0xff]  }
 0x14c   : > { %v3077_v26 = vpop.f32.mrb[27].mxu0  ;;  %v9680_v31 = vadd.f32 %v9679_v27, %v9678_v22  ;;  %v3086_v34 = vadd.f32 %v12735_v20, %v13951_v61  ;;  %v8143_v36 = vadd.f32 %v8142_v16, %v8141_v28  ;;  %v5051_v38 = vmax.f32 %v3083_v30, 0.0  ;;  %v13365_v30 = vld [vmem:[%s13827_s11 + $0x240] sm:$0xff]  }
 0x14d   : > { %v5049_v40 = vmax.f32 %v3075_v33, 0.0  ;;  %v3078_v42 = vadd.f32 %v13951_v61, %v3077_v26  ;;  %v9683_v43 = vsel %vm8098_vm4, %v9150_v23, 0.0  ;;  %v9685_v53 = vsel %vm8098_vm4, %v9151_v35, 0.0 }
 0x14e   : > { %12841 = vmatmul.mubr.msk.bf16.gmra.mrb[132].mxu0 %vm2168_vm2, %v13360_v15  ;;  %v9682_v39 = vadd.f32 %v9681_v37, %v9680_v31  ;;  %v5052_v41 = vmax.f32 %v3086_v34, 0.0  ;;  %v8145_v44 = vadd.f32 %v8144_v32, %v8143_v36  ;;  %v11959_v45 = vpack.c.bf16 %v5051_v38, %v5051_v38 }
 0x14f   : > { %12844 = vmatprep.mubr.msk.bf16.mxu0 %vm2168_vm2, %v13361_v21  ;;  %v11957_v48 = vpack.c.bf16 %v5049_v40, %v5049_v40  ;;  %v8146_v49 = vsel %vm8098_vm4, %v5049_v40, 0.0  ;;  %v9152_v50 = vmul.f32 %v5049_v40, %v5049_v40  ;;  %v5050_v60 = vmax.f32 %v3078_v42, 0.0 }
 0x150   : > { %v9684_v47 = vadd.f32 %v9683_v43, %v9682_v39  ;;  %7612 = vst.msk [vmem:[%s13964_s12 + $0x68] sm:$0xf] %vm7585_vm3, %v11959_v45  ;;  %v8147_v54 = vadd.f32 %v8146_v49, %v8145_v44  ;;  %v11960_v55 = vpack.c.bf16 %v5052_v41, %v5052_v41  ;;  %v9154_v3 = vmul.f32 %v5051_v38, %v5051_v38 }
 0x151   : > { %v12738_v46 = vpop.f32.mrb[28].mxu0  ;;  %7610 = vst.msk [vmem:[%s13964_s12 + $0x60] sm:$0xf] %vm7585_vm3, %v11957_v48  ;;  %v9687_v59 = vsel %vm8098_vm4, %v9152_v50, 0.0  ;;  %v11958_v5 = vpack.c.bf16 %v5050_v60, %v5050_v60  ;;  %v8148_v6 = vsel %vm8098_vm4, %v5050_v60, 0.0  ;;  %v9153_v8 = vmul.f32 %v5050_v60, %v5050_v60 }
 0x152   : > { %v3090_v51 = vpop.f32.mrb[29].mxu0  ;;  %v9686_v58 = vadd.f32 %v9685_v53, %v9684_v47  ;;  %7613 = vst.msk [vmem:[%s13964_s12 + $0x6c] sm:$0xf] %vm7585_vm3, %v11960_v55  ;;  %v3099_v63 = vadd.f32 %v12738_v46, %v13951_v61  ;;  %v8149_v7 = vadd.f32 %v8148_v6, %v8147_v54  ;;  %v8150_v11 = vsel %vm8098_vm4, %v5051_v38, 0.0 }
 0x153   : > { %v12739_v56 = vpop.f32.mrb[30].mxu0  ;;  %v3091_v0 = vadd.f32 %v13951_v61, %v3090_v51  ;;  %v9155_v12 = vmul.f32 %v5052_v41, %v5052_v41  ;;  %7611 = vst.msk [vmem:[%s13964_s12 + $0x64] sm:$0xf] %vm7585_vm3, %v11958_v5  ;;  %v9689_v16 = vsel %vm8098_vm4, %v9153_v8, 0.0  ;;  %v8152_v19 = vsel %vm8098_vm4, %v5052_v41, 0.0 }
 0x154   : > { %v3093_v62 = vpop.f32.mrb[31].mxu0  ;;  %v3102_v1 = vadd.f32 %v12739_v56, %v13951_v61  ;;  %v9688_v4 = vadd.f32 %v9687_v59, %v9686_v58  ;;  %v5055_v9 = vmax.f32 %v3099_v63, 0.0  ;;  %v8151_v15 = vadd.f32 %v8150_v11, %v8149_v7 }
 0x155   : > { %v3094_v2 = vadd.f32 %v13951_v61, %v3093_v62  ;;  %v5053_v10 = vmax.f32 %v3091_v0, 0.0  ;;  %v9691_v25 = vsel %vm8098_vm4, %v9154_v3, 0.0  ;;  %v9693_v31 = vsel %vm8098_vm4, %v9155_v12, 0.0  ;;  %v13366_v62 = vld [vmem:[%s13827_s11 + $0x248] sm:$0xff]  }
 0x156   : > { %12845 = vmatmul.mubr.msk.bf16.gmra.mrb[136].mxu0 %vm2168_vm2, %v13362_v52  ;;  %v5056_v13 = vmax.f32 %v3102_v1, 0.0  ;;  %v11963_v17 = vpack.c.bf16 %v5055_v9, %v5055_v9  ;;  %v9690_v20 = vadd.f32 %v9689_v16, %v9688_v4  ;;  %v8153_v26 = vadd.f32 %v8152_v19, %v8151_v15  ;;  %v13367_v4 = vld [vmem:[%s13827_s11 + $0x250] sm:$0xff]  }
 0x157   : > { %12848 = vmatprep.mubr.msk.bf16.mxu0 %vm2168_vm2, %v13363_v57  ;;  %v5054_v14 = vmax.f32 %v3094_v2, 0.0  ;;  %v11961_v21 = vpack.c.bf16 %v5053_v10, %v5053_v10  ;;  %v8154_v22 = vsel %vm8098_vm4, %v5053_v10, 0.0  ;;  %v9156_v27 = vmul.f32 %v5053_v10, %v5053_v10 }
 0x158   : > { %7616 = vst.msk [vmem:[%s13964_s12 + $0x78] sm:$0xf] %vm7585_vm3, %v11963_v17  ;;  %v11964_v28 = vpack.c.bf16 %v5056_v13, %v5056_v13  ;;  %v9692_v32 = vadd.f32 %v9691_v25, %v9690_v20  ;;  %v8158_v33 = vsel %vm8098_vm4, %v5055_v9, 0.0  ;;  %v8155_v36 = vadd.f32 %v8154_v22, %v8153_v26 }
 0x159   : > { %v12742_v18 = vpop.f32.mrb[32].mxu0  ;;  %7614 = vst.msk [vmem:[%s13964_s12 + $0x70] sm:$0xf] %vm7585_vm3, %v11961_v21  ;;  %v11962_v34 = vpack.c.bf16 %v5054_v14, %v5054_v14  ;;  %v9695_v37 = vsel %vm8098_vm4, %v9156_v27, 0.0  ;;  %v8156_v38 = vsel %vm8098_vm4, %v5054_v14, 0.0  ;;  %v9157_v39 = vmul.f32 %v5054_v14, %v5054_v14 }
 0x15a   : > { %v3106_v23 = vpop.f32.mrb[33].mxu0  ;;  %7617 = vst.msk [vmem:[%s13964_s12 + $0x7c] sm:$0xf] %vm7585_vm3, %v11964_v28  ;;  %v9694_v40 = vadd.f32 %v9693_v31, %v9692_v32  ;;  %v9158_v41 = vmul.f32 %v5055_v9, %v5055_v9  ;;  %v3115_v42 = vadd.f32 %v12742_v18, %v13951_v61  ;;  %v8157_v44 = vadd.f32 %v8156_v38, %v8155_v36 }
 0x15b   : > { %v12743_v29 = vpop.f32.mrb[34].mxu0  ;;  %7615 = vst.msk [vmem:[%s13964_s12 + $0x74] sm:$0xf] %vm7585_vm3, %v11962_v34  ;;  %v3107_v43 = vadd.f32 %v13951_v61, %v3106_v23  ;;  %v9697_v45 = vsel %vm8098_vm4, %v9157_v39, 0.0  ;;  %v9159_v49 = vmul.f32 %v5056_v13, %v5056_v13  ;;  %v8160_v57 = vsel %vm8098_vm4, %v5056_v13, 0.0 }
 0x15c   : > { %v3109_v35 = vpop.f32.mrb[35].mxu0  ;;  %v3118_v46 = vadd.f32 %v12743_v29, %v13951_v61  ;;  %v9696_v48 = vadd.f32 %v9695_v37, %v9694_v40  ;;  %v5059_v50 = vmax.f32 %v3115_v42, 0.0  ;;  %v8159_v52 = vadd.f32 %v8158_v33, %v8157_v44 }
 0x15d   : > { %v3110_v47 = vadd.f32 %v13951_v61, %v3109_v35  ;;  %v5057_v51 = vmax.f32 %v3107_v43, 0.0  ;;  %v9699_v56 = vsel %vm8098_vm4, %v9158_v41, 0.0  ;;  %v9701_v5 = vsel %vm8098_vm4, %v9159_v49, 0.0  ;;  %v13368_v35 = vld [vmem:[%s13827_s11 + $0x258] sm:$0xff]   ;;  %v13369_v41 = vld [vmem:[%s13827_s11 + $0x260] sm:$0xff]  }
 0x15e   : > { %12849 = vmatmul.mubr.msk.bf16.gmra.mrb[140].mxu0 %vm2168_vm2, %v13364_v24  ;;  %v5060_v53 = vmax.f32 %v3118_v46, 0.0  ;;  %v9698_v58 = vadd.f32 %v9697_v45, %v9696_v48  ;;  %v11967_v59 = vpack.c.bf16 %v5059_v50, %v5059_v50  ;;  %v8161_v63 = vadd.f32 %v8160_v57, %v8159_v52 }
 0x15f   : > { %12852 = vmatprep.mubr.msk.bf16.mxu0 %vm2168_vm2, %v13365_v30  ;;  %v5058_v54 = vmax.f32 %v3110_v47, 0.0  ;;  %v11965_v0 = vpack.c.bf16 %v5057_v51, %v5057_v51  ;;  %v8162_v1 = vsel %vm8098_vm4, %v5057_v51, 0.0  ;;  %v9160_v2 = vmul.f32 %v5057_v51, %v5057_v51 }
 0x160   : > { %v9700_v6 = vadd.f32 %v9699_v56, %v9698_v58  ;;  %7620 = vst.msk [vmem:[%s13964_s12 + $0x88] sm:$0xf] %vm7585_vm3, %v11967_v59  ;;  %v11968_v7 = vpack.c.bf16 %v5060_v53, %v5060_v53  ;;  %v9162_v9 = vmul.f32 %v5059_v50, %v5059_v50  ;;  %v8163_v10 = vadd.f32 %v8162_v1, %v8161_v63 }
 0x161   : > { %v12746_v55 = vpop.f32.mrb[36].mxu0  ;;  %7618 = vst.msk [vmem:[%s13964_s12 + $0x80] sm:$0xf] %vm7585_vm3, %v11965_v0  ;;  %v9703_v11 = vsel %vm8098_vm4, %v9160_v2, 0.0  ;;  %v11966_v12 = vpack.c.bf16 %v5058_v54, %v5058_v54  ;;  %v8164_v14 = vsel %vm8098_vm4, %v5058_v54, 0.0  ;;  %v9161_v15 = vmul.f32 %v5058_v54, %v5058_v54 }
 0x162   : > { %v3122_v60 = vpop.f32.mrb[37].mxu0  ;;  %v9702_v13 = vadd.f32 %v9701_v5, %v9700_v6  ;;  %7621 = vst.msk [vmem:[%s13964_s12 + $0x8c] sm:$0xf] %vm7585_vm3, %v11968_v7  ;;  %v3131_v16 = vadd.f32 %v12746_v55, %v13951_v61  ;;  %v8166_v17 = vsel %vm8098_vm4, %v5059_v50, 0.0  ;;  %v8165_v18 = vadd.f32 %v8164_v14, %v8163_v10 }
 0x163   : > { %v12747_v3 = vpop.f32.mrb[38].mxu0  ;;  %7619 = vst.msk [vmem:[%s13964_s12 + $0x84] sm:$0xf] %vm7585_vm3, %v11966_v12  ;;  %v3123_v19 = vadd.f32 %v13951_v61, %v3122_v60  ;;  %v9163_v22 = vmul.f32 %v5060_v53, %v5060_v53  ;;  %v9705_v23 = vsel %vm8098_vm4, %v9161_v15, 0.0  ;;  %v9707_v30 = vsel %vm8098_vm4, %v9162_v9, 0.0  ;;  %v13370_v9 = vld [vmem:[%s13827_s11 + $0x268] sm:$0xff]  }
 0x164   : > { %v3125_v8 = vpop.f32.mrb[39].mxu0  ;;  %v3134_v20 = vadd.f32 %v12747_v3, %v13951_v61  ;;  %v9704_v21 = vadd.f32 %v9703_v11, %v9702_v13  ;;  %v5063_v24 = vmax.f32 %v3131_v16, 0.0  ;;  %v8167_v25 = vadd.f32 %v8166_v17, %v8165_v18  ;;  %v13371_v15 = vld [vmem:[%s13827_s11 + $0x270] sm:$0xff]  }
 0x165   : > { %v5061_v26 = vmax.f32 %v3123_v19, 0.0  ;;  %v3126_v28 = vadd.f32 %v13951_v61, %v3125_v8  ;;  %v8168_v31 = vsel %vm8098_vm4, %v5060_v53, 0.0  ;;  %v9709_v42 = vsel %vm8098_vm4, %v9163_v22, 0.0 }
 0x166   : > { %12853 = vmatmul.mubr.msk.bf16.gmra.mrb[144].mxu0 %vm2168_vm2, %v13366_v62  ;;  %v5064_v27 = vmax.f32 %v3134_v20, 0.0  ;;  %v9706_v32 = vadd.f32 %v9705_v23, %v9704_v21  ;;  %v11971_v33 = vpack.c.bf16 %v5063_v24, %v5063_v24  ;;  %v8169_v36 = vadd.f32 %v8168_v31, %v8167_v25 }
 0x167   : > { %12856 = vmatprep.mubr.msk.bf16.mxu0 %vm2168_vm2, %v13367_v4  ;;  %v11969_v37 = vpack.c.bf16 %v5061_v26, %v5061_v26  ;;  %v8170_v38 = vsel %vm8098_vm4, %v5061_v26, 0.0  ;;  %v9164_v39 = vmul.f32 %v5061_v26, %v5061_v26  ;;  %v9166_v46 = vmul.f32 %v5063_v24, %v5063_v24 }
 0x168   : > { %v9708_v43 = vadd.f32 %v9707_v30, %v9706_v32  ;;  %7624 = vst.msk [vmem:[%s13964_s12 + $0x98] sm:$0xf] %vm7585_vm3, %v11971_v33  ;;  %v11972_v44 = vpack.c.bf16 %v5064_v27, %v5064_v27  ;;  %v8171_v47 = vadd.f32 %v8170_v38, %v8169_v36  ;;  %v5062_v49 = vmax.f32 %v3126_v28, 0.0 }
 0x169   : > { %v12750_v29 = vpop.f32.mrb[40].mxu0  ;;  %7622 = vst.msk [vmem:[%s13964_s12 + $0x90] sm:$0xf] %vm7585_vm3, %v11969_v37  ;;  %v9711_v48 = vsel %vm8098_vm4, %v9164_v39, 0.0  ;;  %v8174_v54 = vsel %vm8098_vm4, %v5063_v24, 0.0  ;;  %v9167_v63 = vmul.f32 %v5064_v27, %v5064_v27  ;;  %v9715_v4 = vsel %vm8098_vm4, %v9166_v46, 0.0 }
 0x16a   : > { %v3138_v34 = vpop.f32.mrb[41].mxu0  ;;  %v9710_v50 = vadd.f32 %v9709_v42, %v9708_v43  ;;  %7625 = vst.msk [vmem:[%s13964_s12 + $0x9c] sm:$0xf] %vm7585_vm3, %v11972_v44  ;;  %v3147_v51 = vadd.f32 %v12750_v29, %v13951_v61  ;;  %v11970_v55 = vpack.c.bf16 %v5062_v49, %v5062_v49  ;;  %v8172_v56 = vsel %vm8098_vm4, %v5062_v49, 0.0  ;;  %v13372_v46 = vld [vmem:[%s13827_s11 + $0x278] sm:$0xff]  }
 0x16b   : > { %v12751_v40 = vpop.f32.mrb[42].mxu0  ;;  %v3139_v52 = vadd.f32 %v13951_v61, %v3138_v34  ;;  %v9165_v57 = vmul.f32 %v5062_v49, %v5062_v49  ;;  %v8173_v59 = vadd.f32 %v8172_v56, %v8171_v47  ;;  %v8176_v10 = vsel %vm8098_vm4, %v5064_v27, 0.0 }
 0x16c   : > { %v3141_v45 = vpop.f32.mrb[43].mxu0  ;;  %v3150_v53 = vadd.f32 %v12751_v40, %v13951_v61  ;;  %v9712_v58 = vadd.f32 %v9711_v48, %v9710_v50  ;;  %v5067_v60 = vmax.f32 %v3147_v51, 0.0  ;;  %7623 = vst.msk [vmem:[%s13964_s12 + $0x94] sm:$0xf] %vm7585_vm3, %v11970_v55  ;;  %v9717_v20 = vsel %vm8098_vm4, %v9167_v63, 0.0 }
 0x16d   : > { %v5065_v62 = vmax.f32 %v3139_v52, 0.0  ;;  %v9713_v0 = vsel %vm8098_vm4, %v9165_v57, 0.0  ;;  %v3142_v2 = vadd.f32 %v13951_v61, %v3141_v45  ;;  %v8175_v5 = vadd.f32 %v8174_v54, %v8173_v59  ;;  %v13373_v52 = vld [vmem:[%s13827_s11 + $0x280] sm:$0xff]  }
 0x16e   : > { %12857 = vmatmul.mubr.msk.bf16.gmra.mrb[148].mxu0 %vm2168_vm2, %v13368_v35  ;;  %v5068_v1 = vmax.f32 %v3150_v53, 0.0  ;;  %v9714_v6 = vadd.f32 %v9713_v0, %v9712_v58  ;;  %v11975_v7 = vpack.c.bf16 %v5067_v60, %v5067_v60  ;;  %v8182_v21 = vsel %vm8098_vm4, %v5067_v60, 0.0  ;;  %v14241_v59 = vld [vmem:[%s17805_s2] ss:$0 sm:$0xff] }
 0x16f   : > { %12860 = vmatprep.mubr.msk.bf16.mxu0 %vm2168_vm2, %v13369_v41  ;;  %v11973_v11 = vpack.c.bf16 %v5065_v62, %v5065_v62  ;;  %v8178_v12 = vsel %vm8098_vm4, %v5065_v62, 0.0  ;;  %v9168_v13 = vmul.f32 %v5065_v62, %v5065_v62  ;;  %v8177_v16 = vadd.f32 %v8176_v10, %v8175_v5 }
 0x170   : > { %v9716_v17 = vadd.f32 %v9715_v4, %v9714_v6  ;;  %7628 = vst.msk [vmem:[%s13964_s12 + $0xa8] sm:$0xf] %vm7585_vm3, %v11975_v7  ;;  %v11976_v18 = vpack.c.bf16 %v5068_v1, %v5068_v1  ;;  %v5066_v23 = vmax.f32 %v3142_v2, 0.0  ;;  %v9170_v28 = vmul.f32 %v5067_v60, %v5067_v60 }
 0x171   : > { %v12754_v3 = vpop.f32.mrb[44].mxu0  ;;  %7626 = vst.msk [vmem:[%s13964_s12 + $0xa0] sm:$0xf] %vm7585_vm3, %v11973_v11  ;;  %v9719_v22 = vsel %vm8098_vm4, %v9168_v13, 0.0  ;;  %v8179_v25 = vadd.f32 %v8178_v12, %v8177_v16  ;;  %v9171_v36 = vmul.f32 %v5068_v1, %v5068_v1  ;;  %v8184_v41 = vsel %vm8098_vm4, %v5068_v1, 0.0 }
 0x172   : > { %v3154_v8 = vpop.f32.mrb[45].mxu0  ;;  %v9718_v24 = vadd.f32 %v9717_v20, %v9716_v17  ;;  %7629 = vst.msk [vmem:[%s13964_s12 + $0xac] sm:$0xf] %vm7585_vm3, %v11976_v18  ;;  %v3163_v26 = vadd.f32 %v12754_v3, %v13951_v61  ;;  %v11974_v29 = vpack.c.bf16 %v5066_v23, %v5066_v23  ;;  %v8180_v30 = vsel %vm8098_vm4, %v5066_v23, 0.0 }
 0x173   : > { %v12755_v14 = vpop.f32.mrb[46].mxu0  ;;  %v3155_v27 = vadd.f32 %v13951_v61, %v3154_v8  ;;  %v9169_v31 = vmul.f32 %v5066_v23, %v5066_v23  ;;  %v8181_v33 = vadd.f32 %v8180_v30, %v8179_v25  ;;  %v9723_v47 = vsel %vm8098_vm4, %v9170_v28, 0.0 }
 0x174   : > { %v3157_v19 = vpop.f32.mrb[47].mxu0  ;;  %v9720_v32 = vadd.f32 %v9719_v22, %v9718_v24  ;;  %v5071_v34 = vmax.f32 %v3163_v26, 0.0  ;;  %7627 = vst.msk [vmem:[%s13964_s12 + $0xa4] sm:$0xf] %vm7585_vm3, %v11974_v29  ;;  %v3166_v38 = vadd.f32 %v12755_v14, %v13951_v61  ;;  %v9725_v57 = vsel %vm8098_vm4, %v9171_v36, 0.0 }
 0x175   : > { %v5069_v35 = vmax.f32 %v3155_v27, 0.0  ;;  %v9721_v37 = vsel %vm8098_vm4, %v9169_v31, 0.0  ;;  %v3158_v39 = vadd.f32 %v13951_v61, %v3157_v19  ;;  %v8183_v42 = vadd.f32 %v8182_v21, %v8181_v33  ;;  %v13374_v21 = vld [vmem:[%s13827_s11 + $0x288] sm:$0xff]   ;;  %v13375_v27 = vld [vmem:[%s13827_s11 + $0x290] sm:$0xff]  }
 0x176   : > { %12861 = vmatmul.mubr.msk.bf16.gmra.mrb[152].mxu0 %vm2168_vm2, %v13370_v9  ;;  %v9722_v43 = vadd.f32 %v9721_v37, %v9720_v32  ;;  %v11979_v44 = vpack.c.bf16 %v5071_v34, %v5071_v34  ;;  %v5072_v54 = vmax.f32 %v3166_v38, 0.0  ;;  %v9174_v0 = vmul.f32 %v5071_v34, %v5071_v34 }
 0x177   : > { %12864 = vmatprep.mubr.msk.bf16.mxu0 %vm2168_vm2, %v13371_v15  ;;  %v11977_v48 = vpack.c.bf16 %v5069_v35, %v5069_v35  ;;  %v8186_v49 = vsel %vm8098_vm4, %v5069_v35, 0.0  ;;  %v9172_v50 = vmul.f32 %v5069_v35, %v5069_v35  ;;  %v8185_v53 = vadd.f32 %v8184_v41, %v8183_v42 }
 0x178   : > { %v9724_v61 = vadd.f32 %v9723_v47, %v9722_v43  ;;  %7632 = vst.msk [vmem:[%s13964_s12 + $0xb8] sm:$0xf] %vm7585_vm3, %v11979_v44  ;;  %v5070_v55 = vmax.f32 %v3158_v39, 0.0  ;;  %v11980_v2 = vpack.c.bf16 %v5072_v54, %v5072_v54  ;;  %v8190_v3 = vsel %vm8098_vm4, %v5071_v34, 0.0 }
 0x179   : > { %v12758_v40 = vpop.f32.mrb[48].mxu0  ;;  %7630 = vst.msk [vmem:[%s13964_s12 + $0xb0] sm:$0xf] %vm7585_vm3, %v11977_v48  ;;  %v9727_v58 = vsel %vm8098_vm4, %v9172_v50, 0.0  ;;  %v8187_v1 = vadd.f32 %v8186_v49, %v8185_v53  ;;  %v9175_v11 = vmul.f32 %v5072_v54, %v5072_v54  ;;  %v9731_v16 = vsel %vm8098_vm4, %v9174_v0, 0.0 }
 0x17a   : > { %v3170_v45 = vpop.f32.mrb[49].mxu0  ;;  %v3179_v60 = vadd.f32 %v14241_v59, %v12758_v40  ;;  %v9726_v63 = vadd.f32 %v9725_v57, %v9724_v61  ;;  %v11978_v4 = vpack.c.bf16 %v5070_v55, %v5070_v55  ;;  %v8188_v5 = vsel %vm8098_vm4, %v5070_v55, 0.0  ;;  %7633 = vst.msk [vmem:[%s13964_s12 + $0xbc] sm:$0xf] %vm7585_vm3, %v11980_v2  ;;  %v13377_v2 = vld [vmem:[%s13827_s11 + $0x2a0] sm:$0xff]  }
 0x17b   : > { %v12759_v51 = vpop.f32.mrb[50].mxu0  ;;  %v3171_v62 = vadd.f32 %v14241_v59, %v3170_v45  ;;  %v9173_v6 = vmul.f32 %v5070_v55, %v5070_v55  ;;  %v8189_v8 = vadd.f32 %v8188_v5, %v8187_v1  ;;  %v8192_v22 = vsel %vm8098_vm4, %v5072_v54, 0.0 }
 0x17c   : > { %v3173_v56 = vpop.f32.mrb[51].mxu0  ;;  %v9728_v7 = vadd.f32 %v9727_v58, %v9726_v63  ;;  %v5075_v9 = vmax.f32 %v3179_v60, 0.0  ;;  %7631 = vst.msk [vmem:[%s13964_s12 + $0xb4] sm:$0xf] %vm7585_vm3, %v11978_v4  ;;  %v3182_v13 = vadd.f32 %v14241_v59, %v12759_v51  ;;  %v9733_v33 = vsel %vm8098_vm4, %v9175_v11, 0.0  ;;  %v13376_v58 = vld [vmem:[%s13827_s11 + $0x298] sm:$0xff]  }
 0x17d   : > { %v5073_v10 = vmax.f32 %v3171_v62, 0.0  ;;  %v9729_v12 = vsel %vm8098_vm4, %v9173_v6, 0.0  ;;  %v3174_v14 = vadd.f32 %v14241_v59, %v3173_v56  ;;  %v8191_v17 = vadd.f32 %v8190_v3, %v8189_v8 }
 0x17e   : > { %12865 = vmatmul.mubr.msk.bf16.gmra.mrb[156].mxu0 %vm2168_vm2, %v13372_v46  ;;  %v9730_v18 = vadd.f32 %v9729_v12, %v9728_v7  ;;  %v11983_v19 = vpack.c.bf16 %v5075_v9, %v5075_v9  ;;  %v5076_v30 = vmax.f32 %v3182_v13, 0.0  ;;  %v9178_v38 = vmul.f32 %v5075_v9, %v5075_v9 }
 0x17f   : > { %12868 = vmatprep.mubr.msk.bf16.mxu0 %vm2168_vm2, %v13373_v52  ;;  %v11981_v23 = vpack.c.bf16 %v5073_v10, %v5073_v10  ;;  %v8194_v24 = vsel %vm8098_vm4, %v5073_v10, 0.0  ;;  %v9176_v25 = vmul.f32 %v5073_v10, %v5073_v10  ;;  %v8193_v28 = vadd.f32 %v8192_v22, %v8191_v17 }
 0x180   : > { %v9732_v29 = vadd.f32 %v9731_v16, %v9730_v18  ;;  %7636 = vst.msk [vmem:[%s13964_s12 + $0xc8] sm:$0xf] %vm7585_vm3, %v11983_v19  ;;  %v5074_v31 = vmax.f32 %v3174_v14, 0.0  ;;  %v11984_v40 = vpack.c.bf16 %v5076_v30, %v5076_v30  ;;  %v8198_v41 = vsel %vm8098_vm4, %v5075_v9, 0.0 }
 0x181   : > { %v12762_v15 = vpop.f32.mrb[52].mxu0  ;;  %7634 = vst.msk [vmem:[%s13964_s12 + $0xc0] sm:$0xf] %vm7585_vm3, %v11981_v23  ;;  %v9735_v34 = vsel %vm8098_vm4, %v9176_v25, 0.0  ;;  %v8195_v39 = vadd.f32 %v8194_v24, %v8193_v28  ;;  %v9179_v49 = vmul.f32 %v5076_v30, %v5076_v30  ;;  %v9739_v61 = vsel %vm8098_vm4, %v9178_v38, 0.0 }
 0x182   : > { %v3186_v20 = vpop.f32.mrb[53].mxu0  ;;  %v3195_v35 = vadd.f32 %v14241_v59, %v12762_v15  ;;  %v9734_v37 = vadd.f32 %v9733_v33, %v9732_v29  ;;  %v11982_v42 = vpack.c.bf16 %v5074_v31, %v5074_v31  ;;  %v8196_v43 = vsel %vm8098_vm4, %v5074_v31, 0.0  ;;  %7637 = vst.msk [vmem:[%s13964_s12 + $0xcc] sm:$0xf] %vm7585_vm3, %v11984_v40  ;;  %v13379_v40 = vld [vmem:[%s13827_s11 + $0x2b0] sm:$0xff]  }
 0x183   : > { %v12763_v26 = vpop.f32.mrb[54].mxu0  ;;  %v3187_v36 = vadd.f32 %v14241_v59, %v3186_v20  ;;  %v9177_v44 = vmul.f32 %v5074_v31, %v5074_v31  ;;  %v8197_v46 = vadd.f32 %v8196_v43, %v8195_v39  ;;  %v8200_v60 = vsel %vm8098_vm4, %v5076_v30, 0.0 }
 0x184   : > { %v3189_v32 = vpop.f32.mrb[55].mxu0  ;;  %v9736_v45 = vadd.f32 %v9735_v34, %v9734_v37  ;;  %v5079_v47 = vmax.f32 %v3195_v35, 0.0  ;;  %7635 = vst.msk [vmem:[%s13964_s12 + $0xc4] sm:$0xf] %vm7585_vm3, %v11982_v42  ;;  %v3198_v51 = vadd.f32 %v14241_v59, %v12763_v26  ;;  %v9741_v8 = vsel %vm8098_vm4, %v9179_v49, 0.0  ;;  %v13378_v34 = vld [vmem:[%s13827_s11 + $0x2a8] sm:$0xff]  }
 0x185   : > { %v5077_v48 = vmax.f32 %v3187_v36, 0.0  ;;  %v9737_v50 = vsel %vm8098_vm4, %v9177_v44, 0.0  ;;  %v3190_v52 = vadd.f32 %v14241_v59, %v3189_v32  ;;  %v8199_v54 = vadd.f32 %v8198_v41, %v8197_v46 }
 0x186   : > { %12869 = vmatmul.mubr.msk.bf16.gmra.mrb[160].mxu0 %vm2168_vm2, %v13374_v21  ;;  %v9738_v55 = vadd.f32 %v9737_v50, %v9736_v45  ;;  %v11987_v56 = vpack.c.bf16 %v5079_v47, %v5079_v47  ;;  %v5080_v5 = vmax.f32 %v3198_v51, 0.0  ;;  %v9182_v13 = vmul.f32 %v5079_v47, %v5079_v47 }
 0x187   : > { %12872 = vmatprep.mubr.msk.bf16.mxu0 %vm2168_vm2, %v13375_v27  ;;  %v11985_v62 = vpack.c.bf16 %v5077_v48, %v5077_v48  ;;  %v8202_v63 = vsel %vm8098_vm4, %v5077_v48, 0.0  ;;  %v9180_v0 = vmul.f32 %v5077_v48, %v5077_v48  ;;  %v8201_v3 = vadd.f32 %v8200_v60, %v8199_v54 }
 0x188   : > { %v9740_v4 = vadd.f32 %v9739_v61, %v9738_v55  ;;  %7640 = vst.msk [vmem:[%s13964_s12 + $0xd8] sm:$0xf] %vm7585_vm3, %v11987_v56  ;;  %v5078_v6 = vmax.f32 %v3190_v52, 0.0  ;;  %v11988_v15 = vpack.c.bf16 %v5080_v5, %v5080_v5  ;;  %v8206_v16 = vsel %vm8098_vm4, %v5079_v47, 0.0 }
 0x189   : > { %v12766_v53 = vpop.f32.mrb[56].mxu0  ;;  %7638 = vst.msk [vmem:[%s13964_s12 + $0xd0] sm:$0xf] %vm7585_vm3, %v11985_v62  ;;  %v9743_v9 = vsel %vm8098_vm4, %v9180_v0, 0.0  ;;  %v8203_v14 = vadd.f32 %v8202_v63, %v8201_v3  ;;  %v9183_v24 = vmul.f32 %v5080_v5, %v5080_v5  ;;  %v9747_v29 = vsel %vm8098_vm4, %v9182_v13, 0.0 }
 0x18a   : > { %v3202_v57 = vpop.f32.mrb[57].mxu0  ;;  %v3211_v10 = vadd.f32 %v14241_v59, %v12766_v53  ;;  %v9742_v12 = vadd.f32 %v9741_v8, %v9740_v4  ;;  %v11986_v17 = vpack.c.bf16 %v5078_v6, %v5078_v6  ;;  %v8204_v18 = vsel %vm8098_vm4, %v5078_v6, 0.0  ;;  %7641 = vst.msk [vmem:[%s13964_s12 + $0xdc] sm:$0xf] %vm7585_vm3, %v11988_v15  ;;  %v13381_v15 = vld [vmem:[%s13827_s11 + $0x2c0] sm:$0xff]  }
 0x18b   : > { %v12767_v1 = vpop.f32.mrb[58].mxu0  ;;  %v3203_v11 = vadd.f32 %v14241_v59, %v3202_v57  ;;  %v9181_v19 = vmul.f32 %v5078_v6, %v5078_v6  ;;  %v8205_v21 = vadd.f32 %v8204_v18, %v8203_v14  ;;  %v8208_v35 = vsel %vm8098_vm4, %v5080_v5, 0.0 }
 0x18c   : > { %v3205_v7 = vpop.f32.mrb[59].mxu0  ;;  %v9744_v20 = vadd.f32 %v9743_v9, %v9742_v12  ;;  %v5083_v22 = vmax.f32 %v3211_v10, 0.0  ;;  %7639 = vst.msk [vmem:[%s13964_s12 + $0xd4] sm:$0xf] %vm7585_vm3, %v11986_v17  ;;  %v3214_v26 = vadd.f32 %v14241_v59, %v12767_v1  ;;  %v9749_v46 = vsel %vm8098_vm4, %v9183_v24, 0.0  ;;  %v13380_v9 = vld [vmem:[%s13827_s11 + $0x2b8] sm:$0xff]  }
 0x18d   : > { %v5081_v23 = vmax.f32 %v3203_v11, 0.0  ;;  %v9745_v25 = vsel %vm8098_vm4, %v9181_v19, 0.0  ;;  %v3206_v27 = vadd.f32 %v14241_v59, %v3205_v7  ;;  %v8207_v30 = vadd.f32 %v8206_v16, %v8205_v21 }
 0x18e   : > { %12873 = vmatmul.mubr.msk.bf16.gmra.mrb[164].mxu0 %vm2168_vm2, %v13376_v58  ;;  %v9746_v31 = vadd.f32 %v9745_v25, %v9744_v20  ;;  %v11991_v32 = vpack.c.bf16 %v5083_v22, %v5083_v22  ;;  %v5084_v43 = vmax.f32 %v3214_v26, 0.0  ;;  %v9186_v51 = vmul.f32 %v5083_v22, %v5083_v22 }
 0x18f   : > { %12876 = vmatprep.mubr.msk.bf16.mxu0 %vm2168_vm2, %v13377_v2  ;;  %v11989_v36 = vpack.c.bf16 %v5081_v23, %v5081_v23  ;;  %v8210_v37 = vsel %vm8098_vm4, %v5081_v23, 0.0  ;;  %v9184_v38 = vmul.f32 %v5081_v23, %v5081_v23  ;;  %v8209_v41 = vadd.f32 %v8208_v35, %v8207_v30 }
 0x190   : > { %v9748_v42 = vadd.f32 %v9747_v29, %v9746_v31  ;;  %7644 = vst.msk [vmem:[%s13964_s12 + $0xe8] sm:$0xf] %vm7585_vm3, %v11991_v32  ;;  %v5082_v44 = vmax.f32 %v3206_v27, 0.0  ;;  %v11992_v53 = vpack.c.bf16 %v5084_v43, %v5084_v43  ;;  %v8214_v61 = vsel %vm8098_vm4, %v5083_v22, 0.0 }
 0x191   : > { %v12770_v28 = vpop.f32.mrb[60].mxu0  ;;  %7642 = vst.msk [vmem:[%s13964_s12 + $0xe0] sm:$0xf] %vm7585_vm3, %v11989_v36  ;;  %v9751_v47 = vsel %vm8098_vm4, %v9184_v38, 0.0  ;;  %v8211_v52 = vadd.f32 %v8210_v37, %v8209_v41  ;;  %v9187_v63 = vmul.f32 %v5084_v43, %v5084_v43  ;;  %v9755_v4 = vsel %vm8098_vm4, %v9186_v51, 0.0 }
 0x192   : > { %v3218_v33 = vpop.f32.mrb[61].mxu0  ;;  %v3227_v48 = vadd.f32 %v14241_v59, %v12770_v28  ;;  %v9750_v50 = vadd.f32 %v9749_v46, %v9748_v42  ;;  %v11990_v54 = vpack.c.bf16 %v5082_v44, %v5082_v44  ;;  %v8212_v55 = vsel %vm8098_vm4, %v5082_v44, 0.0  ;;  %7645 = vst.msk [vmem:[%s13964_s12 + $0xec] sm:$0xf] %vm7585_vm3, %v11992_v53  ;;  %v13383_v53 = vld [vmem:[%s13827_s11 + $0x2d0] sm:$0xff]  }
 0x193   : > { %v12771_v39 = vpop.f32.mrb[62].mxu0  ;;  %v3219_v49 = vadd.f32 %v14241_v59, %v3218_v33  ;;  %v9185_v56 = vmul.f32 %v5082_v44, %v5082_v44  ;;  %v8213_v58 = vadd.f32 %v8212_v55, %v8211_v52  ;;  %v8216_v10 = vsel %vm8098_vm4, %v5084_v43, 0.0 }
 0x194   : > { %v3221_v45 = vpop.f32.mrb[63].mxu0  ;;  %v9752_v57 = vadd.f32 %v9751_v47, %v9750_v50  ;;  %v5087_v60 = vmax.f32 %v3227_v48, 0.0  ;;  %7643 = vst.msk [vmem:[%s13964_s12 + $0xe4] sm:$0xf] %vm7585_vm3, %v11990_v54  ;;  %v3230_v1 = vadd.f32 %v14241_v59, %v12771_v39  ;;  %v9757_v21 = vsel %vm8098_vm4, %v9187_v63, 0.0  ;;  %v13382_v47 = vld [vmem:[%s13827_s11 + $0x2c8] sm:$0xff]  }
 0x195   : > { %v5085_v62 = vmax.f32 %v3219_v49, 0.0  ;;  %v9753_v0 = vsel %vm8098_vm4, %v9185_v56, 0.0  ;;  %v3222_v2 = vadd.f32 %v14241_v59, %v3221_v45  ;;  %v8215_v5 = vadd.f32 %v8214_v61, %v8213_v58 }
 0x196   : > { %12877 = vmatmul.mubr.msk.bf16.gmra.mrb[168].mxu0 %vm2168_vm2, %v13378_v34  ;;  %v9754_v6 = vadd.f32 %v9753_v0, %v9752_v57  ;;  %v11995_v7 = vpack.c.bf16 %v5087_v60, %v5087_v60  ;;  %v5088_v18 = vmax.f32 %v3230_v1, 0.0  ;;  %v9190_v26 = vmul.f32 %v5087_v60, %v5087_v60 }
 0x197   : > { %12880 = vmatprep.mubr.msk.bf16.mxu0 %vm2168_vm2, %v13379_v40  ;;  %v11993_v11 = vpack.c.bf16 %v5085_v62, %v5085_v62  ;;  %v8218_v12 = vsel %vm8098_vm4, %v5085_v62, 0.0  ;;  %v9188_v13 = vmul.f32 %v5085_v62, %v5085_v62  ;;  %v8217_v16 = vadd.f32 %v8216_v10, %v8215_v5 }
 0x198   : > { %v9756_v17 = vadd.f32 %v9755_v4, %v9754_v6  ;;  %7648 = vst.msk [vmem:[%s13964_s12 + $0xf8] sm:$0xf] %vm7585_vm3, %v11995_v7  ;;  %v5086_v19 = vmax.f32 %v3222_v2, 0.0  ;;  %v11996_v28 = vpack.c.bf16 %v5088_v18, %v5088_v18  ;;  %v8222_v29 = vsel %vm8098_vm4, %v5087_v60, 0.0 }
 0x199   : > { %v12774_v3 = vpop.f32.mrb[64].mxu0  ;;  %7646 = vst.msk [vmem:[%s13964_s12 + $0xf0] sm:$0xf] %vm7585_vm3, %v11993_v11  ;;  %v9759_v22 = vsel %vm8098_vm4, %v9188_v13, 0.0  ;;  %v8219_v27 = vadd.f32 %v8218_v12, %v8217_v16  ;;  %v9191_v37 = vmul.f32 %v5088_v18, %v5088_v18  ;;  %v9763_v42 = vsel %vm8098_vm4, %v9190_v26, 0.0 }
 0x19a   : > { %v3234_v8 = vpop.f32.mrb[65].mxu0  ;;  %v3243_v23 = vadd.f32 %v14241_v59, %v12774_v3  ;;  %v9758_v25 = vadd.f32 %v9757_v21, %v9756_v17  ;;  %v11994_v30 = vpack.c.bf16 %v5086_v19, %v5086_v19  ;;  %v8220_v31 = vsel %vm8098_vm4, %v5086_v19, 0.0  ;;  %7649 = vst.msk [vmem:[%s13964_s12 + $0xfc] sm:$0xf] %vm7585_vm3, %v11996_v28  ;;  %v13385_v28 = vld [vmem:[%s13827_s11 + $0x2e0] sm:$0xff]  }
 0x19b   : > { %v12775_v14 = vpop.f32.mrb[66].mxu0  ;;  %v3235_v24 = vadd.f32 %v14241_v59, %v3234_v8  ;;  %v9189_v32 = vmul.f32 %v5086_v19, %v5086_v19  ;;  %v8221_v34 = vadd.f32 %v8220_v31, %v8219_v27  ;;  %v8224_v48 = vsel %vm8098_vm4, %v5088_v18, 0.0 }
 0x19c   : > { %v3237_v20 = vpop.f32.mrb[67].mxu0  ;;  %v9760_v33 = vadd.f32 %v9759_v22, %v9758_v25  ;;  %v5091_v35 = vmax.f32 %v3243_v23, 0.0  ;;  %7647 = vst.msk [vmem:[%s13964_s12 + $0xf4] sm:$0xf] %vm7585_vm3, %v11994_v30  ;;  %v3246_v39 = vadd.f32 %v14241_v59, %v12775_v14  ;;  %v9765_v58 = vsel %vm8098_vm4, %v9191_v37, 0.0  ;;  %v13384_v22 = vld [vmem:[%s13827_s11 + $0x2d8] sm:$0xff]  }
 0x19d   : > { %v5089_v36 = vmax.f32 %v3235_v24, 0.0  ;;  %v9761_v38 = vsel %vm8098_vm4, %v9189_v32, 0.0  ;;  %v3238_v40 = vadd.f32 %v14241_v59, %v3237_v20  ;;  %v8223_v43 = vadd.f32 %v8222_v29, %v8221_v34 }
 0x19e   : > { %12881 = vmatmul.mubr.msk.bf16.gmra.mrb[172].mxu0 %vm2168_vm2, %v13380_v9  ;;  %v9762_v44 = vadd.f32 %v9761_v38, %v9760_v33  ;;  %v11999_v45 = vpack.c.bf16 %v5091_v35, %v5091_v35  ;;  %v5092_v55 = vmax.f32 %v3246_v39, 0.0  ;;  %v9194_v1 = vmul.f32 %v5091_v35, %v5091_v35 }
 0x19f   : > { %12884 = vmatprep.mubr.msk.bf16.mxu0 %vm2168_vm2, %v13381_v15  ;;  %v11997_v49 = vpack.c.bf16 %v5089_v36, %v5089_v36  ;;  %v8226_v50 = vsel %vm8098_vm4, %v5089_v36, 0.0  ;;  %v9192_v51 = vmul.f32 %v5089_v36, %v5089_v36  ;;  %v8225_v61 = vadd.f32 %v8224_v48, %v8223_v43 }
 0x1a0   : > { %v9764_v54 = vadd.f32 %v9763_v42, %v9762_v44  ;;  %7652 = vst.msk [vmem:[%s13964_s12 + $0x108] sm:$0xf] %vm7585_vm3, %v11999_v45  ;;  %v5090_v56 = vmax.f32 %v3238_v40, 0.0  ;;  %v12000_v3 = vpack.c.bf16 %v5092_v55, %v5092_v55  ;;  %v8230_v4 = vsel %vm8098_vm4, %v5091_v35, 0.0 }
 0x1a1   : > { %v12778_v41 = vpop.f32.mrb[68].mxu0  ;;  %7650 = vst.msk [vmem:[%s13964_s12 + $0x100] sm:$0xf] %vm7585_vm3, %v11997_v49  ;;  %v9767_v60 = vsel %vm8098_vm4, %v9192_v51, 0.0  ;;  %v8227_v2 = vadd.f32 %v8226_v50, %v8225_v61  ;;  %v9195_v12 = vmul.f32 %v5092_v55, %v5092_v55  ;;  %v9771_v17 = vsel %vm8098_vm4, %v9194_v1, 0.0 }
 0x1a2   : > { %v3250_v46 = vpop.f32.mrb[69].mxu0  ;;  %v3259_v62 = vadd.f32 %v14241_v59, %v12778_v41  ;;  %v9766_v0 = vadd.f32 %v9765_v58, %v9764_v54  ;;  %v11998_v5 = vpack.c.bf16 %v5090_v56, %v5090_v56  ;;  %v8228_v6 = vsel %vm8098_vm4, %v5090_v56, 0.0  ;;  %7653 = vst.msk [vmem:[%s13964_s12 + $0x10c] sm:$0xf] %vm7585_vm3, %v12000_v3  ;;  %v13387_v3 = vld [vmem:[%s13827_s11 + $0x2f0] sm:$0xff]  }
 0x1a3   : > { %v12779_v52 = vpop.f32.mrb[70].mxu0  ;;  %v3251_v63 = vadd.f32 %v14241_v59, %v3250_v46  ;;  %v9193_v7 = vmul.f32 %v5090_v56, %v5090_v56  ;;  %v8229_v9 = vadd.f32 %v8228_v6, %v8227_v2  ;;  %v8232_v23 = vsel %vm8098_vm4, %v5092_v55, 0.0 }
 0x1a4   : > { %v3253_v57 = vpop.f32.mrb[71].mxu0  ;;  %v9768_v8 = vadd.f32 %v9767_v60, %v9766_v0  ;;  %v5095_v10 = vmax.f32 %v3259_v62, 0.0  ;;  %7651 = vst.msk [vmem:[%s13964_s12 + $0x104] sm:$0xf] %vm7585_vm3, %v11998_v5  ;;  %v3262_v14 = vadd.f32 %v14241_v59, %v12779_v52  ;;  %v9773_v34 = vsel %vm8098_vm4, %v9195_v12, 0.0  ;;  %v13386_v60 = vld [vmem:[%s13827_s11 + $0x2e8] sm:$0xff]  }
 0x1a5   : > { %v5093_v11 = vmax.f32 %v3251_v63, 0.0  ;;  %v9769_v13 = vsel %vm8098_vm4, %v9193_v7, 0.0  ;;  %v3254_v15 = vadd.f32 %v14241_v59, %v3253_v57  ;;  %v8231_v18 = vadd.f32 %v8230_v4, %v8229_v9 }
 0x1a6   : > { %12885 = vmatmul.mubr.msk.bf16.gmra.mrb[176].mxu0 %vm2168_vm2, %v13382_v47  ;;  %v9770_v19 = vadd.f32 %v9769_v13, %v9768_v8  ;;  %v12003_v20 = vpack.c.bf16 %v5095_v10, %v5095_v10  ;;  %v5096_v31 = vmax.f32 %v3262_v14, 0.0  ;;  %v9198_v39 = vmul.f32 %v5095_v10, %v5095_v10 }
 0x1a7   : > { %12888 = vmatprep.mubr.msk.bf16.mxu0 %vm2168_vm2, %v13383_v53  ;;  %v12001_v24 = vpack.c.bf16 %v5093_v11, %v5093_v11  ;;  %v8234_v25 = vsel %vm8098_vm4, %v5093_v11, 0.0  ;;  %v9196_v26 = vmul.f32 %v5093_v11, %v5093_v11  ;;  %v8233_v29 = vadd.f32 %v8232_v23, %v8231_v18 }
 0x1a8   : > { %v9772_v30 = vadd.f32 %v9771_v17, %v9770_v19  ;;  %7656 = vst.msk [vmem:[%s13964_s12 + $0x118] sm:$0xf] %vm7585_vm3, %v12003_v20  ;;  %v5094_v32 = vmax.f32 %v3254_v15, 0.0  ;;  %v12004_v41 = vpack.c.bf16 %v5096_v31, %v5096_v31  ;;  %v8238_v42 = vsel %vm8098_vm4, %v5095_v10, 0.0 }
 0x1a9   : > { %v12782_v16 = vpop.f32.mrb[72].mxu0  ;;  %7654 = vst.msk [vmem:[%s13964_s12 + $0x110] sm:$0xf] %vm7585_vm3, %v12001_v24  ;;  %v9775_v35 = vsel %vm8098_vm4, %v9196_v26, 0.0  ;;  %v8235_v40 = vadd.f32 %v8234_v25, %v8233_v29  ;;  %v9199_v50 = vmul.f32 %v5096_v31, %v5096_v31  ;;  %v9779_v54 = vsel %vm8098_vm4, %v9198_v39, 0.0 }
 0x1aa   : > { %v3266_v21 = vpop.f32.mrb[73].mxu0  ;;  %v3275_v36 = vadd.f32 %v14241_v59, %v12782_v16  ;;  %v9774_v38 = vadd.f32 %v9773_v34, %v9772_v30  ;;  %v12002_v43 = vpack.c.bf16 %v5094_v32, %v5094_v32  ;;  %v8236_v44 = vsel %vm8098_vm4, %v5094_v32, 0.0  ;;  %7657 = vst.msk [vmem:[%s13964_s12 + $0x11c] sm:$0xf] %vm7585_vm3, %v12004_v41  ;;  %v13389_v41 = vld [vmem:[%s13827_s11 + $0x300] sm:$0xff]  }
 0x1ab   : > { %v12783_v27 = vpop.f32.mrb[74].mxu0  ;;  %v3267_v37 = vadd.f32 %v14241_v59, %v3266_v21  ;;  %v9197_v45 = vmul.f32 %v5094_v32, %v5094_v32  ;;  %v8237_v47 = vadd.f32 %v8236_v44, %v8235_v40  ;;  %v8240_v62 = vsel %vm8098_vm4, %v5096_v31, 0.0 }
 0x1ac   : > { %v3269_v33 = vpop.f32.mrb[75].mxu0  ;;  %v9776_v46 = vadd.f32 %v9775_v35, %v9774_v38  ;;  %v5099_v48 = vmax.f32 %v3275_v36, 0.0  ;;  %7655 = vst.msk [vmem:[%s13964_s12 + $0x114] sm:$0xf] %vm7585_vm3, %v12002_v43  ;;  %v3278_v52 = vadd.f32 %v14241_v59, %v12783_v27  ;;  %v9781_v9 = vsel %vm8098_vm4, %v9199_v50, 0.0  ;;  %v13388_v35 = vld [vmem:[%s13827_s11 + $0x2f8] sm:$0xff]  }
 0x1ad   : > { %v5097_v49 = vmax.f32 %v3267_v37, 0.0  ;;  %v9777_v51 = vsel %vm8098_vm4, %v9197_v45, 0.0  ;;  %v3270_v53 = vadd.f32 %v14241_v59, %v3269_v33  ;;  %v8239_v55 = vadd.f32 %v8238_v42, %v8237_v47 }
 0x1ae   : > { %12889 = vmatmul.mubr.msk.bf16.gmra.mrb[180].mxu0 %vm2168_vm2, %v13384_v22  ;;  %v9778_v56 = vadd.f32 %v9777_v51, %v9776_v46  ;;  %v12007_v57 = vpack.c.bf16 %v5099_v48, %v5099_v48  ;;  %v5100_v6 = vmax.f32 %v3278_v52, 0.0  ;;  %v9202_v14 = vmul.f32 %v5099_v48, %v5099_v48 }
 0x1af   : > { %12892 = vmatprep.mubr.msk.bf16.mxu0 %vm2168_vm2, %v13385_v28  ;;  %v12005_v63 = vpack.c.bf16 %v5097_v49, %v5097_v49  ;;  %v8242_v0 = vsel %vm8098_vm4, %v5097_v49, 0.0  ;;  %v9200_v1 = vmul.f32 %v5097_v49, %v5097_v49  ;;  %v8241_v4 = vadd.f32 %v8240_v62, %v8239_v55 }
 0x1b0   : > { %v9780_v5 = vadd.f32 %v9779_v54, %v9778_v56  ;;  %7660 = vst.msk [vmem:[%s13964_s12 + $0x128] sm:$0xf] %vm7585_vm3, %v12007_v57  ;;  %v5098_v7 = vmax.f32 %v3270_v53, 0.0  ;;  %v12008_v16 = vpack.c.bf16 %v5100_v6, %v5100_v6  ;;  %v8246_v17 = vsel %vm8098_vm4, %v5099_v48, 0.0 }
 0x1b1   : > { %v12786_v61 = vpop.f32.mrb[76].mxu0  ;;  %7658 = vst.msk [vmem:[%s13964_s12 + $0x120] sm:$0xf] %vm7585_vm3, %v12005_v63  ;;  %v9783_v10 = vsel %vm8098_vm4, %v9200_v1, 0.0  ;;  %v8243_v15 = vadd.f32 %v8242_v0, %v8241_v4  ;;  %v9203_v25 = vmul.f32 %v5100_v6, %v5100_v6  ;;  %v9787_v30 = vsel %vm8098_vm4, %v9202_v14, 0.0 }
 0x1b2   : > { %v3282_v58 = vpop.f32.mrb[77].mxu0  ;;  %v3291_v11 = vadd.f32 %v14241_v59, %v12786_v61  ;;  %v9782_v13 = vadd.f32 %v9781_v9, %v9780_v5  ;;  %v12006_v18 = vpack.c.bf16 %v5098_v7, %v5098_v7  ;;  %v8244_v19 = vsel %vm8098_vm4, %v5098_v7, 0.0  ;;  %7661 = vst.msk [vmem:[%s13964_s12 + $0x12c] sm:$0xf] %vm7585_vm3, %v12008_v16  ;;  %v13391_v16 = vld [vmem:[%s13827_s11 + $0x310] sm:$0xff]  }
 0x1b3   : > { %v12787_v2 = vpop.f32.mrb[78].mxu0  ;;  %v3283_v12 = vadd.f32 %v14241_v59, %v3282_v58  ;;  %v9201_v20 = vmul.f32 %v5098_v7, %v5098_v7  ;;  %v8245_v22 = vadd.f32 %v8244_v19, %v8243_v15  ;;  %v8248_v36 = vsel %vm8098_vm4, %v5100_v6, 0.0 }
 0x1b4   : > { %v3285_v8 = vpop.f32.mrb[79].mxu0  ;;  %v9784_v21 = vadd.f32 %v9783_v10, %v9782_v13  ;;  %v5103_v23 = vmax.f32 %v3291_v11, 0.0  ;;  %7659 = vst.msk [vmem:[%s13964_s12 + $0x124] sm:$0xf] %vm7585_vm3, %v12006_v18  ;;  %v3294_v27 = vadd.f32 %v14241_v59, %v12787_v2  ;;  %v9789_v47 = vsel %vm8098_vm4, %v9203_v25, 0.0  ;;  %v13390_v10 = vld [vmem:[%s13827_s11 + $0x308] sm:$0xff]  }
 0x1b5   : > { %v5101_v24 = vmax.f32 %v3283_v12, 0.0  ;;  %v9785_v26 = vsel %vm8098_vm4, %v9201_v20, 0.0  ;;  %v3286_v28 = vadd.f32 %v14241_v59, %v3285_v8  ;;  %v8247_v31 = vadd.f32 %v8246_v17, %v8245_v22 }
 0x1b6   : > { %12893 = vmatmul.mubr.msk.bf16.gmra.mrb[184].mxu0 %vm2168_vm2, %v13386_v60  ;;  %v9786_v32 = vadd.f32 %v9785_v26, %v9784_v21  ;;  %v12011_v33 = vpack.c.bf16 %v5103_v23, %v5103_v23  ;;  %v5104_v44 = vmax.f32 %v3294_v27, 0.0  ;;  %v9206_v52 = vmul.f32 %v5103_v23, %v5103_v23 }
 0x1b7   : > { %12896 = vmatprep.mubr.msk.bf16.mxu0 %vm2168_vm2, %v13387_v3  ;;  %v12009_v37 = vpack.c.bf16 %v5101_v24, %v5101_v24  ;;  %v8250_v38 = vsel %vm8098_vm4, %v5101_v24, 0.0  ;;  %v9204_v39 = vmul.f32 %v5101_v24, %v5101_v24  ;;  %v8249_v42 = vadd.f32 %v8248_v36, %v8247_v31 }
 0x1b8   : > { %v9788_v43 = vadd.f32 %v9787_v30, %v9786_v32  ;;  %7664 = vst.msk [vmem:[%s13964_s12 + $0x138] sm:$0xf] %vm7585_vm3, %v12011_v33  ;;  %v5102_v45 = vmax.f32 %v3286_v28, 0.0  ;;  %v12012_v61 = vpack.c.bf16 %v5104_v44, %v5104_v44  ;;  %v8254_v54 = vsel %vm8098_vm4, %v5103_v23, 0.0 }
 0x1b9   : > { %v12790_v29 = vpop.f32.mrb[80].mxu0  ;;  %7662 = vst.msk [vmem:[%s13964_s12 + $0x130] sm:$0xf] %vm7585_vm3, %v12009_v37  ;;  %v9791_v48 = vsel %vm8098_vm4, %v9204_v39, 0.0  ;;  %v8251_v53 = vadd.f32 %v8250_v38, %v8249_v42  ;;  %v9207_v0 = vmul.f32 %v5104_v44, %v5104_v44  ;;  %v9795_v5 = vsel %vm8098_vm4, %v9206_v52, 0.0  ;;  %v13422_v39 = vld [vmem:[%s13827_s11 + $0x408] sm:$0xff]  }
 0x1ba   : > { %v3298_v34 = vpop.f32.mrb[81].mxu0  ;;  %v3307_v49 = vadd.f32 %v14241_v59, %v12790_v29  ;;  %v9790_v51 = vadd.f32 %v9789_v47, %v9788_v43  ;;  %v12010_v55 = vpack.c.bf16 %v5102_v45, %v5102_v45  ;;  %v8252_v56 = vsel %vm8098_vm4, %v5102_v45, 0.0  ;;  %7665 = vst.msk [vmem:[%s13964_s12 + $0x13c] sm:$0xf] %vm7585_vm3, %v12012_v61 }
 0x1bb   : > { %v12791_v40 = vpop.f32.mrb[82].mxu0  ;;  %v3299_v50 = vadd.f32 %v14241_v59, %v3298_v34  ;;  %v9205_v57 = vmul.f32 %v5102_v45, %v5102_v45  ;;  %v8253_v60 = vadd.f32 %v8252_v56, %v8251_v53  ;;  %v8256_v11 = vsel %vm8098_vm4, %v5104_v44, 0.0  ;;  %v13421_v34 = vld [vmem:[%s13827_s11 + $0x400] sm:$0xff]  }
 0x1bc   : > { %v3301_v46 = vpop.f32.mrb[83].mxu0  ;;  %v9792_v58 = vadd.f32 %v9791_v48, %v9790_v51  ;;  %v5107_v62 = vmax.f32 %v3307_v49, 0.0  ;;  %7663 = vst.msk [vmem:[%s13964_s12 + $0x134] sm:$0xf] %vm7585_vm3, %v12010_v55  ;;  %v3310_v2 = vadd.f32 %v14241_v59, %v12791_v40  ;;  %v9797_v22 = vsel %vm8098_vm4, %v9207_v0, 0.0  ;;  %12964 = vmatprep.mubr.msk.bf16.mxu1 %vm2168_vm2, %v13421_v34  ;;  %v13393_v55 = vld [vmem:[%s13827_s11 + $0x320] sm:$0xff]  }
 0x1bd   : > { %v5105_v63 = vmax.f32 %v3299_v50, 0.0  ;;  %v9793_v1 = vsel %vm8098_vm4, %v9205_v57, 0.0  ;;  %v3302_v3 = vadd.f32 %v14241_v59, %v3301_v46  ;;  %v8255_v6 = vadd.f32 %v8254_v54, %v8253_v60  ;;  %v13392_v50 = vld [vmem:[%s13827_s11 + $0x318] sm:$0xff]   ;;  %12965 = vmatmul.mubr.msk.bf16.vlgmr.msra.gmra.mrb[0].mxu1 %vm2168_vm2, %v13422_v39 }
 0x1be   : > { %12897 = vmatmul.mubr.msk.bf16.gmra.mrb[188].mxu0 %vm2168_vm2, %v13388_v35  ;;  %v9794_v7 = vadd.f32 %v9793_v1, %v9792_v58  ;;  %v12015_v8 = vpack.c.bf16 %v5107_v62, %v5107_v62  ;;  %v5108_v19 = vmax.f32 %v3310_v2, 0.0  ;;  %v9210_v27 = vmul.f32 %v5107_v62, %v5107_v62 }
 0x1bf   : > { %12900 = vmatprep.mubr.msk.bf16.mxu0 %vm2168_vm2, %v13389_v41  ;;  %v12013_v12 = vpack.c.bf16 %v5105_v63, %v5105_v63  ;;  %v8258_v13 = vsel %vm8098_vm4, %v5105_v63, 0.0  ;;  %v9208_v14 = vmul.f32 %v5105_v63, %v5105_v63  ;;  %v8257_v17 = vadd.f32 %v8256_v11, %v8255_v6  ;;  %v13423_v11 = vld [vmem:[%s13827_s11 + $0x410] sm:$0xff]  }
 0x1c0   : > { %v9796_v18 = vadd.f32 %v9795_v5, %v9794_v7  ;;  %7668 = vst.msk [vmem:[%s13964_s12 + $0x148] sm:$0xf] %vm7585_vm3, %v12015_v8  ;;  %v5106_v20 = vmax.f32 %v3302_v3, 0.0  ;;  %v12016_v29 = vpack.c.bf16 %v5108_v19, %v5108_v19  ;;  %v8262_v30 = vsel %vm8098_vm4, %v5107_v62, 0.0  ;;  %12968 = vmatprep.mubr.msk.bf16.mxu1 %vm2168_vm2, %v13423_v11 }
 0x1c1   : > { %v12794_v4 = vpop.f32.mrb[84].mxu0  ;;  %7666 = vst.msk [vmem:[%s13964_s12 + $0x140] sm:$0xf] %vm7585_vm3, %v12013_v12  ;;  %v9799_v23 = vsel %vm8098_vm4, %v9208_v14, 0.0  ;;  %v8259_v28 = vadd.f32 %v8258_v13, %v8257_v17  ;;  %v9211_v40 = vmul.f32 %v5108_v19, %v5108_v19  ;;  %v9803_v45 = vsel %vm8098_vm4, %v9210_v27, 0.0  ;;  %v13394_v27 = vld [vmem:[%s13827_s11 + $0x328] sm:$0xff]  }
 0x1c2   : > { %v3314_v9 = vpop.f32.mrb[85].mxu0  ;;  %v3323_v24 = vadd.f32 %v14241_v59, %v12794_v4  ;;  %v9798_v26 = vadd.f32 %v9797_v22, %v9796_v18  ;;  %v12014_v31 = vpack.c.bf16 %v5106_v20, %v5106_v20  ;;  %v8260_v32 = vsel %vm8098_vm4, %v5106_v20, 0.0  ;;  %7669 = vst.msk [vmem:[%s13964_s12 + $0x14c] sm:$0xf] %vm7585_vm3, %v12016_v29 }
 0x1c3   : > { %v12795_v15 = vpop.f32.mrb[86].mxu0  ;;  %v3315_v25 = vadd.f32 %v14241_v59, %v3314_v9  ;;  %v9209_v33 = vmul.f32 %v5106_v20, %v5106_v20  ;;  %v8261_v36 = vadd.f32 %v8260_v32, %v8259_v28  ;;  %v8264_v51 = vsel %vm8098_vm4, %v5108_v19, 0.0 }
 0x1c4   : > { %v3317_v21 = vpop.f32.mrb[87].mxu0  ;;  %v9800_v35 = vadd.f32 %v9799_v23, %v9798_v26  ;;  %v5111_v37 = vmax.f32 %v3323_v24, 0.0  ;;  %7667 = vst.msk [vmem:[%s13964_s12 + $0x144] sm:$0xf] %vm7585_vm3, %v12014_v31  ;;  %v3326_v42 = vadd.f32 %v14241_v59, %v12795_v15  ;;  %v9805_v63 = vsel %vm8098_vm4, %v9211_v40, 0.0 }
 0x1c5   : > { %v5109_v38 = vmax.f32 %v3315_v25, 0.0  ;;  %v9801_v41 = vsel %vm8098_vm4, %v9209_v33, 0.0  ;;  %v3318_v43 = vadd.f32 %v14241_v59, %v3317_v21  ;;  %v8263_v46 = vadd.f32 %v8262_v30, %v8261_v36  ;;  %v13395_v33 = vld [vmem:[%s13827_s11 + $0x330] sm:$0xff]  }
 0x1c6   : > { %12901 = vmatmul.mubr.msk.bf16.gmra.mrb[192].mxu0 %vm2168_vm2, %v13390_v10  ;;  %v9802_v47 = vadd.f32 %v9801_v41, %v9800_v35  ;;  %v12019_v48 = vpack.c.bf16 %v5111_v37, %v5111_v37  ;;  %v5112_v58 = vmax.f32 %v3326_v42, 0.0  ;;  %v9214_v4 = vmul.f32 %v5111_v37, %v5111_v37 }
 0x1c7   : > { %12904 = vmatprep.mubr.msk.bf16.mxu0 %vm2168_vm2, %v13391_v16  ;;  %v12017_v52 = vpack.c.bf16 %v5109_v38, %v5109_v38  ;;  %v8266_v53 = vsel %vm8098_vm4, %v5109_v38, 0.0  ;;  %v9212_v61 = vmul.f32 %v5109_v38, %v5109_v38  ;;  %v8265_v56 = vadd.f32 %v8264_v51, %v8263_v46  ;;  %v13424_v16 = vld [vmem:[%s13827_s11 + $0x418] sm:$0xff]   ;;  %v13425_v51 = vld [vmem:[%s13827_s11 + $0x420] sm:$0xff]  }
 0x1c8   : > { %v9804_v57 = vadd.f32 %v9803_v45, %v9802_v47  ;;  %7672 = vst.msk [vmem:[%s13964_s12 + $0x158] sm:$0xf] %vm7585_vm3, %v12019_v48  ;;  %v5110_v60 = vmax.f32 %v3318_v43, 0.0  ;;  %v12020_v6 = vpack.c.bf16 %v5112_v58, %v5112_v58  ;;  %v8270_v7 = vsel %vm8098_vm4, %v5111_v37, 0.0  ;;  %12969 = vmatmul.mubr.msk.bf16.gmra.mrb[4].mxu1 %vm2168_vm2, %v13424_v16 }
 0x1c9   : > { %v12798_v44 = vpop.f32.mrb[88].mxu0  ;;  %7670 = vst.msk [vmem:[%s13964_s12 + $0x150] sm:$0xf] %vm7585_vm3, %v12017_v52  ;;  %v9807_v0 = vsel %vm8098_vm4, %v9212_v61, 0.0  ;;  %v8267_v5 = vadd.f32 %v8266_v53, %v8265_v56  ;;  %v9215_v17 = vmul.f32 %v5112_v58, %v5112_v58  ;;  %v9811_v22 = vsel %vm8098_vm4, %v9214_v4, 0.0  ;;  %12972 = vmatprep.mubr.msk.bf16.mxu1 %vm2168_vm2, %v13425_v51  ;;  %v13396_v4 = vld [vmem:[%s13827_s11 + $0x338] sm:$0xff]  }
 0x1ca   : > { %v3330_v49 = vpop.f32.mrb[89].mxu0  ;;  %v3339_v1 = vadd.f32 %v14241_v59, %v12798_v44  ;;  %v9806_v3 = vadd.f32 %v9805_v63, %v9804_v57  ;;  %v12018_v8 = vpack.c.bf16 %v5110_v60, %v5110_v60  ;;  %v8268_v9 = vsel %vm8098_vm4, %v5110_v60, 0.0  ;;  %7673 = vst.msk [vmem:[%s13964_s12 + $0x15c] sm:$0xf] %vm7585_vm3, %v12020_v6  ;;  %v14531_v57 = vld [vmem:[%s17805_s2] ss:$0 sm:$0xff] }
 0x1cb   : > { %v12799_v54 = vpop.f32.mrb[90].mxu0  ;;  %v3331_v2 = vadd.f32 %v14241_v59, %v3330_v49  ;;  %v9213_v10 = vmul.f32 %v5110_v60, %v5110_v60  ;;  %v8269_v13 = vadd.f32 %v8268_v9, %v8267_v5  ;;  %v8272_v28 = vsel %vm8098_vm4, %v5112_v58, 0.0 }
 0x1cc   : > { %v3333_v62 = vpop.f32.mrb[91].mxu0  ;;  %v9808_v12 = vadd.f32 %v9807_v0, %v9806_v3  ;;  %v5115_v14 = vmax.f32 %v3339_v1, 0.0  ;;  %7671 = vst.msk [vmem:[%s13964_s12 + $0x154] sm:$0xf] %vm7585_vm3, %v12018_v8  ;;  %v3342_v19 = vadd.f32 %v14241_v59, %v12799_v54  ;;  %v9813_v39 = vsel %vm8098_vm4, %v9215_v17, 0.0  ;;  %v13426_v54 = vld [vmem:[%s13827_s11 + $0x428] sm:$0xff]  }
 0x1cd   : > { %v5113_v15 = vmax.f32 %v3331_v2, 0.0  ;;  %v9809_v18 = vsel %vm8098_vm4, %v9213_v10, 0.0  ;;  %v3334_v20 = vadd.f32 %v14241_v59, %v3333_v62  ;;  %v8271_v23 = vadd.f32 %v8270_v7, %v8269_v13  ;;  %v13397_v10 = vld [vmem:[%s13827_s11 + $0x340] sm:$0xff]  }
 0x1ce   : > { %12905 = vmatmul.mubr.msk.bf16.gmra.mrb[196].mxu0 %vm2168_vm2, %v13392_v50  ;;  %v9810_v24 = vadd.f32 %v9809_v18, %v9808_v12  ;;  %v12023_v25 = vpack.c.bf16 %v5115_v14, %v5115_v14  ;;  %v5116_v36 = vmax.f32 %v3342_v19, 0.0  ;;  %v9218_v44 = vmul.f32 %v5115_v14, %v5115_v14 }
 0x1cf   : > { %12908 = vmatprep.mubr.msk.bf16.mxu0 %vm2168_vm2, %v13393_v55  ;;  %v12021_v29 = vpack.c.bf16 %v5113_v15, %v5113_v15  ;;  %v8274_v30 = vsel %vm8098_vm4, %v5113_v15, 0.0  ;;  %v9216_v31 = vmul.f32 %v5113_v15, %v5113_v15  ;;  %v8273_v34 = vadd.f32 %v8272_v28, %v8271_v23  ;;  %v13427_v28 = vld [vmem:[%s13827_s11 + $0x430] sm:$0xff]  }
 0x1d0   : > { %v9812_v35 = vadd.f32 %v9811_v22, %v9810_v24  ;;  %7676 = vst.msk [vmem:[%s13964_s12 + $0x168] sm:$0xf] %vm7585_vm3, %v12023_v25  ;;  %v5114_v37 = vmax.f32 %v3334_v20, 0.0  ;;  %v12024_v46 = vpack.c.bf16 %v5116_v36, %v5116_v36  ;;  %v8278_v47 = vsel %vm8098_vm4, %v5115_v14, 0.0  ;;  %12973 = vmatmul.mubr.msk.bf16.gmra.mrb[8].mxu1 %vm2168_vm2, %v13426_v54 }
 0x1d1   : > { %v12802_v21 = vpop.f32.mrb[92].mxu0  ;;  %7674 = vst.msk [vmem:[%s13964_s12 + $0x160] sm:$0xf] %vm7585_vm3, %v12021_v29  ;;  %v9815_v40 = vsel %vm8098_vm4, %v9216_v31, 0.0  ;;  %v8275_v45 = vadd.f32 %v8274_v30, %v8273_v34  ;;  %v9219_v55 = vmul.f32 %v5116_v36, %v5116_v36  ;;  %v9819_v63 = vsel %vm8098_vm4, %v9218_v44, 0.0  ;;  %12976 = vmatprep.mubr.msk.bf16.mxu1 %vm2168_vm2, %v13427_v28  ;;  %v13398_v44 = vld [vmem:[%s13827_s11 + $0x348] sm:$0xff]  }
 0x1d2   : > { %v3346_v26 = vpop.f32.mrb[93].mxu0  ;;  %v3355_v41 = vadd.f32 %v14241_v59, %v12802_v21  ;;  %v9814_v43 = vadd.f32 %v9813_v39, %v9812_v35  ;;  %v12022_v48 = vpack.c.bf16 %v5114_v37, %v5114_v37  ;;  %v8276_v49 = vsel %vm8098_vm4, %v5114_v37, 0.0  ;;  %7677 = vst.msk [vmem:[%s13964_s12 + $0x16c] sm:$0xf] %vm7585_vm3, %v12024_v46 }
 0x1d3   : > { %v12803_v32 = vpop.f32.mrb[94].mxu0  ;;  %v3347_v42 = vadd.f32 %v14241_v59, %v3346_v26  ;;  %v9217_v50 = vmul.f32 %v5114_v37, %v5114_v37  ;;  %v8277_v59 = vadd.f32 %v8276_v49, %v8275_v45  ;;  %v8280_v5 = vsel %vm8098_vm4, %v5116_v36, 0.0 }
 0x1d4   : > { %v3349_v38 = vpop.f32.mrb[95].mxu0  ;;  %v9816_v52 = vadd.f32 %v9815_v40, %v9814_v43  ;;  %v5119_v53 = vmax.f32 %v3355_v41, 0.0  ;;  %7675 = vst.msk [vmem:[%s13964_s12 + $0x164] sm:$0xf] %vm7585_vm3, %v12022_v48  ;;  %v3358_v58 = vadd.f32 %v14531_v57, %v12803_v32  ;;  %v9821_v16 = vsel %vm8098_vm4, %v9219_v55, 0.0 }
 0x1d5   : > { %v5117_v61 = vmax.f32 %v3347_v42, 0.0  ;;  %v9817_v56 = vsel %vm8098_vm4, %v9217_v50, 0.0  ;;  %v3350_v60 = vadd.f32 %v14531_v57, %v3349_v38  ;;  %v8279_v0 = vadd.f32 %v8278_v47, %v8277_v59  ;;  %v13399_v50 = vld [vmem:[%s13827_s11 + $0x350] sm:$0xff]  }
 0x1d6   : > { %12909 = vmatmul.mubr.msk.bf16.gmra.mrb[200].mxu0 %vm2168_vm2, %v13394_v27  ;;  %v9818_v1 = vadd.f32 %v9817_v56, %v9816_v52  ;;  %v12027_v2 = vpack.c.bf16 %v5119_v53, %v5119_v53  ;;  %v5120_v13 = vmax.f32 %v3358_v58, 0.0  ;;  %v9222_v21 = vmul.f32 %v5119_v53, %v5119_v53 }
 0x1d7   : > { %12912 = vmatprep.mubr.msk.bf16.mxu0 %vm2168_vm2, %v13395_v33  ;;  %v12025_v6 = vpack.c.bf16 %v5117_v61, %v5117_v61  ;;  %v8282_v7 = vsel %vm8098_vm4, %v5117_v61, 0.0  ;;  %v9220_v8 = vmul.f32 %v5117_v61, %v5117_v61  ;;  %v8281_v11 = vadd.f32 %v8280_v5, %v8279_v0  ;;  %v13428_v33 = vld [vmem:[%s13827_s11 + $0x438] sm:$0xff]   ;;  %v13429_v5 = vld [vmem:[%s13827_s11 + $0x440] sm:$0xff]  }
 0x1d8   : > { %v9820_v12 = vadd.f32 %v9819_v63, %v9818_v1  ;;  %7680 = vst.msk [vmem:[%s13964_s12 + $0x178] sm:$0xf] %vm7585_vm3, %v12027_v2  ;;  %v5118_v14 = vmax.f32 %v3350_v60, 0.0  ;;  %v12028_v23 = vpack.c.bf16 %v5120_v13, %v5120_v13  ;;  %v8286_v24 = vsel %vm8098_vm4, %v5119_v53, 0.0  ;;  %12977 = vmatmul.mubr.msk.bf16.gmra.mrb[12].mxu1 %vm2168_vm2, %v13428_v33 }
 0x1d9   : > { %v12806_v62 = vpop.f32.mrb[96].mxu0  ;;  %7678 = vst.msk [vmem:[%s13964_s12 + $0x170] sm:$0xf] %vm7585_vm3, %v12025_v6  ;;  %v9823_v17 = vsel %vm8098_vm4, %v9220_v8, 0.0  ;;  %v8283_v22 = vadd.f32 %v8282_v7, %v8281_v11  ;;  %v9223_v34 = vmul.f32 %v5120_v13, %v5120_v13  ;;  %v9827_v39 = vsel %vm8098_vm4, %v9222_v21, 0.0  ;;  %12980 = vmatprep.mubr.msk.bf16.mxu1 %vm2168_vm2, %v13429_v5  ;;  %v13400_v21 = vld [vmem:[%s13827_s11 + $0x358] sm:$0xff]  }
 0x1da   : > { %v3362_v3 = vpop.f32.mrb[97].mxu0  ;;  %v3371_v18 = vadd.f32 %v14531_v57, %v12806_v62  ;;  %v9822_v20 = vadd.f32 %v9821_v16, %v9820_v12  ;;  %v12026_v25 = vpack.c.bf16 %v5118_v14, %v5118_v14  ;;  %v8284_v26 = vsel %vm8098_vm4, %v5118_v14, 0.0  ;;  %7681 = vst.msk [vmem:[%s13964_s12 + $0x17c] sm:$0xf] %vm7585_vm3, %v12028_v23 }
 0x1db   : > { %v12807_v9 = vpop.f32.mrb[98].mxu0  ;;  %v3363_v19 = vadd.f32 %v14531_v57, %v3362_v3  ;;  %v9221_v27 = vmul.f32 %v5118_v14, %v5118_v14  ;;  %v8285_v30 = vadd.f32 %v8284_v26, %v8283_v22  ;;  %v8288_v45 = vsel %vm8098_vm4, %v5120_v13, 0.0 }
 0x1dc   : > { %v3365_v15 = vpop.f32.mrb[99].mxu0  ;;  %v9824_v29 = vadd.f32 %v9823_v17, %v9822_v20  ;;  %v5123_v31 = vmax.f32 %v3371_v18, 0.0  ;;  %7679 = vst.msk [vmem:[%s13964_s12 + $0x174] sm:$0xf] %vm7585_vm3, %v12026_v25  ;;  %v3374_v36 = vadd.f32 %v14531_v57, %v12807_v9  ;;  %v9829_v54 = vsel %vm8098_vm4, %v9223_v34, 0.0 }
 0x1dd   : > { %v5121_v32 = vmax.f32 %v3363_v19, 0.0  ;;  %v9825_v35 = vsel %vm8098_vm4, %v9221_v27, 0.0  ;;  %v3366_v37 = vadd.f32 %v14531_v57, %v3365_v15  ;;  %v8287_v40 = vadd.f32 %v8286_v24, %v8285_v30  ;;  %v13401_v27 = vld [vmem:[%s13827_s11 + $0x360] sm:$0xff]  }
 0x1de   : > { %12913 = vmatmul.mubr.msk.bf16.gmra.mrb[204].mxu0 %vm2168_vm2, %v13396_v4  ;;  %v9826_v41 = vadd.f32 %v9825_v35, %v9824_v29  ;;  %v12031_v42 = vpack.c.bf16 %v5123_v31, %v5123_v31  ;;  %v5124_v59 = vmax.f32 %v3374_v36, 0.0  ;;  %v9226_v62 = vmul.f32 %v5123_v31, %v5123_v31 }
 0x1df   : > { %12916 = vmatprep.mubr.msk.bf16.mxu0 %vm2168_vm2, %v13397_v10  ;;  %v12029_v46 = vpack.c.bf16 %v5121_v32, %v5121_v32  ;;  %v8290_v47 = vsel %vm8098_vm4, %v5121_v32, 0.0  ;;  %v9224_v48 = vmul.f32 %v5121_v32, %v5121_v32  ;;  %v8289_v51 = vadd.f32 %v8288_v45, %v8287_v40  ;;  %v13430_v10 = vld [vmem:[%s13827_s11 + $0x448] sm:$0xff]   ;;  %v13431_v45 = vld [vmem:[%s13827_s11 + $0x450] sm:$0xff]  }
 0x1e0   : > { %v9828_v52 = vadd.f32 %v9827_v39, %v9826_v41  ;;  %7684 = vst.msk [vmem:[%s13964_s12 + $0x188] sm:$0xf] %vm7585_vm3, %v12031_v42  ;;  %v5122_v53 = vmax.f32 %v3366_v37, 0.0  ;;  %v12032_v0 = vpack.c.bf16 %v5124_v59, %v5124_v59  ;;  %v8294_v1 = vsel %vm8098_vm4, %v5123_v31, 0.0  ;;  %12981 = vmatmul.mubr.msk.bf16.gmra.mrb[16].mxu1 %vm2168_vm2, %v13430_v10 }
 0x1e1   : > { %v12810_v38 = vpop.f32.mrb[100].mxu0  ;;  %7682 = vst.msk [vmem:[%s13964_s12 + $0x180] sm:$0xf] %vm7585_vm3, %v12029_v46  ;;  %v9831_v55 = vsel %vm8098_vm4, %v9224_v48, 0.0  ;;  %v8291_v63 = vadd.f32 %v8290_v47, %v8289_v51  ;;  %v9227_v11 = vmul.f32 %v5124_v59, %v5124_v59  ;;  %v9835_v16 = vsel %vm8098_vm4, %v9226_v62, 0.0  ;;  %12984 = vmatprep.mubr.msk.bf16.mxu1 %vm2168_vm2, %v13431_v45  ;;  %v13402_v62 = vld [vmem:[%s13827_s11 + $0x368] sm:$0xff]  }
 0x1e2   : > { %v3378_v43 = vpop.f32.mrb[101].mxu0  ;;  %v3387_v56 = vadd.f32 %v14531_v57, %v12810_v38  ;;  %v9830_v60 = vadd.f32 %v9829_v54, %v9828_v52  ;;  %v12030_v2 = vpack.c.bf16 %v5122_v53, %v5122_v53  ;;  %v8292_v3 = vsel %vm8098_vm4, %v5122_v53, 0.0  ;;  %7685 = vst.msk [vmem:[%s13964_s12 + $0x18c] sm:$0xf] %vm7585_vm3, %v12032_v0 }
 0x1e3   : > { %v12811_v49 = vpop.f32.mrb[102].mxu0  ;;  %v3379_v58 = vadd.f32 %v14531_v57, %v3378_v43  ;;  %v9225_v4 = vmul.f32 %v5122_v53, %v5122_v53  ;;  %v8293_v7 = vadd.f32 %v8292_v3, %v8291_v63  ;;  %v8296_v22 = vsel %vm8098_vm4, %v5124_v59, 0.0 }
 0x1e4   : > { %v3381_v61 = vpop.f32.mrb[103].mxu0  ;;  %v9832_v6 = vadd.f32 %v9831_v55, %v9830_v60  ;;  %v5127_v8 = vmax.f32 %v3387_v56, 0.0  ;;  %7683 = vst.msk [vmem:[%s13964_s12 + $0x184] sm:$0xf] %vm7585_vm3, %v12030_v2  ;;  %v3390_v13 = vadd.f32 %v14531_v57, %v12811_v49  ;;  %v9837_v33 = vsel %vm8098_vm4, %v9227_v11, 0.0 }
 0x1e5   : > { %v5125_v9 = vmax.f32 %v3379_v58, 0.0  ;;  %v9833_v12 = vsel %vm8098_vm4, %v9225_v4, 0.0  ;;  %v3382_v14 = vadd.f32 %v14531_v57, %v3381_v61  ;;  %v8295_v17 = vadd.f32 %v8294_v1, %v8293_v7  ;;  %v13403_v4 = vld [vmem:[%s13827_s11 + $0x370] sm:$0xff]  }
 0x1e6   : > { %12917 = vmatmul.mubr.msk.bf16.gmra.mrb[208].mxu0 %vm2168_vm2, %v13398_v44  ;;  %v9834_v18 = vadd.f32 %v9833_v12, %v9832_v6  ;;  %v12035_v19 = vpack.c.bf16 %v5127_v8, %v5127_v8  ;;  %v5128_v30 = vmax.f32 %v3390_v13, 0.0  ;;  %v9230_v38 = vmul.f32 %v5127_v8, %v5127_v8 }
 0x1e7   : > { %12920 = vmatprep.mubr.msk.bf16.mxu0 %vm2168_vm2, %v13399_v50  ;;  %v12033_v23 = vpack.c.bf16 %v5125_v9, %v5125_v9  ;;  %v8298_v24 = vsel %vm8098_vm4, %v5125_v9, 0.0  ;;  %v9228_v25 = vmul.f32 %v5125_v9, %v5125_v9  ;;  %v8297_v28 = vadd.f32 %v8296_v22, %v8295_v17  ;;  %v13432_v50 = vld [vmem:[%s13827_s11 + $0x458] sm:$0xff]   ;;  %v13433_v22 = vld [vmem:[%s13827_s11 + $0x460] sm:$0xff]  }
 0x1e8   : > { %v9836_v29 = vadd.f32 %v9835_v16, %v9834_v18  ;;  %7688 = vst.msk [vmem:[%s13964_s12 + $0x198] sm:$0xf] %vm7585_vm3, %v12035_v19  ;;  %v5126_v31 = vmax.f32 %v3382_v14, 0.0  ;;  %v12036_v40 = vpack.c.bf16 %v5128_v30, %v5128_v30  ;;  %v8302_v41 = vsel %vm8098_vm4, %v5127_v8, 0.0  ;;  %12985 = vmatmul.mubr.msk.bf16.gmra.mrb[20].mxu1 %vm2168_vm2, %v13432_v50 }
 0x1e9   : > { %v12814_v15 = vpop.f32.mrb[104].mxu0  ;;  %7686 = vst.msk [vmem:[%s13964_s12 + $0x190] sm:$0xf] %vm7585_vm3, %v12033_v23  ;;  %v9839_v34 = vsel %vm8098_vm4, %v9228_v25, 0.0  ;;  %v8299_v39 = vadd.f32 %v8298_v24, %v8297_v28  ;;  %v9231_v51 = vmul.f32 %v5128_v30, %v5128_v30  ;;  %v9843_v54 = vsel %vm8098_vm4, %v9230_v38, 0.0  ;;  %12988 = vmatprep.mubr.msk.bf16.mxu1 %vm2168_vm2, %v13433_v22  ;;  %v13404_v38 = vld [vmem:[%s13827_s11 + $0x378] sm:$0xff]  }
 0x1ea   : > { %v3394_v20 = vpop.f32.mrb[105].mxu0  ;;  %v3403_v35 = vadd.f32 %v14531_v57, %v12814_v15  ;;  %v9838_v37 = vadd.f32 %v9837_v33, %v9836_v29  ;;  %v12034_v42 = vpack.c.bf16 %v5126_v31, %v5126_v31  ;;  %v8300_v43 = vsel %vm8098_vm4, %v5126_v31, 0.0  ;;  %7689 = vst.msk [vmem:[%s13964_s12 + $0x19c] sm:$0xf] %vm7585_vm3, %v12036_v40 }
 0x1eb   : > { %v12815_v26 = vpop.f32.mrb[106].mxu0  ;;  %v3395_v36 = vadd.f32 %v14531_v57, %v3394_v20  ;;  %v9229_v44 = vmul.f32 %v5126_v31, %v5126_v31  ;;  %v8301_v47 = vadd.f32 %v8300_v43, %v8299_v39  ;;  %v8304_v63 = vsel %vm8098_vm4, %v5128_v30, 0.0 }
 0x1ec   : > { %v3397_v32 = vpop.f32.mrb[107].mxu0  ;;  %v9840_v46 = vadd.f32 %v9839_v34, %v9838_v37  ;;  %v5131_v48 = vmax.f32 %v3403_v35, 0.0  ;;  %7687 = vst.msk [vmem:[%s13964_s12 + $0x194] sm:$0xf] %vm7585_vm3, %v12034_v42  ;;  %v3406_v59 = vadd.f32 %v14531_v57, %v12815_v26  ;;  %v9845_v10 = vsel %vm8098_vm4, %v9231_v51, 0.0 }
 0x1ed   : > { %v5129_v49 = vmax.f32 %v3395_v36, 0.0  ;;  %v9841_v52 = vsel %vm8098_vm4, %v9229_v44, 0.0  ;;  %v3398_v53 = vadd.f32 %v14531_v57, %v3397_v32  ;;  %v8303_v55 = vadd.f32 %v8302_v41, %v8301_v47  ;;  %v13405_v44 = vld [vmem:[%s13827_s11 + $0x380] sm:$0xff]  }
 0x1ee   : > { %12921 = vmatmul.mubr.msk.bf16.gmra.mrb[212].mxu0 %vm2168_vm2, %v13400_v21  ;;  %v9842_v56 = vadd.f32 %v9841_v52, %v9840_v46  ;;  %v12039_v58 = vpack.c.bf16 %v5131_v48, %v5131_v48  ;;  %v5132_v7 = vmax.f32 %v3406_v59, 0.0  ;;  %v9234_v15 = vmul.f32 %v5131_v48, %v5131_v48 }
 0x1ef   : > { %12924 = vmatprep.mubr.msk.bf16.mxu0 %vm2168_vm2, %v13401_v27  ;;  %v12037_v0 = vpack.c.bf16 %v5129_v49, %v5129_v49  ;;  %v8306_v1 = vsel %vm8098_vm4, %v5129_v49, 0.0  ;;  %v9232_v2 = vmul.f32 %v5129_v49, %v5129_v49  ;;  %v8305_v5 = vadd.f32 %v8304_v63, %v8303_v55  ;;  %v13434_v27 = vld [vmem:[%s13827_s11 + $0x468] sm:$0xff]   ;;  %v13435_v63 = vld [vmem:[%s13827_s11 + $0x470] sm:$0xff]  }
 0x1f0   : > { %v9844_v6 = vadd.f32 %v9843_v54, %v9842_v56  ;;  %7692 = vst.msk [vmem:[%s13964_s12 + $0x1a8] sm:$0xf] %vm7585_vm3, %v12039_v58  ;;  %v5130_v8 = vmax.f32 %v3398_v53, 0.0  ;;  %v12040_v17 = vpack.c.bf16 %v5132_v7, %v5132_v7  ;;  %v8310_v18 = vsel %vm8098_vm4, %v5131_v48, 0.0  ;;  %12989 = vmatmul.mubr.msk.bf16.gmra.mrb[24].mxu1 %vm2168_vm2, %v13434_v27 }
 0x1f1   : > { %v12818_v61 = vpop.f32.mrb[108].mxu0  ;;  %7690 = vst.msk [vmem:[%s13964_s12 + $0x1a0] sm:$0xf] %vm7585_vm3, %v12037_v0  ;;  %v9847_v11 = vsel %vm8098_vm4, %v9232_v2, 0.0  ;;  %v8307_v16 = vadd.f32 %v8306_v1, %v8305_v5  ;;  %v9235_v28 = vmul.f32 %v5132_v7, %v5132_v7  ;;  %v9851_v33 = vsel %vm8098_vm4, %v9234_v15, 0.0  ;;  %12992 = vmatprep.mubr.msk.bf16.mxu1 %vm2168_vm2, %v13435_v63  ;;  %v13406_v15 = vld [vmem:[%s13827_s11 + $0x388] sm:$0xff]  }
 0x1f2   : > { %v3410_v60 = vpop.f32.mrb[109].mxu0  ;;  %v3419_v12 = vadd.f32 %v14531_v57, %v12818_v61  ;;  %v9846_v14 = vadd.f32 %v9845_v10, %v9844_v6  ;;  %v12038_v19 = vpack.c.bf16 %v5130_v8, %v5130_v8  ;;  %v8308_v20 = vsel %vm8098_vm4, %v5130_v8, 0.0  ;;  %7693 = vst.msk [vmem:[%s13964_s12 + $0x1ac] sm:$0xf] %vm7585_vm3, %v12040_v17 }
 0x1f3   : > { %v12819_v3 = vpop.f32.mrb[110].mxu0  ;;  %v3411_v13 = vadd.f32 %v14531_v57, %v3410_v60  ;;  %v9233_v21 = vmul.f32 %v5130_v8, %v5130_v8  ;;  %v8309_v24 = vadd.f32 %v8308_v20, %v8307_v16  ;;  %v8312_v39 = vsel %vm8098_vm4, %v5132_v7, 0.0 }
 0x1f4   : > { %v3413_v9 = vpop.f32.mrb[111].mxu0  ;;  %v9848_v23 = vadd.f32 %v9847_v11, %v9846_v14  ;;  %v5135_v25 = vmax.f32 %v3419_v12, 0.0  ;;  %7691 = vst.msk [vmem:[%s13964_s12 + $0x1a4] sm:$0xf] %vm7585_vm3, %v12038_v19  ;;  %v3422_v30 = vadd.f32 %v14531_v57, %v12819_v3  ;;  %v9853_v50 = vsel %vm8098_vm4, %v9235_v28, 0.0 }
 0x1f5   : > { %v5133_v26 = vmax.f32 %v3411_v13, 0.0  ;;  %v9849_v29 = vsel %vm8098_vm4, %v9233_v21, 0.0  ;;  %v3414_v31 = vadd.f32 %v14531_v57, %v3413_v9  ;;  %v8311_v34 = vadd.f32 %v8310_v18, %v8309_v24  ;;  %v13407_v21 = vld [vmem:[%s13827_s11 + $0x390] sm:$0xff]  }
 0x1f6   : > { %12925 = vmatmul.mubr.msk.bf16.gmra.mrb[216].mxu0 %vm2168_vm2, %v13402_v62  ;;  %v9850_v35 = vadd.f32 %v9849_v29, %v9848_v23  ;;  %v12043_v36 = vpack.c.bf16 %v5135_v25, %v5135_v25  ;;  %v5136_v47 = vmax.f32 %v3422_v30, 0.0  ;;  %v9238_v61 = vmul.f32 %v5135_v25, %v5135_v25 }
 0x1f7   : > { %12928 = vmatprep.mubr.msk.bf16.mxu0 %vm2168_vm2, %v13403_v4  ;;  %v12041_v40 = vpack.c.bf16 %v5133_v26, %v5133_v26  ;;  %v8314_v41 = vsel %vm8098_vm4, %v5133_v26, 0.0  ;;  %v9236_v42 = vmul.f32 %v5133_v26, %v5133_v26  ;;  %v8313_v45 = vadd.f32 %v8312_v39, %v8311_v34  ;;  %v13436_v4 = vld [vmem:[%s13827_s11 + $0x478] sm:$0xff]   ;;  %v13437_v39 = vld [vmem:[%s13827_s11 + $0x480] sm:$0xff]  }
 0x1f8   : > { %v9852_v46 = vadd.f32 %v9851_v33, %v9850_v35  ;;  %7696 = vst.msk [vmem:[%s13964_s12 + $0x1b8] sm:$0xf] %vm7585_vm3, %v12043_v36  ;;  %v5134_v48 = vmax.f32 %v3414_v31, 0.0  ;;  %v12044_v55 = vpack.c.bf16 %v5136_v47, %v5136_v47  ;;  %v8318_v56 = vsel %vm8098_vm4, %v5135_v25, 0.0  ;;  %12993 = vmatmul.mubr.msk.bf16.gmra.mrb[28].mxu1 %vm2168_vm2, %v13436_v4 }
 0x1f9   : > { %v12822_v32 = vpop.f32.mrb[112].mxu0  ;;  %7694 = vst.msk [vmem:[%s13964_s12 + $0x1b0] sm:$0xf] %vm7585_vm3, %v12041_v40  ;;  %v9855_v51 = vsel %vm8098_vm4, %v9236_v42, 0.0  ;;  %v8315_v54 = vadd.f32 %v8314_v41, %v8313_v45  ;;  %v9239_v5 = vmul.f32 %v5136_v47, %v5136_v47  ;;  %v9859_v10 = vsel %vm8098_vm4, %v9238_v61, 0.0  ;;  %12996 = vmatprep.mubr.msk.bf16.mxu1 %vm2168_vm2, %v13437_v39  ;;  %v13408_v61 = vld [vmem:[%s13827_s11 + $0x398] sm:$0xff]  }
 0x1fa   : > { %v3426_v37 = vpop.f32.mrb[113].mxu0  ;;  %v3435_v52 = vadd.f32 %v14531_v57, %v12822_v32  ;;  %v9854_v53 = vadd.f32 %v9853_v50, %v9852_v46  ;;  %v12042_v58 = vpack.c.bf16 %v5134_v48, %v5134_v48  ;;  %v8316_v60 = vsel %vm8098_vm4, %v5134_v48, 0.0  ;;  %7697 = vst.msk [vmem:[%s13964_s12 + $0x1bc] sm:$0xf] %vm7585_vm3, %v12044_v55 }
 0x1fb   : > { %v12823_v43 = vpop.f32.mrb[114].mxu0  ;;  %v3427_v59 = vadd.f32 %v14531_v57, %v3426_v37  ;;  %v9237_v62 = vmul.f32 %v5134_v48, %v5134_v48  ;;  %v8317_v1 = vadd.f32 %v8316_v60, %v8315_v54  ;;  %v8320_v16 = vsel %vm8098_vm4, %v5136_v47, 0.0 }
 0x1fc   : > { %v3429_v49 = vpop.f32.mrb[115].mxu0  ;;  %v9856_v0 = vadd.f32 %v9855_v51, %v9854_v53  ;;  %v5139_v2 = vmax.f32 %v3435_v52, 0.0  ;;  %7695 = vst.msk [vmem:[%s13964_s12 + $0x1b4] sm:$0xf] %vm7585_vm3, %v12042_v58  ;;  %v3438_v7 = vadd.f32 %v14531_v57, %v12823_v43  ;;  %v9861_v27 = vsel %vm8098_vm4, %v9239_v5, 0.0 }
 0x1fd   : > { %v5137_v3 = vmax.f32 %v3427_v59, 0.0  ;;  %v9857_v6 = vsel %vm8098_vm4, %v9237_v62, 0.0  ;;  %v3430_v8 = vadd.f32 %v14531_v57, %v3429_v49  ;;  %v8319_v11 = vadd.f32 %v8318_v56, %v8317_v1  ;;  %v13409_v62 = vld [vmem:[%s13827_s11 + $0x3a0] sm:$0xff]  }
 0x1fe   : > { %12929 = vmatmul.mubr.msk.bf16.gmra.mrb[220].mxu0 %vm2168_vm2, %v13404_v38  ;;  %v9858_v12 = vadd.f32 %v9857_v6, %v9856_v0  ;;  %v12047_v13 = vpack.c.bf16 %v5139_v2, %v5139_v2  ;;  %v5140_v24 = vmax.f32 %v3438_v7, 0.0  ;;  %v9242_v32 = vmul.f32 %v5139_v2, %v5139_v2 }
 0x1ff   : > { %12932 = vmatprep.mubr.msk.bf16.mxu0 %vm2168_vm2, %v13405_v44  ;;  %v12045_v17 = vpack.c.bf16 %v5137_v3, %v5137_v3  ;;  %v8322_v18 = vsel %vm8098_vm4, %v5137_v3, 0.0  ;;  %v9240_v19 = vmul.f32 %v5137_v3, %v5137_v3  ;;  %v8321_v22 = vadd.f32 %v8320_v16, %v8319_v11  ;;  %v13438_v44 = vld [vmem:[%s13827_s11 + $0x488] sm:$0xff]   ;;  %v13439_v16 = vld [vmem:[%s13827_s11 + $0x490] sm:$0xff]  }
 0x200   : > { %v9860_v23 = vadd.f32 %v9859_v10, %v9858_v12  ;;  %7700 = vst.msk [vmem:[%s13964_s12 + $0x1c8] sm:$0xf] %vm7585_vm3, %v12047_v13  ;;  %v5138_v25 = vmax.f32 %v3430_v8, 0.0  ;;  %v12048_v34 = vpack.c.bf16 %v5140_v24, %v5140_v24  ;;  %v8326_v35 = vsel %vm8098_vm4, %v5139_v2, 0.0  ;;  %12997 = vmatmul.mubr.msk.bf16.gmra.mrb[32].mxu1 %vm2168_vm2, %v13438_v44 }
 0x201   : > { %v12826_v9 = vpop.f32.mrb[116].mxu0  ;;  %7698 = vst.msk [vmem:[%s13964_s12 + $0x1c0] sm:$0xf] %vm7585_vm3, %v12045_v17  ;;  %v9863_v28 = vsel %vm8098_vm4, %v9240_v19, 0.0  ;;  %v8323_v33 = vadd.f32 %v8322_v18, %v8321_v22  ;;  %v9243_v45 = vmul.f32 %v5140_v24, %v5140_v24  ;;  %v9867_v50 = vsel %vm8098_vm4, %v9242_v32, 0.0  ;;  %13000 = vmatprep.mubr.msk.bf16.mxu1 %vm2168_vm2, %v13439_v16  ;;  %v13410_v32 = vld [vmem:[%s13827_s11 + $0x3a8] sm:$0xff]  }
 0x202   : > { %v3442_v14 = vpop.f32.mrb[117].mxu0  ;;  %v3451_v29 = vadd.f32 %v14531_v57, %v12826_v9  ;;  %v9862_v31 = vadd.f32 %v9861_v27, %v9860_v23  ;;  %v12046_v36 = vpack.c.bf16 %v5138_v25, %v5138_v25  ;;  %v8324_v37 = vsel %vm8098_vm4, %v5138_v25, 0.0  ;;  %7701 = vst.msk [vmem:[%s13964_s12 + $0x1cc] sm:$0xf] %vm7585_vm3, %v12048_v34 }
 0x203   : > { %v12827_v20 = vpop.f32.mrb[118].mxu0  ;;  %v3443_v30 = vadd.f32 %v14531_v57, %v3442_v14  ;;  %v9241_v38 = vmul.f32 %v5138_v25, %v5138_v25  ;;  %v8325_v41 = vadd.f32 %v8324_v37, %v8323_v33  ;;  %v8328_v54 = vsel %vm8098_vm4, %v5140_v24, 0.0 }
 0x204   : > { %v3445_v26 = vpop.f32.mrb[119].mxu0  ;;  %v9864_v40 = vadd.f32 %v9863_v28, %v9862_v31  ;;  %v5143_v42 = vmax.f32 %v3451_v29, 0.0  ;;  %7699 = vst.msk [vmem:[%s13964_s12 + $0x1c4] sm:$0xf] %vm7585_vm3, %v12046_v36  ;;  %v3454_v47 = vadd.f32 %v14531_v57, %v12827_v20  ;;  %v9869_v4 = vsel %vm8098_vm4, %v9243_v45, 0.0 }
 0x205   : > { %v5141_v43 = vmax.f32 %v3443_v30, 0.0  ;;  %v9865_v46 = vsel %vm8098_vm4, %v9241_v38, 0.0  ;;  %v3446_v48 = vadd.f32 %v14531_v57, %v3445_v26  ;;  %v8327_v51 = vadd.f32 %v8326_v35, %v8325_v41  ;;  %v13411_v38 = vld [vmem:[%s13827_s11 + $0x3b0] sm:$0xff]  }
 0x206   : > { %12933 = vmatmul.mubr.msk.bf16.gmra.mrb[224].mxu0 %vm2168_vm2, %v13406_v15  ;;  %v9866_v52 = vadd.f32 %v9865_v46, %v9864_v40  ;;  %v12051_v59 = vpack.c.bf16 %v5143_v42, %v5143_v42  ;;  %v5144_v1 = vmax.f32 %v3454_v47, 0.0  ;;  %v9246_v9 = vmul.f32 %v5143_v42, %v5143_v42 }
 0x207   : > { %12936 = vmatprep.mubr.msk.bf16.mxu0 %vm2168_vm2, %v13407_v21  ;;  %v12049_v55 = vpack.c.bf16 %v5141_v43, %v5141_v43  ;;  %v8330_v56 = vsel %vm8098_vm4, %v5141_v43, 0.0  ;;  %v9244_v58 = vmul.f32 %v5141_v43, %v5141_v43  ;;  %v8329_v63 = vadd.f32 %v8328_v54, %v8327_v51  ;;  %v13440_v21 = vld [vmem:[%s13827_s11 + $0x498] sm:$0xff]   ;;  %v13441_v54 = vld [vmem:[%s13827_s11 + $0x4a0] sm:$0xff]  }
 0x208   : > { %v9868_v0 = vadd.f32 %v9867_v50, %v9866_v52  ;;  %7704 = vst.msk [vmem:[%s13964_s12 + $0x1d8] sm:$0xf] %vm7585_vm3, %v12051_v59  ;;  %v5142_v2 = vmax.f32 %v3446_v48, 0.0  ;;  %v12052_v11 = vpack.c.bf16 %v5144_v1, %v5144_v1  ;;  %v8334_v12 = vsel %vm8098_vm4, %v5143_v42, 0.0  ;;  %13001 = vmatmul.mubr.msk.bf16.gmra.mrb[36].mxu1 %vm2168_vm2, %v13440_v21 }
 0x209   : > { %v12830_v49 = vpop.f32.mrb[120].mxu0  ;;  %7702 = vst.msk [vmem:[%s13964_s12 + $0x1d0] sm:$0xf] %vm7585_vm3, %v12049_v55  ;;  %v9871_v5 = vsel %vm8098_vm4, %v9244_v58, 0.0  ;;  %v8331_v10 = vadd.f32 %v8330_v56, %v8329_v63  ;;  %v9247_v22 = vmul.f32 %v5144_v1, %v5144_v1  ;;  %v9875_v27 = vsel %vm8098_vm4, %v9246_v9, 0.0  ;;  %13004 = vmatprep.mubr.msk.bf16.mxu1 %vm2168_vm2, %v13441_v54  ;;  %v13412_v9 = vld [vmem:[%s13827_s11 + $0x3b8] sm:$0xff]  }
 0x20a   : > { %v3458_v53 = vpop.f32.mrb[121].mxu0  ;;  %v3467_v6 = vadd.f32 %v14531_v57, %v12830_v49  ;;  %v9870_v8 = vadd.f32 %v9869_v4, %v9868_v0  ;;  %v12050_v13 = vpack.c.bf16 %v5142_v2, %v5142_v2  ;;  %v8332_v14 = vsel %vm8098_vm4, %v5142_v2, 0.0  ;;  %7705 = vst.msk [vmem:[%s13964_s12 + $0x1dc] sm:$0xf] %vm7585_vm3, %v12052_v11 }
 0x20b   : > { %v12831_v60 = vpop.f32.mrb[122].mxu0  ;;  %v3459_v7 = vadd.f32 %v14531_v57, %v3458_v53  ;;  %v9245_v15 = vmul.f32 %v5142_v2, %v5142_v2  ;;  %v8333_v18 = vadd.f32 %v8332_v14, %v8331_v10  ;;  %v8336_v33 = vsel %vm8098_vm4, %v5144_v1, 0.0 }
 0x20c   : > { %v3461_v3 = vpop.f32.mrb[123].mxu0  ;;  %v9872_v17 = vadd.f32 %v9871_v5, %v9870_v8  ;;  %v5147_v19 = vmax.f32 %v3467_v6, 0.0  ;;  %7703 = vst.msk [vmem:[%s13964_s12 + $0x1d4] sm:$0xf] %vm7585_vm3, %v12050_v13  ;;  %v3470_v24 = vadd.f32 %v14531_v57, %v12831_v60  ;;  %v9877_v44 = vsel %vm8098_vm4, %v9247_v22, 0.0 }
 0x20d   : > { %v5145_v20 = vmax.f32 %v3459_v7, 0.0  ;;  %v9873_v23 = vsel %vm8098_vm4, %v9245_v15, 0.0  ;;  %v3462_v25 = vadd.f32 %v14531_v57, %v3461_v3  ;;  %v8335_v28 = vadd.f32 %v8334_v12, %v8333_v18  ;;  %v13413_v15 = vld [vmem:[%s13827_s11 + $0x3c0] sm:$0xff]  }
 0x20e   : > { %12937 = vmatmul.mubr.msk.bf16.gmra.mrb[228].mxu0 %vm2168_vm2, %v13408_v61  ;;  %v9874_v29 = vadd.f32 %v9873_v23, %v9872_v17  ;;  %v12055_v30 = vpack.c.bf16 %v5147_v19, %v5147_v19  ;;  %v5148_v41 = vmax.f32 %v3470_v24, 0.0  ;;  %v9250_v49 = vmul.f32 %v5147_v19, %v5147_v19 }
 0x20f   : > { %12940 = vmatprep.mubr.msk.bf16.mxu0 %vm2168_vm2, %v13409_v62  ;;  %v12053_v34 = vpack.c.bf16 %v5145_v20, %v5145_v20  ;;  %v8338_v35 = vsel %vm8098_vm4, %v5145_v20, 0.0  ;;  %v9248_v36 = vmul.f32 %v5145_v20, %v5145_v20  ;;  %v8337_v39 = vadd.f32 %v8336_v33, %v8335_v28  ;;  %v13442_v62 = vld [vmem:[%s13827_s11 + $0x4a8] sm:$0xff]   ;;  %v13443_v33 = vld [vmem:[%s13827_s11 + $0x4b0] sm:$0xff]  }
 0x210   : > { %v9876_v40 = vadd.f32 %v9875_v27, %v9874_v29  ;;  %7708 = vst.msk [vmem:[%s13964_s12 + $0x1e8] sm:$0xf] %vm7585_vm3, %v12055_v30  ;;  %v5146_v42 = vmax.f32 %v3462_v25, 0.0  ;;  %v12056_v51 = vpack.c.bf16 %v5148_v41, %v5148_v41  ;;  %v8342_v52 = vsel %vm8098_vm4, %v5147_v19, 0.0  ;;  %13005 = vmatmul.mubr.msk.bf16.gmra.mrb[40].mxu1 %vm2168_vm2, %v13442_v62 }
 0x211   : > { %v12834_v26 = vpop.f32.mrb[124].mxu0  ;;  %7706 = vst.msk [vmem:[%s13964_s12 + $0x1e0] sm:$0xf] %vm7585_vm3, %v12053_v34  ;;  %v9879_v45 = vsel %vm8098_vm4, %v9248_v36, 0.0  ;;  %v8339_v50 = vadd.f32 %v8338_v35, %v8337_v39  ;;  %v9251_v63 = vmul.f32 %v5148_v41, %v5148_v41  ;;  %v9883_v4 = vsel %vm8098_vm4, %v9250_v49, 0.0  ;;  %13008 = vmatprep.mubr.msk.bf16.mxu1 %vm2168_vm2, %v13443_v33  ;;  %v13414_v49 = vld [vmem:[%s13827_s11 + $0x3c8] sm:$0xff]  }
 0x212   : > { %v3474_v31 = vpop.f32.mrb[125].mxu0  ;;  %v3483_v46 = vadd.f32 %v14531_v57, %v12834_v26  ;;  %v9878_v48 = vadd.f32 %v9877_v44, %v9876_v40  ;;  %v12054_v59 = vpack.c.bf16 %v5146_v42, %v5146_v42  ;;  %v8340_v53 = vsel %vm8098_vm4, %v5146_v42, 0.0  ;;  %7709 = vst.msk [vmem:[%s13964_s12 + $0x1ec] sm:$0xf] %vm7585_vm3, %v12056_v51 }
 0x213   : > { %v12835_v37 = vpop.f32.mrb[126].mxu0  ;;  %v3475_v47 = vadd.f32 %v14531_v57, %v3474_v31  ;;  %v9249_v61 = vmul.f32 %v5146_v42, %v5146_v42  ;;  %v8341_v56 = vadd.f32 %v8340_v53, %v8339_v50  ;;  %v8344_v10 = vsel %vm8098_vm4, %v5148_v41, 0.0 }
 0x214   : > { %v3477_v43 = vpop.f32.mrb[127].mxu0  ;;  %v9880_v55 = vadd.f32 %v9879_v45, %v9878_v48  ;;  %v5151_v58 = vmax.f32 %v3483_v46, 0.0  ;;  %7707 = vst.msk [vmem:[%s13964_s12 + $0x1e4] sm:$0xf] %vm7585_vm3, %v12054_v59  ;;  %v3486_v1 = vadd.f32 %v14531_v57, %v12835_v37  ;;  %v9885_v21 = vsel %vm8098_vm4, %v9251_v63, 0.0 }
 0x215   : > { %v5149_v60 = vmax.f32 %v3475_v47, 0.0  ;;  %v9881_v0 = vsel %vm8098_vm4, %v9249_v61, 0.0  ;;  %v3478_v2 = vadd.f32 %v14531_v57, %v3477_v43  ;;  %v8343_v5 = vadd.f32 %v8342_v52, %v8341_v56  ;;  %v13415_v61 = vld [vmem:[%s13827_s11 + $0x3d0] sm:$0xff]  }
 0x216   : > { %12941 = vmatmul.mubr.msk.bf16.gmra.mrb[232].mxu0 %vm2168_vm2, %v13410_v32  ;;  %v9882_v6 = vadd.f32 %v9881_v0, %v9880_v55  ;;  %v12059_v7 = vpack.c.bf16 %v5151_v58, %v5151_v58  ;;  %v5152_v18 = vmax.f32 %v3486_v1, 0.0  ;;  %v9254_v26 = vmul.f32 %v5151_v58, %v5151_v58 }
 0x217   : > { %12944 = vmatprep.mubr.msk.bf16.mxu0 %vm2168_vm2, %v13411_v38  ;;  %v12057_v11 = vpack.c.bf16 %v5149_v60, %v5149_v60  ;;  %v8346_v12 = vsel %vm8098_vm4, %v5149_v60, 0.0  ;;  %v9252_v13 = vmul.f32 %v5149_v60, %v5149_v60  ;;  %v8345_v16 = vadd.f32 %v8344_v10, %v8343_v5  ;;  %v13444_v38 = vld [vmem:[%s13827_s11 + $0x4b8] sm:$0xff]   ;;  %v13445_v10 = vld [vmem:[%s13827_s11 + $0x4c0] sm:$0xff]  }
 0x218   : > { %v9884_v17 = vadd.f32 %v9883_v4, %v9882_v6  ;;  %7712 = vst.msk [vmem:[%s13964_s12 + $0x1f8] sm:$0xf] %vm7585_vm3, %v12059_v7  ;;  %v5150_v19 = vmax.f32 %v3478_v2, 0.0  ;;  %v12060_v28 = vpack.c.bf16 %v5152_v18, %v5152_v18  ;;  %v8350_v29 = vsel %vm8098_vm4, %v5151_v58, 0.0  ;;  %13009 = vmatmul.mubr.msk.bf16.gmra.mrb[44].mxu1 %vm2168_vm2, %v13444_v38 }
 0x219   : > { %v12838_v3 = vpop.f32.mrb[128].mxu0  ;;  %7710 = vst.msk [vmem:[%s13964_s12 + $0x1f0] sm:$0xf] %vm7585_vm3, %v12057_v11  ;;  %v9887_v22 = vsel %vm8098_vm4, %v9252_v13, 0.0  ;;  %v8347_v27 = vadd.f32 %v8346_v12, %v8345_v16  ;;  %v9255_v39 = vmul.f32 %v5152_v18, %v5152_v18  ;;  %v9891_v44 = vsel %vm8098_vm4, %v9254_v26, 0.0  ;;  %13012 = vmatprep.mubr.msk.bf16.mxu1 %vm2168_vm2, %v13445_v10  ;;  %v13416_v26 = vld [vmem:[%s13827_s11 + $0x3d8] sm:$0xff]  }
 0x21a   : > { %v3490_v8 = vpop.f32.mrb[129].mxu0  ;;  %v3499_v23 = vadd.f32 %v14531_v57, %v12838_v3  ;;  %v9886_v25 = vadd.f32 %v9885_v21, %v9884_v17  ;;  %v12058_v30 = vpack.c.bf16 %v5150_v19, %v5150_v19  ;;  %v8348_v31 = vsel %vm8098_vm4, %v5150_v19, 0.0  ;;  %7713 = vst.msk [vmem:[%s13964_s12 + $0x1fc] sm:$0xf] %vm7585_vm3, %v12060_v28 }
 0x21b   : > { %v12839_v14 = vpop.f32.mrb[130].mxu0  ;;  %v3491_v24 = vadd.f32 %v14531_v57, %v3490_v8  ;;  %v9253_v32 = vmul.f32 %v5150_v19, %v5150_v19  ;;  %v8349_v35 = vadd.f32 %v8348_v31, %v8347_v27  ;;  %v8352_v50 = vsel %vm8098_vm4, %v5152_v18, 0.0 }
 0x21c   : > { %v3493_v20 = vpop.f32.mrb[131].mxu0  ;;  %v9888_v34 = vadd.f32 %v9887_v22, %v9886_v25  ;;  %v5155_v36 = vmax.f32 %v3499_v23, 0.0  ;;  %7711 = vst.msk [vmem:[%s13964_s12 + $0x1f4] sm:$0xf] %vm7585_vm3, %v12058_v30  ;;  %v3502_v41 = vadd.f32 %v14531_v57, %v12839_v14  ;;  %v9893_v62 = vsel %vm8098_vm4, %v9255_v39, 0.0 }
 0x21d   : > { %v5153_v37 = vmax.f32 %v3491_v24, 0.0  ;;  %v9889_v40 = vsel %vm8098_vm4, %v9253_v32, 0.0  ;;  %v3494_v42 = vadd.f32 %v14531_v57, %v3493_v20  ;;  %v8351_v45 = vadd.f32 %v8350_v29, %v8349_v35  ;;  %v13417_v32 = vld [vmem:[%s13827_s11 + $0x3e0] sm:$0xff]  }
 0x21e   : > { %12945 = vmatmul.mubr.msk.bf16.gmra.mrb[236].mxu0 %vm2168_vm2, %v13412_v9  ;;  %v9890_v46 = vadd.f32 %v9889_v40, %v9888_v34  ;;  %v12063_v47 = vpack.c.bf16 %v5155_v36, %v5155_v36  ;;  %v5156_v56 = vmax.f32 %v3502_v41, 0.0  ;;  %v9258_v3 = vmul.f32 %v5155_v36, %v5155_v36 }
 0x21f   : > { %12948 = vmatprep.mubr.msk.bf16.mxu0 %vm2168_vm2, %v13413_v15  ;;  %v12061_v51 = vpack.c.bf16 %v5153_v37, %v5153_v37  ;;  %v8354_v52 = vsel %vm8098_vm4, %v5153_v37, 0.0  ;;  %v9256_v59 = vmul.f32 %v5153_v37, %v5153_v37  ;;  %v8353_v54 = vadd.f32 %v8352_v50, %v8351_v45  ;;  %v13446_v15 = vld [vmem:[%s13827_s11 + $0x4c8] sm:$0xff]   ;;  %v13447_v50 = vld [vmem:[%s13827_s11 + $0x4d0] sm:$0xff]  }
 0x220   : > { %v9892_v55 = vadd.f32 %v9891_v44, %v9890_v46  ;;  %7716 = vst.msk [vmem:[%s13964_s12 + $0x208] sm:$0xf] %vm7585_vm3, %v12063_v47  ;;  %v5154_v58 = vmax.f32 %v3494_v42, 0.0  ;;  %v12064_v5 = vpack.c.bf16 %v5156_v56, %v5156_v56  ;;  %v8358_v6 = vsel %vm8098_vm4, %v5155_v36, 0.0  ;;  %13013 = vmatmul.mubr.msk.bf16.gmra.mrb[48].mxu1 %vm2168_vm2, %v13446_v15 }
 0x221   : > { %v12842_v43 = vpop.f32.mrb[132].mxu0  ;;  %7714 = vst.msk [vmem:[%s13964_s12 + $0x200] sm:$0xf] %vm7585_vm3, %v12061_v51  ;;  %v9895_v63 = vsel %vm8098_vm4, %v9256_v59, 0.0  ;;  %v8355_v4 = vadd.f32 %v8354_v52, %v8353_v54  ;;  %v9259_v16 = vmul.f32 %v5156_v56, %v5156_v56  ;;  %v9899_v21 = vsel %vm8098_vm4, %v9258_v3, 0.0  ;;  %13016 = vmatprep.mubr.msk.bf16.mxu1 %vm2168_vm2, %v13447_v50  ;;  %v13418_v3 = vld [vmem:[%s13827_s11 + $0x3e8] sm:$0xff]  }
 0x222   : > { %v3506_v48 = vpop.f32.mrb[133].mxu0  ;;  %v3515_v0 = vadd.f32 %v14531_v57, %v12842_v43  ;;  %v9894_v2 = vadd.f32 %v9893_v62, %v9892_v55  ;;  %v12062_v7 = vpack.c.bf16 %v5154_v58, %v5154_v58  ;;  %v8356_v8 = vsel %vm8098_vm4, %v5154_v58, 0.0  ;;  %7717 = vst.msk [vmem:[%s13964_s12 + $0x20c] sm:$0xf] %vm7585_vm3, %v12064_v5  ;;  %v14844_v55 = vld [vmem:[%s17805_s2] ss:$0 sm:$0xff] }
 0x223   : > { %v12843_v53 = vpop.f32.mrb[134].mxu0  ;;  %v3507_v1 = vadd.f32 %v14531_v57, %v3506_v48  ;;  %v9257_v9 = vmul.f32 %v5154_v58, %v5154_v58  ;;  %v8357_v12 = vadd.f32 %v8356_v8, %v8355_v4  ;;  %v8360_v27 = vsel %vm8098_vm4, %v5156_v56, 0.0 }
 0x224   : > { %v3509_v60 = vpop.f32.mrb[135].mxu0  ;;  %v9896_v11 = vadd.f32 %v9895_v63, %v9894_v2  ;;  %v5159_v13 = vmax.f32 %v3515_v0, 0.0  ;;  %7715 = vst.msk [vmem:[%s13964_s12 + $0x204] sm:$0xf] %vm7585_vm3, %v12062_v7  ;;  %v3518_v18 = vadd.f32 %v14531_v57, %v12843_v53  ;;  %v9901_v38 = vsel %vm8098_vm4, %v9259_v16, 0.0  ;;  %v13448_v53 = vld [vmem:[%s13827_s11 + $0x4d8] sm:$0xff]  }
 0x225   : > { %v5157_v14 = vmax.f32 %v3507_v1, 0.0  ;;  %v9897_v17 = vsel %vm8098_vm4, %v9257_v9, 0.0  ;;  %v3510_v19 = vadd.f32 %v14531_v57, %v3509_v60  ;;  %v8359_v22 = vadd.f32 %v8358_v6, %v8357_v12  ;;  %v13419_v9 = vld [vmem:[%s13827_s11 + $0x3f0] sm:$0xff]  }
 0x226   : > { %12949 = vmatmul.mubr.msk.bf16.gmra.mrb[240].mxu0 %vm2168_vm2, %v13414_v49  ;;  %v9898_v23 = vadd.f32 %v9897_v17, %v9896_v11  ;;  %v12067_v24 = vpack.c.bf16 %v5159_v13, %v5159_v13  ;;  %v5160_v35 = vmax.f32 %v3518_v18, 0.0  ;;  %v9262_v43 = vmul.f32 %v5159_v13, %v5159_v13 }
 0x227   : > { %12952 = vmatprep.mubr.msk.bf16.mxu0 %vm2168_vm2, %v13415_v61  ;;  %v12065_v28 = vpack.c.bf16 %v5157_v14, %v5157_v14  ;;  %v8362_v29 = vsel %vm8098_vm4, %v5157_v14, 0.0  ;;  %v9260_v30 = vmul.f32 %v5157_v14, %v5157_v14  ;;  %v8361_v33 = vadd.f32 %v8360_v27, %v8359_v22  ;;  %v13449_v27 = vld [vmem:[%s13827_s11 + $0x4e0] sm:$0xff]  }
 0x228   : > { %v9900_v34 = vadd.f32 %v9899_v21, %v9898_v23  ;;  %7720 = vst.msk [vmem:[%s13964_s12 + $0x218] sm:$0xf] %vm7585_vm3, %v12067_v24  ;;  %v5158_v36 = vmax.f32 %v3510_v19, 0.0  ;;  %v12068_v45 = vpack.c.bf16 %v5160_v35, %v5160_v35  ;;  %v8366_v46 = vsel %vm8098_vm4, %v5159_v13, 0.0  ;;  %13017 = vmatmul.mubr.msk.bf16.gmra.mrb[52].mxu1 %vm2168_vm2, %v13448_v53 }
 0x229   : > { %v12846_v20 = vpop.f32.mrb[136].mxu0  ;;  %7718 = vst.msk [vmem:[%s13964_s12 + $0x210] sm:$0xf] %vm7585_vm3, %v12065_v28  ;;  %v9903_v39 = vsel %vm8098_vm4, %v9260_v30, 0.0  ;;  %v8363_v44 = vadd.f32 %v8362_v29, %v8361_v33  ;;  %v9263_v61 = vmul.f32 %v5160_v35, %v5160_v35  ;;  %v9907_v62 = vsel %vm8098_vm4, %v9262_v43, 0.0  ;;  %13020 = vmatprep.mubr.msk.bf16.mxu1 %vm2168_vm2, %v13449_v27  ;;  %v13420_v43 = vld [vmem:[%s13827_s11 + $0x3f8] sm:$0xff]  }
 0x22a   : > { %v3522_v25 = vpop.f32.mrb[137].mxu0  ;;  %v3531_v40 = vadd.f32 %v14531_v57, %v12846_v20  ;;  %v9902_v42 = vadd.f32 %v9901_v38, %v9900_v34  ;;  %v12066_v47 = vpack.c.bf16 %v5158_v36, %v5158_v36  ;;  %v8364_v48 = vsel %vm8098_vm4, %v5158_v36, 0.0  ;;  %7721 = vst.msk [vmem:[%s13964_s12 + $0x21c] sm:$0xf] %vm7585_vm3, %v12068_v45 }
 0x22b   : > { %v12847_v31 = vpop.f32.mrb[138].mxu0  ;;  %v3523_v41 = vadd.f32 %v14531_v57, %v3522_v25  ;;  %v9261_v49 = vmul.f32 %v5158_v36, %v5158_v36  ;;  %v8365_v57 = vadd.f32 %v8364_v48, %v8363_v44  ;;  %v8368_v4 = vsel %vm8098_vm4, %v5160_v35, 0.0 }
 0x22c   : > { %v3525_v37 = vpop.f32.mrb[139].mxu0  ;;  %v9904_v51 = vadd.f32 %v9903_v39, %v9902_v42  ;;  %v5163_v52 = vmax.f32 %v3531_v40, 0.0  ;;  %7719 = vst.msk [vmem:[%s13964_s12 + $0x214] sm:$0xf] %vm7585_vm3, %v12066_v47  ;;  %v3534_v56 = vadd.f32 %v14844_v55, %v12847_v31  ;;  %v9909_v15 = vsel %vm8098_vm4, %v9263_v61, 0.0 }
 0x22d   : > { %v5161_v59 = vmax.f32 %v3523_v41, 0.0  ;;  %v9905_v54 = vsel %vm8098_vm4, %v9261_v49, 0.0  ;;  %v3526_v58 = vadd.f32 %v14844_v55, %v3525_v37  ;;  %v8367_v63 = vadd.f32 %v8366_v46, %v8365_v57 }
 0x22e   : > { %12953 = vmatmul.mubr.msk.bf16.gmra.mrb[244].mxu0 %vm2168_vm2, %v13416_v26  ;;  %v9906_v0 = vadd.f32 %v9905_v54, %v9904_v51  ;;  %v12071_v1 = vpack.c.bf16 %v5163_v52, %v5163_v52  ;;  %v5164_v12 = vmax.f32 %v3534_v56, 0.0  ;;  %v9266_v20 = vmul.f32 %v5163_v52, %v5163_v52 }
 0x22f   : > { %12956 = vmatprep.mubr.msk.bf16.mxu0 %vm2168_vm2, %v13417_v32  ;;  %v12069_v5 = vpack.c.bf16 %v5161_v59, %v5161_v59  ;;  %v8370_v6 = vsel %vm8098_vm4, %v5161_v59, 0.0  ;;  %v9264_v7 = vmul.f32 %v5161_v59, %v5161_v59  ;;  %v8369_v10 = vadd.f32 %v8368_v4, %v8367_v63  ;;  %v13450_v32 = vld [vmem:[%s13827_s11 + $0x4e8] sm:$0xff]  }
 0x230   : > { %v9908_v11 = vadd.f32 %v9907_v62, %v9906_v0  ;;  %7724 = vst.msk [vmem:[%s13964_s12 + $0x228] sm:$0xf] %vm7585_vm3, %v12071_v1  ;;  %v5162_v13 = vmax.f32 %v3526_v58, 0.0  ;;  %v12072_v22 = vpack.c.bf16 %v5164_v12, %v5164_v12  ;;  %v8374_v23 = vsel %vm8098_vm4, %v5163_v52, 0.0  ;;  %13021 = vmatmul.mubr.msk.bf16.gmra.mrb[56].mxu1 %vm2168_vm2, %v13450_v32 }
 0x231   : > { %v12850_v60 = vpop.f32.mrb[140].mxu0  ;;  %7722 = vst.msk [vmem:[%s13964_s12 + $0x220] sm:$0xf] %vm7585_vm3, %v12069_v5  ;;  %v9911_v16 = vsel %vm8098_vm4, %v9264_v7, 0.0  ;;  %v8371_v21 = vadd.f32 %v8370_v6, %v8369_v10  ;;  %v9267_v33 = vmul.f32 %v5164_v12, %v5164_v12  ;;  %v9915_v38 = vsel %vm8098_vm4, %v9266_v20, 0.0 }
 0x232   : > { %v3538_v2 = vpop.f32.mrb[141].mxu0  ;;  %v3547_v17 = vadd.f32 %v14844_v55, %v12850_v60  ;;  %v9910_v19 = vadd.f32 %v9909_v15, %v9908_v11  ;;  %v12070_v24 = vpack.c.bf16 %v5162_v13, %v5162_v13  ;;  %v8372_v25 = vsel %vm8098_vm4, %v5162_v13, 0.0  ;;  %7725 = vst.msk [vmem:[%s13964_s12 + $0x22c] sm:$0xf] %vm7585_vm3, %v12072_v22 }
 0x233   : > { %v12851_v8 = vpop.f32.mrb[142].mxu0  ;;  %v3539_v18 = vadd.f32 %v14844_v55, %v3538_v2  ;;  %v9265_v26 = vmul.f32 %v5162_v13, %v5162_v13  ;;  %v8373_v29 = vadd.f32 %v8372_v25, %v8371_v21  ;;  %v8376_v44 = vsel %vm8098_vm4, %v5164_v12, 0.0 }
 0x234   : > { %v3541_v14 = vpop.f32.mrb[143].mxu0  ;;  %v9912_v28 = vadd.f32 %v9911_v16, %v9910_v19  ;;  %v5167_v30 = vmax.f32 %v3547_v17, 0.0  ;;  %7723 = vst.msk [vmem:[%s13964_s12 + $0x224] sm:$0xf] %vm7585_vm3, %v12070_v24  ;;  %v3550_v35 = vadd.f32 %v14844_v55, %v12851_v8  ;;  %v9917_v59 = vsel %vm8098_vm4, %v9267_v33, 0.0  ;;  %v13452_v8 = vld [vmem:[%s13827_s11 + $0x4f8] sm:$0xff]  }
 0x235   : > { %v5165_v31 = vmax.f32 %v3539_v18, 0.0  ;;  %v9913_v34 = vsel %vm8098_vm4, %v9265_v26, 0.0  ;;  %v3542_v36 = vadd.f32 %v14844_v55, %v3541_v14  ;;  %v8375_v39 = vadd.f32 %v8374_v23, %v8373_v29 }
 0x236   : > { %12957 = vmatmul.mubr.msk.bf16.gmra.mrb[248].mxu0 %vm2168_vm2, %v13418_v3  ;;  %v9914_v40 = vadd.f32 %v9913_v34, %v9912_v28  ;;  %v12075_v41 = vpack.c.bf16 %v5167_v30, %v5167_v30  ;;  %v5168_v51 = vmax.f32 %v3550_v35, 0.0  ;;  %v9270_v58 = vmul.f32 %v5167_v30, %v5167_v30  ;;  %v13451_v3 = vld [vmem:[%s13827_s11 + $0x4f0] sm:$0xff]  }
 0x237   : > { %12960 = vmatprep.mubr.msk.bf16.mxu0 %vm2168_vm2, %v13419_v9  ;;  %v12073_v45 = vpack.c.bf16 %v5165_v31, %v5165_v31  ;;  %v8378_v46 = vsel %vm8098_vm4, %v5165_v31, 0.0  ;;  %v9268_v47 = vmul.f32 %v5165_v31, %v5165_v31  ;;  %v8377_v49 = vadd.f32 %v8376_v44, %v8375_v39  ;;  %13024 = vmatprep.mubr.msk.bf16.mxu1 %vm2168_vm2, %v13451_v3 }
 0x238   : > { %v9916_v50 = vadd.f32 %v9915_v38, %v9914_v40  ;;  %7728 = vst.msk [vmem:[%s13964_s12 + $0x238] sm:$0xf] %vm7585_vm3, %v12075_v41  ;;  %v5166_v57 = vmax.f32 %v3542_v36, 0.0  ;;  %v12076_v62 = vpack.c.bf16 %v5168_v51, %v5168_v51  ;;  %v8382_v63 = vsel %vm8098_vm4, %v5167_v30, 0.0  ;;  %13025 = vmatmul.mubr.msk.bf16.gmra.mrb[60].mxu1 %vm2168_vm2, %v13452_v8  ;;  %v13453_v41 = vld [vmem:[%s13827_s11 + $0x500] sm:$0xff]  }
 0x239   : > { %v12854_v37 = vpop.f32.mrb[144].mxu0  ;;  %7726 = vst.msk [vmem:[%s13964_s12 + $0x230] sm:$0xf] %vm7585_vm3, %v12073_v45  ;;  %v9919_v53 = vsel %vm8098_vm4, %v9268_v47, 0.0  ;;  %v8379_v60 = vadd.f32 %v8378_v46, %v8377_v49  ;;  %v9271_v9 = vmul.f32 %v5168_v51, %v5168_v51  ;;  %v9923_v14 = vsel %vm8098_vm4, %v9270_v58, 0.0  ;;  %v13454_v46 = vld [vmem:[%s13827_s11 + $0x508] sm:$0xff]   ;;  %13028 = vmatprep.mubr.msk.bf16.mxu1 %vm2168_vm2, %v13453_v41 }
 0x23a   : > { %v3554_v42 = vpop.f32.mrb[145].mxu0  ;;  %v3563_v61 = vadd.f32 %v14844_v55, %v12854_v37  ;;  %v9918_v56 = vadd.f32 %v9917_v59, %v9916_v50  ;;  %v12074_v0 = vpack.c.bf16 %v5166_v57, %v5166_v57  ;;  %v8380_v1 = vsel %vm8098_vm4, %v5166_v57, 0.0  ;;  %7729 = vst.msk [vmem:[%s13964_s12 + $0x23c] sm:$0xf] %vm7585_vm3, %v12076_v62 }
 0x23b   : > { %v12855_v48 = vpop.f32.mrb[146].mxu0  ;;  %v3555_v54 = vadd.f32 %v14844_v55, %v3554_v42  ;;  %v9269_v2 = vmul.f32 %v5166_v57, %v5166_v57  ;;  %v8381_v5 = vadd.f32 %v8380_v1, %v8379_v60  ;;  %v8384_v19 = vsel %vm8098_vm4, %v5168_v51, 0.0 }
 0x23c   : > { %v3557_v52 = vpop.f32.mrb[147].mxu0  ;;  %v9920_v4 = vadd.f32 %v9919_v53, %v9918_v56  ;;  %v5171_v6 = vmax.f32 %v3563_v61, 0.0  ;;  %7727 = vst.msk [vmem:[%s13964_s12 + $0x234] sm:$0xf] %vm7585_vm3, %v12074_v0  ;;  %v3566_v11 = vadd.f32 %v14844_v55, %v12855_v48  ;;  %v9925_v29 = vsel %vm8098_vm4, %v9271_v9, 0.0 }
 0x23d   : > { %v5169_v7 = vmax.f32 %v3555_v54, 0.0  ;;  %v9921_v10 = vsel %vm8098_vm4, %v9269_v2, 0.0  ;;  %v3558_v12 = vadd.f32 %v14844_v55, %v3557_v52  ;;  %v8383_v15 = vadd.f32 %v8382_v63, %v8381_v5 }
 0x23e   : > { %12961 = vmatmul.mubr.msk.bf16.gmra.mrb[252].mxu0 %vm2168_vm2, %v13420_v43  ;;  %v9922_v16 = vadd.f32 %v9921_v10, %v9920_v4  ;;  %v12079_v17 = vpack.c.bf16 %v5171_v6, %v5171_v6  ;;  %v5172_v26 = vmax.f32 %v3566_v11, 0.0  ;;  %v9274_v34 = vmul.f32 %v5171_v6, %v5171_v6 }
 0x23f   : > { %v12077_v20 = vpack.c.bf16 %v5169_v7, %v5169_v7  ;;  %v8386_v21 = vsel %vm8098_vm4, %v5169_v7, 0.0  ;;  %v9272_v22 = vmul.f32 %v5169_v7, %v5169_v7  ;;  %v8385_v24 = vadd.f32 %v8384_v19, %v8383_v15 }
 0x240   : > { %v9924_v25 = vadd.f32 %v9923_v14, %v9922_v16  ;;  %7732 = vst.msk [vmem:[%s13964_s12 + $0x248] sm:$0xf] %vm7585_vm3, %v12079_v17  ;;  %v5170_v27 = vmax.f32 %v3558_v12, 0.0  ;;  %v12080_v36 = vpack.c.bf16 %v5172_v26, %v5172_v26  ;;  %v8390_v37 = vsel %vm8098_vm4, %v5171_v6, 0.0  ;;  %13029 = vmatmul.mubr.msk.bf16.gmra.mrb[64].mxu1 %vm2168_vm2, %v13454_v46  ;;  %v13455_v16 = vld [vmem:[%s13827_s11 + $0x510] sm:$0xff]  }
 0x241   : > { %v12858_v13 = vpop.f32.mrb[148].mxu0  ;;  %7730 = vst.msk [vmem:[%s13964_s12 + $0x240] sm:$0xf] %vm7585_vm3, %v12077_v20  ;;  %v9927_v30 = vsel %vm8098_vm4, %v9272_v22, 0.0  ;;  %v8387_v35 = vadd.f32 %v8386_v21, %v8385_v24  ;;  %v9275_v47 = vmul.f32 %v5172_v26, %v5172_v26  ;;  %v9931_v57 = vsel %vm8098_vm4, %v9274_v34, 0.0  ;;  %v13456_v21 = vld [vmem:[%s13827_s11 + $0x518] sm:$0xff]   ;;  %13032 = vmatprep.mubr.msk.bf16.mxu1 %vm2168_vm2, %v13455_v16 }
 0x242   : > { %v3570_v18 = vpop.f32.mrb[149].mxu0  ;;  %v3579_v31 = vadd.f32 %v14844_v55, %v12858_v13  ;;  %v9926_v33 = vadd.f32 %v9925_v29, %v9924_v25  ;;  %v12078_v38 = vpack.c.bf16 %v5170_v27, %v5170_v27  ;;  %v8388_v39 = vsel %vm8098_vm4, %v5170_v27, 0.0  ;;  %7733 = vst.msk [vmem:[%s13964_s12 + $0x24c] sm:$0xf] %vm7585_vm3, %v12080_v36 }
 0x243   : > { %v12859_v23 = vpop.f32.mrb[150].mxu0  ;;  %v3571_v32 = vadd.f32 %v14844_v55, %v3570_v18  ;;  %v9273_v40 = vmul.f32 %v5170_v27, %v5170_v27  ;;  %v8389_v43 = vadd.f32 %v8388_v39, %v8387_v35  ;;  %v8392_v54 = vsel %vm8098_vm4, %v5172_v26, 0.0 }
 0x244   : > { %v3573_v28 = vpop.f32.mrb[151].mxu0  ;;  %v9928_v42 = vadd.f32 %v9927_v30, %v9926_v33  ;;  %v5175_v44 = vmax.f32 %v3579_v31, 0.0  ;;  %7731 = vst.msk [vmem:[%s13964_s12 + $0x244] sm:$0xf] %vm7585_vm3, %v12078_v38  ;;  %v3582_v49 = vadd.f32 %v14844_v55, %v12859_v23  ;;  %v9933_v4 = vsel %vm8098_vm4, %v9275_v47, 0.0 }
 0x245   : > { %v5173_v45 = vmax.f32 %v3571_v32, 0.0  ;;  %v9929_v48 = vsel %vm8098_vm4, %v9273_v40, 0.0  ;;  %v3574_v50 = vadd.f32 %v14844_v55, %v3573_v28  ;;  %v8391_v52 = vadd.f32 %v8390_v37, %v8389_v43 }
 0x246   : > { %v9930_v59 = vadd.f32 %v9929_v48, %v9928_v42  ;;  %v12083_v53 = vpack.c.bf16 %v5175_v44, %v5175_v44  ;;  %v5176_v1 = vmax.f32 %v3582_v49, 0.0  ;;  %v9278_v9 = vmul.f32 %v5175_v44, %v5175_v44 }
 0x247   : > { %v12081_v56 = vpack.c.bf16 %v5173_v45, %v5173_v45  ;;  %v8394_v58 = vsel %vm8098_vm4, %v5173_v45, 0.0  ;;  %v9276_v60 = vmul.f32 %v5173_v45, %v5173_v45  ;;  %v8393_v63 = vadd.f32 %v8392_v54, %v8391_v52 }
 0x248   : > { %v9932_v0 = vadd.f32 %v9931_v57, %v9930_v59  ;;  %7736 = vst.msk [vmem:[%s13964_s12 + $0x258] sm:$0xf] %vm7585_vm3, %v12083_v53  ;;  %v5174_v2 = vmax.f32 %v3574_v50, 0.0  ;;  %v12084_v11 = vpack.c.bf16 %v5176_v1, %v5176_v1  ;;  %v8398_v12 = vsel %vm8098_vm4, %v5175_v44, 0.0  ;;  %13033 = vmatmul.mubr.msk.bf16.gmra.mrb[68].mxu1 %vm2168_vm2, %v13456_v21  ;;  %v13457_v59 = vld [vmem:[%s13827_s11 + $0x520] sm:$0xff]  }
 0x249   : > { %v12862_v51 = vpop.f32.mrb[152].mxu0  ;;  %7734 = vst.msk [vmem:[%s13964_s12 + $0x250] sm:$0xf] %vm7585_vm3, %v12081_v56  ;;  %v9935_v5 = vsel %vm8098_vm4, %v9276_v60, 0.0  ;;  %v8395_v10 = vadd.f32 %v8394_v58, %v8393_v63  ;;  %v9279_v22 = vmul.f32 %v5176_v1, %v5176_v1  ;;  %v9939_v27 = vsel %vm8098_vm4, %v9278_v9, 0.0  ;;  %v13458_v58 = vld [vmem:[%s13827_s11 + $0x528] sm:$0xff]   ;;  %13036 = vmatprep.mubr.msk.bf16.mxu1 %vm2168_vm2, %v13457_v59 }
 0x24a   : > { %v3586_v61 = vpop.f32.mrb[153].mxu0  ;;  %v3595_v6 = vadd.f32 %v14844_v55, %v12862_v51  ;;  %v9934_v8 = vadd.f32 %v9933_v4, %v9932_v0  ;;  %v12082_v13 = vpack.c.bf16 %v5174_v2, %v5174_v2  ;;  %v8396_v14 = vsel %vm8098_vm4, %v5174_v2, 0.0  ;;  %7737 = vst.msk [vmem:[%s13964_s12 + $0x25c] sm:$0xf] %vm7585_vm3, %v12084_v11 }
 0x24b   : > { %v12863_v62 = vpop.f32.mrb[154].mxu0  ;;  %v3587_v7 = vadd.f32 %v14844_v55, %v3586_v61  ;;  %v9277_v15 = vmul.f32 %v5174_v2, %v5174_v2  ;;  %v8397_v18 = vadd.f32 %v8396_v14, %v8395_v10  ;;  %v8400_v32 = vsel %vm8098_vm4, %v5176_v1, 0.0 }
 0x24c   : > { %v3589_v3 = vpop.f32.mrb[155].mxu0  ;;  %v9936_v17 = vadd.f32 %v9935_v5, %v9934_v8  ;;  %v5179_v19 = vmax.f32 %v3595_v6, 0.0  ;;  %7735 = vst.msk [vmem:[%s13964_s12 + $0x254] sm:$0xf] %vm7585_vm3, %v12082_v13  ;;  %v3598_v24 = vadd.f32 %v14844_v55, %v12863_v62  ;;  %v9941_v42 = vsel %vm8098_vm4, %v9279_v22, 0.0 }
 0x24d   : > { %v5177_v20 = vmax.f32 %v3587_v7, 0.0  ;;  %v9937_v23 = vsel %vm8098_vm4, %v9277_v15, 0.0  ;;  %v3590_v25 = vadd.f32 %v14844_v55, %v3589_v3  ;;  %v8399_v28 = vadd.f32 %v8398_v12, %v8397_v18 }
 0x24e   : > { %v9938_v29 = vadd.f32 %v9937_v23, %v9936_v17  ;;  %v12087_v30 = vpack.c.bf16 %v5179_v19, %v5179_v19  ;;  %v5180_v39 = vmax.f32 %v3598_v24, 0.0  ;;  %v9282_v47 = vmul.f32 %v5179_v19, %v5179_v19 }
 0x24f   : > { %v12085_v33 = vpack.c.bf16 %v5177_v20, %v5177_v20  ;;  %v8402_v34 = vsel %vm8098_vm4, %v5177_v20, 0.0  ;;  %v9280_v35 = vmul.f32 %v5177_v20, %v5177_v20  ;;  %v8401_v37 = vadd.f32 %v8400_v32, %v8399_v28 }
 0x250   : > { %v9940_v38 = vadd.f32 %v9939_v27, %v9938_v29  ;;  %7740 = vst.msk [vmem:[%s13964_s12 + $0x268] sm:$0xf] %vm7585_vm3, %v12087_v30  ;;  %v5178_v40 = vmax.f32 %v3590_v25, 0.0  ;;  %v12088_v49 = vpack.c.bf16 %v5180_v39, %v5180_v39  ;;  %v8406_v50 = vsel %vm8098_vm4, %v5179_v19, 0.0  ;;  %13037 = vmatmul.mubr.msk.bf16.gmra.mrb[72].mxu1 %vm2168_vm2, %v13458_v58  ;;  %v13459_v29 = vld [vmem:[%s13827_s11 + $0x530] sm:$0xff]  }
 0x251   : > { %v12866_v26 = vpop.f32.mrb[156].mxu0  ;;  %7738 = vst.msk [vmem:[%s13964_s12 + $0x260] sm:$0xf] %vm7585_vm3, %v12085_v33  ;;  %v9943_v43 = vsel %vm8098_vm4, %v9280_v35, 0.0  ;;  %v8403_v48 = vadd.f32 %v8402_v34, %v8401_v37  ;;  %v9283_v60 = vmul.f32 %v5180_v39, %v5180_v39  ;;  %v9947_v2 = vsel %vm8098_vm4, %v9282_v47, 0.0  ;;  %v13460_v34 = vld [vmem:[%s13827_s11 + $0x538] sm:$0xff]   ;;  %13040 = vmatprep.mubr.msk.bf16.mxu1 %vm2168_vm2, %v13459_v29 }
 0x252   : > { %v3602_v31 = vpop.f32.mrb[157].mxu0  ;;  %v3611_v44 = vadd.f32 %v14844_v55, %v12866_v26  ;;  %v9942_v46 = vadd.f32 %v9941_v42, %v9940_v38  ;;  %v12086_v51 = vpack.c.bf16 %v5178_v40, %v5178_v40  ;;  %v8404_v57 = vsel %vm8098_vm4, %v5178_v40, 0.0  ;;  %7741 = vst.msk [vmem:[%s13964_s12 + $0x26c] sm:$0xf] %vm7585_vm3, %v12088_v49 }
 0x253   : > { %v12867_v36 = vpop.f32.mrb[158].mxu0  ;;  %v3603_v45 = vadd.f32 %v14844_v55, %v3602_v31  ;;  %v9281_v52 = vmul.f32 %v5178_v40, %v5178_v40  ;;  %v8405_v61 = vadd.f32 %v8404_v57, %v8403_v48  ;;  %v8408_v7 = vsel %vm8098_vm4, %v5180_v39, 0.0 }
 0x254   : > { %v3605_v41 = vpop.f32.mrb[159].mxu0  ;;  %v9944_v53 = vadd.f32 %v9943_v43, %v9942_v46  ;;  %v5183_v54 = vmax.f32 %v3611_v44, 0.0  ;;  %7739 = vst.msk [vmem:[%s13964_s12 + $0x264] sm:$0xf] %vm7585_vm3, %v12086_v51  ;;  %v3614_v63 = vadd.f32 %v14844_v55, %v12867_v36  ;;  %v9949_v17 = vsel %vm8098_vm4, %v9283_v60, 0.0 }
 0x255   : > { %v5181_v56 = vmax.f32 %v3603_v45, 0.0  ;;  %v9945_v62 = vsel %vm8098_vm4, %v9281_v52, 0.0  ;;  %v3606_v0 = vadd.f32 %v14844_v55, %v3605_v41  ;;  %v8407_v3 = vadd.f32 %v8406_v50, %v8405_v61 }
 0x256   : > { %v9946_v4 = vadd.f32 %v9945_v62, %v9944_v53  ;;  %v12091_v5 = vpack.c.bf16 %v5183_v54, %v5183_v54  ;;  %v5184_v14 = vmax.f32 %v3614_v63, 0.0  ;;  %v9286_v22 = vmul.f32 %v5183_v54, %v5183_v54 }
 0x257   : > { %v12089_v8 = vpack.c.bf16 %v5181_v56, %v5181_v56  ;;  %v8410_v9 = vsel %vm8098_vm4, %v5181_v56, 0.0  ;;  %v9284_v10 = vmul.f32 %v5181_v56, %v5181_v56  ;;  %v8409_v12 = vadd.f32 %v8408_v7, %v8407_v3 }
 0x258   : > { %v9948_v13 = vadd.f32 %v9947_v2, %v9946_v4  ;;  %7744 = vst.msk [vmem:[%s13964_s12 + $0x278] sm:$0xf] %vm7585_vm3, %v12091_v5  ;;  %v5182_v15 = vmax.f32 %v3606_v0, 0.0  ;;  %v12092_v24 = vpack.c.bf16 %v5184_v14, %v5184_v14  ;;  %v8414_v25 = vsel %vm8098_vm4, %v5183_v54, 0.0  ;;  %13041 = vmatmul.mubr.msk.bf16.gmra.mrb[76].mxu1 %vm2168_vm2, %v13460_v34  ;;  %v13461_v4 = vld [vmem:[%s13827_s11 + $0x540] sm:$0xff]  }
 0x259   : > { %v12870_v1 = vpop.f32.mrb[160].mxu0  ;;  %7742 = vst.msk [vmem:[%s13964_s12 + $0x270] sm:$0xf] %vm7585_vm3, %v12089_v8  ;;  %v9951_v18 = vsel %vm8098_vm4, %v9284_v10, 0.0  ;;  %v8411_v23 = vadd.f32 %v8410_v9, %v8409_v12  ;;  %v9287_v35 = vmul.f32 %v5184_v14, %v5184_v14  ;;  %v9955_v40 = vsel %vm8098_vm4, %v9286_v22, 0.0  ;;  %v13462_v9 = vld [vmem:[%s13827_s11 + $0x548] sm:$0xff]   ;;  %13044 = vmatprep.mubr.msk.bf16.mxu1 %vm2168_vm2, %v13461_v4 }
 0x25a   : > { %v3618_v6 = vpop.f32.mrb[161].mxu0  ;;  %v3627_v19 = vadd.f32 %v14844_v55, %v12870_v1  ;;  %v9950_v21 = vadd.f32 %v9949_v17, %v9948_v13  ;;  %v12090_v26 = vpack.c.bf16 %v5182_v15, %v5182_v15  ;;  %v8412_v27 = vsel %vm8098_vm4, %v5182_v15, 0.0  ;;  %7745 = vst.msk [vmem:[%s13964_s12 + $0x27c] sm:$0xf] %vm7585_vm3, %v12092_v24 }
 0x25b   : > { %v12871_v11 = vpop.f32.mrb[162].mxu0  ;;  %v3619_v20 = vadd.f32 %v14844_v55, %v3618_v6  ;;  %v9285_v28 = vmul.f32 %v5182_v15, %v5182_v15  ;;  %v8413_v31 = vadd.f32 %v8412_v27, %v8411_v23  ;;  %v8416_v45 = vsel %vm8098_vm4, %v5184_v14, 0.0 }
 0x25c   : > { %v3621_v16 = vpop.f32.mrb[163].mxu0  ;;  %v9952_v30 = vadd.f32 %v9951_v18, %v9950_v21  ;;  %v5187_v32 = vmax.f32 %v3627_v19, 0.0  ;;  %7743 = vst.msk [vmem:[%s13964_s12 + $0x274] sm:$0xf] %vm7585_vm3, %v12090_v26  ;;  %v3630_v37 = vadd.f32 %v14844_v55, %v12871_v11  ;;  %v9957_v53 = vsel %vm8098_vm4, %v9287_v35, 0.0 }
 0x25d   : > { %v5185_v33 = vmax.f32 %v3619_v20, 0.0  ;;  %v9953_v36 = vsel %vm8098_vm4, %v9285_v28, 0.0  ;;  %v3622_v38 = vadd.f32 %v14844_v55, %v3621_v16  ;;  %v8415_v41 = vadd.f32 %v8414_v25, %v8413_v31 }
 0x25e   : > { %v9954_v42 = vadd.f32 %v9953_v36, %v9952_v30  ;;  %v12095_v43 = vpack.c.bf16 %v5187_v32, %v5187_v32  ;;  %v5188_v57 = vmax.f32 %v3630_v37, 0.0  ;;  %v9290_v60 = vmul.f32 %v5187_v32, %v5187_v32 }
 0x25f   : > { %v12093_v46 = vpack.c.bf16 %v5185_v33, %v5185_v33  ;;  %v8418_v47 = vsel %vm8098_vm4, %v5185_v33, 0.0  ;;  %v9288_v48 = vmul.f32 %v5185_v33, %v5185_v33  ;;  %v8417_v50 = vadd.f32 %v8416_v45, %v8415_v41 }
 0x260   : > { %v9956_v51 = vadd.f32 %v9955_v40, %v9954_v42  ;;  %7748 = vst.msk [vmem:[%s13964_s12 + $0x288] sm:$0xf] %vm7585_vm3, %v12095_v43  ;;  %v5186_v52 = vmax.f32 %v3622_v38, 0.0  ;;  %v12096_v63 = vpack.c.bf16 %v5188_v57, %v5188_v57  ;;  %v8422_v0 = vsel %vm8098_vm4, %v5187_v32, 0.0  ;;  %13045 = vmatmul.mubr.msk.bf16.gmra.mrb[80].mxu1 %vm2168_vm2, %v13462_v9  ;;  %v13463_v42 = vld [vmem:[%s13827_s11 + $0x550] sm:$0xff]  }
 0x261   : > { %v12874_v39 = vpop.f32.mrb[164].mxu0  ;;  %7746 = vst.msk [vmem:[%s13964_s12 + $0x280] sm:$0xf] %vm7585_vm3, %v12093_v46  ;;  %v9959_v61 = vsel %vm8098_vm4, %v9288_v48, 0.0  ;;  %v8419_v62 = vadd.f32 %v8418_v47, %v8417_v50  ;;  %v9291_v10 = vmul.f32 %v5188_v57, %v5188_v57  ;;  %v9963_v15 = vsel %vm8098_vm4, %v9290_v60, 0.0  ;;  %v13464_v47 = vld [vmem:[%s13827_s11 + $0x558] sm:$0xff]   ;;  %13048 = vmatprep.mubr.msk.bf16.mxu1 %vm2168_vm2, %v13463_v42 }
 0x262   : > { %v3634_v44 = vpop.f32.mrb[165].mxu0  ;;  %v3643_v54 = vadd.f32 %v14844_v55, %v12874_v39  ;;  %v9958_v58 = vadd.f32 %v9957_v53, %v9956_v51  ;;  %v12094_v1 = vpack.c.bf16 %v5186_v52, %v5186_v52  ;;  %v8420_v2 = vsel %vm8098_vm4, %v5186_v52, 0.0  ;;  %7749 = vst.msk [vmem:[%s13964_s12 + $0x28c] sm:$0xf] %vm7585_vm3, %v12096_v63 }
 0x263   : > { %v12875_v49 = vpop.f32.mrb[166].mxu0  ;;  %v3635_v56 = vadd.f32 %v14844_v55, %v3634_v44  ;;  %v9289_v3 = vmul.f32 %v5186_v52, %v5186_v52  ;;  %v8421_v6 = vadd.f32 %v8420_v2, %v8419_v62  ;;  %v8424_v20 = vsel %vm8098_vm4, %v5188_v57, 0.0 }
 0x264   : > { %v3637_v59 = vpop.f32.mrb[167].mxu0  ;;  %v9960_v5 = vadd.f32 %v9959_v61, %v9958_v58  ;;  %v5191_v7 = vmax.f32 %v3643_v54, 0.0  ;;  %7747 = vst.msk [vmem:[%s13964_s12 + $0x284] sm:$0xf] %vm7585_vm3, %v12094_v1  ;;  %v3646_v12 = vadd.f32 %v14844_v55, %v12875_v49  ;;  %v9965_v30 = vsel %vm8098_vm4, %v9291_v10, 0.0 }
 0x265   : > { %v5189_v8 = vmax.f32 %v3635_v56, 0.0  ;;  %v9961_v11 = vsel %vm8098_vm4, %v9289_v3, 0.0  ;;  %v3638_v13 = vadd.f32 %v14844_v55, %v3637_v59  ;;  %v8423_v16 = vadd.f32 %v8422_v0, %v8421_v6 }
 0x266   : > { %v9962_v17 = vadd.f32 %v9961_v11, %v9960_v5  ;;  %v12099_v18 = vpack.c.bf16 %v5191_v7, %v5191_v7  ;;  %v5192_v27 = vmax.f32 %v3646_v12, 0.0  ;;  %v9294_v35 = vmul.f32 %v5191_v7, %v5191_v7 }
 0x267   : > { %v12097_v21 = vpack.c.bf16 %v5189_v8, %v5189_v8  ;;  %v8426_v22 = vsel %vm8098_vm4, %v5189_v8, 0.0  ;;  %v9292_v23 = vmul.f32 %v5189_v8, %v5189_v8  ;;  %v8425_v25 = vadd.f32 %v8424_v20, %v8423_v16 }
 0x268   : > { %v9964_v26 = vadd.f32 %v9963_v15, %v9962_v17  ;;  %7752 = vst.msk [vmem:[%s13964_s12 + $0x298] sm:$0xf] %vm7585_vm3, %v12099_v18  ;;  %v5190_v28 = vmax.f32 %v3638_v13, 0.0  ;;  %v12100_v37 = vpack.c.bf16 %v5192_v27, %v5192_v27  ;;  %v8430_v38 = vsel %vm8098_vm4, %v5191_v7, 0.0  ;;  %13049 = vmatmul.mubr.msk.bf16.gmra.mrb[84].mxu1 %vm2168_vm2, %v13464_v47  ;;  %v13465_v17 = vld [vmem:[%s13827_s11 + $0x560] sm:$0xff]  }
 0x269   : > { %v12878_v14 = vpop.f32.mrb[168].mxu0  ;;  %7750 = vst.msk [vmem:[%s13964_s12 + $0x290] sm:$0xf] %vm7585_vm3, %v12097_v21  ;;  %v9967_v31 = vsel %vm8098_vm4, %v9292_v23, 0.0  ;;  %v8427_v36 = vadd.f32 %v8426_v22, %v8425_v25  ;;  %v9295_v48 = vmul.f32 %v5192_v27, %v5192_v27  ;;  %v9971_v52 = vsel %vm8098_vm4, %v9294_v35, 0.0  ;;  %v13466_v22 = vld [vmem:[%s13827_s11 + $0x568] sm:$0xff]   ;;  %13052 = vmatprep.mubr.msk.bf16.mxu1 %vm2168_vm2, %v13465_v17 }
 0x26a   : > { %v3650_v19 = vpop.f32.mrb[169].mxu0  ;;  %v3659_v32 = vadd.f32 %v14844_v55, %v12878_v14  ;;  %v9966_v34 = vadd.f32 %v9965_v30, %v9964_v26  ;;  %v12098_v39 = vpack.c.bf16 %v5190_v28, %v5190_v28  ;;  %v8428_v40 = vsel %vm8098_vm4, %v5190_v28, 0.0  ;;  %7753 = vst.msk [vmem:[%s13964_s12 + $0x29c] sm:$0xf] %vm7585_vm3, %v12100_v37 }
 0x26b   : > { %v12879_v24 = vpop.f32.mrb[170].mxu0  ;;  %v3651_v33 = vadd.f32 %v14844_v55, %v3650_v19  ;;  %v9293_v41 = vmul.f32 %v5190_v28, %v5190_v28  ;;  %v8429_v44 = vadd.f32 %v8428_v40, %v8427_v36  ;;  %v8432_v56 = vsel %vm8098_vm4, %v5192_v27, 0.0 }
 0x26c   : > { %v3653_v29 = vpop.f32.mrb[171].mxu0  ;;  %v9968_v43 = vadd.f32 %v9967_v31, %v9966_v34  ;;  %v5195_v45 = vmax.f32 %v3659_v32, 0.0  ;;  %7751 = vst.msk [vmem:[%s13964_s12 + $0x294] sm:$0xf] %vm7585_vm3, %v12098_v39  ;;  %v3662_v50 = vadd.f32 %v14844_v55, %v12879_v24  ;;  %v9973_v5 = vsel %vm8098_vm4, %v9295_v48, 0.0 }
 0x26d   : > { %v5193_v46 = vmax.f32 %v3651_v33, 0.0  ;;  %v9969_v49 = vsel %vm8098_vm4, %v9293_v41, 0.0  ;;  %v3654_v51 = vadd.f32 %v14844_v55, %v3653_v29  ;;  %v8431_v59 = vadd.f32 %v8430_v38, %v8429_v44 }
 0x26e   : > { %v9970_v53 = vadd.f32 %v9969_v49, %v9968_v43  ;;  %v12103_v61 = vpack.c.bf16 %v5195_v45, %v5195_v45  ;;  %v5196_v2 = vmax.f32 %v3662_v50, 0.0  ;;  %v9298_v10 = vmul.f32 %v5195_v45, %v5195_v45 }
 0x26f   : > { %v12101_v58 = vpack.c.bf16 %v5193_v46, %v5193_v46  ;;  %v8434_v60 = vsel %vm8098_vm4, %v5193_v46, 0.0  ;;  %v9296_v62 = vmul.f32 %v5193_v46, %v5193_v46  ;;  %v8433_v0 = vadd.f32 %v8432_v56, %v8431_v59 }
 0x270   : > { %v9972_v1 = vadd.f32 %v9971_v52, %v9970_v53  ;;  %7756 = vst.msk [vmem:[%s13964_s12 + $0x2a8] sm:$0xf] %vm7585_vm3, %v12103_v61  ;;  %v5194_v3 = vmax.f32 %v3654_v51, 0.0  ;;  %v12104_v12 = vpack.c.bf16 %v5196_v2, %v5196_v2  ;;  %v8438_v13 = vsel %vm8098_vm4, %v5195_v45, 0.0  ;;  %13053 = vmatmul.mubr.msk.bf16.gmra.mrb[88].mxu1 %vm2168_vm2, %v13466_v22  ;;  %v13467_v53 = vld [vmem:[%s13827_s11 + $0x570] sm:$0xff]  }
 0x271   : > { %v12882_v57 = vpop.f32.mrb[172].mxu0  ;;  %7754 = vst.msk [vmem:[%s13964_s12 + $0x2a0] sm:$0xf] %vm7585_vm3, %v12101_v58  ;;  %v9975_v6 = vsel %vm8098_vm4, %v9296_v62, 0.0  ;;  %v8435_v11 = vadd.f32 %v8434_v60, %v8433_v0  ;;  %v9299_v23 = vmul.f32 %v5196_v2, %v5196_v2  ;;  %v9979_v28 = vsel %vm8098_vm4, %v9298_v10, 0.0  ;;  %v13468_v60 = vld [vmem:[%s13827_s11 + $0x578] sm:$0xff]   ;;  %13056 = vmatprep.mubr.msk.bf16.mxu1 %vm2168_vm2, %v13467_v53 }
 0x272   : > { %v3666_v54 = vpop.f32.mrb[173].mxu0  ;;  %v3675_v7 = vadd.f32 %v14844_v55, %v12882_v57  ;;  %v9974_v9 = vadd.f32 %v9973_v5, %v9972_v1  ;;  %v12102_v14 = vpack.c.bf16 %v5194_v3, %v5194_v3  ;;  %v8436_v15 = vsel %vm8098_vm4, %v5194_v3, 0.0  ;;  %7757 = vst.msk [vmem:[%s13964_s12 + $0x2ac] sm:$0xf] %vm7585_vm3, %v12104_v12 }
 0x273   : > { %v12883_v63 = vpop.f32.mrb[174].mxu0  ;;  %v3667_v8 = vadd.f32 %v14844_v55, %v3666_v54  ;;  %v9297_v16 = vmul.f32 %v5194_v3, %v5194_v3  ;;  %v8437_v19 = vadd.f32 %v8436_v15, %v8435_v11  ;;  %v8440_v33 = vsel %vm8098_vm4, %v5196_v2, 0.0 }
 0x274   : > { %v3669_v4 = vpop.f32.mrb[175].mxu0  ;;  %v9976_v18 = vadd.f32 %v9975_v6, %v9974_v9  ;;  %v5199_v20 = vmax.f32 %v3675_v7, 0.0  ;;  %7755 = vst.msk [vmem:[%s13964_s12 + $0x2a4] sm:$0xf] %vm7585_vm3, %v12102_v14  ;;  %v3678_v25 = vadd.f32 %v14844_v55, %v12883_v63  ;;  %v9981_v43 = vsel %vm8098_vm4, %v9299_v23, 0.0 }
 0x275   : > { %v5197_v21 = vmax.f32 %v3667_v8, 0.0  ;;  %v9977_v24 = vsel %vm8098_vm4, %v9297_v16, 0.0  ;;  %v3670_v26 = vadd.f32 %v14844_v55, %v3669_v4  ;;  %v8439_v29 = vadd.f32 %v8438_v13, %v8437_v19 }
 0x276   : > { %v9978_v30 = vadd.f32 %v9977_v24, %v9976_v18  ;;  %v12107_v31 = vpack.c.bf16 %v5199_v20, %v5199_v20  ;;  %v5200_v40 = vmax.f32 %v3678_v25, 0.0  ;;  %v9302_v48 = vmul.f32 %v5199_v20, %v5199_v20 }
 0x277   : > { %v12105_v34 = vpack.c.bf16 %v5197_v21, %v5197_v21  ;;  %v8442_v35 = vsel %vm8098_vm4, %v5197_v21, 0.0  ;;  %v9300_v36 = vmul.f32 %v5197_v21, %v5197_v21  ;;  %v8441_v38 = vadd.f32 %v8440_v33, %v8439_v29 }
 0x278   : > { %v9980_v39 = vadd.f32 %v9979_v28, %v9978_v30  ;;  %7760 = vst.msk [vmem:[%s13964_s12 + $0x2b8] sm:$0xf] %vm7585_vm3, %v12107_v31  ;;  %v5198_v41 = vmax.f32 %v3670_v26, 0.0  ;;  %v12108_v50 = vpack.c.bf16 %v5200_v40, %v5200_v40  ;;  %v8446_v51 = vsel %vm8098_vm4, %v5199_v20, 0.0  ;;  %13057 = vmatmul.mubr.msk.bf16.gmra.mrb[92].mxu1 %vm2168_vm2, %v13468_v60  ;;  %v13469_v30 = vld [vmem:[%s13827_s11 + $0x580] sm:$0xff]  }
 0x279   : > { %v12886_v27 = vpop.f32.mrb[176].mxu0  ;;  %7758 = vst.msk [vmem:[%s13964_s12 + $0x2b0] sm:$0xf] %vm7585_vm3, %v12105_v34  ;;  %v9983_v44 = vsel %vm8098_vm4, %v9300_v36, 0.0  ;;  %v8443_v49 = vadd.f32 %v8442_v35, %v8441_v38  ;;  %v9303_v62 = vmul.f32 %v5200_v40, %v5200_v40  ;;  %v9987_v3 = vsel %vm8098_vm4, %v9302_v48, 0.0  ;;  %v13470_v35 = vld [vmem:[%s13827_s11 + $0x588] sm:$0xff]   ;;  %13060 = vmatprep.mubr.msk.bf16.mxu1 %vm2168_vm2, %v13469_v30 }
 0x27a   : > { %v3682_v32 = vpop.f32.mrb[177].mxu0  ;;  %v3691_v45 = vadd.f32 %v14844_v55, %v12886_v27  ;;  %v9982_v47 = vadd.f32 %v9981_v43, %v9980_v39  ;;  %v12106_v57 = vpack.c.bf16 %v5198_v41, %v5198_v41  ;;  %v8444_v52 = vsel %vm8098_vm4, %v5198_v41, 0.0  ;;  %7761 = vst.msk [vmem:[%s13964_s12 + $0x2bc] sm:$0xf] %vm7585_vm3, %v12108_v50 }
 0x27b   : > { %v12887_v37 = vpop.f32.mrb[178].mxu0  ;;  %v3683_v46 = vadd.f32 %v14844_v55, %v3682_v32  ;;  %v9301_v59 = vmul.f32 %v5198_v41, %v5198_v41  ;;  %v8445_v54 = vadd.f32 %v8444_v52, %v8443_v49  ;;  %v8448_v8 = vsel %vm8098_vm4, %v5200_v40, 0.0 }
 0x27c   : > { %v3685_v42 = vpop.f32.mrb[179].mxu0  ;;  %v9984_v61 = vadd.f32 %v9983_v44, %v9982_v47  ;;  %v5203_v56 = vmax.f32 %v3691_v45, 0.0  ;;  %7759 = vst.msk [vmem:[%s13964_s12 + $0x2b4] sm:$0xf] %vm7585_vm3, %v12106_v57  ;;  %v3694_v0 = vadd.f32 %v14844_v55, %v12887_v37  ;;  %v9989_v18 = vsel %vm8098_vm4, %v9303_v62, 0.0 }
 0x27d   : > { %v5201_v58 = vmax.f32 %v3683_v46, 0.0  ;;  %v9985_v63 = vsel %vm8098_vm4, %v9301_v59, 0.0  ;;  %v3686_v1 = vadd.f32 %v14844_v55, %v3685_v42  ;;  %v8447_v4 = vadd.f32 %v8446_v51, %v8445_v54  ;;  %v15132_v54 = vld [vmem:[%s17805_s2] ss:$0 sm:$0xff] }
 0x27e   : > { %v9986_v5 = vadd.f32 %v9985_v63, %v9984_v61  ;;  %v12111_v6 = vpack.c.bf16 %v5203_v56, %v5203_v56  ;;  %v5204_v15 = vmax.f32 %v3694_v0, 0.0  ;;  %v9306_v23 = vmul.f32 %v5203_v56, %v5203_v56 }
 0x27f   : > { %v12109_v9 = vpack.c.bf16 %v5201_v58, %v5201_v58  ;;  %v8450_v10 = vsel %vm8098_vm4, %v5201_v58, 0.0  ;;  %v9304_v11 = vmul.f32 %v5201_v58, %v5201_v58  ;;  %v8449_v13 = vadd.f32 %v8448_v8, %v8447_v4 }
 0x280   : > { %v9988_v14 = vadd.f32 %v9987_v3, %v9986_v5  ;;  %7764 = vst.msk [vmem:[%s13964_s12 + $0x2c8] sm:$0xf] %vm7585_vm3, %v12111_v6  ;;  %v5202_v16 = vmax.f32 %v3686_v1, 0.0  ;;  %v12112_v25 = vpack.c.bf16 %v5204_v15, %v5204_v15  ;;  %v8454_v26 = vsel %vm8098_vm4, %v5203_v56, 0.0  ;;  %13061 = vmatmul.mubr.msk.bf16.gmra.mrb[96].mxu1 %vm2168_vm2, %v13470_v35  ;;  %v13471_v5 = vld [vmem:[%s13827_s11 + $0x590] sm:$0xff]  }
 0x281   : > { %v12890_v2 = vpop.f32.mrb[180].mxu0  ;;  %7762 = vst.msk [vmem:[%s13964_s12 + $0x2c0] sm:$0xf] %vm7585_vm3, %v12109_v9  ;;  %v9991_v19 = vsel %vm8098_vm4, %v9304_v11, 0.0  ;;  %v8451_v24 = vadd.f32 %v8450_v10, %v8449_v13  ;;  %v9307_v36 = vmul.f32 %v5204_v15, %v5204_v15  ;;  %v9995_v41 = vsel %vm8098_vm4, %v9306_v23, 0.0  ;;  %v13472_v10 = vld [vmem:[%s13827_s11 + $0x598] sm:$0xff]   ;;  %13064 = vmatprep.mubr.msk.bf16.mxu1 %vm2168_vm2, %v13471_v5 }
 0x282   : > { %v3698_v7 = vpop.f32.mrb[181].mxu0  ;;  %v3707_v20 = vadd.f32 %v14844_v55, %v12890_v2  ;;  %v9990_v22 = vadd.f32 %v9989_v18, %v9988_v14  ;;  %v12110_v27 = vpack.c.bf16 %v5202_v16, %v5202_v16  ;;  %v8452_v28 = vsel %vm8098_vm4, %v5202_v16, 0.0  ;;  %7765 = vst.msk [vmem:[%s13964_s12 + $0x2cc] sm:$0xf] %vm7585_vm3, %v12112_v25 }
 0x283   : > { %v12891_v12 = vpop.f32.mrb[182].mxu0  ;;  %v3699_v21 = vadd.f32 %v14844_v55, %v3698_v7  ;;  %v9305_v29 = vmul.f32 %v5202_v16, %v5202_v16  ;;  %v8453_v32 = vadd.f32 %v8452_v28, %v8451_v24  ;;  %v8456_v46 = vsel %vm8098_vm4, %v5204_v15, 0.0 }
 0x284   : > { %v3701_v17 = vpop.f32.mrb[183].mxu0  ;;  %v9992_v31 = vadd.f32 %v9991_v19, %v9990_v22  ;;  %v5207_v33 = vmax.f32 %v3707_v20, 0.0  ;;  %7763 = vst.msk [vmem:[%s13964_s12 + $0x2c4] sm:$0xf] %vm7585_vm3, %v12110_v27  ;;  %v3710_v38 = vadd.f32 %v14844_v55, %v12891_v12  ;;  %v9997_v53 = vsel %vm8098_vm4, %v9307_v36, 0.0 }
 0x285   : > { %v5205_v34 = vmax.f32 %v3699_v21, 0.0  ;;  %v9993_v37 = vsel %vm8098_vm4, %v9305_v29, 0.0  ;;  %v3702_v39 = vadd.f32 %v14844_v55, %v3701_v17  ;;  %v8455_v42 = vadd.f32 %v8454_v26, %v8453_v32 }
 0x286   : > { %v9994_v43 = vadd.f32 %v9993_v37, %v9992_v31  ;;  %v12115_v44 = vpack.c.bf16 %v5207_v33, %v5207_v33  ;;  %v5208_v57 = vmax.f32 %v3710_v38, 0.0  ;;  %v9310_v62 = vmul.f32 %v5207_v33, %v5207_v33 }
 0x287   : > { %v12113_v47 = vpack.c.bf16 %v5205_v34, %v5205_v34  ;;  %v8458_v48 = vsel %vm8098_vm4, %v5205_v34, 0.0  ;;  %v9308_v49 = vmul.f32 %v5205_v34, %v5205_v34  ;;  %v8457_v50 = vadd.f32 %v8456_v46, %v8455_v42 }
 0x288   : > { %v9996_v51 = vadd.f32 %v9995_v41, %v9994_v43  ;;  %7768 = vst.msk [vmem:[%s13964_s12 + $0x2d8] sm:$0xf] %vm7585_vm3, %v12115_v44  ;;  %v5206_v52 = vmax.f32 %v3702_v39, 0.0  ;;  %v12116_v0 = vpack.c.bf16 %v5208_v57, %v5208_v57  ;;  %v8462_v1 = vsel %vm8098_vm4, %v5207_v33, 0.0  ;;  %13065 = vmatmul.mubr.msk.bf16.gmra.mrb[100].mxu1 %vm2168_vm2, %v13472_v10  ;;  %v13473_v43 = vld [vmem:[%s13827_s11 + $0x5a0] sm:$0xff]  }
 0x289   : > { %v12894_v40 = vpop.f32.mrb[184].mxu0  ;;  %7766 = vst.msk [vmem:[%s13964_s12 + $0x2d0] sm:$0xf] %vm7585_vm3, %v12113_v47  ;;  %v9999_v61 = vsel %vm8098_vm4, %v9308_v49, 0.0  ;;  %v8459_v63 = vadd.f32 %v8458_v48, %v8457_v50  ;;  %v9311_v11 = vmul.f32 %v5208_v57, %v5208_v57  ;;  %v10003_v16 = vsel %vm8098_vm4, %v9310_v62, 0.0  ;;  %v13474_v48 = vld [vmem:[%s13827_s11 + $0x5a8] sm:$0xff]   ;;  %13068 = vmatprep.mubr.msk.bf16.mxu1 %vm2168_vm2, %v13473_v43 }
 0x28a   : > { %v3714_v45 = vpop.f32.mrb[185].mxu0  ;;  %v3723_v56 = vadd.f32 %v15132_v54, %v12894_v40  ;;  %v9998_v60 = vadd.f32 %v9997_v53, %v9996_v51  ;;  %v12114_v2 = vpack.c.bf16 %v5206_v52, %v5206_v52  ;;  %v8460_v3 = vsel %vm8098_vm4, %v5206_v52, 0.0  ;;  %7769 = vst.msk [vmem:[%s13964_s12 + $0x2dc] sm:$0xf] %vm7585_vm3, %v12116_v0 }
 0x28b   : > { %v12895_v55 = vpop.f32.mrb[186].mxu0  ;;  %v3715_v58 = vadd.f32 %v15132_v54, %v3714_v45  ;;  %v9309_v4 = vmul.f32 %v5206_v52, %v5206_v52  ;;  %v8461_v7 = vadd.f32 %v8460_v3, %v8459_v63  ;;  %v8464_v21 = vsel %vm8098_vm4, %v5208_v57, 0.0 }
 0x28c   : > { %v3717_v59 = vpop.f32.mrb[187].mxu0  ;;  %v10000_v6 = vadd.f32 %v9999_v61, %v9998_v60  ;;  %v5211_v8 = vmax.f32 %v3723_v56, 0.0  ;;  %7767 = vst.msk [vmem:[%s13964_s12 + $0x2d4] sm:$0xf] %vm7585_vm3, %v12114_v2  ;;  %v3726_v13 = vadd.f32 %v15132_v54, %v12895_v55  ;;  %v10005_v31 = vsel %vm8098_vm4, %v9311_v11, 0.0 }
 0x28d   : > { %v5209_v9 = vmax.f32 %v3715_v58, 0.0  ;;  %v10001_v12 = vsel %vm8098_vm4, %v9309_v4, 0.0  ;;  %v3718_v14 = vadd.f32 %v15132_v54, %v3717_v59  ;;  %v8463_v17 = vadd.f32 %v8462_v1, %v8461_v7 }
 0x28e   : > { %v10002_v18 = vadd.f32 %v10001_v12, %v10000_v6  ;;  %v12119_v19 = vpack.c.bf16 %v5211_v8, %v5211_v8  ;;  %v5212_v28 = vmax.f32 %v3726_v13, 0.0  ;;  %v9314_v36 = vmul.f32 %v5211_v8, %v5211_v8 }
 0x28f   : > { %v12117_v22 = vpack.c.bf16 %v5209_v9, %v5209_v9  ;;  %v8466_v23 = vsel %vm8098_vm4, %v5209_v9, 0.0  ;;  %v9312_v24 = vmul.f32 %v5209_v9, %v5209_v9  ;;  %v8465_v26 = vadd.f32 %v8464_v21, %v8463_v17 }
 0x290   : > { %v10004_v27 = vadd.f32 %v10003_v16, %v10002_v18  ;;  %7772 = vst.msk [vmem:[%s13964_s12 + $0x2e8] sm:$0xf] %vm7585_vm3, %v12119_v19  ;;  %v5210_v29 = vmax.f32 %v3718_v14, 0.0  ;;  %v12120_v38 = vpack.c.bf16 %v5212_v28, %v5212_v28  ;;  %v8470_v39 = vsel %vm8098_vm4, %v5211_v8, 0.0  ;;  %13069 = vmatmul.mubr.msk.bf16.gmra.mrb[104].mxu1 %vm2168_vm2, %v13474_v48  ;;  %v15184_v10 = vpop.f32.mrb[0].mxu1 }
 0x291   : > { %v12898_v15 = vpop.f32.mrb[188].mxu0  ;;  %7770 = vst.msk [vmem:[%s13964_s12 + $0x2e0] sm:$0xf] %vm7585_vm3, %v12117_v22  ;;  %v10007_v32 = vsel %vm8098_vm4, %v9312_v24, 0.0  ;;  %v8467_v37 = vadd.f32 %v8466_v23, %v8465_v26  ;;  %v9315_v49 = vmul.f32 %v5212_v28, %v5212_v28  ;;  %v10011_v52 = vsel %vm8098_vm4, %v9314_v36, 0.0 }
 0x292   : > { %v3730_v20 = vpop.f32.mrb[189].mxu0  ;;  %v3739_v33 = vadd.f32 %v15132_v54, %v12898_v15  ;;  %v10006_v35 = vadd.f32 %v10005_v31, %v10004_v27  ;;  %v12118_v40 = vpack.c.bf16 %v5210_v29, %v5210_v29  ;;  %v8468_v41 = vsel %vm8098_vm4, %v5210_v29, 0.0  ;;  %7773 = vst.msk [vmem:[%s13964_s12 + $0x2ec] sm:$0xf] %vm7585_vm3, %v12120_v38  ;;  %v15186_v15 = vpop.f32.mrb[1].mxu1 }
 0x293   : > { %v12899_v25 = vpop.f32.mrb[190].mxu0  ;;  %v3731_v34 = vadd.f32 %v15132_v54, %v3730_v20  ;;  %v9313_v42 = vmul.f32 %v5210_v29, %v5210_v29  ;;  %v8469_v45 = vadd.f32 %v8468_v41, %v8467_v37  ;;  %v8472_v58 = vsel %vm8098_vm4, %v5212_v28, 0.0  ;;  %v15190_v20 = vpop.f32.mrb[2].mxu1  ;;  %v13476_v37 = vld [vmem:[%s13827_s11 + $0x5b8] sm:$0xff]  }
 0x294   : > { %v3733_v30 = vpop.f32.mrb[191].mxu0  ;;  %v10008_v44 = vadd.f32 %v10007_v32, %v10006_v35  ;;  %v5215_v46 = vmax.f32 %v3739_v33, 0.0  ;;  %7771 = vst.msk [vmem:[%s13964_s12 + $0x2e4] sm:$0xf] %vm7585_vm3, %v12118_v40  ;;  %v3742_v50 = vadd.f32 %v15132_v54, %v12899_v25  ;;  %v10013_v6 = vsel %vm8098_vm4, %v9315_v49, 0.0  ;;  %v15201_v36 = vpop.f32.mrb[3].mxu1 }
 0x295   : > { %v5213_v47 = vmax.f32 %v3731_v34, 0.0  ;;  %v10009_v55 = vsel %vm8098_vm4, %v9313_v42, 0.0  ;;  %v3734_v51 = vadd.f32 %v15132_v54, %v3733_v30  ;;  %v8471_v59 = vadd.f32 %v8470_v39, %v8469_v45  ;;  %v13475_v30 = vld [vmem:[%s13827_s11 + $0x5b0] sm:$0xff]  }
 0x296   : > { %v10010_v53 = vadd.f32 %v10009_v55, %v10008_v44  ;;  %v12123_v61 = vpack.c.bf16 %v5215_v46, %v5215_v46  ;;  %v5216_v3 = vmax.f32 %v3742_v50, 0.0  ;;  %v9318_v12 = vmul.f32 %v5215_v46, %v5215_v46  ;;  %13072 = vmatprep.mubr.msk.bf16.mxu1 %vm2168_vm2, %v13475_v30 }
 0x297   : > { %v12121_v60 = vpack.c.bf16 %v5213_v47, %v5213_v47  ;;  %v8474_v62 = vsel %vm8098_vm4, %v5213_v47, 0.0  ;;  %v9316_v63 = vmul.f32 %v5213_v47, %v5213_v47  ;;  %v8473_v1 = vadd.f32 %v8472_v58, %v8471_v59 }
 0x298   : > { %v10012_v2 = vadd.f32 %v10011_v52, %v10010_v53  ;;  %7776 = vst.msk [vmem:[%s13964_s12 + $0x2f8] sm:$0xf] %vm7585_vm3, %v12123_v61  ;;  %v5214_v4 = vmax.f32 %v3734_v51, 0.0  ;;  %v12124_v14 = vpack.c.bf16 %v5216_v3, %v5216_v3  ;;  %v8478_v16 = vsel %vm8098_vm4, %v5215_v46, 0.0  ;;  %13073 = vmatmul.mubr.msk.bf16.gmra.mrb[108].mxu1 %vm2168_vm2, %v13476_v37 }
 0x299   : > { %v12902_v57 = vpop.f32.mrb[192].mxu0  ;;  %7774 = vst.msk [vmem:[%s13964_s12 + $0x2f0] sm:$0xf] %vm7585_vm3, %v12121_v60  ;;  %v10015_v7 = vsel %vm8098_vm4, %v9316_v63, 0.0  ;;  %v8475_v13 = vadd.f32 %v8474_v62, %v8473_v1  ;;  %v9319_v25 = vmul.f32 %v5216_v3, %v5216_v3  ;;  %v10019_v31 = vsel %vm8098_vm4, %v9318_v12, 0.0 }
 0x29a   : > { %v3746_v56 = vpop.f32.mrb[193].mxu0  ;;  %v3755_v8 = vadd.f32 %v15132_v54, %v12902_v57  ;;  %v10014_v11 = vadd.f32 %v10013_v6, %v10012_v2  ;;  %v12122_v17 = vpack.c.bf16 %v5214_v4, %v5214_v4  ;;  %v8476_v18 = vsel %vm8098_vm4, %v5214_v4, 0.0  ;;  %7777 = vst.msk [vmem:[%s13964_s12 + $0x2fc] sm:$0xf] %vm7585_vm3, %v12124_v14 }
 0x29b   : > { %v12903_v0 = vpop.f32.mrb[194].mxu0  ;;  %v3747_v9 = vadd.f32 %v15132_v54, %v3746_v56  ;;  %v9317_v19 = vmul.f32 %v5214_v4, %v5214_v4  ;;  %v8477_v22 = vadd.f32 %v8476_v18, %v8475_v13  ;;  %v8480_v38 = vsel %vm8098_vm4, %v5216_v3, 0.0  ;;  %v15218_v60 = vpop.f32.mrb[4].mxu1  ;;  %v13478_v18 = vld [vmem:[%s13827_s11 + $0x5c8] sm:$0xff]  }
 0x29c   : > { %v3749_v5 = vpop.f32.mrb[195].mxu0  ;;  %v10016_v21 = vadd.f32 %v10015_v7, %v10014_v11  ;;  %v5219_v23 = vmax.f32 %v3755_v8, 0.0  ;;  %7775 = vst.msk [vmem:[%s13964_s12 + $0x2f4] sm:$0xf] %vm7585_vm3, %v12122_v17  ;;  %v3758_v27 = vadd.f32 %v15132_v54, %v12903_v0  ;;  %v10021_v48 = vsel %vm8098_vm4, %v9319_v25, 0.0  ;;  %v15222_v2 = vpop.f32.mrb[5].mxu1 }
 0x29d   : > { %v5217_v24 = vmax.f32 %v3747_v9, 0.0  ;;  %v10017_v26 = vsel %vm8098_vm4, %v9317_v19, 0.0  ;;  %v3750_v28 = vadd.f32 %v15132_v54, %v3749_v5  ;;  %v8479_v32 = vadd.f32 %v8478_v16, %v8477_v22  ;;  %v15229_v8 = vpop.f32.mrb[6].mxu1  ;;  %v13477_v9 = vld [vmem:[%s13827_s11 + $0x5c0] sm:$0xff]  }
 0x29e   : > { %v10018_v33 = vadd.f32 %v10017_v26, %v10016_v21  ;;  %v12127_v34 = vpack.c.bf16 %v5219_v23, %v5219_v23  ;;  %v5220_v45 = vmax.f32 %v3758_v27, 0.0  ;;  %v9322_v57 = vmul.f32 %v5219_v23, %v5219_v23  ;;  %v15233_v17 = vpop.f32.mrb[7].mxu1  ;;  %13076 = vmatprep.mubr.msk.bf16.mxu1 %vm2168_vm2, %v13477_v9 }
 0x29f   : > { %v12125_v39 = vpack.c.bf16 %v5217_v24, %v5217_v24  ;;  %v8482_v40 = vsel %vm8098_vm4, %v5217_v24, 0.0  ;;  %v9320_v41 = vmul.f32 %v5217_v24, %v5217_v24  ;;  %v8481_v43 = vadd.f32 %v8480_v38, %v8479_v32 }
 0x2a0   : > { %v10020_v44 = vadd.f32 %v10019_v31, %v10018_v33  ;;  %7780 = vst.msk [vmem:[%s13964_s12 + $0x308] sm:$0xf] %vm7585_vm3, %v12127_v34  ;;  %v5218_v46 = vmax.f32 %v3750_v28, 0.0  ;;  %v12128_v59 = vpack.c.bf16 %v5220_v45, %v5220_v45  ;;  %v8486_v53 = vsel %vm8098_vm4, %v5219_v23, 0.0  ;;  %13077 = vmatmul.mubr.msk.bf16.gmra.mrb[112].mxu1 %vm2168_vm2, %v13478_v18 }
 0x2a1   : > { %v12906_v29 = vpop.f32.mrb[196].mxu0  ;;  %7778 = vst.msk [vmem:[%s13964_s12 + $0x300] sm:$0xf] %vm7585_vm3, %v12125_v39  ;;  %v10023_v49 = vsel %vm8098_vm4, %v9320_v41, 0.0  ;;  %v8483_v52 = vadd.f32 %v8482_v40, %v8481_v43  ;;  %v9323_v3 = vmul.f32 %v5220_v45, %v5220_v45  ;;  %v10027_v11 = vsel %vm8098_vm4, %v9322_v57, 0.0 }
 0x2a2   : > { %v3762_v35 = vpop.f32.mrb[197].mxu0  ;;  %v3771_v55 = vadd.f32 %v15132_v54, %v12906_v29  ;;  %v10022_v51 = vadd.f32 %v10021_v48, %v10020_v44  ;;  %v12126_v61 = vpack.c.bf16 %v5218_v46, %v5218_v46  ;;  %v8484_v56 = vsel %vm8098_vm4, %v5218_v46, 0.0  ;;  %7781 = vst.msk [vmem:[%s13964_s12 + $0x30c] sm:$0xf] %vm7585_vm3, %v12128_v59  ;;  %v13479_v59 = vld [vmem:[%s13827_s11 + $0x5d0] sm:$0xff]  }
 0x2a3   : > { %v12907_v42 = vpop.f32.mrb[198].mxu0  ;;  %v3763_v50 = vadd.f32 %v15132_v54, %v3762_v35  ;;  %v9321_v58 = vmul.f32 %v5218_v46, %v5218_v46  ;;  %v8485_v63 = vadd.f32 %v8484_v56, %v8483_v52  ;;  %v8488_v19 = vsel %vm8098_vm4, %v5220_v45, 0.0  ;;  %v15250_v43 = vpop.f32.mrb[8].mxu1  ;;  %13080 = vmatprep.mubr.msk.bf16.mxu1 %vm2168_vm2, %v13479_v59 }
 0x2a4   : > { %v3765_v47 = vpop.f32.mrb[199].mxu0  ;;  %v10024_v62 = vadd.f32 %v10023_v49, %v10022_v51  ;;  %v5223_v0 = vmax.f32 %v3771_v55, 0.0  ;;  %7779 = vst.msk [vmem:[%s13964_s12 + $0x304] sm:$0xf] %vm7585_vm3, %v12126_v61  ;;  %v3774_v5 = vadd.f32 %v15132_v54, %v12907_v42  ;;  %v10029_v30 = vsel %vm8098_vm4, %v9323_v3, 0.0  ;;  %v15254_v48 = vpop.f32.mrb[9].mxu1 }
 0x2a5   : > { %v5221_v1 = vmax.f32 %v3763_v50, 0.0  ;;  %v10025_v4 = vsel %vm8098_vm4, %v9321_v58, 0.0  ;;  %v3766_v6 = vadd.f32 %v15132_v54, %v3765_v47  ;;  %v8487_v12 = vadd.f32 %v8486_v53, %v8485_v63  ;;  %v15261_v52 = vpop.f32.mrb[10].mxu1 }
 0x2a6   : > { %v10026_v13 = vadd.f32 %v10025_v4, %v10024_v62  ;;  %v12131_v14 = vpack.c.bf16 %v5223_v0, %v5223_v0  ;;  %v5224_v27 = vmax.f32 %v3774_v5, 0.0  ;;  %v9326_v35 = vmul.f32 %v5223_v0, %v5223_v0  ;;  %v15265_v63 = vpop.f32.mrb[11].mxu1 }
 0x2a7   : > { %v12129_v21 = vpack.c.bf16 %v5221_v1, %v5221_v1  ;;  %v8490_v22 = vsel %vm8098_vm4, %v5221_v1, 0.0  ;;  %v9324_v23 = vmul.f32 %v5221_v1, %v5221_v1  ;;  %v8489_v25 = vadd.f32 %v8488_v19, %v8487_v12 }
 0x2a8   : > { %v10028_v26 = vadd.f32 %v10027_v11, %v10026_v13  ;;  %7784 = vst.msk [vmem:[%s13964_s12 + $0x318] sm:$0xf] %vm7585_vm3, %v12131_v14  ;;  %v5222_v28 = vmax.f32 %v3766_v6, 0.0  ;;  %v12132_v38 = vpack.c.bf16 %v5224_v27, %v5224_v27  ;;  %v8494_v39 = vsel %vm8098_vm4, %v5223_v0, 0.0  ;;  %v13480_v0 = vld [vmem:[%s13827_s11 + $0x5d8] sm:$0xff]  }
 0x2a9   : > { %v12910_v7 = vpop.f32.mrb[200].mxu0  ;;  %7782 = vst.msk [vmem:[%s13964_s12 + $0x310] sm:$0xf] %vm7585_vm3, %v12129_v21  ;;  %v10031_v31 = vsel %vm8098_vm4, %v9324_v23, 0.0  ;;  %v8491_v37 = vadd.f32 %v8490_v22, %v8489_v25  ;;  %v9327_v49 = vmul.f32 %v5224_v27, %v5224_v27  ;;  %v10035_v53 = vsel %vm8098_vm4, %v9326_v35, 0.0  ;;  %13081 = vmatmul.mubr.msk.bf16.gmra.mrb[116].mxu1 %vm2168_vm2, %v13480_v0 }
 0x2aa   : > { %v3778_v16 = vpop.f32.mrb[201].mxu0  ;;  %v3787_v32 = vadd.f32 %v15132_v54, %v12910_v7  ;;  %v10030_v34 = vadd.f32 %v10029_v30, %v10028_v26  ;;  %v12130_v40 = vpack.c.bf16 %v5222_v28, %v5222_v28  ;;  %v8492_v41 = vsel %vm8098_vm4, %v5222_v28, 0.0  ;;  %7785 = vst.msk [vmem:[%s13964_s12 + $0x31c] sm:$0xf] %vm7585_vm3, %v12132_v38 }
 0x2ab   : > { %v12911_v24 = vpop.f32.mrb[202].mxu0  ;;  %v3779_v33 = vadd.f32 %v15132_v54, %v3778_v16  ;;  %v9325_v42 = vmul.f32 %v5222_v28, %v5222_v28  ;;  %v8493_v45 = vadd.f32 %v8492_v41, %v8491_v37  ;;  %v8496_v1 = vsel %vm8098_vm4, %v5224_v27, 0.0 }
 0x2ac   : > { %v3781_v29 = vpop.f32.mrb[203].mxu0  ;;  %v10032_v44 = vadd.f32 %v10031_v31, %v10030_v34  ;;  %v5227_v46 = vmax.f32 %v3787_v32, 0.0  ;;  %7783 = vst.msk [vmem:[%s13964_s12 + $0x314] sm:$0xf] %vm7585_vm3, %v12130_v40  ;;  %v3790_v50 = vadd.f32 %v15132_v54, %v12911_v24  ;;  %v10037_v14 = vsel %vm8098_vm4, %v9327_v49, 0.0 }
 0x2ad   : > { %v5225_v47 = vmax.f32 %v3779_v33, 0.0  ;;  %v10033_v55 = vsel %vm8098_vm4, %v9325_v42, 0.0  ;;  %v3782_v51 = vadd.f32 %v15132_v54, %v3781_v29  ;;  %v8495_v61 = vadd.f32 %v8494_v39, %v8493_v45  ;;  %v15282_v29 = vpop.f32.mrb[12].mxu1  ;;  %v13481_v42 = vld [vmem:[%s13827_s11 + $0x5e0] sm:$0xff]  }
 0x2ae   : > { %v10034_v56 = vadd.f32 %v10033_v55, %v10032_v44  ;;  %v12135_v58 = vpack.c.bf16 %v5227_v46, %v5227_v46  ;;  %v5228_v11 = vmax.f32 %v3790_v50, 0.0  ;;  %v9330_v22 = vmul.f32 %v5227_v46, %v5227_v46  ;;  %v15286_v34 = vpop.f32.mrb[13].mxu1  ;;  %v13482_v50 = vld [vmem:[%s13827_s11 + $0x5e8] sm:$0xff]   ;;  %13084 = vmatprep.mubr.msk.bf16.mxu1 %vm2168_vm2, %v13481_v42 }
 0x2af   : > { %v12133_v3 = vpack.c.bf16 %v5225_v47, %v5225_v47  ;;  %v8498_v4 = vsel %vm8098_vm4, %v5225_v47, 0.0  ;;  %v9328_v5 = vmul.f32 %v5225_v47, %v5225_v47  ;;  %v8497_v7 = vadd.f32 %v8496_v1, %v8495_v61  ;;  %v15293_v41 = vpop.f32.mrb[14].mxu1 }
 0x2b0   : > { %v10036_v9 = vadd.f32 %v10035_v53, %v10034_v56  ;;  %7788 = vst.msk [vmem:[%s13964_s12 + $0x328] sm:$0xf] %vm7585_vm3, %v12135_v58  ;;  %v5226_v12 = vmax.f32 %v3782_v51, 0.0  ;;  %v12136_v24 = vpack.c.bf16 %v5228_v11, %v5228_v11  ;;  %v8502_v25 = vsel %vm8098_vm4, %v5227_v46, 0.0  ;;  %v15297_v55 = vpop.f32.mrb[15].mxu1 }
 0x2b1   : > { %v12914_v57 = vpop.f32.mrb[204].mxu0  ;;  %7786 = vst.msk [vmem:[%s13964_s12 + $0x320] sm:$0xf] %vm7585_vm3, %v12133_v3  ;;  %v10039_v16 = vsel %vm8098_vm4, %v9328_v5, 0.0  ;;  %v8499_v23 = vadd.f32 %v8498_v4, %v8497_v7  ;;  %v9331_v35 = vmul.f32 %v5228_v11, %v5228_v11  ;;  %v10043_v44 = vsel %vm8098_vm4, %v9330_v22, 0.0  ;;  %13085 = vmatmul.mubr.msk.bf16.gmra.mrb[120].mxu1 %vm2168_vm2, %v13482_v50 }
 0x2b2   : > { %v3794_v62 = vpop.f32.mrb[205].mxu0  ;;  %v3803_v18 = vadd.f32 %v15132_v54, %v12914_v57  ;;  %v10038_v21 = vadd.f32 %v10037_v14, %v10036_v9  ;;  %v12134_v26 = vpack.c.bf16 %v5226_v12, %v5226_v12  ;;  %v8500_v27 = vsel %vm8098_vm4, %v5226_v12, 0.0  ;;  %7789 = vst.msk [vmem:[%s13964_s12 + $0x32c] sm:$0xf] %vm7585_vm3, %v12136_v24 }
 0x2b3   : > { %v12915_v6 = vpop.f32.mrb[206].mxu0  ;;  %v3795_v19 = vadd.f32 %v15132_v54, %v3794_v62  ;;  %v9329_v28 = vmul.f32 %v5226_v12, %v5226_v12  ;;  %v8501_v31 = vadd.f32 %v8500_v27, %v8499_v23  ;;  %v8504_v51 = vsel %vm8098_vm4, %v5228_v11, 0.0 }
 0x2b4   : > { %v3797_v13 = vpop.f32.mrb[207].mxu0  ;;  %v10040_v30 = vadd.f32 %v10039_v16, %v10038_v21  ;;  %v5231_v32 = vmax.f32 %v3803_v18, 0.0  ;;  %7787 = vst.msk [vmem:[%s13964_s12 + $0x324] sm:$0xf] %vm7585_vm3, %v12134_v26  ;;  %v3806_v38 = vadd.f32 %v15132_v54, %v12915_v6  ;;  %v10045_v3 = vsel %vm8098_vm4, %v9331_v35, 0.0 }
 0x2b5   : > { %v5229_v33 = vmax.f32 %v3795_v19, 0.0  ;;  %v10041_v37 = vsel %vm8098_vm4, %v9329_v28, 0.0  ;;  %v3798_v39 = vadd.f32 %v15132_v54, %v3797_v13  ;;  %v8503_v45 = vadd.f32 %v8502_v25, %v8501_v31  ;;  %v15314_v19 = vpop.f32.mrb[16].mxu1 }
 0x2b6   : > { %v10042_v46 = vadd.f32 %v10041_v37, %v10040_v30  ;;  %v12139_v47 = vpack.c.bf16 %v5231_v32, %v5231_v32  ;;  %v5232_v62 = vmax.f32 %v3806_v38, 0.0  ;;  %v9334_v9 = vmul.f32 %v5231_v32, %v5231_v32  ;;  %v15318_v25 = vpop.f32.mrb[17].mxu1 }
 0x2b7   : > { %v12137_v57 = vpack.c.bf16 %v5229_v33, %v5229_v33  ;;  %v8506_v59 = vsel %vm8098_vm4, %v5229_v33, 0.0  ;;  %v9332_v53 = vmul.f32 %v5229_v33, %v5229_v33  ;;  %v8505_v56 = vadd.f32 %v8504_v51, %v8503_v45  ;;  %v13483_v33 = vld [vmem:[%s13827_s11 + $0x5f0] sm:$0xff]  }
 0x2b8   : > { %v10044_v58 = vadd.f32 %v10043_v44, %v10042_v46  ;;  %7792 = vst.msk [vmem:[%s13964_s12 + $0x338] sm:$0xf] %vm7585_vm3, %v12139_v47  ;;  %v5230_v0 = vmax.f32 %v3798_v39, 0.0  ;;  %v12140_v12 = vpack.c.bf16 %v5232_v62, %v5232_v62  ;;  %v8510_v13 = vsel %vm8098_vm4, %v5231_v32, 0.0  ;;  %v15325_v32 = vpop.f32.mrb[18].mxu1  ;;  %v13484_v44 = vld [vmem:[%s13827_s11 + $0x5f8] sm:$0xff]   ;;  %13088 = vmatprep.mubr.msk.bf16.mxu1 %vm2168_vm2, %v13483_v33 }
 0x2b9   : > { %v12918_v40 = vpop.f32.mrb[208].mxu0  ;;  %7790 = vst.msk [vmem:[%s13964_s12 + $0x330] sm:$0xf] %vm7585_vm3, %v12137_v57  ;;  %v10047_v4 = vsel %vm8098_vm4, %v9332_v53, 0.0  ;;  %v8507_v11 = vadd.f32 %v8506_v59, %v8505_v56  ;;  %v9335_v26 = vmul.f32 %v5232_v62, %v5232_v62  ;;  %v10051_v35 = vsel %vm8098_vm4, %v9334_v9, 0.0  ;;  %v15329_v42 = vpop.f32.mrb[19].mxu1  ;;  %13089 = vmatmul.mubr.msk.bf16.gmra.mrb[124].mxu1 %vm2168_vm2, %v13484_v44 }
 0x2ba   : > { %v3810_v49 = vpop.f32.mrb[209].mxu0  ;;  %v3819_v5 = vadd.f32 %v15132_v54, %v12918_v40  ;;  %v10046_v7 = vadd.f32 %v10045_v3, %v10044_v58  ;;  %v12138_v14 = vpack.c.bf16 %v5230_v0, %v5230_v0  ;;  %v8508_v16 = vsel %vm8098_vm4, %v5230_v0, 0.0  ;;  %7793 = vst.msk [vmem:[%s13964_s12 + $0x33c] sm:$0xf] %vm7585_vm3, %v12140_v12 }
 0x2bb   : > { %v12919_v61 = vpop.f32.mrb[210].mxu0  ;;  %v3811_v6 = vadd.f32 %v15132_v54, %v3810_v49  ;;  %v9333_v18 = vmul.f32 %v5230_v0, %v5230_v0  ;;  %v8509_v22 = vadd.f32 %v8508_v16, %v8507_v11  ;;  %v8512_v45 = vsel %vm8098_vm4, %v5232_v62, 0.0  ;;  %v15346_v12 = vpop.f32.mrb[20].mxu1 }
 0x2bc   : > { %v3813_v1 = vpop.f32.mrb[211].mxu0  ;;  %v10048_v21 = vadd.f32 %v10047_v4, %v10046_v7  ;;  %v5235_v23 = vmax.f32 %v3819_v5, 0.0  ;;  %7791 = vst.msk [vmem:[%s13964_s12 + $0x334] sm:$0xf] %vm7585_vm3, %v12138_v14  ;;  %v3822_v28 = vadd.f32 %v15132_v54, %v12919_v61  ;;  %v10053_v56 = vsel %vm8098_vm4, %v9335_v26, 0.0 }
 0x2bd   : > { %v5233_v24 = vmax.f32 %v3811_v6, 0.0  ;;  %v10049_v27 = vsel %vm8098_vm4, %v9333_v18, 0.0  ;;  %v3814_v30 = vadd.f32 %v15132_v54, %v3813_v1  ;;  %v8511_v37 = vadd.f32 %v8510_v13, %v8509_v22 }
 0x2be   : > { %v10050_v38 = vadd.f32 %v10049_v27, %v10048_v21  ;;  %v12143_v39 = vpack.c.bf16 %v5235_v23, %v5235_v23  ;;  %v5236_v59 = vmax.f32 %v3822_v28, 0.0  ;;  %v9338_v3 = vmul.f32 %v5235_v23, %v5235_v23  ;;  %v15350_v21 = vpop.f32.mrb[21].mxu1 }
 0x2bf   : > { %v12141_v46 = vpack.c.bf16 %v5233_v24, %v5233_v24  ;;  %v8514_v47 = vsel %vm8098_vm4, %v5233_v24, 0.0  ;;  %v9336_v49 = vmul.f32 %v5233_v24, %v5233_v24  ;;  %v8513_v51 = vadd.f32 %v8512_v45, %v8511_v37  ;;  %v15357_v28 = vpop.f32.mrb[22].mxu1 }
 0x2c0   : > { %v10052_v57 = vadd.f32 %v10051_v35, %v10050_v38  ;;  %7796 = vst.msk [vmem:[%s13964_s12 + $0x348] sm:$0xf] %vm7585_vm3, %v12143_v39  ;;  %v5234_v53 = vmax.f32 %v3814_v30, 0.0  ;;  %v12144_v5 = vpack.c.bf16 %v5236_v59, %v5236_v59  ;;  %v8518_v6 = vsel %vm8098_vm4, %v5235_v23, 0.0  ;;  %v13485_v30 = vld [vmem:[%s13827_s11 + $0x600] sm:$0xff]   ;;  %v15361_v39 = vpop.f32.mrb[23].mxu1 }
 0x2c1   : > { %v12922_v31 = vpop.f32.mrb[212].mxu0  ;;  %7794 = vst.msk [vmem:[%s13964_s12 + $0x340] sm:$0xf] %vm7585_vm3, %v12141_v46  ;;  %v10055_v58 = vsel %vm8098_vm4, %v9336_v49, 0.0  ;;  %v8515_v4 = vadd.f32 %v8514_v47, %v8513_v51  ;;  %v9339_v22 = vmul.f32 %v5236_v59, %v5236_v59  ;;  %v8520_v44 = vsel %vm8098_vm4, %v5236_v59, 0.0  ;;  %13092 = vmatprep.mubr.msk.bf16.mxu1 %vm2168_vm2, %v13485_v30 }
 0x2c2   : > { %v3826_v40 = vpop.f32.mrb[213].mxu0  ;;  %v3835_v62 = vadd.f32 %v15132_v54, %v12922_v31  ;;  %v10054_v1 = vadd.f32 %v10053_v56, %v10052_v57  ;;  %v12142_v7 = vpack.c.bf16 %v5234_v53, %v5234_v53  ;;  %v8516_v9 = vsel %vm8098_vm4, %v5234_v53, 0.0  ;;  %7797 = vst.msk [vmem:[%s13964_s12 + $0x34c] sm:$0xf] %vm7585_vm3, %v12144_v5 }
 0x2c3   : > { %v12923_v50 = vpop.f32.mrb[214].mxu0  ;;  %v3827_v0 = vadd.f32 %v15132_v54, %v3826_v40  ;;  %v9337_v11 = vmul.f32 %v5234_v53, %v5234_v53  ;;  %v8517_v14 = vadd.f32 %v8516_v9, %v8515_v4  ;;  %v10059_v31 = vsel %vm8098_vm4, %v9338_v3, 0.0  ;;  %v13486_v40 = vld [vmem:[%s13827_s11 + $0x608] sm:$0xff]  }
 0x2c4   : > { %v3829_v61 = vpop.f32.mrb[215].mxu0  ;;  %v10056_v13 = vadd.f32 %v10055_v58, %v10054_v1  ;;  %v5239_v16 = vmax.f32 %v3835_v62, 0.0  ;;  %7795 = vst.msk [vmem:[%s13964_s12 + $0x344] sm:$0xf] %vm7585_vm3, %v12142_v7  ;;  %v3838_v24 = vadd.f32 %v15132_v54, %v12923_v50  ;;  %13093 = vmatmul.mubr.msk.bf16.gmra.mrb[128].mxu1 %vm2168_vm2, %v13486_v40  ;;  %v10061_v56 = vsel %vm8098_vm4, %v9339_v22, 0.0 }
 0x2c5   : > { %v5237_v18 = vmax.f32 %v3827_v0, 0.0  ;;  %v10057_v23 = vsel %vm8098_vm4, %v9337_v11, 0.0  ;;  %v3830_v26 = vadd.f32 %v15132_v54, %v3829_v61  ;;  %v8519_v33 = vadd.f32 %v8518_v6, %v8517_v14  ;;  %v15378_v11 = vpop.f32.mrb[24].mxu1 }
 0x2c6   : > { %v10058_v35 = vadd.f32 %v10057_v23, %v10056_v13  ;;  %v12147_v37 = vpack.c.bf16 %v5239_v16, %v5239_v16  ;;  %v5240_v57 = vmax.f32 %v3838_v24, 0.0  ;;  %v9342_v1 = vmul.f32 %v5239_v16, %v5239_v16  ;;  %v15382_v23 = vpop.f32.mrb[25].mxu1 }
 0x2c7   : > { %v12145_v45 = vpack.c.bf16 %v5237_v18, %v5237_v18  ;;  %v8522_v46 = vsel %vm8098_vm4, %v5237_v18, 0.0  ;;  %v9340_v47 = vmul.f32 %v5237_v18, %v5237_v18  ;;  %v8521_v50 = vadd.f32 %v8520_v44, %v8519_v33  ;;  %v13487_v33 = vld [vmem:[%s13827_s11 + $0x610] sm:$0xff]  }
 0x2c8   : > { %v10060_v51 = vadd.f32 %v10059_v31, %v10058_v35  ;;  %7800 = vst.msk [vmem:[%s13964_s12 + $0x358] sm:$0xf] %vm7585_vm3, %v12147_v37  ;;  %v5238_v53 = vmax.f32 %v3830_v26, 0.0  ;;  %v12148_v4 = vpack.c.bf16 %v5240_v57, %v5240_v57  ;;  %v8526_v5 = vsel %vm8098_vm4, %v5239_v16, 0.0  ;;  %v15389_v31 = vpop.f32.mrb[26].mxu1  ;;  %13096 = vmatprep.mubr.msk.bf16.mxu1 %vm2168_vm2, %v13487_v33 }
 0x2c9   : > { %v12926_v27 = vpop.f32.mrb[216].mxu0  ;;  %7798 = vst.msk [vmem:[%s13964_s12 + $0x350] sm:$0xf] %vm7585_vm3, %v12145_v45  ;;  %v10063_v59 = vsel %vm8098_vm4, %v9340_v47, 0.0  ;;  %v8523_v3 = vadd.f32 %v8522_v46, %v8521_v50  ;;  %v9343_v24 = vmul.f32 %v5240_v57, %v5240_v57  ;;  %v10067_v35 = vsel %vm8098_vm4, %v9342_v1, 0.0  ;;  %v15393_v45 = vpop.f32.mrb[27].mxu1 }
 0x2ca   : > { %v3842_v38 = vpop.f32.mrb[217].mxu0  ;;  %v3851_v58 = vadd.f32 %v15132_v54, %v12926_v27  ;;  %v10062_v0 = vadd.f32 %v10061_v56, %v10060_v51  ;;  %v12146_v6 = vpack.c.bf16 %v5238_v53, %v5238_v53  ;;  %v8524_v7 = vsel %vm8098_vm4, %v5238_v53, 0.0  ;;  %7801 = vst.msk [vmem:[%s13964_s12 + $0x35c] sm:$0xf] %vm7585_vm3, %v12148_v4  ;;  %v13488_v46 = vld [vmem:[%s13827_s11 + $0x618] sm:$0xff]  }
 0x2cb   : > { %v12927_v49 = vpop.f32.mrb[218].mxu0  ;;  %v3843_v62 = vadd.f32 %v15132_v54, %v3842_v38  ;;  %v9341_v9 = vmul.f32 %v5238_v53, %v5238_v53  ;;  %v8525_v14 = vadd.f32 %v8524_v7, %v8523_v3  ;;  %v8528_v47 = vsel %vm8098_vm4, %v5240_v57, 0.0 }
 0x2cc   : > { %v3845_v61 = vpop.f32.mrb[219].mxu0  ;;  %v10064_v13 = vadd.f32 %v10063_v59, %v10062_v0  ;;  %v5243_v18 = vmax.f32 %v3851_v58, 0.0  ;;  %7799 = vst.msk [vmem:[%s13964_s12 + $0x354] sm:$0xf] %vm7585_vm3, %v12146_v6  ;;  %v3854_v26 = vadd.f32 %v15132_v54, %v12927_v49  ;;  %13097 = vmatmul.mubr.msk.bf16.gmra.mrb[132].mxu1 %vm2168_vm2, %v13488_v46  ;;  %v10069_v0 = vsel %vm8098_vm4, %v9343_v24, 0.0  ;;  %v15410_v24 = vpop.f32.mrb[28].mxu1 }
 0x2cd   : > { %v5241_v22 = vmax.f32 %v3843_v62, 0.0  ;;  %v10065_v16 = vsel %vm8098_vm4, %v9341_v9, 0.0  ;;  %v3846_v27 = vadd.f32 %v15132_v54, %v3845_v61  ;;  %v8527_v37 = vadd.f32 %v8526_v5, %v8525_v14  ;;  %v15414_v33 = vpop.f32.mrb[29].mxu1  ;;  %v13489_v46 = vld [vmem:[%s13827_s11 + $0x620] sm:$0xff]  }
 0x2ce   : > { %v10066_v38 = vadd.f32 %v10065_v16, %v10064_v13  ;;  %v12151_v40 = vpack.c.bf16 %v5243_v18, %v5243_v18  ;;  %v5244_v59 = vmax.f32 %v3854_v26, 0.0  ;;  %v9346_v5 = vmul.f32 %v5243_v18, %v5243_v18  ;;  %13100 = vmatprep.mubr.msk.bf16.mxu1 %vm2168_vm2, %v13489_v46 }
 0x2cf   : > { %v12149_v49 = vpack.c.bf16 %v5241_v22, %v5241_v22  ;;  %v8530_v50 = vsel %vm8098_vm4, %v5241_v22, 0.0  ;;  %v9344_v51 = vmul.f32 %v5241_v22, %v5241_v22  ;;  %v8529_v61 = vadd.f32 %v8528_v47, %v8527_v37 }
 0x2d0   : > { %v10068_v56 = vadd.f32 %v10067_v35, %v10066_v38  ;;  %7804 = vst.msk [vmem:[%s13964_s12 + $0x368] sm:$0xf] %vm7585_vm3, %v12151_v40  ;;  %v5242_v58 = vmax.f32 %v3846_v27, 0.0  ;;  %v12152_v7 = vpack.c.bf16 %v5244_v59, %v5244_v59  ;;  %v8534_v9 = vsel %vm8098_vm4, %v5243_v18, 0.0 }
 0x2d1   : > { %v12930_v30 = vpop.f32.mrb[220].mxu0  ;;  %7802 = vst.msk [vmem:[%s13964_s12 + $0x360] sm:$0xf] %vm7585_vm3, %v12149_v49  ;;  %v10071_v57 = vsel %vm8098_vm4, %v9344_v51, 0.0  ;;  %v8531_v6 = vadd.f32 %v8530_v50, %v8529_v61  ;;  %v9347_v35 = vmul.f32 %v5244_v59, %v5244_v59  ;;  %v10075_v47 = vsel %vm8098_vm4, %v9346_v5, 0.0 }
 0x2d2   : > { %v3858_v44 = vpop.f32.mrb[221].mxu0  ;;  %v3867_v1 = vadd.f32 %v15132_v54, %v12930_v30  ;;  %v10070_v4 = vadd.f32 %v10069_v0, %v10068_v56  ;;  %v12150_v13 = vpack.c.bf16 %v5242_v58, %v5242_v58  ;;  %v8532_v14 = vsel %vm8098_vm4, %v5242_v58, 0.0  ;;  %7805 = vst.msk [vmem:[%s13964_s12 + $0x36c] sm:$0xf] %vm7585_vm3, %v12152_v7 }
 0x2d3   : > { %v12931_v53 = vpop.f32.mrb[222].mxu0  ;;  %v3859_v3 = vadd.f32 %v15132_v54, %v3858_v44  ;;  %v9345_v22 = vmul.f32 %v5242_v58, %v5242_v58  ;;  %v8533_v26 = vadd.f32 %v8532_v14, %v8531_v6  ;;  %v15421_v44 = vpop.f32.mrb[30].mxu1  ;;  %v13490_v58 = vld [vmem:[%s13827_s11 + $0x628] sm:$0xff]   ;;  %v8536_v0 = vsel %vm8098_vm4, %v5244_v59, 0.0 }
 0x2d4   : > { %v3861_v62 = vpop.f32.mrb[223].mxu0  ;;  %v10072_v16 = vadd.f32 %v10071_v57, %v10070_v4  ;;  %v5247_v27 = vmax.f32 %v3867_v1, 0.0  ;;  %7803 = vst.msk [vmem:[%s13964_s12 + $0x364] sm:$0xf] %vm7585_vm3, %v12150_v13  ;;  %v3870_v37 = vadd.f32 %v15132_v54, %v12931_v53  ;;  %v15425_v56 = vpop.f32.mrb[31].mxu1  ;;  %13101 = vmatmul.mubr.msk.bf16.gmra.mrb[136].mxu1 %vm2168_vm2, %v13490_v58 }
 0x2d5   : > { %v5245_v30 = vmax.f32 %v3859_v3, 0.0  ;;  %v10073_v18 = vsel %vm8098_vm4, %v9345_v22, 0.0  ;;  %v3862_v38 = vadd.f32 %v15132_v54, %v3861_v62  ;;  %v8535_v49 = vadd.f32 %v8534_v9, %v8533_v26  ;;  %v15442_v46 = vpop.f32.mrb[32].mxu1 }
 0x2d6   : > { %v10074_v50 = vadd.f32 %v10073_v18, %v10072_v16  ;;  %v12155_v51 = vpack.c.bf16 %v5247_v27, %v5247_v27  ;;  %v5248_v5 = vmax.f32 %v3870_v37, 0.0  ;;  %v10077_v9 = vsel %vm8098_vm4, %v9347_v35, 0.0 }
 0x2d7   : > { %v12153_v53 = vpack.c.bf16 %v5245_v30, %v5245_v30  ;;  %v8538_v62 = vsel %vm8098_vm4, %v5245_v30, 0.0  ;;  %v9348_v57 = vmul.f32 %v5245_v30, %v5245_v30  ;;  %v8537_v3 = vadd.f32 %v8536_v0, %v8535_v49 }
 0x2d8   : > { %v10076_v4 = vadd.f32 %v10075_v47, %v10074_v50  ;;  %7808 = vst.msk [vmem:[%s13964_s12 + $0x378] sm:$0xf] %vm7585_vm3, %v12155_v51  ;;  %v5246_v6 = vmax.f32 %v3862_v38, 0.0  ;;  %v9350_v16 = vmul.f32 %v5247_v27, %v5247_v27  ;;  %v12156_v30 = vpack.c.bf16 %v5248_v5, %v5248_v5  ;;  %v15446_v51 = vpop.f32.mrb[33].mxu1 }
 0x2d9   : > { %v12934_v40 = vpop.f32.mrb[224].mxu0  ;;  %7806 = vst.msk [vmem:[%s13964_s12 + $0x370] sm:$0xf] %vm7585_vm3, %v12153_v53  ;;  %v10079_v59 = vsel %vm8098_vm4, %v9348_v57, 0.0  ;;  %v8539_v26 = vadd.f32 %v8538_v62, %v8537_v3  ;;  %v8542_v18 = vsel %vm8098_vm4, %v5247_v27, 0.0  ;;  %v15453_v62 = vpop.f32.mrb[34].mxu1 }
 0x2da   : > { %v3874_v61 = vpop.f32.mrb[225].mxu0  ;;  %v3883_v13 = vadd.f32 %v15132_v54, %v12934_v40  ;;  %v10078_v22 = vadd.f32 %v10077_v9, %v10076_v4  ;;  %v12154_v37 = vpack.c.bf16 %v5246_v6, %v5246_v6  ;;  %v8540_v38 = vsel %vm8098_vm4, %v5246_v6, 0.0  ;;  %7809 = vst.msk [vmem:[%s13964_s12 + $0x37c] sm:$0xf] %vm7585_vm3, %v12156_v30  ;;  %v13491_v57 = vld [vmem:[%s13827_s11 + $0x630] sm:$0xff]  }
 0x2db   : > { %v12935_v1 = vpop.f32.mrb[226].mxu0  ;;  %v3875_v14 = vadd.f32 %v15132_v54, %v3874_v61  ;;  %v9349_v35 = vmul.f32 %v5246_v6, %v5246_v6  ;;  %v8541_v40 = vadd.f32 %v8540_v38, %v8539_v26  ;;  %v9351_v61 = vmul.f32 %v5248_v5, %v5248_v5  ;;  %13104 = vmatprep.mubr.msk.bf16.mxu1 %vm2168_vm2, %v13491_v57 }
 0x2dc   : > { %v3877_v7 = vpop.f32.mrb[227].mxu0  ;;  %v10080_v47 = vadd.f32 %v10079_v59, %v10078_v22  ;;  %v5251_v49 = vmax.f32 %v3883_v13, 0.0  ;;  %7807 = vst.msk [vmem:[%s13964_s12 + $0x374] sm:$0xf] %vm7585_vm3, %v12154_v37  ;;  %v3886_v58 = vadd.f32 %v15132_v54, %v12935_v1  ;;  %v10083_v3 = vsel %vm8098_vm4, %v9350_v16, 0.0  ;;  %v15457_v13 = vpop.f32.mrb[35].mxu1 }
 0x2dd   : > { %v5249_v50 = vmax.f32 %v3875_v14, 0.0  ;;  %v10081_v27 = vsel %vm8098_vm4, %v9349_v35, 0.0  ;;  %v3878_v0 = vadd.f32 %v15132_v54, %v3877_v7  ;;  %v8543_v4 = vadd.f32 %v8542_v18, %v8541_v40  ;;  %v13492_v14 = vld [vmem:[%s13827_s11 + $0x638] sm:$0xff]  }
 0x2de   : > { %v10082_v6 = vadd.f32 %v10081_v27, %v10080_v47  ;;  %v12159_v9 = vpack.c.bf16 %v5251_v49, %v5251_v49  ;;  %v8544_v22 = vsel %vm8098_vm4, %v5248_v5, 0.0  ;;  %v5252_v16 = vmax.f32 %v3886_v58, 0.0  ;;  %13105 = vmatmul.mubr.msk.bf16.gmra.mrb[140].mxu1 %vm2168_vm2, %v13492_v14  ;;  %v15473_v47 = vld [vmem:[%s17805_s2] ss:$0 sm:$0xff] }
 0x2df   : > { %v12157_v1 = vpack.c.bf16 %v5249_v50, %v5249_v50  ;;  %v8546_v54 = vsel %vm8098_vm4, %v5249_v50, 0.0  ;;  %v9352_v7 = vmul.f32 %v5249_v50, %v5249_v50  ;;  %v8545_v30 = vadd.f32 %v8544_v22, %v8543_v4 }
 0x2e0   : > { %v10084_v37 = vadd.f32 %v10083_v3, %v10082_v6  ;;  %7812 = vst.msk [vmem:[%s13964_s12 + $0x388] sm:$0xf] %vm7585_vm3, %v12159_v9  ;;  %v5250_v18 = vmax.f32 %v3878_v0, 0.0  ;;  %v10085_v35 = vsel %vm8098_vm4, %v9351_v61, 0.0  ;;  %v9354_v58 = vmul.f32 %v5251_v49, %v5251_v49  ;;  %v15479_v9 = vpop.f32.mrb[36].mxu1 }
 0x2e1   : > { %v12938_v53 = vpop.f32.mrb[228].mxu0  ;;  %7810 = vst.msk [vmem:[%s13964_s12 + $0x380] sm:$0xf] %vm7585_vm3, %v12157_v1  ;;  %v10087_v5 = vsel %vm8098_vm4, %v9352_v7, 0.0  ;;  %v8547_v0 = vadd.f32 %v8546_v54, %v8545_v30  ;;  %v12160_v57 = vpack.c.bf16 %v5252_v16, %v5252_v16  ;;  %v8550_v61 = vsel %vm8098_vm4, %v5251_v49, 0.0  ;;  %17816 = vst [vmem:[#allocation8_spill] sm:$0xff] %v15479_v9 }
 0x2e2   : > { %v3890_v59 = vpop.f32.mrb[229].mxu0  ;;  %v3899_v40 = vadd.f32 %v15473_v47, %v12938_v53  ;;  %v10086_v27 = vadd.f32 %v10085_v35, %v10084_v37  ;;  %v12158_v3 = vpack.c.bf16 %v5250_v18, %v5250_v18  ;;  %v8548_v4 = vsel %vm8098_vm4, %v5250_v18, 0.0  ;;  %v15483_v1 = vpop.f32.mrb[37].mxu1  ;;  %v13493_v35 = vld [vmem:[%s13827_s11 + $0x640] sm:$0xff]  }
 0x2e3   : > { %v12939_v26 = vpop.f32.mrb[230].mxu0  ;;  %v3891_v50 = vadd.f32 %v15473_v47, %v3890_v59  ;;  %v9353_v6 = vmul.f32 %v5250_v18, %v5250_v18  ;;  %7813 = vst.msk [vmem:[%s13964_s12 + $0x38c] sm:$0xf] %vm7585_vm3, %v12160_v57  ;;  %v8549_v53 = vadd.f32 %v8548_v4, %v8547_v0  ;;  %17817 = vst [vmem:[#allocation9_spill] sm:$0xff] %v15483_v1  ;;  %v15490_v18 = vpop.f32.mrb[38].mxu1  ;;  %v8552_v4 = vsel %vm8098_vm4, %v5252_v16, 0.0 }
 0x2e4   : > { %v3893_v38 = vpop.f32.mrb[231].mxu0  ;;  %v10088_v14 = vadd.f32 %v10087_v5, %v10086_v27  ;;  %v5255_v22 = vmax.f32 %v3899_v40, 0.0  ;;  %v9355_v54 = vmul.f32 %v5252_v16, %v5252_v16  ;;  %7811 = vst.msk [vmem:[%s13964_s12 + $0x384] sm:$0xf] %vm7585_vm3, %v12158_v3  ;;  %v3902_v7 = vadd.f32 %v15473_v47, %v12939_v26  ;;  %17818 = vst [vmem:[#allocation10_spill] sm:$0xff] %v15490_v18  ;;  %v15494_v57 = vpop.f32.mrb[39].mxu1 }
 0x2e5   : > { %v5253_v59 = vmax.f32 %v3891_v50, 0.0  ;;  %v10089_v49 = vsel %vm8098_vm4, %v9353_v6, 0.0  ;;  %v3894_v30 = vadd.f32 %v15473_v47, %v3893_v38  ;;  %v10091_v5 = vsel %vm8098_vm4, %v9354_v58, 0.0  ;;  %17819 = vst [vmem:[#allocation11_spill] sm:$0xff] %v15494_v57  ;;  %v13494_v3 = vld [vmem:[%s13827_s11 + $0x648] sm:$0xff]   ;;  %13108 = vmatprep.mubr.msk.bf16.mxu1 %vm2168_vm2, %v13493_v35 }
 0x2e6   : > { %v8551_v40 = vadd.f32 %v8550_v61, %v8549_v53  ;;  %v10090_v50 = vadd.f32 %v10089_v49, %v10088_v14  ;;  %v12163_v27 = vpack.c.bf16 %v5255_v22, %v5255_v22  ;;  %v5256_v58 = vmax.f32 %v3902_v7, 0.0  ;;  %13109 = vmatmul.mubr.msk.bf16.gmra.mrb[144].mxu1 %vm2168_vm2, %v13494_v3  ;;  %v15511_v3 = vpop.f32.mrb[40].mxu1 }
 0x2e7   : > { %v12161_v26 = vpack.c.bf16 %v5253_v59, %v5253_v59  ;;  %v8554_v38 = vsel %vm8098_vm4, %v5253_v59, 0.0  ;;  %v9356_v6 = vmul.f32 %v5253_v59, %v5253_v59  ;;  %v5254_v61 = vmax.f32 %v3894_v30, 0.0  ;;  %17820 = vst [vmem:[#allocation12_spill] sm:$0xff] %v15511_v3 }
 0x2e8   : > { %v8553_v18 = vadd.f32 %v8552_v4, %v8551_v40  ;;  %v10092_v9 = vadd.f32 %v10091_v5, %v10090_v50  ;;  %7816 = vst.msk [vmem:[%s13964_s12 + $0x398] sm:$0xf] %vm7585_vm3, %v12163_v27  ;;  %v10093_v53 = vsel %vm8098_vm4, %v9355_v54, 0.0  ;;  %v9358_v5 = vmul.f32 %v5255_v22, %v5255_v22 }
 0x2e9   : > { %v12942_v37 = vpop.f32.mrb[232].mxu0  ;;  %7814 = vst.msk [vmem:[%s13964_s12 + $0x390] sm:$0xf] %vm7585_vm3, %v12161_v26  ;;  %v10095_v16 = vsel %vm8098_vm4, %v9356_v6, 0.0  ;;  %v12164_v7 = vpack.c.bf16 %v5256_v58, %v5256_v58  ;;  %v8558_v30 = vsel %vm8098_vm4, %v5255_v22, 0.0  ;;  %v12162_v50 = vpack.c.bf16 %v5254_v61, %v5254_v61 }
 0x2ea   : > { %v3906_v0 = vpop.f32.mrb[233].mxu0  ;;  %v3915_v59 = vadd.f32 %v15473_v47, %v12942_v37  ;;  %v10094_v35 = vadd.f32 %v10093_v53, %v10092_v9  ;;  %v8555_v40 = vadd.f32 %v8554_v38, %v8553_v18  ;;  %v8556_v27 = vsel %vm8098_vm4, %v5254_v61, 0.0  ;;  %v15515_v9 = vpop.f32.mrb[41].mxu1 }
 0x2eb   : > { %v12943_v1 = vpop.f32.mrb[234].mxu0  ;;  %v3907_v49 = vadd.f32 %v15473_v47, %v3906_v0  ;;  %v9357_v54 = vmul.f32 %v5254_v61, %v5254_v61  ;;  %7817 = vst.msk [vmem:[%s13964_s12 + $0x39c] sm:$0xf] %vm7585_vm3, %v12164_v7  ;;  %17821 = vst [vmem:[#allocation13_spill] sm:$0xff] %v15515_v9  ;;  %v9359_v18 = vmul.f32 %v5256_v58, %v5256_v58  ;;  %v15522_v53 = vpop.f32.mrb[42].mxu1 }
 0x2ec   : > { %v3909_v14 = vpop.f32.mrb[235].mxu0  ;;  %v10096_v4 = vadd.f32 %v10095_v16, %v10094_v35  ;;  %v8557_v37 = vadd.f32 %v8556_v27, %v8555_v40  ;;  %v5259_v26 = vmax.f32 %v3915_v59, 0.0  ;;  %7815 = vst.msk [vmem:[%s13964_s12 + $0x394] sm:$0xf] %vm7585_vm3, %v12162_v50  ;;  %v3918_v38 = vadd.f32 %v15473_v47, %v12943_v1  ;;  %17822 = vst [vmem:[#allocation14_spill] sm:$0xff] %v15522_v53  ;;  %v13495_v16 = vld [vmem:[%s13827_s11 + $0x650] sm:$0xff]  }
 0x2ed   : > { %v5257_v0 = vmax.f32 %v3907_v49, 0.0  ;;  %v10097_v22 = vsel %vm8098_vm4, %v9357_v54, 0.0  ;;  %v3910_v6 = vadd.f32 %v15473_v47, %v3909_v14  ;;  %v10099_v59 = vsel %vm8098_vm4, %v9358_v5, 0.0  ;;  %v15526_v27 = vpop.f32.mrb[43].mxu1  ;;  %v13496_v50 = vld [vmem:[%s13827_s11 + $0x658] sm:$0xff]   ;;  %13112 = vmatprep.mubr.msk.bf16.mxu1 %vm2168_vm2, %v13495_v16 }
 0x2ee   : > { %v8559_v49 = vadd.f32 %v8558_v30, %v8557_v37  ;;  %v10098_v35 = vadd.f32 %v10097_v22, %v10096_v4  ;;  %v12167_v40 = vpack.c.bf16 %v5259_v26, %v5259_v26  ;;  %17823 = vst [vmem:[#allocation15_spill] sm:$0xff] %v15526_v27  ;;  %v8560_v54 = vsel %vm8098_vm4, %v5256_v58, 0.0  ;;  %13113 = vmatmul.mubr.msk.bf16.gmra.mrb[148].mxu1 %vm2168_vm2, %v13496_v50  ;;  %v15543_v50 = vpop.f32.mrb[44].mxu1 }
 0x2ef   : > { %v12165_v1 = vpack.c.bf16 %v5257_v0, %v5257_v0  ;;  %v8562_v14 = vsel %vm8098_vm4, %v5257_v0, 0.0  ;;  %v9360_v9 = vmul.f32 %v5257_v0, %v5257_v0  ;;  %v5260_v5 = vmax.f32 %v3918_v38, 0.0  ;;  %17824 = vst [vmem:[#allocation16_spill] sm:$0xff] %v15543_v50 }
 0x2f0   : > { %v8561_v53 = vadd.f32 %v8560_v54, %v8559_v49  ;;  %v10100_v57 = vadd.f32 %v10099_v59, %v10098_v35  ;;  %7820 = vst.msk [vmem:[%s13964_s12 + $0x3a8] sm:$0xf] %vm7585_vm3, %v12167_v40  ;;  %v5258_v30 = vmax.f32 %v3910_v6, 0.0  ;;  %v10101_v37 = vsel %vm8098_vm4, %v9359_v18, 0.0 }
 0x2f1   : > { %v12946_v61 = vpop.f32.mrb[236].mxu0  ;;  %7818 = vst.msk [vmem:[%s13964_s12 + $0x3a0] sm:$0xf] %vm7585_vm3, %v12165_v1  ;;  %v10103_v58 = vsel %vm8098_vm4, %v9360_v9, 0.0  ;;  %v9362_v59 = vmul.f32 %v5259_v26, %v5259_v26  ;;  %v12168_v38 = vpack.c.bf16 %v5260_v5, %v5260_v5  ;;  %v8566_v6 = vsel %vm8098_vm4, %v5259_v26, 0.0 }
 0x2f2   : > { %v3922_v7 = vpop.f32.mrb[237].mxu0  ;;  %v3931_v0 = vadd.f32 %v15473_v47, %v12946_v61  ;;  %v10102_v16 = vadd.f32 %v10101_v37, %v10100_v57  ;;  %v8563_v49 = vadd.f32 %v8562_v14, %v8561_v53  ;;  %v12166_v35 = vpack.c.bf16 %v5258_v30, %v5258_v30  ;;  %v15547_v57 = vpop.f32.mrb[45].mxu1 }
 0x2f3   : > { %v12947_v3 = vpop.f32.mrb[238].mxu0  ;;  %v3923_v22 = vadd.f32 %v15473_v47, %v3922_v7  ;;  %v8564_v40 = vsel %vm8098_vm4, %v5258_v30, 0.0  ;;  %v9361_v18 = vmul.f32 %v5258_v30, %v5258_v30  ;;  %7821 = vst.msk [vmem:[%s13964_s12 + $0x3ac] sm:$0xf] %vm7585_vm3, %v12168_v38  ;;  %17825 = vst [vmem:[#allocation17_spill] sm:$0xff] %v15547_v57  ;;  %v9363_v53 = vmul.f32 %v5260_v5, %v5260_v5  ;;  %v15554_v37 = vpop.f32.mrb[46].mxu1 }
 0x2f4   : > { %v3925_v4 = vpop.f32.mrb[239].mxu0  ;;  %v10104_v54 = vadd.f32 %v10103_v58, %v10102_v16  ;;  %v8565_v9 = vadd.f32 %v8564_v40, %v8563_v49  ;;  %v5263_v61 = vmax.f32 %v3931_v0, 0.0  ;;  %7819 = vst.msk [vmem:[%s13964_s12 + $0x3a4] sm:$0xf] %vm7585_vm3, %v12166_v35  ;;  %v3934_v1 = vadd.f32 %v15473_v47, %v12947_v3  ;;  %17826 = vst [vmem:[#allocation18_spill] sm:$0xff] %v15554_v37  ;;  %v13497_v58 = vld [vmem:[%s13827_s11 + $0x660] sm:$0xff]  }
 0x2f5   : > { %v5261_v7 = vmax.f32 %v3923_v22, 0.0  ;;  %v10105_v26 = vsel %vm8098_vm4, %v9361_v18, 0.0  ;;  %v3926_v14 = vadd.f32 %v15473_v47, %v3925_v4  ;;  %v10107_v0 = vsel %vm8098_vm4, %v9362_v59, 0.0  ;;  %v15558_v40 = vpop.f32.mrb[47].mxu1  ;;  %v13498_v35 = vld [vmem:[%s13827_s11 + $0x668] sm:$0xff]   ;;  %13116 = vmatprep.mubr.msk.bf16.mxu1 %vm2168_vm2, %v13497_v58 }
 0x2f6   : > { %v8567_v22 = vadd.f32 %v8566_v6, %v8565_v9  ;;  %v10106_v16 = vadd.f32 %v10105_v26, %v10104_v54  ;;  %v12171_v49 = vpack.c.bf16 %v5263_v61, %v5263_v61  ;;  %17827 = vst [vmem:[#allocation19_spill] sm:$0xff] %v15558_v40  ;;  %v8568_v18 = vsel %vm8098_vm4, %v5260_v5, 0.0  ;;  %13117 = vmatmul.mubr.msk.bf16.gmra.mrb[152].mxu1 %vm2168_vm2, %v13498_v35  ;;  %v15575_v35 = vpop.f32.mrb[48].mxu1 }
 0x2f7   : > { %v12169_v3 = vpack.c.bf16 %v5261_v7, %v5261_v7  ;;  %v8570_v4 = vsel %vm8098_vm4, %v5261_v7, 0.0  ;;  %v9364_v57 = vmul.f32 %v5261_v7, %v5261_v7  ;;  %v5264_v59 = vmax.f32 %v3934_v1, 0.0  ;;  %17828 = vst [vmem:[#allocation20_spill] sm:$0xff] %v15575_v35 }
 0x2f8   : > { %v8569_v37 = vadd.f32 %v8568_v18, %v8567_v22  ;;  %v10108_v27 = vadd.f32 %v10107_v0, %v10106_v16  ;;  %7824 = vst.msk [vmem:[%s13964_s12 + $0x3b8] sm:$0xf] %vm7585_vm3, %v12171_v49  ;;  %v5262_v6 = vmax.f32 %v3926_v14, 0.0  ;;  %v10109_v9 = vsel %vm8098_vm4, %v9363_v53, 0.0 }
 0x2f9   : > { %v12950_v30 = vpop.f32.mrb[240].mxu0  ;;  %7822 = vst.msk [vmem:[%s13964_s12 + $0x3b0] sm:$0xf] %vm7585_vm3, %v12169_v3  ;;  %v10111_v5 = vsel %vm8098_vm4, %v9364_v57, 0.0  ;;  %v9366_v0 = vmul.f32 %v5263_v61, %v5263_v61  ;;  %v12172_v1 = vpack.c.bf16 %v5264_v59, %v5264_v59  ;;  %v8574_v14 = vsel %vm8098_vm4, %v5263_v61, 0.0 }
 0x2fa   : > { %v3938_v38 = vpop.f32.mrb[241].mxu0  ;;  %v3947_v7 = vadd.f32 %v15473_v47, %v12950_v30  ;;  %v10110_v58 = vadd.f32 %v10109_v9, %v10108_v27  ;;  %v8571_v22 = vadd.f32 %v8570_v4, %v8569_v37  ;;  %v12170_v16 = vpack.c.bf16 %v5262_v6, %v5262_v6  ;;  %v15579_v27 = vpop.f32.mrb[49].mxu1 }
 0x2fb   : > { %v12951_v50 = vpop.f32.mrb[242].mxu0  ;;  %v3939_v26 = vadd.f32 %v15473_v47, %v3938_v38  ;;  %v8572_v49 = vsel %vm8098_vm4, %v5262_v6, 0.0  ;;  %v9365_v53 = vmul.f32 %v5262_v6, %v5262_v6  ;;  %7825 = vst.msk [vmem:[%s13964_s12 + $0x3bc] sm:$0xf] %vm7585_vm3, %v12172_v1  ;;  %17829 = vst [vmem:[#allocation21_spill] sm:$0xff] %v15579_v27  ;;  %v9367_v37 = vmul.f32 %v5264_v59, %v5264_v59  ;;  %v15586_v9 = vpop.f32.mrb[50].mxu1 }
 0x2fc   : > { %v3941_v54 = vpop.f32.mrb[243].mxu0  ;;  %v10112_v18 = vadd.f32 %v10111_v5, %v10110_v58  ;;  %v8573_v57 = vadd.f32 %v8572_v49, %v8571_v22  ;;  %v5267_v30 = vmax.f32 %v3947_v7, 0.0  ;;  %7823 = vst.msk [vmem:[%s13964_s12 + $0x3b4] sm:$0xf] %vm7585_vm3, %v12170_v16  ;;  %v3950_v3 = vadd.f32 %v15473_v47, %v12951_v50  ;;  %17830 = vst [vmem:[#allocation22_spill] sm:$0xff] %v15586_v9  ;;  %v13499_v5 = vld [vmem:[%s13827_s11 + $0x670] sm:$0xff]  }
 0x2fd   : > { %v5265_v38 = vmax.f32 %v3939_v26, 0.0  ;;  %v10113_v61 = vsel %vm8098_vm4, %v9365_v53, 0.0  ;;  %v3942_v4 = vadd.f32 %v15473_v47, %v3941_v54  ;;  %v10115_v7 = vsel %vm8098_vm4, %v9366_v0, 0.0  ;;  %v15590_v49 = vpop.f32.mrb[51].mxu1  ;;  %v13500_v16 = vld [vmem:[%s13827_s11 + $0x678] sm:$0xff]   ;;  %13120 = vmatprep.mubr.msk.bf16.mxu1 %vm2168_vm2, %v13499_v5 }
 0x2fe   : > { %v8575_v26 = vadd.f32 %v8574_v14, %v8573_v57  ;;  %v10114_v58 = vadd.f32 %v10113_v61, %v10112_v18  ;;  %v12175_v22 = vpack.c.bf16 %v5267_v30, %v5267_v30  ;;  %17831 = vst [vmem:[#allocation23_spill] sm:$0xff] %v15590_v49  ;;  %v8576_v53 = vsel %vm8098_vm4, %v5264_v59, 0.0  ;;  %13121 = vmatmul.mubr.msk.bf16.gmra.mrb[156].mxu1 %vm2168_vm2, %v13500_v16  ;;  %v15607_v16 = vpop.f32.mrb[52].mxu1 }
 0x2ff   : > { %v12173_v50 = vpack.c.bf16 %v5265_v38, %v5265_v38  ;;  %v8578_v54 = vsel %vm8098_vm4, %v5265_v38, 0.0  ;;  %v9368_v27 = vmul.f32 %v5265_v38, %v5265_v38  ;;  %v5268_v0 = vmax.f32 %v3950_v3, 0.0  ;;  %17832 = vst [vmem:[#allocation24_spill] sm:$0xff] %v15607_v16 }
 0x300   : > { %v8577_v9 = vadd.f32 %v8576_v53, %v8575_v26  ;;  %v10116_v40 = vadd.f32 %v10115_v7, %v10114_v58  ;;  %7828 = vst.msk [vmem:[%s13964_s12 + $0x3c8] sm:$0xf] %vm7585_vm3, %v12175_v22  ;;  %v5266_v14 = vmax.f32 %v3942_v4, 0.0  ;;  %v10117_v57 = vsel %vm8098_vm4, %v9367_v37, 0.0 }
 0x301   : > { %v12954_v6 = vpop.f32.mrb[244].mxu0  ;;  %7826 = vst.msk [vmem:[%s13964_s12 + $0x3c0] sm:$0xf] %vm7585_vm3, %v12173_v50  ;;  %v10119_v59 = vsel %vm8098_vm4, %v9368_v27, 0.0  ;;  %v9370_v7 = vmul.f32 %v5267_v30, %v5267_v30  ;;  %v12176_v3 = vpack.c.bf16 %v5268_v0, %v5268_v0  ;;  %v8582_v4 = vsel %vm8098_vm4, %v5267_v30, 0.0 }
 0x302   : > { %v3954_v1 = vpop.f32.mrb[245].mxu0  ;;  %v3963_v38 = vadd.f32 %v15473_v47, %v12954_v6  ;;  %v10118_v5 = vadd.f32 %v10117_v57, %v10116_v40  ;;  %v8579_v26 = vadd.f32 %v8578_v54, %v8577_v9  ;;  %v12174_v58 = vpack.c.bf16 %v5266_v14, %v5266_v14  ;;  %v15611_v40 = vpop.f32.mrb[53].mxu1 }
 0x303   : > { %v12955_v35 = vpop.f32.mrb[246].mxu0  ;;  %v3955_v61 = vadd.f32 %v15473_v47, %v3954_v1  ;;  %v8580_v22 = vsel %vm8098_vm4, %v5266_v14, 0.0  ;;  %v9369_v37 = vmul.f32 %v5266_v14, %v5266_v14  ;;  %7829 = vst.msk [vmem:[%s13964_s12 + $0x3cc] sm:$0xf] %vm7585_vm3, %v12176_v3  ;;  %17833 = vst [vmem:[#allocation25_spill] sm:$0xff] %v15611_v40  ;;  %v9371_v9 = vmul.f32 %v5268_v0, %v5268_v0  ;;  %v15618_v57 = vpop.f32.mrb[54].mxu1 }
 0x304   : > { %v3957_v18 = vpop.f32.mrb[247].mxu0  ;;  %v10120_v53 = vadd.f32 %v10119_v59, %v10118_v5  ;;  %v8581_v27 = vadd.f32 %v8580_v22, %v8579_v26  ;;  %v5271_v6 = vmax.f32 %v3963_v38, 0.0  ;;  %7827 = vst.msk [vmem:[%s13964_s12 + $0x3c4] sm:$0xf] %vm7585_vm3, %v12174_v58  ;;  %v3966_v50 = vadd.f32 %v15473_v47, %v12955_v35  ;;  %17834 = vst [vmem:[#allocation26_spill] sm:$0xff] %v15618_v57  ;;  %v13501_v59 = vld [vmem:[%s13827_s11 + $0x680] sm:$0xff]  }
 0x305   : > { %v5269_v1 = vmax.f32 %v3955_v61, 0.0  ;;  %v10121_v30 = vsel %vm8098_vm4, %v9369_v37, 0.0  ;;  %v3958_v54 = vadd.f32 %v15473_v47, %v3957_v18  ;;  %v10123_v38 = vsel %vm8098_vm4, %v9370_v7, 0.0  ;;  %v15622_v22 = vpop.f32.mrb[55].mxu1  ;;  %v13502_v58 = vld [vmem:[%s13827_s11 + $0x688] sm:$0xff]   ;;  %13124 = vmatprep.mubr.msk.bf16.mxu1 %vm2168_vm2, %v13501_v59 }
 0x306   : > { %v8583_v61 = vadd.f32 %v8582_v4, %v8581_v27  ;;  %v10122_v5 = vadd.f32 %v10121_v30, %v10120_v53  ;;  %v12179_v26 = vpack.c.bf16 %v5271_v6, %v5271_v6  ;;  %17835 = vst [vmem:[#allocation27_spill] sm:$0xff] %v15622_v22  ;;  %v8584_v37 = vsel %vm8098_vm4, %v5268_v0, 0.0  ;;  %13125 = vmatmul.mubr.msk.bf16.gmra.mrb[160].mxu1 %vm2168_vm2, %v13502_v58  ;;  %v15639_v58 = vpop.f32.mrb[56].mxu1 }
 0x307   : > { %v12177_v35 = vpack.c.bf16 %v5269_v1, %v5269_v1  ;;  %v8586_v18 = vsel %vm8098_vm4, %v5269_v1, 0.0  ;;  %v9372_v40 = vmul.f32 %v5269_v1, %v5269_v1  ;;  %v5272_v7 = vmax.f32 %v3966_v50, 0.0  ;;  %17836 = vst [vmem:[#allocation28_spill] sm:$0xff] %v15639_v58 }
 0x308   : > { %v8585_v57 = vadd.f32 %v8584_v37, %v8583_v61  ;;  %v10124_v49 = vadd.f32 %v10123_v38, %v10122_v5  ;;  %7832 = vst.msk [vmem:[%s13964_s12 + $0x3d8] sm:$0xf] %vm7585_vm3, %v12179_v26  ;;  %v5270_v4 = vmax.f32 %v3958_v54, 0.0  ;;  %v10125_v27 = vsel %vm8098_vm4, %v9371_v9, 0.0 }
 0x309   : > { %v12958_v14 = vpop.f32.mrb[248].mxu0  ;;  %7830 = vst.msk [vmem:[%s13964_s12 + $0x3d0] sm:$0xf] %vm7585_vm3, %v12177_v35  ;;  %v10127_v0 = vsel %vm8098_vm4, %v9372_v40, 0.0  ;;  %v9374_v38 = vmul.f32 %v5271_v6, %v5271_v6  ;;  %v12180_v50 = vpack.c.bf16 %v5272_v7, %v5272_v7  ;;  %v8590_v54 = vsel %vm8098_vm4, %v5271_v6, 0.0 }
 0x30a   : > { %v3970_v3 = vpop.f32.mrb[249].mxu0  ;;  %v3979_v1 = vadd.f32 %v15473_v47, %v12958_v14  ;;  %v10126_v59 = vadd.f32 %v10125_v27, %v10124_v49  ;;  %v8587_v61 = vadd.f32 %v8586_v18, %v8585_v57  ;;  %v12178_v5 = vpack.c.bf16 %v5270_v4, %v5270_v4  ;;  %v15643_v49 = vpop.f32.mrb[57].mxu1 }
 0x30b   : > { %v12959_v16 = vpop.f32.mrb[250].mxu0  ;;  %v3971_v30 = vadd.f32 %v15473_v47, %v3970_v3  ;;  %v8588_v26 = vsel %vm8098_vm4, %v5270_v4, 0.0  ;;  %v9373_v9 = vmul.f32 %v5270_v4, %v5270_v4  ;;  %7833 = vst.msk [vmem:[%s13964_s12 + $0x3dc] sm:$0xf] %vm7585_vm3, %v12180_v50  ;;  %17837 = vst [vmem:[#allocation29_spill] sm:$0xff] %v15643_v49  ;;  %v9375_v57 = vmul.f32 %v5272_v7, %v5272_v7  ;;  %v15650_v27 = vpop.f32.mrb[58].mxu1 }
 0x30c   : > { %v3973_v53 = vpop.f32.mrb[251].mxu0  ;;  %v10128_v37 = vadd.f32 %v10127_v0, %v10126_v59  ;;  %v8589_v40 = vadd.f32 %v8588_v26, %v8587_v61  ;;  %v5275_v14 = vmax.f32 %v3979_v1, 0.0  ;;  %7831 = vst.msk [vmem:[%s13964_s12 + $0x3d4] sm:$0xf] %vm7585_vm3, %v12178_v5  ;;  %v3982_v35 = vadd.f32 %v15473_v47, %v12959_v16  ;;  %17838 = vst [vmem:[#allocation30_spill] sm:$0xff] %v15650_v27  ;;  %v13503_v0 = vld [vmem:[%s13827_s11 + $0x690] sm:$0xff]  }
 0x30d   : > { %v5273_v3 = vmax.f32 %v3971_v30, 0.0  ;;  %v10129_v6 = vsel %vm8098_vm4, %v9373_v9, 0.0  ;;  %v3974_v18 = vadd.f32 %v15473_v47, %v3973_v53  ;;  %v10131_v1 = vsel %vm8098_vm4, %v9374_v38, 0.0  ;;  %v15654_v26 = vpop.f32.mrb[59].mxu1  ;;  %v13504_v5 = vld [vmem:[%s13827_s11 + $0x698] sm:$0xff]   ;;  %13128 = vmatprep.mubr.msk.bf16.mxu1 %vm2168_vm2, %v13503_v0 }
 0x30e   : > { %v8591_v30 = vadd.f32 %v8590_v54, %v8589_v40  ;;  %v10130_v59 = vadd.f32 %v10129_v6, %v10128_v37  ;;  %v12183_v61 = vpack.c.bf16 %v5275_v14, %v5275_v14  ;;  %v8592_v9 = vsel %vm8098_vm4, %v5272_v7, 0.0  ;;  %13129 = vmatmul.mubr.msk.bf16.gmra.mrb[164].mxu1 %vm2168_vm2, %v13504_v5  ;;  %v15671_v5 = vpop.f32.mrb[60].mxu1 }
 0x30f   : > { %v12181_v16 = vpack.c.bf16 %v5273_v3, %v5273_v3  ;;  %v8594_v53 = vsel %vm8098_vm4, %v5273_v3, 0.0  ;;  %v9376_v49 = vmul.f32 %v5273_v3, %v5273_v3  ;;  %v5276_v38 = vmax.f32 %v3982_v35, 0.0 }
 0x310   : > { %v8593_v27 = vadd.f32 %v8592_v9, %v8591_v30  ;;  %v10132_v22 = vadd.f32 %v10131_v1, %v10130_v59  ;;  %7836 = vst.msk [vmem:[%s13964_s12 + $0x3e8] sm:$0xf] %vm7585_vm3, %v12183_v61  ;;  %v5274_v54 = vmax.f32 %v3974_v18, 0.0  ;;  %v10133_v40 = vsel %vm8098_vm4, %v9375_v57, 0.0 }
 0x311   : > { %v12962_v4 = vpop.f32.mrb[252].mxu0  ;;  %7834 = vst.msk [vmem:[%s13964_s12 + $0x3e0] sm:$0xf] %vm7585_vm3, %v12181_v16  ;;  %v10135_v7 = vsel %vm8098_vm4, %v9376_v49, 0.0  ;;  %v9378_v1 = vmul.f32 %v5275_v14, %v5275_v14  ;;  %v12184_v35 = vpack.c.bf16 %v5276_v38, %v5276_v38  ;;  %v8598_v18 = vsel %vm8098_vm4, %v5275_v14, 0.0 }
 0x312   : > { %v3986_v50 = vpop.f32.mrb[253].mxu0  ;;  %v3995_v3 = vadd.f32 %v15473_v47, %v12962_v4  ;;  %v10134_v0 = vadd.f32 %v10133_v40, %v10132_v22  ;;  %v8595_v30 = vadd.f32 %v8594_v53, %v8593_v27  ;;  %v12182_v59 = vpack.c.bf16 %v5274_v54, %v5274_v54  ;;  %v13505_v40 = vld [vmem:[%s13827_s11 + $0x6a0] sm:$0xff]  }
 0x313   : > { %v12963_v58 = vpop.f32.mrb[254].mxu0  ;;  %v3987_v6 = vadd.f32 %v15473_v47, %v3986_v50  ;;  %v8596_v61 = vsel %vm8098_vm4, %v5274_v54, 0.0  ;;  %v9377_v57 = vmul.f32 %v5274_v54, %v5274_v54  ;;  %7837 = vst.msk [vmem:[%s13964_s12 + $0x3ec] sm:$0xf] %vm7585_vm3, %v12184_v35  ;;  %v15675_v50 = vpop.f32.mrb[61].mxu1  ;;  %v9379_v27 = vmul.f32 %v5276_v38, %v5276_v38  ;;  %v13506_v35 = vld [vmem:[%s13827_s11 + $0x6a8] sm:$0xff]   ;;  %13132 = vmatprep.mubr.msk.bf16.mxu1 %vm2168_vm2, %v13505_v40 }
 0x314   : > { %v3989_v37 = vpop.f32.mrb[255].mxu0  ;;  %v10136_v9 = vadd.f32 %v10135_v7, %v10134_v0  ;;  %v8597_v49 = vadd.f32 %v8596_v61, %v8595_v30  ;;  %v5279_v4 = vmax.f32 %v3995_v3, 0.0  ;;  %7835 = vst.msk [vmem:[%s13964_s12 + $0x3e4] sm:$0xf] %vm7585_vm3, %v12182_v59  ;;  %v3998_v16 = vadd.f32 %v15473_v47, %v12963_v58  ;;  %v15682_v54 = vpop.f32.mrb[62].mxu1 }
 0x315   : > { %v5277_v22 = vmax.f32 %v3987_v6, 0.0  ;;  %v10137_v14 = vsel %vm8098_vm4, %v9377_v57, 0.0  ;;  %v3990_v53 = vadd.f32 %v15473_v47, %v3989_v37  ;;  %17839 = vst [vmem:[#allocation31_spill] sm:$0xff] %v15682_v54  ;;  %v10139_v7 = vsel %vm8098_vm4, %v9378_v1, 0.0  ;;  %v15686_v30 = vpop.f32.mrb[63].mxu1 }
 0x316   : > { %v8599_v0 = vadd.f32 %v8598_v18, %v8597_v49  ;;  %v10138_v3 = vadd.f32 %v10137_v14, %v10136_v9  ;;  %v12187_v6 = vpack.c.bf16 %v5279_v4, %v5279_v4  ;;  %v8600_v59 = vsel %vm8098_vm4, %v5276_v38, 0.0  ;;  %13133 = vmatmul.mubr.msk.bf16.gmra.mrb[168].mxu1 %vm2168_vm2, %v13506_v35 }
 0x317   : > { %v12185_v61 = vpack.c.bf16 %v5277_v22, %v5277_v22  ;;  %v8602_v58 = vsel %vm8098_vm4, %v5277_v22, 0.0  ;;  %v9380_v57 = vmul.f32 %v5277_v22, %v5277_v22  ;;  %v5280_v1 = vmax.f32 %v3998_v16, 0.0 }
 0x318   : > { %v8601_v37 = vadd.f32 %v8600_v59, %v8599_v0  ;;  %v10140_v54 = vadd.f32 %v10139_v7, %v10138_v3  ;;  %7840 = vst.msk [vmem:[%s13964_s12 + $0x3f8] sm:$0xf] %vm7585_vm3, %v12187_v6  ;;  %v5278_v18 = vmax.f32 %v3990_v53, 0.0  ;;  %v10141_v9 = vsel %vm8098_vm4, %v9379_v27, 0.0  ;;  %v15705_v6 = vpop.f32.mrb[64].mxu1 }
 0x319   : > { %7838 = vst.msk [vmem:[%s13964_s12 + $0x3f0] sm:$0xf] %vm7585_vm3, %v12185_v61  ;;  %v10143_v38 = vsel %vm8098_vm4, %v9380_v57, 0.0  ;;  %v4011_v49 = vadd.f32 %v15473_v47, %v15184_v10  ;;  %v4003_v22 = vadd.f32 %v15473_v47, %v15186_v15  ;;  %v9382_v40 = vmul.f32 %v5279_v4, %v5279_v4  ;;  %v15709_v59 = vpop.f32.mrb[65].mxu1 }
 0x31a   : > { %v10142_v14 = vadd.f32 %v10141_v9, %v10140_v54  ;;  %v8603_v16 = vadd.f32 %v8602_v58, %v8601_v37  ;;  %v12188_v53 = vpack.c.bf16 %v5280_v1, %v5280_v1  ;;  %v8606_v7 = vsel %vm8098_vm4, %v5279_v4, 0.0  ;;  %v15718_v37 = vpop.f32.mrb[66].mxu1 }
 0x31b   : > { %v12186_v0 = vpack.c.bf16 %v5278_v18, %v5278_v18  ;;  %v8604_v27 = vsel %vm8098_vm4, %v5278_v18, 0.0  ;;  %v9381_v3 = vmul.f32 %v5278_v18, %v5278_v18  ;;  %v5283_v15 = vmax.f32 %v4011_v49, 0.0  ;;  %v13507_v18 = vld [vmem:[%s13827_s11 + $0x6b0] sm:$0xff]  }
 0x31c   : > { %v10144_v35 = vadd.f32 %v10143_v38, %v10142_v14  ;;  %7841 = vst.msk [vmem:[%s13964_s12 + $0x3fc] sm:$0xf] %vm7585_vm3, %v12188_v53  ;;  %v8605_v10 = vadd.f32 %v8604_v27, %v8603_v16  ;;  %v5281_v54 = vmax.f32 %v4003_v22, 0.0  ;;  %v9383_v61 = vmul.f32 %v5280_v1, %v5280_v1  ;;  %v15722_v14 = vpop.f32.mrb[67].mxu1  ;;  %v13508_v16 = vld [vmem:[%s13827_s11 + $0x6b8] sm:$0xff]   ;;  %13136 = vmatprep.mubr.msk.bf16.mxu1 %vm2168_vm2, %v13507_v18 }
 0x31d   : > { %7839 = vst.msk [vmem:[%s13964_s12 + $0x3f4] sm:$0xf] %vm7585_vm3, %v12186_v0  ;;  %v10145_v4 = vsel %vm8098_vm4, %v9381_v3, 0.0  ;;  %v4014_v58 = vadd.f32 %v15473_v47, %v15190_v20  ;;  %v4006_v57 = vadd.f32 %v15473_v47, %v15201_v36  ;;  %v10147_v9 = vsel %vm8098_vm4, %v9382_v40, 0.0 }
 0x31e   : > { %v8607_v38 = vadd.f32 %v8606_v7, %v8605_v10  ;;  %v10146_v49 = vadd.f32 %v10145_v4, %v10144_v35  ;;  %v12191_v22 = vpack.c.bf16 %v5283_v15, %v5283_v15  ;;  %v8608_v53 = vsel %vm8098_vm4, %v5280_v1, 0.0  ;;  %13137 = vmatmul.mubr.msk.bf16.gmra.mrb[172].mxu1 %vm2168_vm2, %v13508_v16 }
 0x31f   : > { %v12189_v0 = vpack.c.bf16 %v5281_v54, %v5281_v54  ;;  %v8610_v20 = vsel %vm8098_vm4, %v5281_v54, 0.0  ;;  %v9384_v27 = vmul.f32 %v5281_v54, %v5281_v54  ;;  %v5284_v40 = vmax.f32 %v4014_v58, 0.0 }
 0x320   : > { %v8609_v36 = vadd.f32 %v8608_v53, %v8607_v38  ;;  %v10148_v3 = vadd.f32 %v10147_v9, %v10146_v49  ;;  %7844 = vst.msk [vmem:[%s13964_s12 + $0x408] sm:$0xf] %vm7585_vm3, %v12191_v22  ;;  %v5282_v7 = vmax.f32 %v4006_v57, 0.0  ;;  %v10149_v35 = vsel %vm8098_vm4, %v9383_v61, 0.0  ;;  %v15741_v22 = vpop.f32.mrb[68].mxu1 }
 0x321   : > { %7842 = vst.msk [vmem:[%s13964_s12 + $0x400] sm:$0xf] %vm7585_vm3, %v12189_v0  ;;  %v10151_v1 = vsel %vm8098_vm4, %v9384_v27, 0.0  ;;  %v4027_v10 = vadd.f32 %v15473_v47, %v15218_v60  ;;  %v4019_v54 = vadd.f32 %v15473_v47, %v15222_v2  ;;  %v9386_v18 = vmul.f32 %v5283_v15, %v5283_v15  ;;  %v15745_v0 = vpop.f32.mrb[69].mxu1 }
 0x322   : > { %v10150_v4 = vadd.f32 %v10149_v35, %v10148_v3  ;;  %v8611_v58 = vadd.f32 %v8610_v20, %v8609_v36  ;;  %v12192_v57 = vpack.c.bf16 %v5284_v40, %v5284_v40  ;;  %v8614_v9 = vsel %vm8098_vm4, %v5283_v15, 0.0  ;;  %v15754_v3 = vpop.f32.mrb[70].mxu1 }
 0x323   : > { %v12190_v38 = vpack.c.bf16 %v5282_v7, %v5282_v7  ;;  %v8612_v61 = vsel %vm8098_vm4, %v5282_v7, 0.0  ;;  %v9385_v49 = vmul.f32 %v5282_v7, %v5282_v7  ;;  %v5287_v2 = vmax.f32 %v4027_v10, 0.0  ;;  %v13509_v7 = vld [vmem:[%s13827_s11 + $0x6c0] sm:$0xff]  }
 0x324   : > { %v10152_v16 = vadd.f32 %v10151_v1, %v10150_v4  ;;  %7845 = vst.msk [vmem:[%s13964_s12 + $0x40c] sm:$0xf] %vm7585_vm3, %v12192_v57  ;;  %v8613_v60 = vadd.f32 %v8612_v61, %v8611_v58  ;;  %v5285_v53 = vmax.f32 %v4019_v54, 0.0  ;;  %v9387_v20 = vmul.f32 %v5284_v40, %v5284_v40  ;;  %v15758_v4 = vpop.f32.mrb[71].mxu1  ;;  %v13510_v58 = vld [vmem:[%s13827_s11 + $0x6c8] sm:$0xff]   ;;  %13140 = vmatprep.mubr.msk.bf16.mxu1 %vm2168_vm2, %v13509_v7 }
 0x325   : > { %7843 = vst.msk [vmem:[%s13964_s12 + $0x404] sm:$0xf] %vm7585_vm3, %v12190_v38  ;;  %v10153_v15 = vsel %vm8098_vm4, %v9385_v49, 0.0  ;;  %v4030_v27 = vadd.f32 %v15473_v47, %v15229_v8  ;;  %v4022_v36 = vadd.f32 %v15473_v47, %v15233_v17  ;;  %v10155_v35 = vsel %vm8098_vm4, %v9386_v18, 0.0 }
 0x326   : > { %v8615_v1 = vadd.f32 %v8614_v9, %v8613_v60  ;;  %v10154_v10 = vadd.f32 %v10153_v15, %v10152_v16  ;;  %v12195_v54 = vpack.c.bf16 %v5287_v2, %v5287_v2  ;;  %v8616_v57 = vsel %vm8098_vm4, %v5284_v40, 0.0  ;;  %13141 = vmatmul.mubr.msk.bf16.gmra.mrb[176].mxu1 %vm2168_vm2, %v13510_v58 }
 0x327   : > { %v12193_v38 = vpack.c.bf16 %v5285_v53, %v5285_v53  ;;  %v8618_v8 = vsel %vm8098_vm4, %v5285_v53, 0.0  ;;  %v9388_v61 = vmul.f32 %v5285_v53, %v5285_v53  ;;  %v5288_v18 = vmax.f32 %v4030_v27, 0.0 }
 0x328   : > { %v8617_v17 = vadd.f32 %v8616_v57, %v8615_v1  ;;  %v10156_v49 = vadd.f32 %v10155_v35, %v10154_v10  ;;  %7848 = vst.msk [vmem:[%s13964_s12 + $0x418] sm:$0xf] %vm7585_vm3, %v12195_v54  ;;  %v5286_v9 = vmax.f32 %v4022_v36, 0.0  ;;  %v10157_v16 = vsel %vm8098_vm4, %v9387_v20, 0.0  ;;  %v15777_v54 = vpop.f32.mrb[72].mxu1 }
 0x329   : > { %7846 = vst.msk [vmem:[%s13964_s12 + $0x410] sm:$0xf] %vm7585_vm3, %v12193_v38  ;;  %v10159_v40 = vsel %vm8098_vm4, %v9388_v61, 0.0  ;;  %v4043_v60 = vadd.f32 %v15473_v47, %v15250_v43  ;;  %v4035_v53 = vadd.f32 %v15473_v47, %v15254_v48  ;;  %v9390_v7 = vmul.f32 %v5287_v2, %v5287_v2  ;;  %v15781_v38 = vpop.f32.mrb[73].mxu1 }
 0x32a   : > { %v10158_v15 = vadd.f32 %v10157_v16, %v10156_v49  ;;  %v8619_v27 = vadd.f32 %v8618_v8, %v8617_v17  ;;  %v12196_v36 = vpack.c.bf16 %v5288_v18, %v5288_v18  ;;  %v8622_v35 = vsel %vm8098_vm4, %v5287_v2, 0.0  ;;  %v15790_v49 = vpop.f32.mrb[74].mxu1 }
 0x32b   : > { %v12194_v1 = vpack.c.bf16 %v5286_v9, %v5286_v9  ;;  %v8620_v20 = vsel %vm8098_vm4, %v5286_v9, 0.0  ;;  %v9389_v10 = vmul.f32 %v5286_v9, %v5286_v9  ;;  %v5291_v48 = vmax.f32 %v4043_v60, 0.0  ;;  %v13511_v9 = vld [vmem:[%s13827_s11 + $0x6d0] sm:$0xff]  }
 0x32c   : > { %v10160_v58 = vadd.f32 %v10159_v40, %v10158_v15  ;;  %7849 = vst.msk [vmem:[%s13964_s12 + $0x41c] sm:$0xf] %vm7585_vm3, %v12196_v36  ;;  %v8621_v43 = vadd.f32 %v8620_v20, %v8619_v27  ;;  %v5289_v57 = vmax.f32 %v4035_v53, 0.0  ;;  %v9391_v8 = vmul.f32 %v5288_v18, %v5288_v18  ;;  %v15794_v15 = vpop.f32.mrb[75].mxu1  ;;  %v13512_v27 = vld [vmem:[%s13827_s11 + $0x6d8] sm:$0xff]   ;;  %13144 = vmatprep.mubr.msk.bf16.mxu1 %vm2168_vm2, %v13511_v9 }
 0x32d   : > { %7847 = vst.msk [vmem:[%s13964_s12 + $0x414] sm:$0xf] %vm7585_vm3, %v12194_v1  ;;  %v10161_v2 = vsel %vm8098_vm4, %v9389_v10, 0.0  ;;  %v4046_v61 = vadd.f32 %v15473_v47, %v15261_v52  ;;  %v4038_v17 = vadd.f32 %v15473_v47, %v15265_v63  ;;  %v10163_v16 = vsel %vm8098_vm4, %v9390_v7, 0.0 }
 0x32e   : > { %v8623_v40 = vadd.f32 %v8622_v35, %v8621_v43  ;;  %v10162_v60 = vadd.f32 %v10161_v2, %v10160_v58  ;;  %v12199_v53 = vpack.c.bf16 %v5291_v48, %v5291_v48  ;;  %v8624_v36 = vsel %vm8098_vm4, %v5288_v18, 0.0  ;;  %13145 = vmatmul.mubr.msk.bf16.gmra.mrb[180].mxu1 %vm2168_vm2, %v13512_v27 }
 0x32f   : > { %v12197_v1 = vpack.c.bf16 %v5289_v57, %v5289_v57  ;;  %v8626_v52 = vsel %vm8098_vm4, %v5289_v57, 0.0  ;;  %v9392_v20 = vmul.f32 %v5289_v57, %v5289_v57  ;;  %v5292_v7 = vmax.f32 %v4046_v61, 0.0 }
 0x330   : > { %v8625_v63 = vadd.f32 %v8624_v36, %v8623_v40  ;;  %v10164_v10 = vadd.f32 %v10163_v16, %v10162_v60  ;;  %7852 = vst.msk [vmem:[%s13964_s12 + $0x428] sm:$0xf] %vm7585_vm3, %v12199_v53  ;;  %v5290_v35 = vmax.f32 %v4038_v17, 0.0  ;;  %v10165_v58 = vsel %vm8098_vm4, %v9391_v8, 0.0  ;;  %v15813_v53 = vpop.f32.mrb[76].mxu1 }
 0x331   : > { %7850 = vst.msk [vmem:[%s13964_s12 + $0x420] sm:$0xf] %vm7585_vm3, %v12197_v1  ;;  %v10167_v18 = vsel %vm8098_vm4, %v9392_v20, 0.0  ;;  %v4059_v43 = vadd.f32 %v15473_v47, %v15282_v29  ;;  %v4051_v57 = vadd.f32 %v15473_v47, %v15286_v34  ;;  %v9394_v9 = vmul.f32 %v5291_v48, %v5291_v48  ;;  %v15817_v1 = vpop.f32.mrb[77].mxu1 }
 0x332   : > { %v10166_v2 = vadd.f32 %v10165_v58, %v10164_v10  ;;  %v8627_v61 = vadd.f32 %v8626_v52, %v8625_v63  ;;  %v12200_v17 = vpack.c.bf16 %v5292_v7, %v5292_v7  ;;  %v8630_v16 = vsel %vm8098_vm4, %v5291_v48, 0.0  ;;  %v15826_v10 = vpop.f32.mrb[78].mxu1 }
 0x333   : > { %v12198_v40 = vpack.c.bf16 %v5290_v35, %v5290_v35  ;;  %v8628_v8 = vsel %vm8098_vm4, %v5290_v35, 0.0  ;;  %v9393_v60 = vmul.f32 %v5290_v35, %v5290_v35  ;;  %v5295_v34 = vmax.f32 %v4059_v43, 0.0  ;;  %v13513_v35 = vld [vmem:[%s13827_s11 + $0x6e0] sm:$0xff]  }
 0x334   : > { %v10168_v27 = vadd.f32 %v10167_v18, %v10166_v2  ;;  %7853 = vst.msk [vmem:[%s13964_s12 + $0x42c] sm:$0xf] %vm7585_vm3, %v12200_v17  ;;  %v8629_v29 = vadd.f32 %v8628_v8, %v8627_v61  ;;  %v5293_v36 = vmax.f32 %v4051_v57, 0.0  ;;  %v9395_v52 = vmul.f32 %v5292_v7, %v5292_v7  ;;  %v15830_v2 = vpop.f32.mrb[79].mxu1  ;;  %v13514_v61 = vld [vmem:[%s13827_s11 + $0x6e8] sm:$0xff]   ;;  %13148 = vmatprep.mubr.msk.bf16.mxu1 %vm2168_vm2, %v13513_v35 }
 0x335   : > { %7851 = vst.msk [vmem:[%s13964_s12 + $0x424] sm:$0xf] %vm7585_vm3, %v12198_v40  ;;  %v10169_v48 = vsel %vm8098_vm4, %v9393_v60, 0.0  ;;  %v4062_v20 = vadd.f32 %v15473_v47, %v15293_v41  ;;  %v4054_v63 = vadd.f32 %v15473_v47, %v15297_v55  ;;  %v10171_v58 = vsel %vm8098_vm4, %v9394_v9, 0.0 }
 0x336   : > { %v8631_v18 = vadd.f32 %v8630_v16, %v8629_v29  ;;  %v10170_v43 = vadd.f32 %v10169_v48, %v10168_v27  ;;  %v12203_v57 = vpack.c.bf16 %v5295_v34, %v5295_v34  ;;  %v8632_v17 = vsel %vm8098_vm4, %v5292_v7, 0.0  ;;  %13149 = vmatmul.mubr.msk.bf16.gmra.mrb[184].mxu1 %vm2168_vm2, %v13514_v61 }
 0x337   : > { %v12201_v40 = vpack.c.bf16 %v5293_v36, %v5293_v36  ;;  %v8634_v41 = vsel %vm8098_vm4, %v5293_v36, 0.0  ;;  %v9396_v8 = vmul.f32 %v5293_v36, %v5293_v36  ;;  %v5296_v9 = vmax.f32 %v4062_v20, 0.0 }
 0x338   : > { %v8633_v55 = vadd.f32 %v8632_v17, %v8631_v18  ;;  %v10172_v60 = vadd.f32 %v10171_v58, %v10170_v43  ;;  %7856 = vst.msk [vmem:[%s13964_s12 + $0x438] sm:$0xf] %vm7585_vm3, %v12203_v57  ;;  %v5294_v16 = vmax.f32 %v4054_v63, 0.0  ;;  %v10173_v27 = vsel %vm8098_vm4, %v9395_v52, 0.0  ;;  %v15849_v57 = vpop.f32.mrb[80].mxu1 }
 0x339   : > { %7854 = vst.msk [vmem:[%s13964_s12 + $0x430] sm:$0xf] %vm7585_vm3, %v12201_v40  ;;  %v10175_v7 = vsel %vm8098_vm4, %v9396_v8, 0.0  ;;  %v4075_v29 = vadd.f32 %v15473_v47, %v15314_v19  ;;  %v4067_v36 = vadd.f32 %v15473_v47, %v15318_v25  ;;  %v9398_v35 = vmul.f32 %v5295_v34, %v5295_v34  ;;  %v15853_v47 = vpop.f32.mrb[81].mxu1 }
 0x33a   : > { %v10174_v48 = vadd.f32 %v10173_v27, %v10172_v60  ;;  %v8635_v20 = vadd.f32 %v8634_v41, %v8633_v55  ;;  %v12204_v63 = vpack.c.bf16 %v5296_v9, %v5296_v9  ;;  %v8638_v58 = vsel %vm8098_vm4, %v5295_v34, 0.0  ;;  %v15861_v41 = vld [vmem:[%s17805_s2] ss:$0 sm:$0xff]  ;;  %v15867_v60 = vpop.f32.mrb[82].mxu1 }
 0x33b   : > { %v12202_v18 = vpack.c.bf16 %v5294_v16, %v5294_v16  ;;  %v8636_v52 = vsel %vm8098_vm4, %v5294_v16, 0.0  ;;  %v9397_v43 = vmul.f32 %v5294_v16, %v5294_v16  ;;  %v5299_v17 = vmax.f32 %v4075_v29, 0.0  ;;  %v13515_v16 = vld [vmem:[%s13827_s11 + $0x6f0] sm:$0xff]  }
 0x33c   : > { %v10176_v61 = vadd.f32 %v10175_v7, %v10174_v48  ;;  %7857 = vst.msk [vmem:[%s13964_s12 + $0x43c] sm:$0xf] %vm7585_vm3, %v12204_v63  ;;  %v8637_v19 = vadd.f32 %v8636_v52, %v8635_v20  ;;  %v5297_v25 = vmax.f32 %v4067_v36, 0.0  ;;  %v9399_v40 = vmul.f32 %v5296_v9, %v5296_v9  ;;  %v15871_v48 = vpop.f32.mrb[83].mxu1  ;;  %v13516_v20 = vld [vmem:[%s13827_s11 + $0x6f8] sm:$0xff]   ;;  %13152 = vmatprep.mubr.msk.bf16.mxu1 %vm2168_vm2, %v13515_v16 }
 0x33d   : > { %7855 = vst.msk [vmem:[%s13964_s12 + $0x434] sm:$0xf] %vm7585_vm3, %v12202_v18  ;;  %v10177_v34 = vsel %vm8098_vm4, %v9397_v43, 0.0  ;;  %v4078_v8 = vadd.f32 %v15861_v41, %v15325_v32  ;;  %v4070_v55 = vadd.f32 %v15861_v41, %v15329_v42  ;;  %v10179_v27 = vsel %vm8098_vm4, %v9398_v35, 0.0 }
 0x33e   : > { %v8639_v7 = vadd.f32 %v8638_v58, %v8637_v19  ;;  %v10178_v29 = vadd.f32 %v10177_v34, %v10176_v61  ;;  %v12207_v36 = vpack.c.bf16 %v5299_v17, %v5299_v17  ;;  %v8640_v63 = vsel %vm8098_vm4, %v5296_v9, 0.0  ;;  %13153 = vmatmul.mubr.msk.bf16.gmra.mrb[188].mxu1 %vm2168_vm2, %v13516_v20 }
 0x33f   : > { %v12205_v18 = vpack.c.bf16 %v5297_v25, %v5297_v25  ;;  %v8642_v32 = vsel %vm8098_vm4, %v5297_v25, 0.0  ;;  %v9400_v52 = vmul.f32 %v5297_v25, %v5297_v25  ;;  %v5300_v35 = vmax.f32 %v4078_v8, 0.0 }
 0x340   : > { %v8641_v42 = vadd.f32 %v8640_v63, %v8639_v7  ;;  %v10180_v43 = vadd.f32 %v10179_v27, %v10178_v29  ;;  %7860 = vst.msk [vmem:[%s13964_s12 + $0x448] sm:$0xf] %vm7585_vm3, %v12207_v36  ;;  %v5298_v58 = vmax.f32 %v4070_v55, 0.0  ;;  %v10181_v61 = vsel %vm8098_vm4, %v9399_v40, 0.0  ;;  %v15890_v36 = vpop.f32.mrb[84].mxu1 }
 0x341   : > { %7858 = vst.msk [vmem:[%s13964_s12 + $0x440] sm:$0xf] %vm7585_vm3, %v12205_v18  ;;  %v10183_v9 = vsel %vm8098_vm4, %v9400_v52, 0.0  ;;  %v4091_v19 = vadd.f32 %v15861_v41, %v15346_v12  ;;  %v4083_v25 = vadd.f32 %v15861_v41, %v15350_v21  ;;  %v9402_v16 = vmul.f32 %v5299_v17, %v5299_v17  ;;  %v15894_v18 = vpop.f32.mrb[85].mxu1 }
 0x342   : > { %v10182_v34 = vadd.f32 %v10181_v61, %v10180_v43  ;;  %v8643_v8 = vadd.f32 %v8642_v32, %v8641_v42  ;;  %v12208_v55 = vpack.c.bf16 %v5300_v35, %v5300_v35  ;;  %v8646_v27 = vsel %vm8098_vm4, %v5299_v17, 0.0  ;;  %v15903_v43 = vpop.f32.mrb[86].mxu1 }
 0x343   : > { %v12206_v7 = vpack.c.bf16 %v5298_v58, %v5298_v58  ;;  %v8644_v40 = vsel %vm8098_vm4, %v5298_v58, 0.0  ;;  %v9401_v29 = vmul.f32 %v5298_v58, %v5298_v58  ;;  %v5303_v21 = vmax.f32 %v4091_v19, 0.0  ;;  %v13517_v58 = vld [vmem:[%s13827_s11 + $0x700] sm:$0xff]  }
 0x344   : > { %v10184_v20 = vadd.f32 %v10183_v9, %v10182_v34  ;;  %7861 = vst.msk [vmem:[%s13964_s12 + $0x44c] sm:$0xf] %vm7585_vm3, %v12208_v55  ;;  %v8645_v12 = vadd.f32 %v8644_v40, %v8643_v8  ;;  %v5301_v63 = vmax.f32 %v4083_v25, 0.0  ;;  %v9403_v32 = vmul.f32 %v5300_v35, %v5300_v35  ;;  %v15907_v34 = vpop.f32.mrb[87].mxu1  ;;  %v13518_v8 = vld [vmem:[%s13827_s11 + $0x708] sm:$0xff]   ;;  %13156 = vmatprep.mubr.msk.bf16.mxu1 %vm2168_vm2, %v13517_v58 }
 0x345   : > { %7859 = vst.msk [vmem:[%s13964_s12 + $0x444] sm:$0xf] %vm7585_vm3, %v12206_v7  ;;  %v10185_v17 = vsel %vm8098_vm4, %v9401_v29, 0.0  ;;  %v4094_v52 = vadd.f32 %v15861_v41, %v15357_v28  ;;  %v4086_v42 = vadd.f32 %v15861_v41, %v15361_v39  ;;  %v10187_v61 = vsel %vm8098_vm4, %v9402_v16, 0.0 }
 0x346   : > { %v8647_v9 = vadd.f32 %v8646_v27, %v8645_v12  ;;  %v10186_v19 = vadd.f32 %v10185_v17, %v10184_v20  ;;  %v12211_v25 = vpack.c.bf16 %v5303_v21, %v5303_v21  ;;  %v8648_v55 = vsel %vm8098_vm4, %v5300_v35, 0.0  ;;  %13157 = vmatmul.mubr.msk.bf16.gmra.mrb[192].mxu1 %vm2168_vm2, %v13518_v8 }
 0x347   : > { %v12209_v7 = vpack.c.bf16 %v5301_v63, %v5301_v63  ;;  %v8650_v28 = vsel %vm8098_vm4, %v5301_v63, 0.0  ;;  %v9404_v40 = vmul.f32 %v5301_v63, %v5301_v63  ;;  %v5304_v16 = vmax.f32 %v4094_v52, 0.0 }
 0x348   : > { %v8649_v39 = vadd.f32 %v8648_v55, %v8647_v9  ;;  %v10188_v29 = vadd.f32 %v10187_v61, %v10186_v19  ;;  %7864 = vst.msk [vmem:[%s13964_s12 + $0x458] sm:$0xf] %vm7585_vm3, %v12211_v25  ;;  %v5302_v27 = vmax.f32 %v4086_v42, 0.0  ;;  %v10189_v20 = vsel %vm8098_vm4, %v9403_v32, 0.0  ;;  %v15926_v25 = vpop.f32.mrb[88].mxu1 }
 0x349   : > { %7862 = vst.msk [vmem:[%s13964_s12 + $0x450] sm:$0xf] %vm7585_vm3, %v12209_v7  ;;  %v10191_v35 = vsel %vm8098_vm4, %v9404_v40, 0.0  ;;  %v4107_v12 = vadd.f32 %v15861_v41, %v15378_v11  ;;  %v4099_v63 = vadd.f32 %v15861_v41, %v15382_v23  ;;  %v9406_v58 = vmul.f32 %v5303_v21, %v5303_v21  ;;  %v15930_v7 = vpop.f32.mrb[89].mxu1 }
 0x34a   : > { %v10190_v17 = vadd.f32 %v10189_v20, %v10188_v29  ;;  %v8651_v52 = vadd.f32 %v8650_v28, %v8649_v39  ;;  %v12212_v42 = vpack.c.bf16 %v5304_v16, %v5304_v16  ;;  %v8654_v61 = vsel %vm8098_vm4, %v5303_v21, 0.0  ;;  %v15939_v29 = vpop.f32.mrb[90].mxu1 }
 0x34b   : > { %v12210_v9 = vpack.c.bf16 %v5302_v27, %v5302_v27  ;;  %v8652_v32 = vsel %vm8098_vm4, %v5302_v27, 0.0  ;;  %v9405_v19 = vmul.f32 %v5302_v27, %v5302_v27  ;;  %v5307_v23 = vmax.f32 %v4107_v12, 0.0  ;;  %v13519_v27 = vld [vmem:[%s13827_s11 + $0x710] sm:$0xff]  }
 0x34c   : > { %v10192_v8 = vadd.f32 %v10191_v35, %v10190_v17  ;;  %7865 = vst.msk [vmem:[%s13964_s12 + $0x45c] sm:$0xf] %vm7585_vm3, %v12212_v42  ;;  %v8653_v11 = vadd.f32 %v8652_v32, %v8651_v52  ;;  %v5305_v55 = vmax.f32 %v4099_v63, 0.0  ;;  %v9407_v28 = vmul.f32 %v5304_v16, %v5304_v16  ;;  %v15943_v17 = vpop.f32.mrb[91].mxu1  ;;  %v13520_v52 = vld [vmem:[%s13827_s11 + $0x718] sm:$0xff]   ;;  %13160 = vmatprep.mubr.msk.bf16.mxu1 %vm2168_vm2, %v13519_v27 }
 0x34d   : > { %7863 = vst.msk [vmem:[%s13964_s12 + $0x454] sm:$0xf] %vm7585_vm3, %v12210_v9  ;;  %v10193_v21 = vsel %vm8098_vm4, %v9405_v19, 0.0  ;;  %v4110_v40 = vadd.f32 %v15861_v41, %v15389_v31  ;;  %v4102_v39 = vadd.f32 %v15861_v41, %v15393_v45  ;;  %v10195_v20 = vsel %vm8098_vm4, %v9406_v58, 0.0 }
 0x34e   : > { %v8655_v35 = vadd.f32 %v8654_v61, %v8653_v11  ;;  %v10194_v12 = vadd.f32 %v10193_v21, %v10192_v8  ;;  %v12215_v63 = vpack.c.bf16 %v5307_v23, %v5307_v23  ;;  %v8656_v42 = vsel %vm8098_vm4, %v5304_v16, 0.0  ;;  %13161 = vmatmul.mubr.msk.bf16.gmra.mrb[196].mxu1 %vm2168_vm2, %v13520_v52 }
 0x34f   : > { %v12213_v9 = vpack.c.bf16 %v5305_v55, %v5305_v55  ;;  %v8658_v31 = vsel %vm8098_vm4, %v5305_v55, 0.0  ;;  %v9408_v32 = vmul.f32 %v5305_v55, %v5305_v55  ;;  %v5308_v58 = vmax.f32 %v4110_v40, 0.0 }
 0x350   : > { %v8657_v45 = vadd.f32 %v8656_v42, %v8655_v35  ;;  %v10196_v19 = vadd.f32 %v10195_v20, %v10194_v12  ;;  %7868 = vst.msk [vmem:[%s13964_s12 + $0x468] sm:$0xf] %vm7585_vm3, %v12215_v63  ;;  %v5306_v61 = vmax.f32 %v4102_v39, 0.0  ;;  %v10197_v8 = vsel %vm8098_vm4, %v9407_v28, 0.0  ;;  %v15962_v63 = vpop.f32.mrb[92].mxu1 }
 0x351   : > { %7866 = vst.msk [vmem:[%s13964_s12 + $0x460] sm:$0xf] %vm7585_vm3, %v12213_v9  ;;  %v10199_v16 = vsel %vm8098_vm4, %v9408_v32, 0.0  ;;  %v4123_v11 = vadd.f32 %v15861_v41, %v15410_v24  ;;  %v4115_v55 = vadd.f32 %v15861_v41, %v15414_v33  ;;  %v9410_v27 = vmul.f32 %v5307_v23, %v5307_v23  ;;  %v15966_v9 = vpop.f32.mrb[93].mxu1 }
 0x352   : > { %v10198_v21 = vadd.f32 %v10197_v8, %v10196_v19  ;;  %v8659_v40 = vadd.f32 %v8658_v31, %v8657_v45  ;;  %v12216_v39 = vpack.c.bf16 %v5308_v58, %v5308_v58  ;;  %v8662_v20 = vsel %vm8098_vm4, %v5307_v23, 0.0  ;;  %v15975_v19 = vpop.f32.mrb[94].mxu1 }
 0x353   : > { %v12214_v35 = vpack.c.bf16 %v5306_v61, %v5306_v61  ;;  %v8660_v28 = vsel %vm8098_vm4, %v5306_v61, 0.0  ;;  %v9409_v12 = vmul.f32 %v5306_v61, %v5306_v61  ;;  %v5311_v33 = vmax.f32 %v4123_v11, 0.0  ;;  %v13521_v61 = vld [vmem:[%s13827_s11 + $0x720] sm:$0xff]  }
 0x354   : > { %v10200_v52 = vadd.f32 %v10199_v16, %v10198_v21  ;;  %7869 = vst.msk [vmem:[%s13964_s12 + $0x46c] sm:$0xf] %vm7585_vm3, %v12216_v39  ;;  %v8661_v24 = vadd.f32 %v8660_v28, %v8659_v40  ;;  %v5309_v42 = vmax.f32 %v4115_v55, 0.0  ;;  %v9411_v31 = vmul.f32 %v5308_v58, %v5308_v58  ;;  %v15979_v21 = vpop.f32.mrb[95].mxu1  ;;  %v13522_v40 = vld [vmem:[%s13827_s11 + $0x728] sm:$0xff]   ;;  %13164 = vmatprep.mubr.msk.bf16.mxu1 %vm2168_vm2, %v13521_v61 }
 0x355   : > { %7867 = vst.msk [vmem:[%s13964_s12 + $0x464] sm:$0xf] %vm7585_vm3, %v12214_v35  ;;  %v10201_v23 = vsel %vm8098_vm4, %v9409_v12, 0.0  ;;  %v4126_v32 = vadd.f32 %v15861_v41, %v15421_v44  ;;  %v4118_v45 = vadd.f32 %v15861_v41, %v15425_v56  ;;  %v10203_v8 = vsel %vm8098_vm4, %v9410_v27, 0.0 }
 0x356   : > { %v8663_v16 = vadd.f32 %v8662_v20, %v8661_v24  ;;  %v10202_v11 = vadd.f32 %v10201_v23, %v10200_v52  ;;  %v12219_v55 = vpack.c.bf16 %v5311_v33, %v5311_v33  ;;  %v8664_v39 = vsel %vm8098_vm4, %v5308_v58, 0.0  ;;  %13165 = vmatmul.mubr.msk.bf16.gmra.mrb[200].mxu1 %vm2168_vm2, %v13522_v40 }
 0x357   : > { %v12217_v35 = vpack.c.bf16 %v5309_v42, %v5309_v42  ;;  %v8666_v44 = vsel %vm8098_vm4, %v5309_v42, 0.0  ;;  %v9412_v28 = vmul.f32 %v5309_v42, %v5309_v42  ;;  %v5312_v27 = vmax.f32 %v4126_v32, 0.0 }
 0x358   : > { %v8665_v56 = vadd.f32 %v8664_v39, %v8663_v16  ;;  %v10204_v12 = vadd.f32 %v10203_v8, %v10202_v11  ;;  %7872 = vst.msk [vmem:[%s13964_s12 + $0x478] sm:$0xf] %vm7585_vm3, %v12219_v55  ;;  %v5310_v20 = vmax.f32 %v4118_v45, 0.0  ;;  %v10205_v52 = vsel %vm8098_vm4, %v9411_v31, 0.0  ;;  %v15998_v55 = vpop.f32.mrb[96].mxu1 }
 0x359   : > { %7870 = vst.msk [vmem:[%s13964_s12 + $0x470] sm:$0xf] %vm7585_vm3, %v12217_v35  ;;  %v10207_v58 = vsel %vm8098_vm4, %v9412_v28, 0.0  ;;  %v4139_v24 = vadd.f32 %v15861_v41, %v15442_v46  ;;  %v4131_v42 = vadd.f32 %v15861_v41, %v15446_v51  ;;  %v9414_v61 = vmul.f32 %v5311_v33, %v5311_v33  ;;  %v16002_v35 = vpop.f32.mrb[97].mxu1 }
 0x35a   : > { %v10206_v23 = vadd.f32 %v10205_v52, %v10204_v12  ;;  %v8667_v32 = vadd.f32 %v8666_v44, %v8665_v56  ;;  %v12220_v45 = vpack.c.bf16 %v5312_v27, %v5312_v27  ;;  %v8670_v8 = vsel %vm8098_vm4, %v5311_v33, 0.0  ;;  %v16011_v12 = vpop.f32.mrb[98].mxu1 }
 0x35b   : > { %v12218_v16 = vpack.c.bf16 %v5310_v20, %v5310_v20  ;;  %v8668_v31 = vsel %vm8098_vm4, %v5310_v20, 0.0  ;;  %v9413_v11 = vmul.f32 %v5310_v20, %v5310_v20  ;;  %v5315_v51 = vmax.f32 %v4139_v24, 0.0  ;;  %v13523_v20 = vld [vmem:[%s13827_s11 + $0x730] sm:$0xff]  }
 0x35c   : > { %v10208_v40 = vadd.f32 %v10207_v58, %v10206_v23  ;;  %7873 = vst.msk [vmem:[%s13964_s12 + $0x47c] sm:$0xf] %vm7585_vm3, %v12220_v45  ;;  %v8669_v46 = vadd.f32 %v8668_v31, %v8667_v32  ;;  %v5313_v39 = vmax.f32 %v4131_v42, 0.0  ;;  %v9415_v44 = vmul.f32 %v5312_v27, %v5312_v27  ;;  %v16015_v23 = vpop.f32.mrb[99].mxu1  ;;  %v13524_v32 = vld [vmem:[%s13827_s11 + $0x738] sm:$0xff]   ;;  %13168 = vmatprep.mubr.msk.bf16.mxu1 %vm2168_vm2, %v13523_v20 }
 0x35d   : > { %7871 = vst.msk [vmem:[%s13964_s12 + $0x474] sm:$0xf] %vm7585_vm3, %v12218_v16  ;;  %v10209_v33 = vsel %vm8098_vm4, %v9413_v11, 0.0  ;;  %v4142_v28 = vadd.f32 %v15861_v41, %v15453_v62  ;;  %v4134_v56 = vadd.f32 %v15861_v41, %v15457_v13  ;;  %v10211_v52 = vsel %vm8098_vm4, %v9414_v61, 0.0  ;;  %17840 = vst [vmem:[#allocation32_spill] sm:$0xff] %v16015_v23 }
 0x35e   : > { %v8671_v58 = vadd.f32 %v8670_v8, %v8669_v46  ;;  %v10210_v24 = vadd.f32 %v10209_v33, %v10208_v40  ;;  %v12223_v42 = vpack.c.bf16 %v5315_v51, %v5315_v51  ;;  %v8672_v45 = vsel %vm8098_vm4, %v5312_v27, 0.0  ;;  %13169 = vmatmul.mubr.msk.bf16.gmra.mrb[204].mxu1 %vm2168_vm2, %v13524_v32  ;;  %v17841_v46 = vld [vmem:[#allocation8_spill] sm:$0xff]  ;;  %v17842_v33 = vld [vmem:[#allocation9_spill] sm:$0xff] }
 0x35f   : > { %v12221_v16 = vpack.c.bf16 %v5313_v39, %v5313_v39  ;;  %v8674_v62 = vsel %vm8098_vm4, %v5313_v39, 0.0  ;;  %v9416_v31 = vmul.f32 %v5313_v39, %v5313_v39  ;;  %v5316_v61 = vmax.f32 %v4142_v28, 0.0 }
 0x360   : > { %v8673_v13 = vadd.f32 %v8672_v45, %v8671_v58  ;;  %v10212_v11 = vadd.f32 %v10211_v52, %v10210_v24  ;;  %7876 = vst.msk [vmem:[%s13964_s12 + $0x488] sm:$0xf] %vm7585_vm3, %v12223_v42  ;;  %v5314_v8 = vmax.f32 %v4134_v56, 0.0  ;;  %v10213_v40 = vsel %vm8098_vm4, %v9415_v44, 0.0  ;;  %v16034_v45 = vpop.f32.mrb[100].mxu1 }
 0x361   : > { %7874 = vst.msk [vmem:[%s13964_s12 + $0x480] sm:$0xf] %vm7585_vm3, %v12221_v16  ;;  %v10215_v27 = vsel %vm8098_vm4, %v9416_v31, 0.0  ;;  %v4155_v39 = vadd.f32 %v15861_v41, %v17841_v46  ;;  %v4147_v20 = vadd.f32 %v15861_v41, %v17842_v33  ;;  %v9418_v58 = vmul.f32 %v5315_v51, %v5315_v51  ;;  %17843 = vst [vmem:[#allocation8_spill] sm:$0xff] %v16034_v45 }
 0x362   : > { %v10214_v52 = vadd.f32 %v10213_v40, %v10212_v11  ;;  %v8675_v28 = vadd.f32 %v8674_v62, %v8673_v13  ;;  %v12224_v56 = vpack.c.bf16 %v5316_v61, %v5316_v61  ;;  %v8678_v24 = vsel %vm8098_vm4, %v5315_v51, 0.0  ;;  %v16038_v40 = vpop.f32.mrb[101].mxu1  ;;  %v17845_v13 = vld [vmem:[#allocation10_spill] sm:$0xff] }
 0x363   : > { %v12222_v42 = vpack.c.bf16 %v5314_v8, %v5314_v8  ;;  %v8676_v44 = vsel %vm8098_vm4, %v5314_v8, 0.0  ;;  %v9417_v32 = vmul.f32 %v5314_v8, %v5314_v8  ;;  %v5319_v46 = vmax.f32 %v4155_v39, 0.0  ;;  %17844 = vst [vmem:[#allocation9_spill] sm:$0xff] %v16038_v40  ;;  %v17846_v8 = vld [vmem:[#allocation11_spill] sm:$0xff] }
 0x364   : > { %v10216_v16 = vadd.f32 %v10215_v27, %v10214_v52  ;;  %7877 = vst.msk [vmem:[%s13964_s12 + $0x48c] sm:$0xf] %vm7585_vm3, %v12224_v56  ;;  %v8677_v31 = vadd.f32 %v8676_v44, %v8675_v28  ;;  %v5317_v11 = vmax.f32 %v4147_v20, 0.0  ;;  %v9419_v62 = vmul.f32 %v5316_v61, %v5316_v61  ;;  %v16047_v27 = vpop.f32.mrb[102].mxu1  ;;  %v13525_v52 = vld [vmem:[%s13827_s11 + $0x740] sm:$0xff]  }
 0x365   : > { %7875 = vst.msk [vmem:[%s13964_s12 + $0x484] sm:$0xf] %vm7585_vm3, %v12222_v42  ;;  %v10217_v51 = vsel %vm8098_vm4, %v9417_v32, 0.0  ;;  %v4158_v33 = vadd.f32 %v15861_v41, %v17845_v13  ;;  %v4150_v45 = vadd.f32 %v15861_v41, %v17846_v8  ;;  %17847 = vst [vmem:[#allocation10_spill] sm:$0xff] %v16047_v27  ;;  %v10219_v39 = vsel %vm8098_vm4, %v9418_v58, 0.0  ;;  %v16051_v44 = vpop.f32.mrb[103].mxu1  ;;  %13172 = vmatprep.mubr.msk.bf16.mxu1 %vm2168_vm2, %v13525_v52 }
 0x366   : > { %v8679_v20 = vadd.f32 %v8678_v24, %v8677_v31  ;;  %v10218_v28 = vadd.f32 %v10217_v51, %v10216_v16  ;;  %v12227_v56 = vpack.c.bf16 %v5319_v46, %v5319_v46  ;;  %17848 = vst [vmem:[#allocation11_spill] sm:$0xff] %v16051_v44  ;;  %v13526_v42 = vld [vmem:[%s13827_s11 + $0x748] sm:$0xff]   ;;  %v8680_v32 = vsel %vm8098_vm4, %v5316_v61, 0.0  ;;  %v17849_v31 = vld [vmem:[#allocation12_spill] sm:$0xff] }
 0x367   : > { %v12225_v40 = vpack.c.bf16 %v5317_v11, %v5317_v11  ;;  %v8682_v13 = vsel %vm8098_vm4, %v5317_v11, 0.0  ;;  %v9420_v23 = vmul.f32 %v5317_v11, %v5317_v11  ;;  %v5320_v58 = vmax.f32 %v4158_v33, 0.0  ;;  %13173 = vmatmul.mubr.msk.bf16.gmra.mrb[208].mxu1 %vm2168_vm2, %v13526_v42  ;;  %v17850_v51 = vld [vmem:[#allocation13_spill] sm:$0xff]  ;;  %v16070_v42 = vpop.f32.mrb[104].mxu1 }
 0x368   : > { %v8681_v8 = vadd.f32 %v8680_v32, %v8679_v20  ;;  %v10220_v27 = vadd.f32 %v10219_v39, %v10218_v28  ;;  %7880 = vst.msk [vmem:[%s13964_s12 + $0x498] sm:$0xf] %vm7585_vm3, %v12227_v56  ;;  %v5318_v24 = vmax.f32 %v4150_v45, 0.0  ;;  %v10221_v16 = vsel %vm8098_vm4, %v9419_v62, 0.0  ;;  %17851 = vst [vmem:[#allocation12_spill] sm:$0xff] %v16070_v42 }
 0x369   : > { %7878 = vst.msk [vmem:[%s13964_s12 + $0x490] sm:$0xf] %vm7585_vm3, %v12225_v40  ;;  %v10223_v61 = vsel %vm8098_vm4, %v9420_v23, 0.0  ;;  %v4171_v11 = vadd.f32 %v15861_v41, %v17849_v31  ;;  %v4163_v52 = vadd.f32 %v15861_v41, %v17850_v51  ;;  %v9422_v20 = vmul.f32 %v5319_v46, %v5319_v46 }
 0x36a   : > { %v10222_v39 = vadd.f32 %v10221_v16, %v10220_v27  ;;  %v8683_v33 = vadd.f32 %v8682_v13, %v8681_v8  ;;  %v12228_v45 = vpack.c.bf16 %v5320_v58, %v5320_v58  ;;  %v8686_v28 = vsel %vm8098_vm4, %v5319_v46, 0.0  ;;  %v16074_v16 = vpop.f32.mrb[105].mxu1  ;;  %v17853_v8 = vld [vmem:[#allocation14_spill] sm:$0xff] }
 0x36b   : > { %v12226_v56 = vpack.c.bf16 %v5318_v24, %v5318_v24  ;;  %v8684_v62 = vsel %vm8098_vm4, %v5318_v24, 0.0  ;;  %v9421_v40 = vmul.f32 %v5318_v24, %v5318_v24  ;;  %v5323_v31 = vmax.f32 %v4171_v11, 0.0  ;;  %17852 = vst [vmem:[#allocation13_spill] sm:$0xff] %v16074_v16  ;;  %v17854_v24 = vld [vmem:[#allocation15_spill] sm:$0xff] }
 0x36c   : > { %v10224_v23 = vadd.f32 %v10223_v61, %v10222_v39  ;;  %7881 = vst.msk [vmem:[%s13964_s12 + $0x49c] sm:$0xf] %vm7585_vm3, %v12228_v45  ;;  %v8685_v32 = vadd.f32 %v8684_v62, %v8683_v33  ;;  %v5321_v27 = vmax.f32 %v4163_v52, 0.0  ;;  %v9423_v13 = vmul.f32 %v5320_v58, %v5320_v58  ;;  %v16083_v61 = vpop.f32.mrb[106].mxu1  ;;  %v13527_v39 = vld [vmem:[%s13827_s11 + $0x750] sm:$0xff]  }
 0x36d   : > { %7879 = vst.msk [vmem:[%s13964_s12 + $0x494] sm:$0xf] %vm7585_vm3, %v12226_v56  ;;  %v10225_v46 = vsel %vm8098_vm4, %v9421_v40, 0.0  ;;  %v4174_v51 = vadd.f32 %v15861_v41, %v17853_v8  ;;  %v4166_v42 = vadd.f32 %v15861_v41, %v17854_v24  ;;  %17855 = vst [vmem:[#allocation14_spill] sm:$0xff] %v16083_v61  ;;  %v10227_v11 = vsel %vm8098_vm4, %v9422_v20, 0.0  ;;  %v16087_v62 = vpop.f32.mrb[107].mxu1  ;;  %13176 = vmatprep.mubr.msk.bf16.mxu1 %vm2168_vm2, %v13527_v39 }
 0x36e   : > { %v8687_v52 = vadd.f32 %v8686_v28, %v8685_v32  ;;  %v10226_v33 = vadd.f32 %v10225_v46, %v10224_v23  ;;  %v12231_v45 = vpack.c.bf16 %v5323_v31, %v5323_v31  ;;  %17856 = vst [vmem:[#allocation15_spill] sm:$0xff] %v16087_v62  ;;  %v13528_v56 = vld [vmem:[%s13827_s11 + $0x758] sm:$0xff]   ;;  %v8688_v40 = vsel %vm8098_vm4, %v5320_v58, 0.0  ;;  %v17857_v32 = vld [vmem:[#allocation16_spill] sm:$0xff]  ;;  %v17858_v46 = vld [vmem:[#allocation17_spill] sm:$0xff] }
 0x36f   : > { %v12229_v16 = vpack.c.bf16 %v5321_v27, %v5321_v27  ;;  %v8690_v8 = vsel %vm8098_vm4, %v5321_v27, 0.0  ;;  %v9424_v44 = vmul.f32 %v5321_v27, %v5321_v27  ;;  %v5324_v20 = vmax.f32 %v4174_v51, 0.0  ;;  %13177 = vmatmul.mubr.msk.bf16.gmra.mrb[212].mxu1 %vm2168_vm2, %v13528_v56  ;;  %v16106_v56 = vpop.f32.mrb[108].mxu1 }
 0x370   : > { %v8689_v24 = vadd.f32 %v8688_v40, %v8687_v52  ;;  %v10228_v61 = vadd.f32 %v10227_v11, %v10226_v33  ;;  %7884 = vst.msk [vmem:[%s13964_s12 + $0x4a8] sm:$0xf] %vm7585_vm3, %v12231_v45  ;;  %v5322_v28 = vmax.f32 %v4166_v42, 0.0  ;;  %v10229_v23 = vsel %vm8098_vm4, %v9423_v13, 0.0  ;;  %17859 = vst [vmem:[#allocation16_spill] sm:$0xff] %v16106_v56 }
 0x371   : > { %7882 = vst.msk [vmem:[%s13964_s12 + $0x4a0] sm:$0xf] %vm7585_vm3, %v12229_v16  ;;  %v10231_v58 = vsel %vm8098_vm4, %v9424_v44, 0.0  ;;  %v4187_v27 = vadd.f32 %v15861_v41, %v17857_v32  ;;  %v4179_v39 = vadd.f32 %v15861_v41, %v17858_v46  ;;  %v9426_v52 = vmul.f32 %v5323_v31, %v5323_v31 }
 0x372   : > { %v10230_v11 = vadd.f32 %v10229_v23, %v10228_v61  ;;  %v8691_v51 = vadd.f32 %v8690_v8, %v8689_v24  ;;  %v12232_v42 = vpack.c.bf16 %v5324_v20, %v5324_v20  ;;  %v8694_v33 = vsel %vm8098_vm4, %v5323_v31, 0.0  ;;  %v16110_v23 = vpop.f32.mrb[109].mxu1  ;;  %v17861_v24 = vld [vmem:[#allocation18_spill] sm:$0xff] }
 0x373   : > { %v12230_v45 = vpack.c.bf16 %v5322_v28, %v5322_v28  ;;  %v8692_v13 = vsel %vm8098_vm4, %v5322_v28, 0.0  ;;  %v9425_v16 = vmul.f32 %v5322_v28, %v5322_v28  ;;  %v5327_v32 = vmax.f32 %v4187_v27, 0.0  ;;  %17860 = vst [vmem:[#allocation17_spill] sm:$0xff] %v16110_v23  ;;  %v17862_v28 = vld [vmem:[#allocation19_spill] sm:$0xff] }
 0x374   : > { %v10232_v44 = vadd.f32 %v10231_v58, %v10230_v11  ;;  %7885 = vst.msk [vmem:[%s13964_s12 + $0x4ac] sm:$0xf] %vm7585_vm3, %v12232_v42  ;;  %v8693_v40 = vadd.f32 %v8692_v13, %v8691_v51  ;;  %v5325_v61 = vmax.f32 %v4179_v39, 0.0  ;;  %v9427_v8 = vmul.f32 %v5324_v20, %v5324_v20  ;;  %v16119_v58 = vpop.f32.mrb[110].mxu1  ;;  %v13529_v11 = vld [vmem:[%s13827_s11 + $0x760] sm:$0xff]  }
 0x375   : > { %7883 = vst.msk [vmem:[%s13964_s12 + $0x4a4] sm:$0xf] %vm7585_vm3, %v12230_v45  ;;  %v10233_v31 = vsel %vm8098_vm4, %v9425_v16, 0.0  ;;  %v4190_v46 = vadd.f32 %v15861_v41, %v17861_v24  ;;  %v4182_v56 = vadd.f32 %v15861_v41, %v17862_v28  ;;  %17863 = vst [vmem:[#allocation18_spill] sm:$0xff] %v16119_v58  ;;  %v10235_v27 = vsel %vm8098_vm4, %v9426_v52, 0.0  ;;  %v16123_v13 = vpop.f32.mrb[111].mxu1  ;;  %13180 = vmatprep.mubr.msk.bf16.mxu1 %vm2168_vm2, %v13529_v11 }
 0x376   : > { %v8695_v39 = vadd.f32 %v8694_v33, %v8693_v40  ;;  %v10234_v51 = vadd.f32 %v10233_v31, %v10232_v44  ;;  %v12235_v42 = vpack.c.bf16 %v5327_v32, %v5327_v32  ;;  %17864 = vst [vmem:[#allocation19_spill] sm:$0xff] %v16123_v13  ;;  %v13530_v45 = vld [vmem:[%s13827_s11 + $0x768] sm:$0xff]   ;;  %v8696_v16 = vsel %vm8098_vm4, %v5324_v20, 0.0  ;;  %v17865_v40 = vld [vmem:[#allocation20_spill] sm:$0xff] }
 0x377   : > { %v12233_v23 = vpack.c.bf16 %v5325_v61, %v5325_v61  ;;  %v8698_v24 = vsel %vm8098_vm4, %v5325_v61, 0.0  ;;  %v9428_v62 = vmul.f32 %v5325_v61, %v5325_v61  ;;  %v5328_v52 = vmax.f32 %v4190_v46, 0.0  ;;  %13181 = vmatmul.mubr.msk.bf16.gmra.mrb[216].mxu1 %vm2168_vm2, %v13530_v45  ;;  %v17866_v31 = vld [vmem:[#allocation21_spill] sm:$0xff]  ;;  %v16142_v45 = vpop.f32.mrb[112].mxu1 }
 0x378   : > { %v8697_v28 = vadd.f32 %v8696_v16, %v8695_v39  ;;  %v10236_v58 = vadd.f32 %v10235_v27, %v10234_v51  ;;  %7888 = vst.msk [vmem:[%s13964_s12 + $0x4b8] sm:$0xf] %vm7585_vm3, %v12235_v42  ;;  %v5326_v33 = vmax.f32 %v4182_v56, 0.0  ;;  %v10237_v44 = vsel %vm8098_vm4, %v9427_v8, 0.0  ;;  %17867 = vst [vmem:[#allocation20_spill] sm:$0xff] %v16142_v45 }
 0x379   : > { %7886 = vst.msk [vmem:[%s13964_s12 + $0x4b0] sm:$0xf] %vm7585_vm3, %v12233_v23  ;;  %v10239_v20 = vsel %vm8098_vm4, %v9428_v62, 0.0  ;;  %v4203_v61 = vadd.f32 %v15861_v41, %v17865_v40  ;;  %v4195_v11 = vadd.f32 %v15861_v41, %v17866_v31  ;;  %v9430_v39 = vmul.f32 %v5327_v32, %v5327_v32 }
 0x37a   : > { %v10238_v27 = vadd.f32 %v10237_v44, %v10236_v58  ;;  %v8699_v46 = vadd.f32 %v8698_v24, %v8697_v28  ;;  %v12236_v56 = vpack.c.bf16 %v5328_v52, %v5328_v52  ;;  %v8702_v51 = vsel %vm8098_vm4, %v5327_v32, 0.0  ;;  %v16146_v44 = vpop.f32.mrb[113].mxu1  ;;  %v17869_v28 = vld [vmem:[#allocation22_spill] sm:$0xff] }
 0x37b   : > { %v12234_v42 = vpack.c.bf16 %v5326_v33, %v5326_v33  ;;  %v8700_v8 = vsel %vm8098_vm4, %v5326_v33, 0.0  ;;  %v9429_v23 = vmul.f32 %v5326_v33, %v5326_v33  ;;  %v5331_v40 = vmax.f32 %v4203_v61, 0.0  ;;  %17868 = vst [vmem:[#allocation21_spill] sm:$0xff] %v16146_v44  ;;  %v17870_v33 = vld [vmem:[#allocation23_spill] sm:$0xff] }
 0x37c   : > { %v10240_v62 = vadd.f32 %v10239_v20, %v10238_v27  ;;  %7889 = vst.msk [vmem:[%s13964_s12 + $0x4bc] sm:$0xf] %vm7585_vm3, %v12236_v56  ;;  %v8701_v16 = vadd.f32 %v8700_v8, %v8699_v46  ;;  %v5329_v58 = vmax.f32 %v4195_v11, 0.0  ;;  %v9431_v24 = vmul.f32 %v5328_v52, %v5328_v52  ;;  %v16155_v20 = vpop.f32.mrb[114].mxu1  ;;  %v13531_v27 = vld [vmem:[%s13827_s11 + $0x770] sm:$0xff]  }
 0x37d   : > { %7887 = vst.msk [vmem:[%s13964_s12 + $0x4b4] sm:$0xf] %vm7585_vm3, %v12234_v42  ;;  %v10241_v32 = vsel %vm8098_vm4, %v9429_v23, 0.0  ;;  %v4206_v31 = vadd.f32 %v15861_v41, %v17869_v28  ;;  %v4198_v45 = vadd.f32 %v15861_v41, %v17870_v33  ;;  %17871 = vst [vmem:[#allocation22_spill] sm:$0xff] %v16155_v20  ;;  %v10243_v61 = vsel %vm8098_vm4, %v9430_v39, 0.0  ;;  %v16159_v8 = vpop.f32.mrb[115].mxu1  ;;  %13184 = vmatprep.mubr.msk.bf16.mxu1 %vm2168_vm2, %v13531_v27 }
 0x37e   : > { %v8703_v11 = vadd.f32 %v8702_v51, %v8701_v16  ;;  %v10242_v46 = vadd.f32 %v10241_v32, %v10240_v62  ;;  %v12239_v56 = vpack.c.bf16 %v5331_v40, %v5331_v40  ;;  %17872 = vst [vmem:[#allocation23_spill] sm:$0xff] %v16159_v8  ;;  %v13532_v42 = vld [vmem:[%s13827_s11 + $0x778] sm:$0xff]   ;;  %v8704_v23 = vsel %vm8098_vm4, %v5328_v52, 0.0  ;;  %v17873_v16 = vld [vmem:[#allocation24_spill] sm:$0xff]  ;;  %v17874_v32 = vld [vmem:[#allocation25_spill] sm:$0xff] }
 0x37f   : > { %v12237_v44 = vpack.c.bf16 %v5329_v58, %v5329_v58  ;;  %v8706_v28 = vsel %vm8098_vm4, %v5329_v58, 0.0  ;;  %v9432_v13 = vmul.f32 %v5329_v58, %v5329_v58  ;;  %v5332_v39 = vmax.f32 %v4206_v31, 0.0  ;;  %13185 = vmatmul.mubr.msk.bf16.gmra.mrb[220].mxu1 %vm2168_vm2, %v13532_v42  ;;  %v16178_v42 = vpop.f32.mrb[116].mxu1 }
 0x380   : > { %v8705_v33 = vadd.f32 %v8704_v23, %v8703_v11  ;;  %v10244_v20 = vadd.f32 %v10243_v61, %v10242_v46  ;;  %7892 = vst.msk [vmem:[%s13964_s12 + $0x4c8] sm:$0xf] %vm7585_vm3, %v12239_v56  ;;  %v5330_v51 = vmax.f32 %v4198_v45, 0.0  ;;  %v10245_v62 = vsel %vm8098_vm4, %v9431_v24, 0.0  ;;  %17875 = vst [vmem:[#allocation24_spill] sm:$0xff] %v16178_v42 }
 0x381   : > { %7890 = vst.msk [vmem:[%s13964_s12 + $0x4c0] sm:$0xf] %vm7585_vm3, %v12237_v44  ;;  %v10247_v52 = vsel %vm8098_vm4, %v9432_v13, 0.0  ;;  %v4219_v58 = vadd.f32 %v15861_v41, %v17873_v16  ;;  %v4211_v27 = vadd.f32 %v15861_v41, %v17874_v32  ;;  %v9434_v11 = vmul.f32 %v5331_v40, %v5331_v40 }
 0x382   : > { %v10246_v61 = vadd.f32 %v10245_v62, %v10244_v20  ;;  %v8707_v31 = vadd.f32 %v8706_v28, %v8705_v33  ;;  %v12240_v45 = vpack.c.bf16 %v5332_v39, %v5332_v39  ;;  %v8710_v46 = vsel %vm8098_vm4, %v5331_v40, 0.0  ;;  %v16182_v62 = vpop.f32.mrb[117].mxu1  ;;  %v17877_v33 = vld [vmem:[#allocation26_spill] sm:$0xff] }
 0x383   : > { %v12238_v56 = vpack.c.bf16 %v5330_v51, %v5330_v51  ;;  %v8708_v24 = vsel %vm8098_vm4, %v5330_v51, 0.0  ;;  %v9433_v44 = vmul.f32 %v5330_v51, %v5330_v51  ;;  %v5335_v16 = vmax.f32 %v4219_v58, 0.0  ;;  %17876 = vst [vmem:[#allocation25_spill] sm:$0xff] %v16182_v62  ;;  %v17878_v51 = vld [vmem:[#allocation27_spill] sm:$0xff] }
 0x384   : > { %v10248_v13 = vadd.f32 %v10247_v52, %v10246_v61  ;;  %7893 = vst.msk [vmem:[%s13964_s12 + $0x4cc] sm:$0xf] %vm7585_vm3, %v12240_v45  ;;  %v8709_v23 = vadd.f32 %v8708_v24, %v8707_v31  ;;  %v5333_v20 = vmax.f32 %v4211_v27, 0.0  ;;  %v9435_v28 = vmul.f32 %v5332_v39, %v5332_v39  ;;  %v16191_v52 = vpop.f32.mrb[118].mxu1  ;;  %v13533_v61 = vld [vmem:[%s13827_s11 + $0x780] sm:$0xff]  }
 0x385   : > { %7891 = vst.msk [vmem:[%s13964_s12 + $0x4c4] sm:$0xf] %vm7585_vm3, %v12238_v56  ;;  %v10249_v40 = vsel %vm8098_vm4, %v9433_v44, 0.0  ;;  %v4222_v32 = vadd.f32 %v15861_v41, %v17877_v33  ;;  %v4214_v42 = vadd.f32 %v15861_v41, %v17878_v51  ;;  %17879 = vst [vmem:[#allocation26_spill] sm:$0xff] %v16191_v52  ;;  %v10251_v58 = vsel %vm8098_vm4, %v9434_v11, 0.0  ;;  %v16195_v24 = vpop.f32.mrb[119].mxu1  ;;  %13188 = vmatprep.mubr.msk.bf16.mxu1 %vm2168_vm2, %v13533_v61 }
 0x386   : > { %v8711_v27 = vadd.f32 %v8710_v46, %v8709_v23  ;;  %v10250_v31 = vadd.f32 %v10249_v40, %v10248_v13  ;;  %v12243_v45 = vpack.c.bf16 %v5335_v16, %v5335_v16  ;;  %v13534_v56 = vld [vmem:[%s13827_s11 + $0x788] sm:$0xff]   ;;  %v8712_v44 = vsel %vm8098_vm4, %v5332_v39, 0.0  ;;  %v17880_v23 = vld [vmem:[#allocation28_spill] sm:$0xff] }
 0x387   : > { %v12241_v62 = vpack.c.bf16 %v5333_v20, %v5333_v20  ;;  %v8714_v33 = vsel %vm8098_vm4, %v5333_v20, 0.0  ;;  %v9436_v8 = vmul.f32 %v5333_v20, %v5333_v20  ;;  %v5336_v11 = vmax.f32 %v4222_v32, 0.0  ;;  %13189 = vmatmul.mubr.msk.bf16.gmra.mrb[224].mxu1 %vm2168_vm2, %v13534_v56  ;;  %v17881_v40 = vld [vmem:[#allocation29_spill] sm:$0xff]  ;;  %v16214_v56 = vpop.f32.mrb[120].mxu1 }
 0x388   : > { %v8713_v51 = vadd.f32 %v8712_v44, %v8711_v27  ;;  %v10252_v52 = vadd.f32 %v10251_v58, %v10250_v31  ;;  %7896 = vst.msk [vmem:[%s13964_s12 + $0x4d8] sm:$0xf] %vm7585_vm3, %v12243_v45  ;;  %v5334_v46 = vmax.f32 %v4214_v42, 0.0  ;;  %v10253_v13 = vsel %vm8098_vm4, %v9435_v28, 0.0  ;;  %17882 = vst [vmem:[#allocation27_spill] sm:$0xff] %v16214_v56 }
 0x389   : > { %7894 = vst.msk [vmem:[%s13964_s12 + $0x4d0] sm:$0xf] %vm7585_vm3, %v12241_v62  ;;  %v10255_v39 = vsel %vm8098_vm4, %v9436_v8, 0.0  ;;  %v4235_v20 = vadd.f32 %v15861_v41, %v17880_v23  ;;  %v4227_v61 = vadd.f32 %v15861_v41, %v17881_v40  ;;  %v9438_v27 = vmul.f32 %v5335_v16, %v5335_v16 }
 0x38a   : > { %v10254_v58 = vadd.f32 %v10253_v13, %v10252_v52  ;;  %v8715_v32 = vadd.f32 %v8714_v33, %v8713_v51  ;;  %v12244_v42 = vpack.c.bf16 %v5336_v11, %v5336_v11  ;;  %v8718_v31 = vsel %vm8098_vm4, %v5335_v16, 0.0  ;;  %v16218_v13 = vpop.f32.mrb[121].mxu1  ;;  %v17884_v51 = vld [vmem:[#allocation30_spill] sm:$0xff] }
 0x38b   : > { %v12242_v45 = vpack.c.bf16 %v5334_v46, %v5334_v46  ;;  %v8716_v28 = vsel %vm8098_vm4, %v5334_v46, 0.0  ;;  %v9437_v62 = vmul.f32 %v5334_v46, %v5334_v46  ;;  %v5339_v23 = vmax.f32 %v4235_v20, 0.0  ;;  %17883 = vst [vmem:[#allocation28_spill] sm:$0xff] %v16218_v13 }
 0x38c   : > { %v10256_v8 = vadd.f32 %v10255_v39, %v10254_v58  ;;  %7897 = vst.msk [vmem:[%s13964_s12 + $0x4dc] sm:$0xf] %vm7585_vm3, %v12244_v42  ;;  %v8717_v44 = vadd.f32 %v8716_v28, %v8715_v32  ;;  %v5337_v52 = vmax.f32 %v4227_v61, 0.0  ;;  %v9439_v33 = vmul.f32 %v5336_v11, %v5336_v11  ;;  %v16227_v39 = vpop.f32.mrb[122].mxu1  ;;  %v13535_v58 = vld [vmem:[%s13827_s11 + $0x790] sm:$0xff]  }
 0x38d   : > { %7895 = vst.msk [vmem:[%s13964_s12 + $0x4d4] sm:$0xf] %vm7585_vm3, %v12242_v45  ;;  %v10257_v16 = vsel %vm8098_vm4, %v9437_v62, 0.0  ;;  %v4238_v40 = vadd.f32 %v15861_v41, %v17884_v51  ;;  %v4230_v46 = vadd.f32 %v15861_v41, %v15654_v26  ;;  %17885 = vst [vmem:[#allocation29_spill] sm:$0xff] %v16227_v39  ;;  %v10259_v20 = vsel %vm8098_vm4, %v9438_v27, 0.0  ;;  %v16231_v28 = vpop.f32.mrb[123].mxu1  ;;  %13192 = vmatprep.mubr.msk.bf16.mxu1 %vm2168_vm2, %v13535_v58 }
 0x38e   : > { %v8719_v61 = vadd.f32 %v8718_v31, %v8717_v44  ;;  %v10258_v32 = vadd.f32 %v10257_v16, %v10256_v8  ;;  %v12247_v42 = vpack.c.bf16 %v5339_v23, %v5339_v23  ;;  %v13536_v45 = vld [vmem:[%s13827_s11 + $0x798] sm:$0xff]   ;;  %v8720_v62 = vsel %vm8098_vm4, %v5336_v11, 0.0 }
 0x38f   : > { %v12245_v13 = vpack.c.bf16 %v5337_v52, %v5337_v52  ;;  %v8722_v51 = vsel %vm8098_vm4, %v5337_v52, 0.0  ;;  %v9440_v56 = vmul.f32 %v5337_v52, %v5337_v52  ;;  %v5340_v27 = vmax.f32 %v4238_v40, 0.0  ;;  %13193 = vmatmul.mubr.msk.bf16.gmra.mrb[228].mxu1 %vm2168_vm2, %v13536_v45 }
 0x390   : > { %v8721_v26 = vadd.f32 %v8720_v62, %v8719_v61  ;;  %v10260_v39 = vadd.f32 %v10259_v20, %v10258_v32  ;;  %7900 = vst.msk [vmem:[%s13964_s12 + $0x4e8] sm:$0xf] %vm7585_vm3, %v12247_v42  ;;  %v5338_v31 = vmax.f32 %v4230_v46, 0.0  ;;  %v10261_v8 = vsel %vm8098_vm4, %v9439_v33, 0.0  ;;  %v16250_v32 = vpop.f32.mrb[124].mxu1  ;;  %v17886_v62 = vld [vmem:[#allocation31_spill] sm:$0xff] }
 0x391   : > { %7898 = vst.msk [vmem:[%s13964_s12 + $0x4e0] sm:$0xf] %vm7585_vm3, %v12245_v13  ;;  %v10263_v11 = vsel %vm8098_vm4, %v9440_v56, 0.0  ;;  %v4251_v44 = vadd.f32 %v15861_v41, %v15671_v5  ;;  %v4243_v52 = vadd.f32 %v15861_v41, %v15675_v50  ;;  %v9442_v58 = vmul.f32 %v5339_v23, %v5339_v23  ;;  %v16254_v42 = vpop.f32.mrb[125].mxu1 }
 0x392   : > { %v10262_v16 = vadd.f32 %v10261_v8, %v10260_v39  ;;  %v8723_v40 = vadd.f32 %v8722_v51, %v8721_v26  ;;  %v12248_v46 = vpack.c.bf16 %v5340_v27, %v5340_v27  ;;  %v8726_v20 = vsel %vm8098_vm4, %v5339_v23, 0.0  ;;  %v13537_v8 = vld [vmem:[%s13827_s11 + $0x7a0] sm:$0xff]  }
 0x393   : > { %v12246_v61 = vpack.c.bf16 %v5338_v31, %v5338_v31  ;;  %v8724_v33 = vsel %vm8098_vm4, %v5338_v31, 0.0  ;;  %v9441_v13 = vmul.f32 %v5338_v31, %v5338_v31  ;;  %v5343_v50 = vmax.f32 %v4251_v44, 0.0  ;;  %v16263_v31 = vpop.f32.mrb[126].mxu1  ;;  %13196 = vmatprep.mubr.msk.bf16.mxu1 %vm2168_vm2, %v13537_v8 }
 0x394   : > { %v10264_v56 = vadd.f32 %v10263_v11, %v10262_v16  ;;  %7901 = vst.msk [vmem:[%s13964_s12 + $0x4ec] sm:$0xf] %vm7585_vm3, %v12248_v46  ;;  %v8725_v5 = vadd.f32 %v8724_v33, %v8723_v40  ;;  %v5341_v39 = vmax.f32 %v4243_v52, 0.0  ;;  %v9443_v45 = vmul.f32 %v5340_v27, %v5340_v27  ;;  %17887 = vst [vmem:[#allocation30_spill] sm:$0xff] %v16263_v31  ;;  %v16267_v40 = vpop.f32.mrb[127].mxu1  ;;  %v13538_v46 = vld [vmem:[%s13827_s11 + $0x7a8] sm:$0xff]  }
 0x395   : > { %7899 = vst.msk [vmem:[%s13964_s12 + $0x4e4] sm:$0xf] %vm7585_vm3, %v12246_v61  ;;  %v10265_v23 = vsel %vm8098_vm4, %v9441_v13, 0.0  ;;  %v4254_v51 = vadd.f32 %v15861_v41, %v17886_v62  ;;  %v4246_v26 = vadd.f32 %v15861_v41, %v15686_v30  ;;  %v10267_v11 = vsel %vm8098_vm4, %v9442_v58, 0.0 }
 0x396   : > { %v8727_v44 = vadd.f32 %v8726_v20, %v8725_v5  ;;  %v10266_v52 = vadd.f32 %v10265_v23, %v10264_v56  ;;  %v12251_v16 = vpack.c.bf16 %v5343_v50, %v5343_v50  ;;  %v8728_v61 = vsel %vm8098_vm4, %v5340_v27, 0.0 }
 0x397   : > { %v12249_v33 = vpack.c.bf16 %v5341_v39, %v5341_v39  ;;  %v8730_v13 = vsel %vm8098_vm4, %v5341_v39, 0.0  ;;  %v9444_v62 = vmul.f32 %v5341_v39, %v5341_v39  ;;  %v5344_v58 = vmax.f32 %v4254_v51, 0.0  ;;  %13197 = vmatmul.mubr.msk.bf16.gmra.mrb[232].mxu1 %vm2168_vm2, %v13538_v46 }
 0x398   : > { %v8729_v30 = vadd.f32 %v8728_v61, %v8727_v44  ;;  %v10268_v31 = vadd.f32 %v10267_v11, %v10266_v52  ;;  %7904 = vst.msk [vmem:[%s13964_s12 + $0x4f8] sm:$0xf] %vm7585_vm3, %v12251_v16  ;;  %v5342_v20 = vmax.f32 %v4246_v26, 0.0  ;;  %v10269_v56 = vsel %vm8098_vm4, %v9443_v45, 0.0  ;;  %v16286_v16 = vpop.f32.mrb[128].mxu1 }
 0x399   : > { %7902 = vst.msk [vmem:[%s13964_s12 + $0x4f0] sm:$0xf] %vm7585_vm3, %v12249_v33  ;;  %v10271_v27 = vsel %vm8098_vm4, %v9444_v62, 0.0  ;;  %v4267_v5 = vadd.f32 %v15861_v41, %v15705_v6  ;;  %v4259_v39 = vadd.f32 %v15861_v41, %v15709_v59  ;;  %v9446_v8 = vmul.f32 %v5343_v50, %v5343_v50  ;;  %v16290_v41 = vpop.f32.mrb[129].mxu1  ;;  %v16298_v33 = vld [vmem:[%s17805_s2] ss:$0 sm:$0xff] }
 0x39a   : > { %v10270_v23 = vadd.f32 %v10269_v56, %v10268_v31  ;;  %v8731_v51 = vadd.f32 %v8730_v13, %v8729_v30  ;;  %v12252_v26 = vpack.c.bf16 %v5344_v58, %v5344_v58  ;;  %v8734_v11 = vsel %vm8098_vm4, %v5343_v50, 0.0  ;;  %v16304_v30 = vpop.f32.mrb[130].mxu1 }
 0x39b   : > { %v12250_v44 = vpack.c.bf16 %v5342_v20, %v5342_v20  ;;  %v8732_v45 = vsel %vm8098_vm4, %v5342_v20, 0.0  ;;  %v9445_v52 = vmul.f32 %v5342_v20, %v5342_v20  ;;  %v5347_v61 = vmax.f32 %v4267_v5, 0.0  ;;  %v13539_v20 = vld [vmem:[%s13827_s11 + $0x7b0] sm:$0xff]  }
 0x39c   : > { %v10272_v46 = vadd.f32 %v10271_v27, %v10270_v23  ;;  %7905 = vst.msk [vmem:[%s13964_s12 + $0x4fc] sm:$0xf] %vm7585_vm3, %v12252_v26  ;;  %v8733_v6 = vadd.f32 %v8732_v45, %v8731_v51  ;;  %v5345_v59 = vmax.f32 %v4259_v39, 0.0  ;;  %v9447_v31 = vmul.f32 %v5344_v58, %v5344_v58  ;;  %v16308_v23 = vpop.f32.mrb[131].mxu1  ;;  %v13540_v51 = vld [vmem:[%s13827_s11 + $0x7b8] sm:$0xff]   ;;  %13200 = vmatprep.mubr.msk.bf16.mxu1 %vm2168_vm2, %v13539_v20 }
 0x39d   : > { %7903 = vst.msk [vmem:[%s13964_s12 + $0x4f4] sm:$0xf] %vm7585_vm3, %v12250_v44  ;;  %v10273_v50 = vsel %vm8098_vm4, %v9445_v52, 0.0  ;;  %v4270_v13 = vadd.f32 %v16298_v33, %v15718_v37  ;;  %v4262_v62 = vadd.f32 %v16298_v33, %v15722_v14  ;;  %v10275_v56 = vsel %vm8098_vm4, %v9446_v8, 0.0 }
 0x39e   : > { %v8735_v27 = vadd.f32 %v8734_v11, %v8733_v6  ;;  %v10274_v5 = vadd.f32 %v10273_v50, %v10272_v46  ;;  %v12255_v39 = vpack.c.bf16 %v5347_v61, %v5347_v61  ;;  %v8736_v26 = vsel %vm8098_vm4, %v5344_v58, 0.0 }
 0x39f   : > { %v12253_v44 = vpack.c.bf16 %v5345_v59, %v5345_v59  ;;  %v8738_v37 = vsel %vm8098_vm4, %v5345_v59, 0.0  ;;  %v9448_v45 = vmul.f32 %v5345_v59, %v5345_v59  ;;  %v5348_v8 = vmax.f32 %v4270_v13, 0.0  ;;  %13201 = vmatmul.mubr.msk.bf16.gmra.mrb[236].mxu1 %vm2168_vm2, %v13540_v51 }
 0x3a0   : > { %v8737_v14 = vadd.f32 %v8736_v26, %v8735_v27  ;;  %v10276_v52 = vadd.f32 %v10275_v56, %v10274_v5  ;;  %7908 = vst.msk [vmem:[%s13964_s12 + $0x508] sm:$0xf] %vm7585_vm3, %v12255_v39  ;;  %v5346_v11 = vmax.f32 %v4262_v62, 0.0  ;;  %v10277_v46 = vsel %vm8098_vm4, %v9447_v31, 0.0  ;;  %v16327_v39 = vpop.f32.mrb[132].mxu1 }
 0x3a1   : > { %7906 = vst.msk [vmem:[%s13964_s12 + $0x500] sm:$0xf] %vm7585_vm3, %v12253_v44  ;;  %v10279_v58 = vsel %vm8098_vm4, %v9448_v45, 0.0  ;;  %v4283_v6 = vadd.f32 %v16298_v33, %v15741_v22  ;;  %v4275_v59 = vadd.f32 %v16298_v33, %v15745_v0  ;;  %v9450_v20 = vmul.f32 %v5347_v61, %v5347_v61  ;;  %v16331_v44 = vpop.f32.mrb[133].mxu1 }
 0x3a2   : > { %v10278_v50 = vadd.f32 %v10277_v46, %v10276_v52  ;;  %v8739_v13 = vadd.f32 %v8738_v37, %v8737_v14  ;;  %v12256_v62 = vpack.c.bf16 %v5348_v8, %v5348_v8  ;;  %v8742_v56 = vsel %vm8098_vm4, %v5347_v61, 0.0  ;;  %v16340_v52 = vpop.f32.mrb[134].mxu1 }
 0x3a3   : > { %v12254_v27 = vpack.c.bf16 %v5346_v11, %v5346_v11  ;;  %v8740_v31 = vsel %vm8098_vm4, %v5346_v11, 0.0  ;;  %v9449_v5 = vmul.f32 %v5346_v11, %v5346_v11  ;;  %v5351_v0 = vmax.f32 %v4283_v6, 0.0  ;;  %v13541_v11 = vld [vmem:[%s13827_s11 + $0x7c0] sm:$0xff]  }
 0x3a4   : > { %v10280_v51 = vadd.f32 %v10279_v58, %v10278_v50  ;;  %7909 = vst.msk [vmem:[%s13964_s12 + $0x50c] sm:$0xf] %vm7585_vm3, %v12256_v62  ;;  %v8741_v22 = vadd.f32 %v8740_v31, %v8739_v13  ;;  %v5349_v26 = vmax.f32 %v4275_v59, 0.0  ;;  %v9451_v37 = vmul.f32 %v5348_v8, %v5348_v8  ;;  %v16344_v50 = vpop.f32.mrb[135].mxu1  ;;  %v13542_v13 = vld [vmem:[%s13827_s11 + $0x7c8] sm:$0xff]   ;;  %13204 = vmatprep.mubr.msk.bf16.mxu1 %vm2168_vm2, %v13541_v11 }
 0x3a5   : > { %7907 = vst.msk [vmem:[%s13964_s12 + $0x504] sm:$0xf] %vm7585_vm3, %v12254_v27  ;;  %v10281_v61 = vsel %vm8098_vm4, %v9449_v5, 0.0  ;;  %v4286_v45 = vadd.f32 %v16298_v33, %v15754_v3  ;;  %v4278_v14 = vadd.f32 %v16298_v33, %v15758_v4  ;;  %v10283_v46 = vsel %vm8098_vm4, %v9450_v20, 0.0 }
 0x3a6   : > { %v8743_v58 = vadd.f32 %v8742_v56, %v8741_v22  ;;  %v10282_v6 = vadd.f32 %v10281_v61, %v10280_v51  ;;  %v12259_v59 = vpack.c.bf16 %v5351_v0, %v5351_v0  ;;  %v8744_v62 = vsel %vm8098_vm4, %v5348_v8, 0.0 }
 0x3a7   : > { %v12257_v27 = vpack.c.bf16 %v5349_v26, %v5349_v26  ;;  %v8746_v3 = vsel %vm8098_vm4, %v5349_v26, 0.0  ;;  %v9452_v31 = vmul.f32 %v5349_v26, %v5349_v26  ;;  %v5352_v20 = vmax.f32 %v4286_v45, 0.0  ;;  %13205 = vmatmul.mubr.msk.bf16.gmra.mrb[240].mxu1 %vm2168_vm2, %v13542_v13 }
 0x3a8   : > { %v8745_v4 = vadd.f32 %v8744_v62, %v8743_v58  ;;  %v10284_v5 = vadd.f32 %v10283_v46, %v10282_v6  ;;  %7912 = vst.msk [vmem:[%s13964_s12 + $0x518] sm:$0xf] %vm7585_vm3, %v12259_v59  ;;  %v5350_v56 = vmax.f32 %v4278_v14, 0.0  ;;  %v10285_v51 = vsel %vm8098_vm4, %v9451_v37, 0.0  ;;  %v16363_v59 = vpop.f32.mrb[136].mxu1 }
 0x3a9   : > { %7910 = vst.msk [vmem:[%s13964_s12 + $0x510] sm:$0xf] %vm7585_vm3, %v12257_v27  ;;  %v10287_v8 = vsel %vm8098_vm4, %v9452_v31, 0.0  ;;  %v4299_v22 = vadd.f32 %v16298_v33, %v15777_v54  ;;  %v4291_v26 = vadd.f32 %v16298_v33, %v15781_v38  ;;  %v9454_v11 = vmul.f32 %v5351_v0, %v5351_v0  ;;  %v16367_v27 = vpop.f32.mrb[137].mxu1 }
 0x3aa   : > { %v10286_v61 = vadd.f32 %v10285_v51, %v10284_v5  ;;  %v8747_v45 = vadd.f32 %v8746_v3, %v8745_v4  ;;  %v12260_v14 = vpack.c.bf16 %v5352_v20, %v5352_v20  ;;  %v8750_v46 = vsel %vm8098_vm4, %v5351_v0, 0.0  ;;  %v16376_v5 = vpop.f32.mrb[138].mxu1 }
 0x3ab   : > { %v12258_v58 = vpack.c.bf16 %v5350_v56, %v5350_v56  ;;  %v8748_v37 = vsel %vm8098_vm4, %v5350_v56, 0.0  ;;  %v9453_v6 = vmul.f32 %v5350_v56, %v5350_v56  ;;  %v5355_v38 = vmax.f32 %v4299_v22, 0.0  ;;  %v13543_v56 = vld [vmem:[%s13827_s11 + $0x7d0] sm:$0xff]  }
 0x3ac   : > { %v10288_v13 = vadd.f32 %v10287_v8, %v10286_v61  ;;  %7913 = vst.msk [vmem:[%s13964_s12 + $0x51c] sm:$0xf] %vm7585_vm3, %v12260_v14  ;;  %v8749_v54 = vadd.f32 %v8748_v37, %v8747_v45  ;;  %v5353_v62 = vmax.f32 %v4291_v26, 0.0  ;;  %v9455_v3 = vmul.f32 %v5352_v20, %v5352_v20  ;;  %v16380_v61 = vpop.f32.mrb[139].mxu1  ;;  %v13544_v45 = vld [vmem:[%s13827_s11 + $0x7d8] sm:$0xff]   ;;  %13208 = vmatprep.mubr.msk.bf16.mxu1 %vm2168_vm2, %v13543_v56 }
 0x3ad   : > { %7911 = vst.msk [vmem:[%s13964_s12 + $0x514] sm:$0xf] %vm7585_vm3, %v12258_v58  ;;  %v10289_v0 = vsel %vm8098_vm4, %v9453_v6, 0.0  ;;  %v4302_v31 = vadd.f32 %v16298_v33, %v15790_v49  ;;  %v4294_v4 = vadd.f32 %v16298_v33, %v15794_v15  ;;  %v10291_v51 = vsel %vm8098_vm4, %v9454_v11, 0.0 }
 0x3ae   : > { %v8751_v8 = vadd.f32 %v8750_v46, %v8749_v54  ;;  %v10290_v22 = vadd.f32 %v10289_v0, %v10288_v13  ;;  %v12263_v26 = vpack.c.bf16 %v5355_v38, %v5355_v38  ;;  %v8752_v14 = vsel %vm8098_vm4, %v5352_v20, 0.0 }
 0x3af   : > { %v12261_v58 = vpack.c.bf16 %v5353_v62, %v5353_v62  ;;  %v8754_v49 = vsel %vm8098_vm4, %v5353_v62, 0.0  ;;  %v9456_v37 = vmul.f32 %v5353_v62, %v5353_v62  ;;  %v5356_v11 = vmax.f32 %v4302_v31, 0.0  ;;  %13209 = vmatmul.mubr.msk.bf16.gmra.mrb[244].mxu1 %vm2168_vm2, %v13544_v45 }
 0x3b0   : > { %v8753_v15 = vadd.f32 %v8752_v14, %v8751_v8  ;;  %v10292_v6 = vadd.f32 %v10291_v51, %v10290_v22  ;;  %7916 = vst.msk [vmem:[%s13964_s12 + $0x528] sm:$0xf] %vm7585_vm3, %v12263_v26  ;;  %v5354_v46 = vmax.f32 %v4294_v4, 0.0  ;;  %v10293_v13 = vsel %vm8098_vm4, %v9455_v3, 0.0 }
 0x3b1   : > { %7914 = vst.msk [vmem:[%s13964_s12 + $0x520] sm:$0xf] %vm7585_vm3, %v12261_v58  ;;  %v10295_v20 = vsel %vm8098_vm4, %v9456_v37, 0.0  ;;  %v4315_v54 = vadd.f32 %v16298_v33, %v15813_v53  ;;  %v4307_v62 = vadd.f32 %v16298_v33, %v15817_v1  ;;  %v9458_v56 = vmul.f32 %v5355_v38, %v5355_v38  ;;  %v16399_v26 = vpop.f32.mrb[140].mxu1 }
 0x3b2   : > { %v10294_v0 = vadd.f32 %v10293_v13, %v10292_v6  ;;  %v8755_v31 = vadd.f32 %v8754_v49, %v8753_v15  ;;  %v12264_v4 = vpack.c.bf16 %v5356_v11, %v5356_v11  ;;  %v8758_v51 = vsel %vm8098_vm4, %v5355_v38, 0.0  ;;  %v16403_v58 = vpop.f32.mrb[141].mxu1 }
 0x3b3   : > { %v12262_v8 = vpack.c.bf16 %v5354_v46, %v5354_v46  ;;  %v8756_v3 = vsel %vm8098_vm4, %v5354_v46, 0.0  ;;  %v9457_v22 = vmul.f32 %v5354_v46, %v5354_v46  ;;  %v5359_v1 = vmax.f32 %v4315_v54, 0.0  ;;  %v16412_v6 = vpop.f32.mrb[142].mxu1  ;;  %v13545_v46 = vld [vmem:[%s13827_s11 + $0x7e0] sm:$0xff]  }
 0x3b4   : > { %v10296_v45 = vadd.f32 %v10295_v20, %v10294_v0  ;;  %7917 = vst.msk [vmem:[%s13964_s12 + $0x52c] sm:$0xf] %vm7585_vm3, %v12264_v4  ;;  %v8757_v53 = vadd.f32 %v8756_v3, %v8755_v31  ;;  %v5357_v14 = vmax.f32 %v4307_v62, 0.0  ;;  %v9459_v49 = vmul.f32 %v5356_v11, %v5356_v11  ;;  %v16416_v0 = vpop.f32.mrb[143].mxu1  ;;  %v13546_v31 = vld [vmem:[%s13827_s11 + $0x7e8] sm:$0xff]   ;;  %13212 = vmatprep.mubr.msk.bf16.mxu1 %vm2168_vm2, %v13545_v46 }
 0x3b5   : > { %7915 = vst.msk [vmem:[%s13964_s12 + $0x524] sm:$0xf] %vm7585_vm3, %v12262_v8  ;;  %v10297_v38 = vsel %vm8098_vm4, %v9457_v22, 0.0  ;;  %v4318_v37 = vadd.f32 %v16298_v33, %v15826_v10  ;;  %v4310_v15 = vadd.f32 %v16298_v33, %v15830_v2  ;;  %v10299_v13 = vsel %vm8098_vm4, %v9458_v56, 0.0 }
 0x3b6   : > { %v8759_v20 = vadd.f32 %v8758_v51, %v8757_v53  ;;  %v10298_v54 = vadd.f32 %v10297_v38, %v10296_v45  ;;  %v12267_v62 = vpack.c.bf16 %v5359_v1, %v5359_v1  ;;  %v8760_v4 = vsel %vm8098_vm4, %v5356_v11, 0.0 }
 0x3b7   : > { %v12265_v8 = vpack.c.bf16 %v5357_v14, %v5357_v14  ;;  %v8762_v10 = vsel %vm8098_vm4, %v5357_v14, 0.0  ;;  %v9460_v3 = vmul.f32 %v5357_v14, %v5357_v14  ;;  %v5360_v56 = vmax.f32 %v4318_v37, 0.0  ;;  %13213 = vmatmul.mubr.msk.bf16.gmra.mrb[248].mxu1 %vm2168_vm2, %v13546_v31 }
 0x3b8   : > { %v8761_v2 = vadd.f32 %v8760_v4, %v8759_v20  ;;  %v10300_v22 = vadd.f32 %v10299_v13, %v10298_v54  ;;  %7920 = vst.msk [vmem:[%s13964_s12 + $0x538] sm:$0xf] %vm7585_vm3, %v12267_v62  ;;  %v5358_v51 = vmax.f32 %v4310_v15, 0.0  ;;  %v10301_v45 = vsel %vm8098_vm4, %v9459_v49, 0.0 }
 0x3b9   : > { %7918 = vst.msk [vmem:[%s13964_s12 + $0x530] sm:$0xf] %vm7585_vm3, %v12265_v8  ;;  %v10303_v11 = vsel %vm8098_vm4, %v9460_v3, 0.0  ;;  %v4331_v53 = vadd.f32 %v16298_v33, %v15849_v57  ;;  %v4323_v14 = vadd.f32 %v16298_v33, %v15853_v47  ;;  %v9462_v46 = vmul.f32 %v5359_v1, %v5359_v1  ;;  %v16435_v62 = vpop.f32.mrb[144].mxu1 }
 0x3ba   : > { %v10302_v38 = vadd.f32 %v10301_v45, %v10300_v22  ;;  %v8763_v37 = vadd.f32 %v8762_v10, %v8761_v2  ;;  %v12268_v15 = vpack.c.bf16 %v5360_v56, %v5360_v56  ;;  %v8766_v13 = vsel %vm8098_vm4, %v5359_v1, 0.0  ;;  %v16439_v8 = vpop.f32.mrb[145].mxu1 }
 0x3bb   : > { %v12266_v20 = vpack.c.bf16 %v5358_v51, %v5358_v51  ;;  %v8764_v49 = vsel %vm8098_vm4, %v5358_v51, 0.0  ;;  %v9461_v54 = vmul.f32 %v5358_v51, %v5358_v51  ;;  %v5363_v47 = vmax.f32 %v4331_v53, 0.0  ;;  %v16448_v22 = vpop.f32.mrb[146].mxu1  ;;  %v13547_v51 = vld [vmem:[%s13827_s11 + $0x7f0] sm:$0xff]  }
 0x3bc   : > { %v10304_v31 = vadd.f32 %v10303_v11, %v10302_v38  ;;  %7921 = vst.msk [vmem:[%s13964_s12 + $0x53c] sm:$0xf] %vm7585_vm3, %v12268_v15  ;;  %v8765_v57 = vadd.f32 %v8764_v49, %v8763_v37  ;;  %v5361_v4 = vmax.f32 %v4323_v14, 0.0  ;;  %v9463_v10 = vmul.f32 %v5360_v56, %v5360_v56  ;;  %v16452_v38 = vpop.f32.mrb[147].mxu1  ;;  %v13548_v37 = vld [vmem:[%s13827_s11 + $0x7f8] sm:$0xff]   ;;  %13216 = vmatprep.mubr.msk.bf16.mxu1 %vm2168_vm2, %v13547_v51  ;;  %s13677_s11 = smov [#allocation5]  }
 0x3bd   : > { %7919 = vst.msk [vmem:[%s13964_s12 + $0x534] sm:$0xf] %vm7585_vm3, %v12266_v20  ;;  %v10305_v1 = vsel %vm8098_vm4, %v9461_v54, 0.0  ;;  %v4334_v3 = vadd.f32 %v16298_v33, %v15867_v60  ;;  %v4326_v2 = vadd.f32 %v16298_v33, %v15871_v48  ;;  %v10307_v45 = vsel %vm8098_vm4, %v9462_v46, 0.0  ;;  %s13593_s25 = sshll.u32 %s13677_s11, 4  ;;  %s13594_s25 = int_to_ptr.vmem [resolvable:$false] %s13593_s25 }
 0x3be   : > { %v8767_v11 = vadd.f32 %v8766_v13, %v8765_v57  ;;  %v10306_v53 = vadd.f32 %v10305_v1, %v10304_v31  ;;  %v12271_v14 = vpack.c.bf16 %v5363_v47, %v5363_v47  ;;  %v8768_v15 = vsel %vm8098_vm4, %v5360_v56, 0.0  ;;  %s13595_s27 = scalar_lea.vmem %s13594_s25, 65536  ;;  %p13596_p10 = scmp.lt.s32.totalorder %s17735_s17, %s13594_s25 }
 0x3bf   : > { %v12269_v20 = vpack.c.bf16 %v5361_v4, %v5361_v4  ;;  %v8770_v60 = vsel %vm8098_vm4, %v5361_v4, 0.0  ;;  %v9464_v49 = vmul.f32 %v5361_v4, %v5361_v4  ;;  %v5364_v46 = vmax.f32 %v4334_v3, 0.0  ;;  %13217 = vmatmul.mubr.msk.bf16.gmra.mrb[252].mxu1 %vm2168_vm2, %v13548_v37  ;;  %p13597_p12 = scmp.lt.s32.totalorder %s13595_s27, %s13589_s15 }
 0x3c0   : > { %v8769_v48 = vadd.f32 %v8768_v15, %v8767_v11  ;;  %v10308_v54 = vadd.f32 %v10307_v45, %v10306_v53  ;;  %7924 = vst.msk [vmem:[%s13964_s12 + $0x548] sm:$0xf] %vm7585_vm3, %v12271_v14  ;;  %v5362_v13 = vmax.f32 %v4326_v2, 0.0  ;;  %v10309_v31 = vsel %vm8098_vm4, %v9463_v10, 0.0 }
 0x3c1   : > { %7922 = vst.msk [vmem:[%s13964_s12 + $0x540] sm:$0xf] %vm7585_vm3, %v12269_v20  ;;  %v10311_v56 = vsel %vm8098_vm4, %v9464_v49, 0.0  ;;  %v4347_v57 = vadd.f32 %v16298_v33, %v15890_v36  ;;  %v4339_v4 = vadd.f32 %v16298_v33, %v15894_v18  ;;  %v9466_v51 = vmul.f32 %v5363_v47, %v5363_v47  ;;  %v16471_v14 = vpop.f32.mrb[148].mxu1  ;;  %p13598_p1 = por %p13597_p12, %p13596_p10 }
 0x3c2   : > { %v10310_v1 = vadd.f32 %v10309_v31, %v10308_v54  ;;  %v8771_v3 = vadd.f32 %v8770_v60, %v8769_v48  ;;  %v12272_v2 = vpack.c.bf16 %v5364_v46, %v5364_v46  ;;  %v8774_v45 = vsel %vm8098_vm4, %v5363_v47, 0.0  ;;  %v16475_v18 = vpop.f32.mrb[149].mxu1 }
 0x3c3   : > { %v12270_v11 = vpack.c.bf16 %v5362_v13, %v5362_v13  ;;  %v8772_v10 = vsel %vm8098_vm4, %v5362_v13, 0.0  ;;  %v9465_v53 = vmul.f32 %v5362_v13, %v5362_v13  ;;  %v5367_v15 = vmax.f32 %v4347_v57, 0.0  ;;  %v16484_v54 = vpop.f32.mrb[150].mxu1  ;;  %p13599_p3 = pnand %p13598_p1, %p13592_p13 }
 0x3c4   : > { %v10312_v37 = vadd.f32 %v10311_v56, %v10310_v1  ;;  %7925 = vst.msk [vmem:[%s13964_s12 + $0x54c] sm:$0xf] %vm7585_vm3, %v12272_v2  ;;  %v8773_v36 = vadd.f32 %v8772_v10, %v8771_v3  ;;  %v5365_v20 = vmax.f32 %v4339_v4, 0.0  ;;  %v9467_v49 = vmul.f32 %v5364_v46, %v5364_v46  ;;  %v16487_v4 = vpop.f32.mrb[151].mxu1 }
 0x3c5   : > { %7923 = vst.msk [vmem:[%s13964_s12 + $0x544] sm:$0xf] %vm7585_vm3, %v12270_v11  ;;  %v10313_v47 = vsel %vm8098_vm4, %v9465_v53, 0.0  ;;  %v4350_v60 = vadd.f32 %v16298_v33, %v15903_v43  ;;  %v4342_v48 = vadd.f32 %v16298_v33, %v15907_v34  ;;  %v10315_v13 = vsel %vm8098_vm4, %v9466_v51, 0.0 }
 0x3c6   : > { %v8775_v31 = vadd.f32 %v8774_v45, %v8773_v36  ;;  %v10314_v56 = vadd.f32 %v10313_v47, %v10312_v37  ;;  %v12275_v57 = vpack.c.bf16 %v5367_v15, %v5367_v15  ;;  %v8776_v1 = vsel %vm8098_vm4, %v5364_v46, 0.0 }
 0x3c7   : > { %v12273_v3 = vpack.c.bf16 %v5365_v20, %v5365_v20  ;;  %v8778_v2 = vsel %vm8098_vm4, %v5365_v20, 0.0  ;;  %v9468_v11 = vmul.f32 %v5365_v20, %v5365_v20  ;;  %v5368_v34 = vmax.f32 %v4350_v60, 0.0 }
 0x3c8   : > { %v8777_v43 = vadd.f32 %v8776_v1, %v8775_v31  ;;  %v10316_v10 = vadd.f32 %v10315_v13, %v10314_v56  ;;  %7928 = vst.msk [vmem:[%s13964_s12 + $0x558] sm:$0xf] %vm7585_vm3, %v12275_v57  ;;  %v5366_v53 = vmax.f32 %v4342_v48, 0.0  ;;  %v10317_v51 = vsel %vm8098_vm4, %v9467_v49, 0.0 }
 0x3c9   : > { %7926 = vst.msk [vmem:[%s13964_s12 + $0x550] sm:$0xf] %vm7585_vm3, %v12273_v3  ;;  %v10319_v45 = vsel %vm8098_vm4, %v9468_v11, 0.0  ;;  %v4363_v46 = vadd.f32 %v16298_v33, %v15926_v25  ;;  %v4355_v37 = vadd.f32 %v16298_v33, %v15930_v7  ;;  %v9470_v20 = vmul.f32 %v5367_v15, %v5367_v15  ;;  %v16503_v56 = vpop.f32.mrb[152].mxu1 }
 0x3ca   : > { %v10318_v36 = vadd.f32 %v10317_v51, %v10316_v10  ;;  %v8779_v47 = vadd.f32 %v8778_v2, %v8777_v43  ;;  %v12276_v13 = vpack.c.bf16 %v5368_v34, %v5368_v34  ;;  %v8782_v60 = vsel %vm8098_vm4, %v5367_v15, 0.0  ;;  %v16507_v7 = vpop.f32.mrb[153].mxu1 }
 0x3cb   : > { %v12274_v48 = vpack.c.bf16 %v5366_v53, %v5366_v53  ;;  %v8780_v49 = vsel %vm8098_vm4, %v5366_v53, 0.0  ;;  %v9469_v31 = vmul.f32 %v5366_v53, %v5366_v53  ;;  %v5371_v1 = vmax.f32 %v4363_v46, 0.0  ;;  %v16516_v10 = vpop.f32.mrb[154].mxu1 }
 0x3cc   : > { %v10320_v57 = vadd.f32 %v10319_v45, %v10318_v36  ;;  %7929 = vst.msk [vmem:[%s13964_s12 + $0x55c] sm:$0xf] %vm7585_vm3, %v12276_v13  ;;  %v8781_v25 = vadd.f32 %v8780_v49, %v8779_v47  ;;  %v5369_v3 = vmax.f32 %v4355_v37, 0.0  ;;  %v9471_v11 = vmul.f32 %v5368_v34, %v5368_v34  ;;  %v16519_v37 = vpop.f32.mrb[155].mxu1 }
 0x3cd   : > { %7927 = vst.msk [vmem:[%s13964_s12 + $0x554] sm:$0xf] %vm7585_vm3, %v12274_v48  ;;  %v10321_v15 = vsel %vm8098_vm4, %v9469_v31, 0.0  ;;  %v4366_v2 = vadd.f32 %v16298_v33, %v15939_v29  ;;  %v4358_v43 = vadd.f32 %v16298_v33, %v15943_v17  ;;  %v10323_v53 = vsel %vm8098_vm4, %v9470_v20, 0.0 }
 0x3ce   : > { %v8783_v51 = vadd.f32 %v8782_v60, %v8781_v25  ;;  %v10322_v45 = vadd.f32 %v10321_v15, %v10320_v57  ;;  %v12279_v46 = vpack.c.bf16 %v5371_v1, %v5371_v1  ;;  %v8784_v36 = vsel %vm8098_vm4, %v5368_v34, 0.0 }
 0x3cf   : > { %v12277_v47 = vpack.c.bf16 %v5369_v3, %v5369_v3  ;;  %v8786_v13 = vsel %vm8098_vm4, %v5369_v3, 0.0  ;;  %v9472_v48 = vmul.f32 %v5369_v3, %v5369_v3  ;;  %v5372_v17 = vmax.f32 %v4366_v2, 0.0 }
 0x3d0   : > { %v8785_v29 = vadd.f32 %v8784_v36, %v8783_v51  ;;  %v10324_v49 = vadd.f32 %v10323_v53, %v10322_v45  ;;  %7932 = vst.msk [vmem:[%s13964_s12 + $0x568] sm:$0xf] %vm7585_vm3, %v12279_v46  ;;  %v5370_v31 = vmax.f32 %v4358_v43, 0.0  ;;  %v10325_v20 = vsel %vm8098_vm4, %v9471_v11, 0.0 }
 0x3d1   : > { %7930 = vst.msk [vmem:[%s13964_s12 + $0x560] sm:$0xf] %vm7585_vm3, %v12277_v47  ;;  %v10327_v60 = vsel %vm8098_vm4, %v9472_v48, 0.0  ;;  %v4379_v34 = vadd.f32 %v16298_v33, %v15962_v63  ;;  %v4371_v57 = vadd.f32 %v16298_v33, %v15966_v9  ;;  %v9474_v3 = vmul.f32 %v5371_v1, %v5371_v1  ;;  %v16535_v45 = vpop.f32.mrb[156].mxu1 }
 0x3d2   : > { %v10326_v25 = vadd.f32 %v10325_v20, %v10324_v49  ;;  %v8787_v15 = vadd.f32 %v8786_v13, %v8785_v29  ;;  %v12280_v53 = vpack.c.bf16 %v5372_v17, %v5372_v17  ;;  %v8790_v2 = vsel %vm8098_vm4, %v5371_v1, 0.0  ;;  %v16539_v9 = vpop.f32.mrb[157].mxu1 }
 0x3d3   : > { %v12278_v43 = vpack.c.bf16 %v5370_v31, %v5370_v31  ;;  %v8788_v11 = vsel %vm8098_vm4, %v5370_v31, 0.0  ;;  %v9473_v51 = vmul.f32 %v5370_v31, %v5370_v31  ;;  %v5375_v36 = vmax.f32 %v4379_v34, 0.0  ;;  %v16548_v49 = vpop.f32.mrb[158].mxu1 }
 0x3d4   : > { %v10328_v46 = vadd.f32 %v10327_v60, %v10326_v25  ;;  %7933 = vst.msk [vmem:[%s13964_s12 + $0x56c] sm:$0xf] %vm7585_vm3, %v12280_v53  ;;  %v8789_v63 = vadd.f32 %v8788_v11, %v8787_v15  ;;  %v5373_v47 = vmax.f32 %v4371_v57, 0.0  ;;  %v9475_v48 = vmul.f32 %v5372_v17, %v5372_v17  ;;  %v16551_v57 = vpop.f32.mrb[159].mxu1 }
 0x3d5   : > { %7931 = vst.msk [vmem:[%s13964_s12 + $0x564] sm:$0xf] %vm7585_vm3, %v12278_v43  ;;  %v10329_v1 = vsel %vm8098_vm4, %v9473_v51, 0.0  ;;  %v4382_v13 = vadd.f32 %v16298_v33, %v15975_v19  ;;  %v4374_v29 = vadd.f32 %v16298_v33, %v15979_v21  ;;  %v10331_v31 = vsel %vm8098_vm4, %v9474_v3, 0.0 }
 0x3d6   : > { %v8791_v20 = vadd.f32 %v8790_v2, %v8789_v63  ;;  %v10330_v60 = vadd.f32 %v10329_v1, %v10328_v46  ;;  %v12283_v34 = vpack.c.bf16 %v5375_v36, %v5375_v36  ;;  %v8792_v25 = vsel %vm8098_vm4, %v5372_v17, 0.0 }
 0x3d7   : > { %v12281_v15 = vpack.c.bf16 %v5373_v47, %v5373_v47  ;;  %v8794_v53 = vsel %vm8098_vm4, %v5373_v47, 0.0  ;;  %v9476_v43 = vmul.f32 %v5373_v47, %v5373_v47  ;;  %v5376_v21 = vmax.f32 %v4382_v13, 0.0 }
 0x3d8   : > { %v8793_v19 = vadd.f32 %v8792_v25, %v8791_v20  ;;  %v10332_v11 = vadd.f32 %v10331_v31, %v10330_v60  ;;  %7936 = vst.msk [vmem:[%s13964_s12 + $0x578] sm:$0xf] %vm7585_vm3, %v12283_v34  ;;  %v5374_v51 = vmax.f32 %v4374_v29, 0.0  ;;  %v10333_v3 = vsel %vm8098_vm4, %v9475_v48, 0.0 }
 0x3d9   : > { %7934 = vst.msk [vmem:[%s13964_s12 + $0x570] sm:$0xf] %vm7585_vm3, %v12281_v15  ;;  %v10335_v2 = vsel %vm8098_vm4, %v9476_v43, 0.0  ;;  %v4395_v17 = vadd.f32 %v16298_v33, %v15998_v55  ;;  %v4387_v46 = vadd.f32 %v16298_v33, %v16002_v35  ;;  %v9478_v47 = vmul.f32 %v5375_v36, %v5375_v36  ;;  %v16567_v60 = vpop.f32.mrb[160].mxu1 }
 0x3da   : > { %v10334_v63 = vadd.f32 %v10333_v3, %v10332_v11  ;;  %v8795_v1 = vadd.f32 %v8794_v53, %v8793_v19  ;;  %v12284_v31 = vpack.c.bf16 %v5376_v21, %v5376_v21  ;;  %v8798_v13 = vsel %vm8098_vm4, %v5375_v36, 0.0  ;;  %v16571_v35 = vpop.f32.mrb[161].mxu1  ;;  %v17888_v19 = vld [vmem:[#allocation32_spill] sm:$0xff] }
 0x3db   : > { %v12282_v29 = vpack.c.bf16 %v5374_v51, %v5374_v51  ;;  %v8796_v48 = vsel %vm8098_vm4, %v5374_v51, 0.0  ;;  %v9477_v20 = vmul.f32 %v5374_v51, %v5374_v51  ;;  %v5379_v25 = vmax.f32 %v4395_v17, 0.0  ;;  %v16580_v51 = vpop.f32.mrb[162].mxu1 }
 0x3dc   : > { %v10336_v34 = vadd.f32 %v10335_v2, %v10334_v63  ;;  %7937 = vst.msk [vmem:[%s13964_s12 + $0x57c] sm:$0xf] %vm7585_vm3, %v12284_v31  ;;  %v8797_v55 = vadd.f32 %v8796_v48, %v8795_v1  ;;  %v5377_v15 = vmax.f32 %v4387_v46, 0.0  ;;  %v9479_v43 = vmul.f32 %v5376_v21, %v5376_v21  ;;  %17889 = vst [vmem:[#allocation31_spill] sm:$0xff] %v16580_v51  ;;  %v16583_v63 = vpop.f32.mrb[163].mxu1 }
 0x3dd   : > { %7935 = vst.msk [vmem:[%s13964_s12 + $0x574] sm:$0xf] %vm7585_vm3, %v12282_v29  ;;  %v10337_v36 = vsel %vm8098_vm4, %v9477_v20, 0.0  ;;  %v4398_v53 = vadd.f32 %v16298_v33, %v16011_v12  ;;  %v4390_v11 = vadd.f32 %v16298_v33, %v17888_v19  ;;  %v10339_v3 = vsel %vm8098_vm4, %v9478_v47, 0.0  ;;  %17890 = vst [vmem:[#allocation32_spill] sm:$0xff] %v16583_v63 }
 0x3de   : > { %v8799_v2 = vadd.f32 %v8798_v13, %v8797_v55  ;;  %v10338_v17 = vadd.f32 %v10337_v36, %v10336_v34  ;;  %v12287_v46 = vpack.c.bf16 %v5379_v25, %v5379_v25  ;;  %v8800_v1 = vsel %vm8098_vm4, %v5376_v21, 0.0  ;;  %v17891_v34 = vld [vmem:[#allocation8_spill] sm:$0xff]  ;;  %v17892_v55 = vld [vmem:[#allocation9_spill] sm:$0xff] }
 0x3df   : > { %v12285_v31 = vpack.c.bf16 %v5377_v15, %v5377_v15  ;;  %v8802_v29 = vsel %vm8098_vm4, %v5377_v15, 0.0  ;;  %v9480_v48 = vmul.f32 %v5377_v15, %v5377_v15  ;;  %v5380_v19 = vmax.f32 %v4398_v53, 0.0 }
 0x3e0   : > { %v8801_v12 = vadd.f32 %v8800_v1, %v8799_v2  ;;  %v10340_v20 = vadd.f32 %v10339_v3, %v10338_v17  ;;  %7940 = vst.msk [vmem:[%s13964_s12 + $0x588] sm:$0xf] %vm7585_vm3, %v12287_v46  ;;  %v5378_v51 = vmax.f32 %v4390_v11, 0.0  ;;  %v10341_v47 = vsel %vm8098_vm4, %v9479_v43, 0.0 }
 0x3e1   : > { %7938 = vst.msk [vmem:[%s13964_s12 + $0x580] sm:$0xf] %vm7585_vm3, %v12285_v31  ;;  %v10343_v13 = vsel %vm8098_vm4, %v9480_v48, 0.0  ;;  %v4411_v21 = vadd.f32 %v16298_v33, %v17891_v34  ;;  %v4403_v36 = vadd.f32 %v16298_v33, %v17892_v55  ;;  %v9482_v3 = vmul.f32 %v5379_v25, %v5379_v25  ;;  %v16599_v1 = vpop.f32.mrb[164].mxu1 }
 0x3e2   : > { %v10342_v15 = vadd.f32 %v10341_v47, %v10340_v20  ;;  %v8803_v2 = vadd.f32 %v8802_v29, %v8801_v12  ;;  %v12288_v17 = vpack.c.bf16 %v5380_v19, %v5380_v19  ;;  %v8806_v53 = vsel %vm8098_vm4, %v5379_v25, 0.0  ;;  %17893 = vst [vmem:[#allocation8_spill] sm:$0xff] %v16599_v1  ;;  %v16603_v55 = vpop.f32.mrb[165].mxu1  ;;  %v17895_v29 = vld [vmem:[#allocation10_spill] sm:$0xff] }
 0x3e3   : > { %v12286_v11 = vpack.c.bf16 %v5378_v51, %v5378_v51  ;;  %v8804_v43 = vsel %vm8098_vm4, %v5378_v51, 0.0  ;;  %v9481_v46 = vmul.f32 %v5378_v51, %v5378_v51  ;;  %v5383_v34 = vmax.f32 %v4411_v21, 0.0  ;;  %17894 = vst [vmem:[#allocation9_spill] sm:$0xff] %v16603_v55  ;;  %v17896_v51 = vld [vmem:[#allocation11_spill] sm:$0xff] }
 0x3e4   : > { %v10344_v31 = vadd.f32 %v10343_v13, %v10342_v15  ;;  %7941 = vst.msk [vmem:[%s13964_s12 + $0x58c] sm:$0xf] %vm7585_vm3, %v12288_v17  ;;  %v8805_v48 = vadd.f32 %v8804_v43, %v8803_v2  ;;  %v5381_v63 = vmax.f32 %v4403_v36, 0.0  ;;  %v9483_v20 = vmul.f32 %v5380_v19, %v5380_v19  ;;  %v16612_v13 = vpop.f32.mrb[166].mxu1 }
 0x3e5   : > { %7939 = vst.msk [vmem:[%s13964_s12 + $0x584] sm:$0xf] %vm7585_vm3, %v12286_v11  ;;  %v10345_v25 = vsel %vm8098_vm4, %v9481_v46, 0.0  ;;  %v4414_v12 = vadd.f32 %v16298_v33, %v17895_v29  ;;  %v4406_v47 = vadd.f32 %v16298_v33, %v17896_v51  ;;  %17897 = vst [vmem:[#allocation10_spill] sm:$0xff] %v16612_v13  ;;  %v10347_v21 = vsel %vm8098_vm4, %v9482_v3, 0.0  ;;  %v16615_v17 = vpop.f32.mrb[167].mxu1 }
 0x3e6   : > { %v8807_v36 = vadd.f32 %v8806_v53, %v8805_v48  ;;  %v10346_v15 = vadd.f32 %v10345_v25, %v10344_v31  ;;  %v12291_v2 = vpack.c.bf16 %v5383_v34, %v5383_v34  ;;  %17898 = vst [vmem:[#allocation11_spill] sm:$0xff] %v16615_v17  ;;  %v8808_v11 = vsel %vm8098_vm4, %v5380_v19, 0.0  ;;  %v17899_v31 = vld [vmem:[#allocation12_spill] sm:$0xff]  ;;  %v17900_v48 = vld [vmem:[#allocation13_spill] sm:$0xff] }
 0x3e7   : > { %v12289_v43 = vpack.c.bf16 %v5381_v63, %v5381_v63  ;;  %v8810_v46 = vsel %vm8098_vm4, %v5381_v63, 0.0  ;;  %v9484_v55 = vmul.f32 %v5381_v63, %v5381_v63  ;;  %v5384_v51 = vmax.f32 %v4414_v12, 0.0 }
 0x3e8   : > { %v8809_v29 = vadd.f32 %v8808_v11, %v8807_v36  ;;  %v10348_v1 = vadd.f32 %v10347_v21, %v10346_v15  ;;  %7944 = vst.msk [vmem:[%s13964_s12 + $0x598] sm:$0xf] %vm7585_vm3, %v12291_v2  ;;  %v5382_v13 = vmax.f32 %v4406_v47, 0.0  ;;  %v10349_v3 = vsel %vm8098_vm4, %v9483_v20, 0.0 }
 0x3e9   : > { %7942 = vst.msk [vmem:[%s13964_s12 + $0x590] sm:$0xf] %vm7585_vm3, %v12289_v43  ;;  %v10351_v53 = vsel %vm8098_vm4, %v9484_v55, 0.0  ;;  %v4427_v19 = vadd.f32 %v16298_v33, %v17899_v31  ;;  %v4419_v25 = vadd.f32 %v16298_v33, %v17900_v48  ;;  %v9486_v21 = vmul.f32 %v5383_v34, %v5383_v34  ;;  %v16631_v11 = vpop.f32.mrb[168].mxu1 }
 0x3ea   : > { %v10350_v63 = vadd.f32 %v10349_v3, %v10348_v1  ;;  %v8811_v36 = vadd.f32 %v8810_v46, %v8809_v29  ;;  %v12292_v15 = vpack.c.bf16 %v5384_v51, %v5384_v51  ;;  %v8814_v12 = vsel %vm8098_vm4, %v5383_v34, 0.0  ;;  %17901 = vst [vmem:[#allocation12_spill] sm:$0xff] %v16631_v11  ;;  %v16635_v48 = vpop.f32.mrb[169].mxu1  ;;  %v17903_v46 = vld [vmem:[#allocation14_spill] sm:$0xff] }
 0x3eb   : > { %v12290_v47 = vpack.c.bf16 %v5382_v13, %v5382_v13  ;;  %v8812_v20 = vsel %vm8098_vm4, %v5382_v13, 0.0  ;;  %v9485_v2 = vmul.f32 %v5382_v13, %v5382_v13  ;;  %v5387_v31 = vmax.f32 %v4427_v19, 0.0  ;;  %17902 = vst [vmem:[#allocation13_spill] sm:$0xff] %v16635_v48  ;;  %v17904_v13 = vld [vmem:[#allocation15_spill] sm:$0xff] }
 0x3ec   : > { %v10352_v55 = vadd.f32 %v10351_v53, %v10350_v63  ;;  %7945 = vst.msk [vmem:[%s13964_s12 + $0x59c] sm:$0xf] %vm7585_vm3, %v12292_v15  ;;  %v8813_v43 = vadd.f32 %v8812_v20, %v8811_v36  ;;  %v5385_v17 = vmax.f32 %v4419_v25, 0.0  ;;  %v9487_v1 = vmul.f32 %v5384_v51, %v5384_v51  ;;  %v16644_v53 = vpop.f32.mrb[170].mxu1 }
 0x3ed   : > { %7943 = vst.msk [vmem:[%s13964_s12 + $0x594] sm:$0xf] %vm7585_vm3, %v12290_v47  ;;  %v10353_v34 = vsel %vm8098_vm4, %v9485_v2, 0.0  ;;  %v4430_v29 = vadd.f32 %v16298_v33, %v17903_v46  ;;  %v4422_v3 = vadd.f32 %v16298_v33, %v17904_v13  ;;  %17905 = vst [vmem:[#allocation14_spill] sm:$0xff] %v16644_v53  ;;  %v10355_v19 = vsel %vm8098_vm4, %v9486_v21, 0.0  ;;  %v16647_v15 = vpop.f32.mrb[171].mxu1 }
 0x3ee   : > { %v8815_v25 = vadd.f32 %v8814_v12, %v8813_v43  ;;  %v10354_v63 = vadd.f32 %v10353_v34, %v10352_v55  ;;  %v12295_v36 = vpack.c.bf16 %v5387_v31, %v5387_v31  ;;  %17906 = vst [vmem:[#allocation15_spill] sm:$0xff] %v16647_v15  ;;  %v8816_v47 = vsel %vm8098_vm4, %v5384_v51, 0.0  ;;  %v17907_v55 = vld [vmem:[#allocation16_spill] sm:$0xff]  ;;  %v17908_v43 = vld [vmem:[#allocation17_spill] sm:$0xff] }
 0x3ef   : > { %v12293_v20 = vpack.c.bf16 %v5385_v17, %v5385_v17  ;;  %v8818_v2 = vsel %vm8098_vm4, %v5385_v17, 0.0  ;;  %v9488_v48 = vmul.f32 %v5385_v17, %v5385_v17  ;;  %v5388_v13 = vmax.f32 %v4430_v29, 0.0 }
 0x3f0   : > { %v8817_v46 = vadd.f32 %v8816_v47, %v8815_v25  ;;  %v10356_v11 = vadd.f32 %v10355_v19, %v10354_v63  ;;  %7948 = vst.msk [vmem:[%s13964_s12 + $0x5a8] sm:$0xf] %vm7585_vm3, %v12295_v36  ;;  %v5386_v53 = vmax.f32 %v4422_v3, 0.0  ;;  %v10357_v21 = vsel %vm8098_vm4, %v9487_v1, 0.0 }
 0x3f1   : > { %7946 = vst.msk [vmem:[%s13964_s12 + $0x5a0] sm:$0xf] %vm7585_vm3, %v12293_v20  ;;  %v10359_v12 = vsel %vm8098_vm4, %v9488_v48, 0.0  ;;  %v4443_v51 = vadd.f32 %v16298_v33, %v17907_v55  ;;  %v4435_v34 = vadd.f32 %v16298_v33, %v17908_v43  ;;  %v9490_v19 = vmul.f32 %v5387_v31, %v5387_v31  ;;  %v16663_v47 = vpop.f32.mrb[172].mxu1 }
 0x3f2   : > { %v10358_v17 = vadd.f32 %v10357_v21, %v10356_v11  ;;  %v8819_v25 = vadd.f32 %v8818_v2, %v8817_v46  ;;  %v12296_v63 = vpack.c.bf16 %v5388_v13, %v5388_v13  ;;  %v8822_v29 = vsel %vm8098_vm4, %v5387_v31, 0.0  ;;  %17909 = vst [vmem:[#allocation16_spill] sm:$0xff] %v16663_v47  ;;  %v16667_v43 = vpop.f32.mrb[173].mxu1  ;;  %v17911_v2 = vld [vmem:[#allocation18_spill] sm:$0xff] }
 0x3f3   : > { %v12294_v3 = vpack.c.bf16 %v5386_v53, %v5386_v53  ;;  %v8820_v1 = vsel %vm8098_vm4, %v5386_v53, 0.0  ;;  %v9489_v36 = vmul.f32 %v5386_v53, %v5386_v53  ;;  %v5391_v55 = vmax.f32 %v4443_v51, 0.0  ;;  %17910 = vst [vmem:[#allocation17_spill] sm:$0xff] %v16667_v43  ;;  %v17912_v53 = vld [vmem:[#allocation19_spill] sm:$0xff] }
 0x3f4   : > { %v10360_v48 = vadd.f32 %v10359_v12, %v10358_v17  ;;  %7949 = vst.msk [vmem:[%s13964_s12 + $0x5ac] sm:$0xf] %vm7585_vm3, %v12296_v63  ;;  %v8821_v20 = vadd.f32 %v8820_v1, %v8819_v25  ;;  %v5389_v15 = vmax.f32 %v4435_v34, 0.0  ;;  %v9491_v11 = vmul.f32 %v5388_v13, %v5388_v13  ;;  %v16676_v12 = vpop.f32.mrb[174].mxu1 }
 0x3f5   : > { %7947 = vst.msk [vmem:[%s13964_s12 + $0x5a4] sm:$0xf] %vm7585_vm3, %v12294_v3  ;;  %v10361_v31 = vsel %vm8098_vm4, %v9489_v36, 0.0  ;;  %v4446_v46 = vadd.f32 %v16298_v33, %v17911_v2  ;;  %v4438_v21 = vadd.f32 %v16298_v33, %v17912_v53  ;;  %17913 = vst [vmem:[#allocation18_spill] sm:$0xff] %v16676_v12  ;;  %v10363_v51 = vsel %vm8098_vm4, %v9490_v19, 0.0  ;;  %v16679_v63 = vpop.f32.mrb[175].mxu1 }
 0x3f6   : > { %v8823_v34 = vadd.f32 %v8822_v29, %v8821_v20  ;;  %v10362_v17 = vadd.f32 %v10361_v31, %v10360_v48  ;;  %v12299_v25 = vpack.c.bf16 %v5391_v55, %v5391_v55  ;;  %17914 = vst [vmem:[#allocation19_spill] sm:$0xff] %v16679_v63  ;;  %v8824_v3 = vsel %vm8098_vm4, %v5388_v13, 0.0  ;;  %v17915_v48 = vld [vmem:[#allocation20_spill] sm:$0xff]  ;;  %v17916_v20 = vld [vmem:[#allocation21_spill] sm:$0xff] }
 0x3f7   : > { %v12297_v1 = vpack.c.bf16 %v5389_v15, %v5389_v15  ;;  %v8826_v36 = vsel %vm8098_vm4, %v5389_v15, 0.0  ;;  %v9492_v43 = vmul.f32 %v5389_v15, %v5389_v15  ;;  %v5392_v53 = vmax.f32 %v4446_v46, 0.0 }
 0x3f8   : > { %v8825_v2 = vadd.f32 %v8824_v3, %v8823_v34  ;;  %v10364_v47 = vadd.f32 %v10363_v51, %v10362_v17  ;;  %7952 = vst.msk [vmem:[%s13964_s12 + $0x5b8] sm:$0xf] %vm7585_vm3, %v12299_v25  ;;  %v5390_v12 = vmax.f32 %v4438_v21, 0.0  ;;  %v10365_v19 = vsel %vm8098_vm4, %v9491_v11, 0.0 }
 0x3f9   : > { %7950 = vst.msk [vmem:[%s13964_s12 + $0x5b0] sm:$0xf] %vm7585_vm3, %v12297_v1  ;;  %v10367_v29 = vsel %vm8098_vm4, %v9492_v43, 0.0  ;;  %v4459_v13 = vadd.f32 %v16298_v33, %v17915_v48  ;;  %v4451_v31 = vadd.f32 %v16298_v33, %v17916_v20  ;;  %v9494_v51 = vmul.f32 %v5391_v55, %v5391_v55  ;;  %v16695_v3 = vpop.f32.mrb[176].mxu1 }
 0x3fa   : > { %v10366_v15 = vadd.f32 %v10365_v19, %v10364_v47  ;;  %v8827_v34 = vadd.f32 %v8826_v36, %v8825_v2  ;;  %v12300_v17 = vpack.c.bf16 %v5392_v53, %v5392_v53  ;;  %v8830_v46 = vsel %vm8098_vm4, %v5391_v55, 0.0  ;;  %17917 = vst [vmem:[#allocation20_spill] sm:$0xff] %v16695_v3  ;;  %v16699_v20 = vpop.f32.mrb[177].mxu1  ;;  %v17919_v36 = vld [vmem:[#allocation22_spill] sm:$0xff] }
 0x3fb   : > { %v12298_v21 = vpack.c.bf16 %v5390_v12, %v5390_v12  ;;  %v8828_v11 = vsel %vm8098_vm4, %v5390_v12, 0.0  ;;  %v9493_v25 = vmul.f32 %v5390_v12, %v5390_v12  ;;  %v5395_v48 = vmax.f32 %v4459_v13, 0.0  ;;  %17918 = vst [vmem:[#allocation21_spill] sm:$0xff] %v16699_v20  ;;  %v17920_v12 = vld [vmem:[#allocation23_spill] sm:$0xff] }
 0x3fc   : > { %v10368_v43 = vadd.f32 %v10367_v29, %v10366_v15  ;;  %7953 = vst.msk [vmem:[%s13964_s12 + $0x5bc] sm:$0xf] %vm7585_vm3, %v12300_v17  ;;  %v8829_v1 = vadd.f32 %v8828_v11, %v8827_v34  ;;  %v5393_v63 = vmax.f32 %v4451_v31, 0.0  ;;  %v9495_v47 = vmul.f32 %v5392_v53, %v5392_v53  ;;  %v16708_v29 = vpop.f32.mrb[178].mxu1 }
 0x3fd   : > { %7951 = vst.msk [vmem:[%s13964_s12 + $0x5b4] sm:$0xf] %vm7585_vm3, %v12298_v21  ;;  %v10369_v55 = vsel %vm8098_vm4, %v9493_v25, 0.0  ;;  %v4462_v2 = vadd.f32 %v16298_v33, %v17919_v36  ;;  %v4454_v19 = vadd.f32 %v16298_v33, %v17920_v12  ;;  %17921 = vst [vmem:[#allocation22_spill] sm:$0xff] %v16708_v29  ;;  %v10371_v13 = vsel %vm8098_vm4, %v9494_v51, 0.0  ;;  %v16711_v17 = vpop.f32.mrb[179].mxu1 }
 0x3fe   : > { %v8831_v31 = vadd.f32 %v8830_v46, %v8829_v1  ;;  %v10370_v15 = vadd.f32 %v10369_v55, %v10368_v43  ;;  %v12303_v34 = vpack.c.bf16 %v5395_v48, %v5395_v48  ;;  %17922 = vst [vmem:[#allocation23_spill] sm:$0xff] %v16711_v17  ;;  %v8832_v21 = vsel %vm8098_vm4, %v5392_v53, 0.0  ;;  %v16724_v53 = vld [vmem:[%s17805_s2] ss:$0 sm:$0xff]  ;;  %v17924_v43 = vld [vmem:[#allocation25_spill] sm:$0xff] }
 0x3ff   : > { %v12301_v11 = vpack.c.bf16 %v5393_v63, %v5393_v63  ;;  %v8834_v25 = vsel %vm8098_vm4, %v5393_v63, 0.0  ;;  %v9496_v20 = vmul.f32 %v5393_v63, %v5393_v63  ;;  %v5396_v33 = vmax.f32 %v4462_v2, 0.0  ;;  %v17923_v46 = vld [vmem:[#allocation24_spill] sm:$0xff] }
 0x400   : > { %v8833_v36 = vadd.f32 %v8832_v21, %v8831_v31  ;;  %v10372_v3 = vadd.f32 %v10371_v13, %v10370_v15  ;;  %7956 = vst.msk [vmem:[%s13964_s12 + $0x5c8] sm:$0xf] %vm7585_vm3, %v12303_v34  ;;  %v5394_v12 = vmax.f32 %v4454_v19, 0.0  ;;  %v10373_v29 = vsel %vm8098_vm4, %v9495_v47, 0.0 }
 0x401   : > { %7954 = vst.msk [vmem:[%s13964_s12 + $0x5c0] sm:$0xf] %vm7585_vm3, %v12301_v11  ;;  %v10375_v51 = vsel %vm8098_vm4, %v9496_v20, 0.0  ;;  %v4475_v63 = vadd.f32 %v16724_v53, %v17923_v46  ;;  %v4467_v1 = vadd.f32 %v16724_v53, %v17924_v43  ;;  %v9498_v2 = vmul.f32 %v5395_v48, %v5395_v48  ;;  %v16732_v34 = vpop.f32.mrb[180].mxu1 }
 0x402   : > { %v10374_v55 = vadd.f32 %v10373_v29, %v10372_v3  ;;  %v8835_v47 = vadd.f32 %v8834_v25, %v8833_v36  ;;  %v12304_v19 = vpack.c.bf16 %v5396_v33, %v5396_v33  ;;  %v8838_v13 = vsel %vm8098_vm4, %v5395_v48, 0.0  ;;  %v16736_v43 = vpop.f32.mrb[181].mxu1  ;;  %v17926_v29 = vld [vmem:[#allocation26_spill] sm:$0xff] }
 0x403   : > { %v12302_v31 = vpack.c.bf16 %v5394_v12, %v5394_v12  ;;  %v8836_v20 = vsel %vm8098_vm4, %v5394_v12, 0.0  ;;  %v9497_v15 = vmul.f32 %v5394_v12, %v5394_v12  ;;  %v5399_v46 = vmax.f32 %v4475_v63, 0.0  ;;  %17925 = vst [vmem:[#allocation24_spill] sm:$0xff] %v16736_v43  ;;  %v16745_v12 = vpop.f32.mrb[182].mxu1 }
 0x404   : > { %v10376_v21 = vadd.f32 %v10375_v51, %v10374_v55  ;;  %7957 = vst.msk [vmem:[%s13964_s12 + $0x5cc] sm:$0xf] %vm7585_vm3, %v12304_v19  ;;  %v8837_v11 = vadd.f32 %v8836_v20, %v8835_v47  ;;  %v5397_v17 = vmax.f32 %v4467_v1, 0.0  ;;  %v9499_v3 = vmul.f32 %v5396_v33, %v5396_v33  ;;  %17927 = vst [vmem:[#allocation25_spill] sm:$0xff] %v16745_v12  ;;  %v16748_v47 = vpop.f32.mrb[183].mxu1 }
 0x405   : > { %7955 = vst.msk [vmem:[%s13964_s12 + $0x5c4] sm:$0xf] %vm7585_vm3, %v12302_v31  ;;  %v10377_v48 = vsel %vm8098_vm4, %v9497_v15, 0.0  ;;  %v4478_v25 = vadd.f32 %v16724_v53, %v17926_v29  ;;  %v4470_v36 = vadd.f32 %v16724_v53, %v16195_v24  ;;  %v10379_v51 = vsel %vm8098_vm4, %v9498_v2, 0.0  ;;  %17928 = vst [vmem:[#allocation26_spill] sm:$0xff] %v16748_v47 }
 0x406   : > { %v8839_v63 = vadd.f32 %v8838_v13, %v8837_v11  ;;  %v10378_v1 = vadd.f32 %v10377_v48, %v10376_v21  ;;  %v12307_v55 = vpack.c.bf16 %v5399_v46, %v5399_v46  ;;  %v8840_v19 = vsel %vm8098_vm4, %v5396_v33, 0.0  ;;  %v17929_v21 = vld [vmem:[#allocation27_spill] sm:$0xff]  ;;  %v17930_v11 = vld [vmem:[#allocation28_spill] sm:$0xff] }
 0x407   : > { %v12305_v31 = vpack.c.bf16 %v5397_v17, %v5397_v17  ;;  %v8842_v20 = vsel %vm8098_vm4, %v5397_v17, 0.0  ;;  %v9500_v15 = vmul.f32 %v5397_v17, %v5397_v17  ;;  %v5400_v24 = vmax.f32 %v4478_v25, 0.0 }
 0x408   : > { %v8841_v29 = vadd.f32 %v8840_v19, %v8839_v63  ;;  %v10380_v43 = vadd.f32 %v10379_v51, %v10378_v1  ;;  %7960 = vst.msk [vmem:[%s13964_s12 + $0x5d8] sm:$0xf] %vm7585_vm3, %v12307_v55  ;;  %v5398_v12 = vmax.f32 %v4470_v36, 0.0  ;;  %v10381_v2 = vsel %vm8098_vm4, %v9499_v3, 0.0 }
 0x409   : > { %7958 = vst.msk [vmem:[%s13964_s12 + $0x5d0] sm:$0xf] %vm7585_vm3, %v12305_v31  ;;  %v10383_v13 = vsel %vm8098_vm4, %v9500_v15, 0.0  ;;  %v4491_v33 = vadd.f32 %v16724_v53, %v17929_v21  ;;  %v4483_v48 = vadd.f32 %v16724_v53, %v17930_v11  ;;  %v9502_v51 = vmul.f32 %v5399_v46, %v5399_v46  ;;  %v16764_v19 = vpop.f32.mrb[184].mxu1 }
 0x40a   : > { %v10382_v17 = vadd.f32 %v10381_v2, %v10380_v43  ;;  %v8843_v63 = vadd.f32 %v8842_v20, %v8841_v29  ;;  %v12308_v1 = vpack.c.bf16 %v5400_v24, %v5400_v24  ;;  %v8846_v25 = vsel %vm8098_vm4, %v5399_v46, 0.0  ;;  %v16768_v11 = vpop.f32.mrb[185].mxu1  ;;  %v17932_v20 = vld [vmem:[#allocation29_spill] sm:$0xff] }
 0x40b   : > { %v12306_v36 = vpack.c.bf16 %v5398_v12, %v5398_v12  ;;  %v8844_v3 = vsel %vm8098_vm4, %v5398_v12, 0.0  ;;  %v9501_v55 = vmul.f32 %v5398_v12, %v5398_v12  ;;  %v5403_v21 = vmax.f32 %v4491_v33, 0.0  ;;  %17931 = vst [vmem:[#allocation27_spill] sm:$0xff] %v16768_v11  ;;  %v16777_v2 = vpop.f32.mrb[186].mxu1 }
 0x40c   : > { %v10384_v31 = vadd.f32 %v10383_v13, %v10382_v17  ;;  %7961 = vst.msk [vmem:[%s13964_s12 + $0x5dc] sm:$0xf] %vm7585_vm3, %v12308_v1  ;;  %v8845_v15 = vadd.f32 %v8844_v3, %v8843_v63  ;;  %v5401_v47 = vmax.f32 %v4483_v48, 0.0  ;;  %v9503_v43 = vmul.f32 %v5400_v24, %v5400_v24  ;;  %17933 = vst [vmem:[#allocation28_spill] sm:$0xff] %v16777_v2  ;;  %v16780_v63 = vpop.f32.mrb[187].mxu1 }
 0x40d   : > { %7959 = vst.msk [vmem:[%s13964_s12 + $0x5d4] sm:$0xf] %vm7585_vm3, %v12306_v36  ;;  %v10385_v46 = vsel %vm8098_vm4, %v9501_v55, 0.0  ;;  %v4494_v29 = vadd.f32 %v16724_v53, %v17932_v20  ;;  %v4486_v12 = vadd.f32 %v16724_v53, %v16231_v28  ;;  %v10387_v13 = vsel %vm8098_vm4, %v9502_v51, 0.0 }
 0x40e   : > { %v8847_v33 = vadd.f32 %v8846_v25, %v8845_v15  ;;  %v10386_v48 = vadd.f32 %v10385_v46, %v10384_v31  ;;  %v12311_v17 = vpack.c.bf16 %v5403_v21, %v5403_v21  ;;  %v8848_v1 = vsel %vm8098_vm4, %v5400_v24, 0.0 }
 0x40f   : > { %v12309_v36 = vpack.c.bf16 %v5401_v47, %v5401_v47  ;;  %v8850_v3 = vsel %vm8098_vm4, %v5401_v47, 0.0  ;;  %v9504_v55 = vmul.f32 %v5401_v47, %v5401_v47  ;;  %v5404_v28 = vmax.f32 %v4494_v29, 0.0 }
 0x410   : > { %v8849_v20 = vadd.f32 %v8848_v1, %v8847_v33  ;;  %v10388_v11 = vadd.f32 %v10387_v13, %v10386_v48  ;;  %7964 = vst.msk [vmem:[%s13964_s12 + $0x5e8] sm:$0xf] %vm7585_vm3, %v12311_v17  ;;  %v5402_v2 = vmax.f32 %v4486_v12, 0.0  ;;  %v10389_v51 = vsel %vm8098_vm4, %v9503_v43, 0.0 }
 0x411   : > { %7962 = vst.msk [vmem:[%s13964_s12 + $0x5e0] sm:$0xf] %vm7585_vm3, %v12309_v36  ;;  %v10391_v25 = vsel %vm8098_vm4, %v9504_v55, 0.0  ;;  %v4507_v24 = vadd.f32 %v16724_v53, %v16250_v32  ;;  %v4499_v31 = vadd.f32 %v16724_v53, %v16254_v42  ;;  %v9506_v15 = vmul.f32 %v5403_v21, %v5403_v21  ;;  %v16796_v48 = vpop.f32.mrb[188].mxu1 }
 0x412   : > { %v10390_v47 = vadd.f32 %v10389_v51, %v10388_v11  ;;  %v8851_v46 = vadd.f32 %v8850_v3, %v8849_v20  ;;  %v12312_v13 = vpack.c.bf16 %v5404_v28, %v5404_v28  ;;  %v8854_v29 = vsel %vm8098_vm4, %v5403_v21, 0.0  ;;  %v16800_v42 = vpop.f32.mrb[189].mxu1  ;;  %v17934_v3 = vld [vmem:[#allocation30_spill] sm:$0xff] }
 0x413   : > { %v12310_v12 = vpack.c.bf16 %v5402_v2, %v5402_v2  ;;  %v8852_v43 = vsel %vm8098_vm4, %v5402_v2, 0.0  ;;  %v9505_v33 = vmul.f32 %v5402_v2, %v5402_v2  ;;  %v5407_v1 = vmax.f32 %v4507_v24, 0.0  ;;  %v16809_v20 = vpop.f32.mrb[190].mxu1 }
 0x414   : > { %v10392_v17 = vadd.f32 %v10391_v25, %v10390_v47  ;;  %7965 = vst.msk [vmem:[%s13964_s12 + $0x5ec] sm:$0xf] %vm7585_vm3, %v12312_v13  ;;  %v8853_v32 = vadd.f32 %v8852_v43, %v8851_v46  ;;  %v5405_v36 = vmax.f32 %v4499_v31, 0.0  ;;  %v9507_v11 = vmul.f32 %v5404_v28, %v5404_v28  ;;  %17935 = vst [vmem:[#allocation29_spill] sm:$0xff] %v16809_v20  ;;  %v16812_v47 = vpop.f32.mrb[191].mxu1 }
 0x415   : > { %7963 = vst.msk [vmem:[%s13964_s12 + $0x5e4] sm:$0xf] %vm7585_vm3, %v12310_v12  ;;  %v10393_v21 = vsel %vm8098_vm4, %v9505_v33, 0.0  ;;  %v4510_v55 = vadd.f32 %v16724_v53, %v17934_v3  ;;  %v4502_v2 = vadd.f32 %v16724_v53, %v16267_v40  ;;  %v10395_v51 = vsel %vm8098_vm4, %v9506_v15, 0.0 }
 0x416   : > { %v8855_v25 = vadd.f32 %v8854_v29, %v8853_v32  ;;  %v10394_v24 = vadd.f32 %v10393_v21, %v10392_v17  ;;  %v12315_v31 = vpack.c.bf16 %v5407_v1, %v5407_v1  ;;  %v8856_v46 = vsel %vm8098_vm4, %v5404_v28, 0.0 }
 0x417   : > { %v12313_v13 = vpack.c.bf16 %v5405_v36, %v5405_v36  ;;  %v8858_v12 = vsel %vm8098_vm4, %v5405_v36, 0.0  ;;  %v9508_v43 = vmul.f32 %v5405_v36, %v5405_v36  ;;  %v5408_v40 = vmax.f32 %v4510_v55, 0.0 }
 0x418   : > { %v8857_v33 = vadd.f32 %v8856_v46, %v8855_v25  ;;  %v10396_v3 = vadd.f32 %v10395_v51, %v10394_v24  ;;  %7968 = vst.msk [vmem:[%s13964_s12 + $0x5f8] sm:$0xf] %vm7585_vm3, %v12315_v31  ;;  %v5406_v20 = vmax.f32 %v4502_v2, 0.0  ;;  %v10397_v15 = vsel %vm8098_vm4, %v9507_v11, 0.0 }
 0x419   : > { %7966 = vst.msk [vmem:[%s13964_s12 + $0x5f0] sm:$0xf] %vm7585_vm3, %v12313_v13  ;;  %v10399_v29 = vsel %vm8098_vm4, %v9508_v43, 0.0  ;;  %v4523_v28 = vadd.f32 %v16724_v53, %v16286_v16  ;;  %v4515_v17 = vadd.f32 %v16724_v53, %v16290_v41  ;;  %v9510_v36 = vmul.f32 %v5407_v1, %v5407_v1  ;;  %v16828_v24 = vpop.f32.mrb[192].mxu1 }
 0x41a   : > { %v10398_v32 = vadd.f32 %v10397_v15, %v10396_v3  ;;  %v8859_v21 = vadd.f32 %v8858_v12, %v8857_v33  ;;  %v12316_v51 = vpack.c.bf16 %v5408_v40, %v5408_v40  ;;  %v8862_v55 = vsel %vm8098_vm4, %v5407_v1, 0.0  ;;  %v16832_v41 = vpop.f32.mrb[193].mxu1 }
 0x41b   : > { %v12314_v2 = vpack.c.bf16 %v5406_v20, %v5406_v20  ;;  %v8860_v11 = vsel %vm8098_vm4, %v5406_v20, 0.0  ;;  %v9509_v25 = vmul.f32 %v5406_v20, %v5406_v20  ;;  %v5411_v46 = vmax.f32 %v4523_v28, 0.0  ;;  %v16841_v33 = vpop.f32.mrb[194].mxu1 }
 0x41c   : > { %v10400_v31 = vadd.f32 %v10399_v29, %v10398_v32  ;;  %7969 = vst.msk [vmem:[%s13964_s12 + $0x5fc] sm:$0xf] %vm7585_vm3, %v12316_v51  ;;  %v8861_v16 = vadd.f32 %v8860_v11, %v8859_v21  ;;  %v5409_v13 = vmax.f32 %v4515_v17, 0.0  ;;  %v9511_v43 = vmul.f32 %v5408_v40, %v5408_v40  ;;  %v16844_v17 = vpop.f32.mrb[195].mxu1 }
 0x41d   : > { %7967 = vst.msk [vmem:[%s13964_s12 + $0x5f4] sm:$0xf] %vm7585_vm3, %v12314_v2  ;;  %v10401_v1 = vsel %vm8098_vm4, %v9509_v25, 0.0  ;;  %v4526_v12 = vadd.f32 %v16724_v53, %v16304_v30  ;;  %v4518_v20 = vadd.f32 %v16724_v53, %v16308_v23  ;;  %v10403_v3 = vsel %vm8098_vm4, %v9510_v36, 0.0 }
 0x41e   : > { %v8863_v15 = vadd.f32 %v8862_v55, %v8861_v16  ;;  %v10402_v29 = vadd.f32 %v10401_v1, %v10400_v31  ;;  %v12319_v28 = vpack.c.bf16 %v5411_v46, %v5411_v46  ;;  %v8864_v32 = vsel %vm8098_vm4, %v5408_v40, 0.0 }
 0x41f   : > { %v12317_v21 = vpack.c.bf16 %v5409_v13, %v5409_v13  ;;  %v8866_v51 = vsel %vm8098_vm4, %v5409_v13, 0.0  ;;  %v9512_v2 = vmul.f32 %v5409_v13, %v5409_v13  ;;  %v5412_v23 = vmax.f32 %v4526_v12, 0.0 }
 0x420   : > { %v8865_v30 = vadd.f32 %v8864_v32, %v8863_v15  ;;  %v10404_v11 = vadd.f32 %v10403_v3, %v10402_v29  ;;  %7972 = vst.msk [vmem:[%s13964_s12 + $0x608] sm:$0xf] %vm7585_vm3, %v12319_v28  ;;  %v5410_v25 = vmax.f32 %v4518_v20, 0.0  ;;  %v10405_v36 = vsel %vm8098_vm4, %v9511_v43, 0.0 }
 0x421   : > { %7970 = vst.msk [vmem:[%s13964_s12 + $0x600] sm:$0xf] %vm7585_vm3, %v12317_v21  ;;  %v10407_v55 = vsel %vm8098_vm4, %v9512_v2, 0.0  ;;  %v4539_v40 = vadd.f32 %v16724_v53, %v16327_v39  ;;  %v4531_v31 = vadd.f32 %v16724_v53, %v16331_v44  ;;  %v9514_v13 = vmul.f32 %v5411_v46, %v5411_v46  ;;  %v16860_v29 = vpop.f32.mrb[196].mxu1 }
 0x422   : > { %v10406_v16 = vadd.f32 %v10405_v36, %v10404_v11  ;;  %v8867_v1 = vadd.f32 %v8866_v51, %v8865_v30  ;;  %v12320_v3 = vpack.c.bf16 %v5412_v23, %v5412_v23  ;;  %v8870_v12 = vsel %vm8098_vm4, %v5411_v46, 0.0  ;;  %v16864_v44 = vpop.f32.mrb[197].mxu1 }
 0x423   : > { %v12318_v20 = vpack.c.bf16 %v5410_v25, %v5410_v25  ;;  %v8868_v43 = vsel %vm8098_vm4, %v5410_v25, 0.0  ;;  %v9513_v15 = vmul.f32 %v5410_v25, %v5410_v25  ;;  %v5415_v32 = vmax.f32 %v4539_v40, 0.0  ;;  %v16873_v11 = vpop.f32.mrb[198].mxu1 }
 0x424   : > { %v10408_v28 = vadd.f32 %v10407_v55, %v10406_v16  ;;  %7973 = vst.msk [vmem:[%s13964_s12 + $0x60c] sm:$0xf] %vm7585_vm3, %v12320_v3  ;;  %v8869_v39 = vadd.f32 %v8868_v43, %v8867_v1  ;;  %v5413_v21 = vmax.f32 %v4531_v31, 0.0  ;;  %v9515_v2 = vmul.f32 %v5412_v23, %v5412_v23  ;;  %v16876_v31 = vpop.f32.mrb[199].mxu1 }
 0x425   : > { %7971 = vst.msk [vmem:[%s13964_s12 + $0x604] sm:$0xf] %vm7585_vm3, %v12318_v20  ;;  %v10409_v46 = vsel %vm8098_vm4, %v9513_v15, 0.0  ;;  %v4542_v51 = vadd.f32 %v16724_v53, %v16340_v52  ;;  %v4534_v30 = vadd.f32 %v16724_v53, %v16344_v50  ;;  %v10411_v25 = vsel %vm8098_vm4, %v9514_v13, 0.0 }
 0x426   : > { %v8871_v36 = vadd.f32 %v8870_v12, %v8869_v39  ;;  %v10410_v55 = vadd.f32 %v10409_v46, %v10408_v28  ;;  %v12323_v40 = vpack.c.bf16 %v5415_v32, %v5415_v32  ;;  %v8872_v16 = vsel %vm8098_vm4, %v5412_v23, 0.0 }
 0x427   : > { %v12321_v1 = vpack.c.bf16 %v5413_v21, %v5413_v21  ;;  %v8874_v3 = vsel %vm8098_vm4, %v5413_v21, 0.0  ;;  %v9516_v20 = vmul.f32 %v5413_v21, %v5413_v21  ;;  %v5416_v50 = vmax.f32 %v4542_v51, 0.0 }
 0x428   : > { %v8873_v52 = vadd.f32 %v8872_v16, %v8871_v36  ;;  %v10412_v43 = vadd.f32 %v10411_v25, %v10410_v55  ;;  %7976 = vst.msk [vmem:[%s13964_s12 + $0x618] sm:$0xf] %vm7585_vm3, %v12323_v40  ;;  %v5414_v15 = vmax.f32 %v4534_v30, 0.0  ;;  %v10413_v13 = vsel %vm8098_vm4, %v9515_v2, 0.0 }
 0x429   : > { %7974 = vst.msk [vmem:[%s13964_s12 + $0x610] sm:$0xf] %vm7585_vm3, %v12321_v1  ;;  %v10415_v12 = vsel %vm8098_vm4, %v9516_v20, 0.0  ;;  %v4555_v23 = vadd.f32 %v16724_v53, %v16363_v59  ;;  %v4547_v28 = vadd.f32 %v16724_v53, %v16367_v27  ;;  %v9518_v21 = vmul.f32 %v5415_v32, %v5415_v32  ;;  %v16892_v55 = vpop.f32.mrb[200].mxu1 }
 0x42a   : > { %v10414_v39 = vadd.f32 %v10413_v13, %v10412_v43  ;;  %v8875_v46 = vadd.f32 %v8874_v3, %v8873_v52  ;;  %v12324_v25 = vpack.c.bf16 %v5416_v50, %v5416_v50  ;;  %v8878_v51 = vsel %vm8098_vm4, %v5415_v32, 0.0  ;;  %v16896_v27 = vpop.f32.mrb[201].mxu1 }
 0x42b   : > { %v12322_v30 = vpack.c.bf16 %v5414_v15, %v5414_v15  ;;  %v8876_v2 = vsel %vm8098_vm4, %v5414_v15, 0.0  ;;  %v9517_v36 = vmul.f32 %v5414_v15, %v5414_v15  ;;  %v5419_v16 = vmax.f32 %v4555_v23, 0.0  ;;  %v16905_v43 = vpop.f32.mrb[202].mxu1 }
 0x42c   : > { %v10416_v40 = vadd.f32 %v10415_v12, %v10414_v39  ;;  %7977 = vst.msk [vmem:[%s13964_s12 + $0x61c] sm:$0xf] %vm7585_vm3, %v12324_v25  ;;  %v8877_v59 = vadd.f32 %v8876_v2, %v8875_v46  ;;  %v5417_v1 = vmax.f32 %v4547_v28, 0.0  ;;  %v9519_v20 = vmul.f32 %v5416_v50, %v5416_v50  ;;  %v16908_v28 = vpop.f32.mrb[203].mxu1 }
 0x42d   : > { %7975 = vst.msk [vmem:[%s13964_s12 + $0x614] sm:$0xf] %vm7585_vm3, %v12322_v30  ;;  %v10417_v32 = vsel %vm8098_vm4, %v9517_v36, 0.0  ;;  %v4558_v3 = vadd.f32 %v16724_v53, %v16376_v5  ;;  %v4550_v52 = vadd.f32 %v16724_v53, %v16380_v61  ;;  %v10419_v15 = vsel %vm8098_vm4, %v9518_v21, 0.0 }
 0x42e   : > { %v8879_v13 = vadd.f32 %v8878_v51, %v8877_v59  ;;  %v10418_v12 = vadd.f32 %v10417_v32, %v10416_v40  ;;  %v12327_v23 = vpack.c.bf16 %v5419_v16, %v5419_v16  ;;  %v8880_v39 = vsel %vm8098_vm4, %v5416_v50, 0.0 }
 0x42f   : > { %v12325_v46 = vpack.c.bf16 %v5417_v1, %v5417_v1  ;;  %v8882_v25 = vsel %vm8098_vm4, %v5417_v1, 0.0  ;;  %v9520_v30 = vmul.f32 %v5417_v1, %v5417_v1  ;;  %v5420_v61 = vmax.f32 %v4558_v3, 0.0 }
 0x430   : > { %v8881_v5 = vadd.f32 %v8880_v39, %v8879_v13  ;;  %v10420_v2 = vadd.f32 %v10419_v15, %v10418_v12  ;;  %7980 = vst.msk [vmem:[%s13964_s12 + $0x628] sm:$0xf] %vm7585_vm3, %v12327_v23  ;;  %v5418_v36 = vmax.f32 %v4550_v52, 0.0  ;;  %v10421_v21 = vsel %vm8098_vm4, %v9519_v20, 0.0 }
 0x431   : > { %7978 = vst.msk [vmem:[%s13964_s12 + $0x620] sm:$0xf] %vm7585_vm3, %v12325_v46  ;;  %v10423_v51 = vsel %vm8098_vm4, %v9520_v30, 0.0  ;;  %v4571_v50 = vadd.f32 %v16724_v53, %v16399_v26  ;;  %v4563_v40 = vadd.f32 %v16724_v53, %v16403_v58  ;;  %v9522_v1 = vmul.f32 %v5419_v16, %v5419_v16  ;;  %v16924_v12 = vpop.f32.mrb[204].mxu1 }
 0x432   : > { %v10422_v59 = vadd.f32 %v10421_v21, %v10420_v2  ;;  %v8883_v32 = vadd.f32 %v8882_v25, %v8881_v5  ;;  %v12328_v15 = vpack.c.bf16 %v5420_v61, %v5420_v61  ;;  %v8886_v3 = vsel %vm8098_vm4, %v5419_v16, 0.0  ;;  %v16928_v58 = vpop.f32.mrb[205].mxu1 }
 0x433   : > { %v12326_v52 = vpack.c.bf16 %v5418_v36, %v5418_v36  ;;  %v8884_v20 = vsel %vm8098_vm4, %v5418_v36, 0.0  ;;  %v9521_v13 = vmul.f32 %v5418_v36, %v5418_v36  ;;  %v5423_v39 = vmax.f32 %v4571_v50, 0.0  ;;  %v16937_v2 = vpop.f32.mrb[206].mxu1 }
 0x434   : > { %v10424_v23 = vadd.f32 %v10423_v51, %v10422_v59  ;;  %7981 = vst.msk [vmem:[%s13964_s12 + $0x62c] sm:$0xf] %vm7585_vm3, %v12328_v15  ;;  %v8885_v26 = vadd.f32 %v8884_v20, %v8883_v32  ;;  %v5421_v46 = vmax.f32 %v4563_v40, 0.0  ;;  %v9523_v30 = vmul.f32 %v5420_v61, %v5420_v61  ;;  %v16940_v40 = vpop.f32.mrb[207].mxu1 }
 0x435   : > { %7979 = vst.msk [vmem:[%s13964_s12 + $0x624] sm:$0xf] %vm7585_vm3, %v12326_v52  ;;  %v10425_v16 = vsel %vm8098_vm4, %v9521_v13, 0.0  ;;  %v4574_v25 = vadd.f32 %v16724_v53, %v16412_v6  ;;  %v4566_v5 = vadd.f32 %v16724_v53, %v16416_v0  ;;  %v10427_v36 = vsel %vm8098_vm4, %v9522_v1, 0.0 }
 0x436   : > { %v8887_v21 = vadd.f32 %v8886_v3, %v8885_v26  ;;  %v10426_v51 = vadd.f32 %v10425_v16, %v10424_v23  ;;  %v12331_v50 = vpack.c.bf16 %v5423_v39, %v5423_v39  ;;  %v8888_v59 = vsel %vm8098_vm4, %v5420_v61, 0.0 }
 0x437   : > { %v12329_v32 = vpack.c.bf16 %v5421_v46, %v5421_v46  ;;  %v8890_v15 = vsel %vm8098_vm4, %v5421_v46, 0.0  ;;  %v9524_v52 = vmul.f32 %v5421_v46, %v5421_v46  ;;  %v5424_v0 = vmax.f32 %v4574_v25, 0.0 }
 0x438   : > { %v8889_v6 = vadd.f32 %v8888_v59, %v8887_v21  ;;  %v10428_v20 = vadd.f32 %v10427_v36, %v10426_v51  ;;  %7984 = vst.msk [vmem:[%s13964_s12 + $0x638] sm:$0xf] %vm7585_vm3, %v12331_v50  ;;  %v5422_v13 = vmax.f32 %v4566_v5, 0.0  ;;  %v10429_v1 = vsel %vm8098_vm4, %v9523_v30, 0.0 }
 0x439   : > { %7982 = vst.msk [vmem:[%s13964_s12 + $0x630] sm:$0xf] %vm7585_vm3, %v12329_v32  ;;  %v10431_v3 = vsel %vm8098_vm4, %v9524_v52, 0.0  ;;  %v4587_v61 = vadd.f32 %v16724_v53, %v16435_v62  ;;  %v4579_v23 = vadd.f32 %v16724_v53, %v16439_v8  ;;  %v9526_v46 = vmul.f32 %v5423_v39, %v5423_v39 }
 0x43a   : > { %v10430_v26 = vadd.f32 %v10429_v1, %v10428_v20  ;;  %v8891_v16 = vadd.f32 %v8890_v15, %v8889_v6  ;;  %v12332_v36 = vpack.c.bf16 %v5424_v0, %v5424_v0  ;;  %v8894_v25 = vsel %vm8098_vm4, %v5423_v39, 0.0  ;;  %v16956_v51 = vpop.f32.mrb[208].mxu1 }
 0x43b   : > { %v12330_v5 = vpack.c.bf16 %v5422_v13, %v5422_v13  ;;  %v8892_v30 = vsel %vm8098_vm4, %v5422_v13, 0.0  ;;  %v9525_v21 = vmul.f32 %v5422_v13, %v5422_v13  ;;  %v5427_v59 = vmax.f32 %v4587_v61, 0.0  ;;  %v16960_v8 = vpop.f32.mrb[209].mxu1 }
 0x43c   : > { %v10432_v50 = vadd.f32 %v10431_v3, %v10430_v26  ;;  %7985 = vst.msk [vmem:[%s13964_s12 + $0x63c] sm:$0xf] %vm7585_vm3, %v12332_v36  ;;  %v8893_v62 = vadd.f32 %v8892_v30, %v8891_v16  ;;  %v5425_v32 = vmax.f32 %v4579_v23, 0.0  ;;  %v9527_v52 = vmul.f32 %v5424_v0, %v5424_v0  ;;  %v16969_v20 = vpop.f32.mrb[210].mxu1 }
 0x43d   : > { %7983 = vst.msk [vmem:[%s13964_s12 + $0x634] sm:$0xf] %vm7585_vm3, %v12330_v5  ;;  %v10433_v39 = vsel %vm8098_vm4, %v9525_v21, 0.0  ;;  %v4590_v15 = vadd.f32 %v16724_v53, %v16448_v22  ;;  %v4582_v6 = vadd.f32 %v16724_v53, %v16452_v38  ;;  %v10435_v13 = vsel %vm8098_vm4, %v9526_v46, 0.0  ;;  %v16972_v23 = vpop.f32.mrb[211].mxu1 }
 0x43e   : > { %v8895_v1 = vadd.f32 %v8894_v25, %v8893_v62  ;;  %v10434_v3 = vadd.f32 %v10433_v39, %v10432_v50  ;;  %v12335_v61 = vpack.c.bf16 %v5427_v59, %v5427_v59  ;;  %v8896_v26 = vsel %vm8098_vm4, %v5424_v0, 0.0 }
 0x43f   : > { %v12333_v16 = vpack.c.bf16 %v5425_v32, %v5425_v32  ;;  %v8898_v36 = vsel %vm8098_vm4, %v5425_v32, 0.0  ;;  %v9528_v5 = vmul.f32 %v5425_v32, %v5425_v32  ;;  %v5428_v38 = vmax.f32 %v4590_v15, 0.0 }
 0x440   : > { %v8897_v22 = vadd.f32 %v8896_v26, %v8895_v1  ;;  %v10436_v30 = vadd.f32 %v10435_v13, %v10434_v3  ;;  %7988 = vst.msk [vmem:[%s13964_s12 + $0x648] sm:$0xf] %vm7585_vm3, %v12335_v61  ;;  %v5426_v21 = vmax.f32 %v4582_v6, 0.0  ;;  %v10437_v46 = vsel %vm8098_vm4, %v9527_v52, 0.0 }
 0x441   : > { %7986 = vst.msk [vmem:[%s13964_s12 + $0x640] sm:$0xf] %vm7585_vm3, %v12333_v16  ;;  %v10439_v25 = vsel %vm8098_vm4, %v9528_v5, 0.0  ;;  %v4603_v0 = vadd.f32 %v16724_v53, %v16471_v14  ;;  %v4595_v50 = vadd.f32 %v16724_v53, %v16475_v18  ;;  %v9530_v32 = vmul.f32 %v5427_v59, %v5427_v59 }
 0x442   : > { %v10438_v62 = vadd.f32 %v10437_v46, %v10436_v30  ;;  %v8899_v39 = vadd.f32 %v8898_v36, %v8897_v22  ;;  %v12336_v13 = vpack.c.bf16 %v5428_v38, %v5428_v38  ;;  %v8902_v15 = vsel %vm8098_vm4, %v5427_v59, 0.0  ;;  %v16988_v3 = vpop.f32.mrb[212].mxu1 }
 0x443   : > { %v12334_v6 = vpack.c.bf16 %v5426_v21, %v5426_v21  ;;  %v8900_v52 = vsel %vm8098_vm4, %v5426_v21, 0.0  ;;  %v9529_v1 = vmul.f32 %v5426_v21, %v5426_v21  ;;  %v5431_v26 = vmax.f32 %v4603_v0, 0.0  ;;  %v16992_v18 = vpop.f32.mrb[213].mxu1 }
 0x444   : > { %v10440_v61 = vadd.f32 %v10439_v25, %v10438_v62  ;;  %7989 = vst.msk [vmem:[%s13964_s12 + $0x64c] sm:$0xf] %vm7585_vm3, %v12336_v13  ;;  %v8901_v14 = vadd.f32 %v8900_v52, %v8899_v39  ;;  %v5429_v16 = vmax.f32 %v4595_v50, 0.0  ;;  %v9531_v5 = vmul.f32 %v5428_v38, %v5428_v38  ;;  %v17001_v30 = vpop.f32.mrb[214].mxu1 }
 0x445   : > { %7987 = vst.msk [vmem:[%s13964_s12 + $0x644] sm:$0xf] %vm7585_vm3, %v12334_v6  ;;  %v10441_v59 = vsel %vm8098_vm4, %v9529_v1, 0.0  ;;  %v4606_v36 = vadd.f32 %v16724_v53, %v16484_v54  ;;  %v4598_v22 = vadd.f32 %v16724_v53, %v16487_v4  ;;  %v10443_v21 = vsel %vm8098_vm4, %v9530_v32, 0.0  ;;  %v17004_v50 = vpop.f32.mrb[215].mxu1 }
 0x446   : > { %v8903_v46 = vadd.f32 %v8902_v15, %v8901_v14  ;;  %v10442_v25 = vadd.f32 %v10441_v59, %v10440_v61  ;;  %v12339_v0 = vpack.c.bf16 %v5431_v26, %v5431_v26  ;;  %v8904_v62 = vsel %vm8098_vm4, %v5428_v38, 0.0 }
 0x447   : > { %v12337_v39 = vpack.c.bf16 %v5429_v16, %v5429_v16  ;;  %v8906_v13 = vsel %vm8098_vm4, %v5429_v16, 0.0  ;;  %v9532_v6 = vmul.f32 %v5429_v16, %v5429_v16  ;;  %v5432_v4 = vmax.f32 %v4606_v36, 0.0 }
 0x448   : > { %v8905_v54 = vadd.f32 %v8904_v62, %v8903_v46  ;;  %v10444_v52 = vadd.f32 %v10443_v21, %v10442_v25  ;;  %7992 = vst.msk [vmem:[%s13964_s12 + $0x658] sm:$0xf] %vm7585_vm3, %v12339_v0  ;;  %v5430_v1 = vmax.f32 %v4598_v22, 0.0  ;;  %v10445_v32 = vsel %vm8098_vm4, %v9531_v5, 0.0 }
 0x449   : > { %7990 = vst.msk [vmem:[%s13964_s12 + $0x650] sm:$0xf] %vm7585_vm3, %v12337_v39  ;;  %v10447_v15 = vsel %vm8098_vm4, %v9532_v6, 0.0  ;;  %v4619_v38 = vadd.f32 %v16724_v53, %v16503_v56  ;;  %v4611_v61 = vadd.f32 %v16724_v53, %v16507_v7  ;;  %v9534_v16 = vmul.f32 %v5431_v26, %v5431_v26 }
 0x44a   : > { %v10446_v14 = vadd.f32 %v10445_v32, %v10444_v52  ;;  %v8907_v59 = vadd.f32 %v8906_v13, %v8905_v54  ;;  %v12340_v21 = vpack.c.bf16 %v5432_v4, %v5432_v4  ;;  %v8910_v36 = vsel %vm8098_vm4, %v5431_v26, 0.0  ;;  %v17020_v25 = vpop.f32.mrb[216].mxu1 }
 0x44b   : > { %v12338_v22 = vpack.c.bf16 %v5430_v1, %v5430_v1  ;;  %v8908_v5 = vsel %vm8098_vm4, %v5430_v1, 0.0  ;;  %v9533_v46 = vmul.f32 %v5430_v1, %v5430_v1  ;;  %v5435_v62 = vmax.f32 %v4619_v38, 0.0  ;;  %v17024_v7 = vpop.f32.mrb[217].mxu1 }
 0x44c   : > { %v10448_v0 = vadd.f32 %v10447_v15, %v10446_v14  ;;  %7993 = vst.msk [vmem:[%s13964_s12 + $0x65c] sm:$0xf] %vm7585_vm3, %v12340_v21  ;;  %v8909_v56 = vadd.f32 %v8908_v5, %v8907_v59  ;;  %v5433_v39 = vmax.f32 %v4611_v61, 0.0  ;;  %v9535_v6 = vmul.f32 %v5432_v4, %v5432_v4  ;;  %v17033_v52 = vpop.f32.mrb[218].mxu1 }
 0x44d   : > { %7991 = vst.msk [vmem:[%s13964_s12 + $0x654] sm:$0xf] %vm7585_vm3, %v12338_v22  ;;  %v10449_v26 = vsel %vm8098_vm4, %v9533_v46, 0.0  ;;  %v4622_v13 = vadd.f32 %v16724_v53, %v16516_v10  ;;  %v4614_v54 = vadd.f32 %v16724_v53, %v16519_v37  ;;  %v10451_v1 = vsel %vm8098_vm4, %v9534_v16, 0.0  ;;  %v17036_v61 = vpop.f32.mrb[219].mxu1 }
 0x44e   : > { %v8911_v32 = vadd.f32 %v8910_v36, %v8909_v56  ;;  %v10450_v15 = vadd.f32 %v10449_v26, %v10448_v0  ;;  %v12343_v38 = vpack.c.bf16 %v5435_v62, %v5435_v62  ;;  %v8912_v14 = vsel %vm8098_vm4, %v5432_v4, 0.0 }
 0x44f   : > { %v12341_v59 = vpack.c.bf16 %v5433_v39, %v5433_v39  ;;  %v8914_v21 = vsel %vm8098_vm4, %v5433_v39, 0.0  ;;  %v9536_v22 = vmul.f32 %v5433_v39, %v5433_v39  ;;  %v5436_v37 = vmax.f32 %v4622_v13, 0.0 }
 0x450   : > { %v8913_v10 = vadd.f32 %v8912_v14, %v8911_v32  ;;  %v10452_v5 = vadd.f32 %v10451_v1, %v10450_v15  ;;  %7996 = vst.msk [vmem:[%s13964_s12 + $0x668] sm:$0xf] %vm7585_vm3, %v12343_v38  ;;  %v5434_v46 = vmax.f32 %v4614_v54, 0.0  ;;  %v10453_v16 = vsel %vm8098_vm4, %v9535_v6, 0.0 }
 0x451   : > { %7994 = vst.msk [vmem:[%s13964_s12 + $0x660] sm:$0xf] %vm7585_vm3, %v12341_v59  ;;  %v10455_v36 = vsel %vm8098_vm4, %v9536_v22, 0.0  ;;  %v4635_v4 = vadd.f32 %v16724_v53, %v16535_v45  ;;  %v4627_v0 = vadd.f32 %v16724_v53, %v16539_v9  ;;  %v9538_v39 = vmul.f32 %v5435_v62, %v5435_v62 }
 0x452   : > { %v10454_v56 = vadd.f32 %v10453_v16, %v10452_v5  ;;  %v8915_v26 = vadd.f32 %v8914_v21, %v8913_v10  ;;  %v12344_v1 = vpack.c.bf16 %v5436_v37, %v5436_v37  ;;  %v8918_v13 = vsel %vm8098_vm4, %v5435_v62, 0.0  ;;  %v17052_v15 = vpop.f32.mrb[220].mxu1 }
 0x453   : > { %v12342_v54 = vpack.c.bf16 %v5434_v46, %v5434_v46  ;;  %v8916_v6 = vsel %vm8098_vm4, %v5434_v46, 0.0  ;;  %v9537_v32 = vmul.f32 %v5434_v46, %v5434_v46  ;;  %v5439_v14 = vmax.f32 %v4635_v4, 0.0  ;;  %v17056_v9 = vpop.f32.mrb[221].mxu1 }
 0x454   : > { %v10456_v38 = vadd.f32 %v10455_v36, %v10454_v56  ;;  %7997 = vst.msk [vmem:[%s13964_s12 + $0x66c] sm:$0xf] %vm7585_vm3, %v12344_v1  ;;  %v8917_v45 = vadd.f32 %v8916_v6, %v8915_v26  ;;  %v5437_v59 = vmax.f32 %v4627_v0, 0.0  ;;  %v9539_v22 = vmul.f32 %v5436_v37, %v5436_v37  ;;  %v17065_v5 = vpop.f32.mrb[222].mxu1 }
 0x455   : > { %7995 = vst.msk [vmem:[%s13964_s12 + $0x664] sm:$0xf] %vm7585_vm3, %v12342_v54  ;;  %v10457_v62 = vsel %vm8098_vm4, %v9537_v32, 0.0  ;;  %v4638_v21 = vadd.f32 %v16724_v53, %v16548_v49  ;;  %v4630_v10 = vadd.f32 %v16724_v53, %v16551_v57  ;;  %v10459_v46 = vsel %vm8098_vm4, %v9538_v39, 0.0  ;;  %v17068_v0 = vpop.f32.mrb[223].mxu1 }
 0x456   : > { %v8919_v16 = vadd.f32 %v8918_v13, %v8917_v45  ;;  %v10458_v36 = vadd.f32 %v10457_v62, %v10456_v38  ;;  %v12347_v4 = vpack.c.bf16 %v5439_v14, %v5439_v14  ;;  %v8920_v56 = vsel %vm8098_vm4, %v5436_v37, 0.0 }
 0x457   : > { %v12345_v26 = vpack.c.bf16 %v5437_v59, %v5437_v59  ;;  %v8922_v1 = vsel %vm8098_vm4, %v5437_v59, 0.0  ;;  %v9540_v54 = vmul.f32 %v5437_v59, %v5437_v59  ;;  %v5440_v57 = vmax.f32 %v4638_v21, 0.0 }
 0x458   : > { %v8921_v49 = vadd.f32 %v8920_v56, %v8919_v16  ;;  %v10460_v6 = vadd.f32 %v10459_v46, %v10458_v36  ;;  %8000 = vst.msk [vmem:[%s13964_s12 + $0x678] sm:$0xf] %vm7585_vm3, %v12347_v4  ;;  %v5438_v32 = vmax.f32 %v4630_v10, 0.0  ;;  %v10461_v39 = vsel %vm8098_vm4, %v9539_v22, 0.0 }
 0x459   : > { %7998 = vst.msk [vmem:[%s13964_s12 + $0x670] sm:$0xf] %vm7585_vm3, %v12345_v26  ;;  %v10463_v13 = vsel %vm8098_vm4, %v9540_v54, 0.0  ;;  %v4651_v37 = vadd.f32 %v16724_v53, %v16567_v60  ;;  %v4643_v38 = vadd.f32 %v16724_v53, %v16571_v35  ;;  %v9542_v59 = vmul.f32 %v5439_v14, %v5439_v14 }
 0x45a   : > { %v10462_v45 = vadd.f32 %v10461_v39, %v10460_v6  ;;  %v8923_v62 = vadd.f32 %v8922_v1, %v8921_v49  ;;  %v12348_v46 = vpack.c.bf16 %v5440_v57, %v5440_v57  ;;  %v8926_v21 = vsel %vm8098_vm4, %v5439_v14, 0.0  ;;  %v17084_v36 = vpop.f32.mrb[224].mxu1  ;;  %v17937_v1 = vld [vmem:[#allocation31_spill] sm:$0xff]  ;;  %v17938_v6 = vld [vmem:[#allocation32_spill] sm:$0xff] }
 0x45b   : > { %v12346_v10 = vpack.c.bf16 %v5438_v32, %v5438_v32  ;;  %v8924_v22 = vsel %vm8098_vm4, %v5438_v32, 0.0  ;;  %v9541_v16 = vmul.f32 %v5438_v32, %v5438_v32  ;;  %v5443_v56 = vmax.f32 %v4651_v37, 0.0  ;;  %v17088_v35 = vpop.f32.mrb[225].mxu1 }
 0x45c   : > { %v10464_v4 = vadd.f32 %v10463_v13, %v10462_v45  ;;  %8001 = vst.msk [vmem:[%s13964_s12 + $0x67c] sm:$0xf] %vm7585_vm3, %v12348_v46  ;;  %v8925_v60 = vadd.f32 %v8924_v22, %v8923_v62  ;;  %v5441_v26 = vmax.f32 %v4643_v38, 0.0  ;;  %17936 = vst [vmem:[#allocation30_spill] sm:$0xff] %v17088_v35  ;;  %v9543_v54 = vmul.f32 %v5440_v57, %v5440_v57  ;;  %v17097_v39 = vpop.f32.mrb[226].mxu1 }
 0x45d   : > { %7999 = vst.msk [vmem:[%s13964_s12 + $0x674] sm:$0xf] %vm7585_vm3, %v12346_v10  ;;  %v10465_v14 = vsel %vm8098_vm4, %v9541_v16, 0.0  ;;  %v4654_v49 = vadd.f32 %v16724_v53, %v17937_v1  ;;  %v4646_v32 = vadd.f32 %v16724_v53, %v17938_v6  ;;  %17939 = vst [vmem:[#allocation31_spill] sm:$0xff] %v17097_v39  ;;  %v10467_v13 = vsel %vm8098_vm4, %v9542_v59, 0.0  ;;  %v17100_v62 = vpop.f32.mrb[227].mxu1 }
 0x45e   : > { %v8927_v37 = vadd.f32 %v8926_v21, %v8925_v60  ;;  %v10466_v38 = vadd.f32 %v10465_v14, %v10464_v4  ;;  %v12351_v45 = vpack.c.bf16 %v5443_v56, %v5443_v56  ;;  %17940 = vst [vmem:[#allocation32_spill] sm:$0xff] %v17100_v62  ;;  %v8928_v46 = vsel %vm8098_vm4, %v5440_v57, 0.0  ;;  %v17941_v4 = vld [vmem:[#allocation8_spill] sm:$0xff]  ;;  %v17942_v60 = vld [vmem:[#allocation9_spill] sm:$0xff] }
 0x45f   : > { %v12349_v10 = vpack.c.bf16 %v5441_v26, %v5441_v26  ;;  %v8930_v22 = vsel %vm8098_vm4, %v5441_v26, 0.0  ;;  %v9544_v16 = vmul.f32 %v5441_v26, %v5441_v26  ;;  %v5444_v6 = vmax.f32 %v4654_v49, 0.0 }
 0x460   : > { %v8929_v1 = vadd.f32 %v8928_v46, %v8927_v37  ;;  %v10468_v35 = vadd.f32 %v10467_v13, %v10466_v38  ;;  %8004 = vst.msk [vmem:[%s13964_s12 + $0x688] sm:$0xf] %vm7585_vm3, %v12351_v45  ;;  %v5442_v39 = vmax.f32 %v4646_v32, 0.0  ;;  %v10469_v59 = vsel %vm8098_vm4, %v9543_v54, 0.0 }
 0x461   : > { %8002 = vst.msk [vmem:[%s13964_s12 + $0x680] sm:$0xf] %vm7585_vm3, %v12349_v10  ;;  %v10471_v21 = vsel %vm8098_vm4, %v9544_v16, 0.0  ;;  %v4667_v57 = vadd.f32 %v16724_v53, %v17941_v4  ;;  %v4659_v14 = vadd.f32 %v16724_v53, %v17942_v60  ;;  %v9546_v13 = vmul.f32 %v5443_v56, %v5443_v56 }
 0x462   : > { %v10470_v26 = vadd.f32 %v10469_v59, %v10468_v35  ;;  %v8931_v37 = vadd.f32 %v8930_v22, %v8929_v1  ;;  %v12352_v38 = vpack.c.bf16 %v5444_v6, %v5444_v6  ;;  %v8934_v49 = vsel %vm8098_vm4, %v5443_v56, 0.0  ;;  %v17116_v46 = vpop.f32.mrb[228].mxu1  ;;  %v17945_v22 = vld [vmem:[#allocation10_spill] sm:$0xff] }
 0x463   : > { %v12350_v32 = vpack.c.bf16 %v5442_v39, %v5442_v39  ;;  %v8932_v54 = vsel %vm8098_vm4, %v5442_v39, 0.0  ;;  %v9545_v45 = vmul.f32 %v5442_v39, %v5442_v39  ;;  %17943 = vst [vmem:[#allocation8_spill] sm:$0xff] %v17116_v46  ;;  %v5447_v4 = vmax.f32 %v4667_v57, 0.0  ;;  %v17120_v60 = vpop.f32.mrb[229].mxu1  ;;  %v17946_v39 = vld [vmem:[#allocation11_spill] sm:$0xff] }
 0x464   : > { %v10472_v10 = vadd.f32 %v10471_v21, %v10470_v26  ;;  %8005 = vst.msk [vmem:[%s13964_s12 + $0x68c] sm:$0xf] %vm7585_vm3, %v12352_v38  ;;  %v8933_v16 = vadd.f32 %v8932_v54, %v8931_v37  ;;  %v5445_v62 = vmax.f32 %v4659_v14, 0.0  ;;  %17944 = vst [vmem:[#allocation9_spill] sm:$0xff] %v17120_v60  ;;  %v9547_v35 = vmul.f32 %v5444_v6, %v5444_v6  ;;  %v17129_v21 = vpop.f32.mrb[230].mxu1 }
 0x465   : > { %8003 = vst.msk [vmem:[%s13964_s12 + $0x684] sm:$0xf] %vm7585_vm3, %v12350_v32  ;;  %v10473_v56 = vsel %vm8098_vm4, %v9545_v45, 0.0  ;;  %v4670_v1 = vadd.f32 %v16724_v53, %v17945_v22  ;;  %v4662_v59 = vadd.f32 %v16724_v53, %v17946_v39  ;;  %17947 = vst [vmem:[#allocation10_spill] sm:$0xff] %v17129_v21  ;;  %v10475_v57 = vsel %vm8098_vm4, %v9546_v13, 0.0  ;;  %v17132_v38 = vpop.f32.mrb[231].mxu1 }
 0x466   : > { %v8935_v14 = vadd.f32 %v8934_v49, %v8933_v16  ;;  %v10474_v26 = vadd.f32 %v10473_v56, %v10472_v10  ;;  %v12355_v37 = vpack.c.bf16 %v5447_v4, %v5447_v4  ;;  %17948 = vst [vmem:[#allocation11_spill] sm:$0xff] %v17132_v38  ;;  %v8936_v32 = vsel %vm8098_vm4, %v5444_v6, 0.0  ;;  %v17145_v6 = vld [vmem:[%s17805_s2] ss:$0 sm:$0xff]  ;;  %v17950_v10 = vld [vmem:[#allocation13_spill] sm:$0xff] }
 0x467   : > { %v12353_v54 = vpack.c.bf16 %v5445_v62, %v5445_v62  ;;  %v8938_v45 = vsel %vm8098_vm4, %v5445_v62, 0.0  ;;  %v9548_v60 = vmul.f32 %v5445_v62, %v5445_v62  ;;  %v5448_v53 = vmax.f32 %v4670_v1, 0.0  ;;  %v17949_v49 = vld [vmem:[#allocation12_spill] sm:$0xff] }
 0x468   : > { %v8937_v22 = vadd.f32 %v8936_v32, %v8935_v14  ;;  %v10476_v46 = vadd.f32 %v10475_v57, %v10474_v26  ;;  %8008 = vst.msk [vmem:[%s13964_s12 + $0x698] sm:$0xf] %vm7585_vm3, %v12355_v37  ;;  %v5446_v39 = vmax.f32 %v4662_v59, 0.0  ;;  %v10477_v21 = vsel %vm8098_vm4, %v9547_v35, 0.0 }
 0x469   : > { %8006 = vst.msk [vmem:[%s13964_s12 + $0x690] sm:$0xf] %vm7585_vm3, %v12353_v54  ;;  %v10479_v13 = vsel %vm8098_vm4, %v9548_v60, 0.0  ;;  %v4683_v62 = vadd.f32 %v17145_v6, %v17949_v49  ;;  %v4675_v16 = vadd.f32 %v17145_v6, %v17950_v10  ;;  %v9550_v1 = vmul.f32 %v5447_v4, %v5447_v4 }
 0x46a   : > { %v10478_v56 = vadd.f32 %v10477_v21, %v10476_v46  ;;  %v8939_v35 = vadd.f32 %v8938_v45, %v8937_v22  ;;  %v12356_v59 = vpack.c.bf16 %v5448_v53, %v5448_v53  ;;  %v8942_v57 = vsel %vm8098_vm4, %v5447_v4, 0.0  ;;  %v17153_v37 = vpop.f32.mrb[232].mxu1  ;;  %v17953_v21 = vld [vmem:[#allocation14_spill] sm:$0xff]  ;;  %v17954_v22 = vld [vmem:[#allocation15_spill] sm:$0xff] }
 0x46b   : > { %v12354_v14 = vpack.c.bf16 %v5446_v39, %v5446_v39  ;;  %v8940_v60 = vsel %vm8098_vm4, %v5446_v39, 0.0  ;;  %v9549_v26 = vmul.f32 %v5446_v39, %v5446_v39  ;;  %17951 = vst [vmem:[#allocation12_spill] sm:$0xff] %v17153_v37  ;;  %v5451_v49 = vmax.f32 %v4683_v62, 0.0  ;;  %v17157_v10 = vpop.f32.mrb[233].mxu1 }
 0x46c   : > { %v10480_v32 = vadd.f32 %v10479_v13, %v10478_v56  ;;  %8009 = vst.msk [vmem:[%s13964_s12 + $0x69c] sm:$0xf] %vm7585_vm3, %v12356_v59  ;;  %v8941_v54 = vadd.f32 %v8940_v60, %v8939_v35  ;;  %v5449_v38 = vmax.f32 %v4675_v16, 0.0  ;;  %17952 = vst [vmem:[#allocation13_spill] sm:$0xff] %v17157_v10  ;;  %v9551_v46 = vmul.f32 %v5448_v53, %v5448_v53  ;;  %v17166_v13 = vpop.f32.mrb[234].mxu1 }
 0x46d   : > { %8007 = vst.msk [vmem:[%s13964_s12 + $0x694] sm:$0xf] %vm7585_vm3, %v12354_v14  ;;  %v10481_v4 = vsel %vm8098_vm4, %v9549_v26, 0.0  ;;  %v4686_v45 = vadd.f32 %v17145_v6, %v17953_v21  ;;  %v4678_v39 = vadd.f32 %v17145_v6, %v17954_v22  ;;  %17955 = vst [vmem:[#allocation14_spill] sm:$0xff] %v17166_v13  ;;  %v10483_v62 = vsel %vm8098_vm4, %v9550_v1, 0.0  ;;  %v17169_v59 = vpop.f32.mrb[235].mxu1 }
 0x46e   : > { %v8943_v16 = vadd.f32 %v8942_v57, %v8941_v54  ;;  %v10482_v56 = vadd.f32 %v10481_v4, %v10480_v32  ;;  %v12359_v35 = vpack.c.bf16 %v5451_v49, %v5451_v49  ;;  %17956 = vst [vmem:[#allocation15_spill] sm:$0xff] %v17169_v59  ;;  %v8944_v14 = vsel %vm8098_vm4, %v5448_v53, 0.0  ;;  %v17957_v32 = vld [vmem:[#allocation16_spill] sm:$0xff]  ;;  %v17958_v54 = vld [vmem:[#allocation17_spill] sm:$0xff] }
 0x46f   : > { %v12357_v60 = vpack.c.bf16 %v5449_v38, %v5449_v38  ;;  %v8946_v26 = vsel %vm8098_vm4, %v5449_v38, 0.0  ;;  %v9552_v10 = vmul.f32 %v5449_v38, %v5449_v38  ;;  %v5452_v22 = vmax.f32 %v4686_v45, 0.0 }
 0x470   : > { %v8945_v21 = vadd.f32 %v8944_v14, %v8943_v16  ;;  %v10484_v37 = vadd.f32 %v10483_v62, %v10482_v56  ;;  %8012 = vst.msk [vmem:[%s13964_s12 + $0x6a8] sm:$0xf] %vm7585_vm3, %v12359_v35  ;;  %v5450_v13 = vmax.f32 %v4678_v39, 0.0  ;;  %v10485_v1 = vsel %vm8098_vm4, %v9551_v46, 0.0 }
 0x471   : > { %8010 = vst.msk [vmem:[%s13964_s12 + $0x6a0] sm:$0xf] %vm7585_vm3, %v12357_v60  ;;  %v10487_v57 = vsel %vm8098_vm4, %v9552_v10, 0.0  ;;  %v4699_v53 = vadd.f32 %v17145_v6, %v17957_v32  ;;  %v4691_v4 = vadd.f32 %v17145_v6, %v17958_v54  ;;  %v9554_v62 = vmul.f32 %v5451_v49, %v5451_v49 }
 0x472   : > { %v10486_v38 = vadd.f32 %v10485_v1, %v10484_v37  ;;  %v8947_v16 = vadd.f32 %v8946_v26, %v8945_v21  ;;  %v12360_v56 = vpack.c.bf16 %v5452_v22, %v5452_v22  ;;  %v8950_v45 = vsel %vm8098_vm4, %v5451_v49, 0.0  ;;  %v17185_v14 = vpop.f32.mrb[236].mxu1  ;;  %v17961_v26 = vld [vmem:[#allocation18_spill] sm:$0xff] }
 0x473   : > { %v12358_v39 = vpack.c.bf16 %v5450_v13, %v5450_v13  ;;  %v8948_v46 = vsel %vm8098_vm4, %v5450_v13, 0.0  ;;  %v9553_v35 = vmul.f32 %v5450_v13, %v5450_v13  ;;  %17959 = vst [vmem:[#allocation16_spill] sm:$0xff] %v17185_v14  ;;  %v5455_v32 = vmax.f32 %v4699_v53, 0.0  ;;  %v17189_v54 = vpop.f32.mrb[237].mxu1  ;;  %v17962_v13 = vld [vmem:[#allocation19_spill] sm:$0xff] }
 0x474   : > { %v10488_v10 = vadd.f32 %v10487_v57, %v10486_v38  ;;  %8013 = vst.msk [vmem:[%s13964_s12 + $0x6ac] sm:$0xf] %vm7585_vm3, %v12360_v56  ;;  %v8949_v60 = vadd.f32 %v8948_v46, %v8947_v16  ;;  %v5453_v59 = vmax.f32 %v4691_v4, 0.0  ;;  %17960 = vst [vmem:[#allocation17_spill] sm:$0xff] %v17189_v54  ;;  %v9555_v37 = vmul.f32 %v5452_v22, %v5452_v22  ;;  %v17198_v57 = vpop.f32.mrb[238].mxu1 }
 0x475   : > { %8011 = vst.msk [vmem:[%s13964_s12 + $0x6a4] sm:$0xf] %vm7585_vm3, %v12358_v39  ;;  %v10489_v49 = vsel %vm8098_vm4, %v9553_v35, 0.0  ;;  %v4702_v21 = vadd.f32 %v17145_v6, %v17961_v26  ;;  %v4694_v1 = vadd.f32 %v17145_v6, %v17962_v13  ;;  %17963 = vst [vmem:[#allocation18_spill] sm:$0xff] %v17198_v57  ;;  %v10491_v53 = vsel %vm8098_vm4, %v9554_v62, 0.0  ;;  %v17201_v56 = vpop.f32.mrb[239].mxu1 }
 0x476   : > { %v8951_v4 = vadd.f32 %v8950_v45, %v8949_v60  ;;  %v10490_v38 = vadd.f32 %v10489_v49, %v10488_v10  ;;  %v12363_v16 = vpack.c.bf16 %v5455_v32, %v5455_v32  ;;  %17964 = vst [vmem:[#allocation19_spill] sm:$0xff] %v17201_v56  ;;  %v8952_v39 = vsel %vm8098_vm4, %v5452_v22, 0.0  ;;  %v17965_v10 = vld [vmem:[#allocation20_spill] sm:$0xff]  ;;  %v17966_v60 = vld [vmem:[#allocation21_spill] sm:$0xff] }
 0x477   : > { %v12361_v46 = vpack.c.bf16 %v5453_v59, %v5453_v59  ;;  %v8954_v35 = vsel %vm8098_vm4, %v5453_v59, 0.0  ;;  %v9556_v54 = vmul.f32 %v5453_v59, %v5453_v59  ;;  %v5456_v13 = vmax.f32 %v4702_v21, 0.0 }
 0x478   : > { %v8953_v26 = vadd.f32 %v8952_v39, %v8951_v4  ;;  %v10492_v14 = vadd.f32 %v10491_v53, %v10490_v38  ;;  %8016 = vst.msk [vmem:[%s13964_s12 + $0x6b8] sm:$0xf] %vm7585_vm3, %v12363_v16  ;;  %v5454_v57 = vmax.f32 %v4694_v1, 0.0  ;;  %v10493_v62 = vsel %vm8098_vm4, %v9555_v37, 0.0 }
 0x479   : > { %8014 = vst.msk [vmem:[%s13964_s12 + $0x6b0] sm:$0xf] %vm7585_vm3, %v12361_v46  ;;  %v10495_v45 = vsel %vm8098_vm4, %v9556_v54, 0.0  ;;  %v4715_v22 = vadd.f32 %v17145_v6, %v17965_v10  ;;  %v4707_v49 = vadd.f32 %v17145_v6, %v17966_v60  ;;  %v9558_v53 = vmul.f32 %v5455_v32, %v5455_v32 }
 0x47a   : > { %v10494_v59 = vadd.f32 %v10493_v62, %v10492_v14  ;;  %v8955_v4 = vadd.f32 %v8954_v35, %v8953_v26  ;;  %v12364_v38 = vpack.c.bf16 %v5456_v13, %v5456_v13  ;;  %v8958_v21 = vsel %vm8098_vm4, %v5455_v32, 0.0  ;;  %v17217_v39 = vpop.f32.mrb[240].mxu1  ;;  %v17969_v35 = vld [vmem:[#allocation22_spill] sm:$0xff] }
 0x47b   : > { %v12362_v1 = vpack.c.bf16 %v5454_v57, %v5454_v57  ;;  %v8956_v37 = vsel %vm8098_vm4, %v5454_v57, 0.0  ;;  %v9557_v16 = vmul.f32 %v5454_v57, %v5454_v57  ;;  %17967 = vst [vmem:[#allocation20_spill] sm:$0xff] %v17217_v39  ;;  %v5459_v10 = vmax.f32 %v4715_v22, 0.0  ;;  %v17221_v60 = vpop.f32.mrb[241].mxu1  ;;  %v17970_v57 = vld [vmem:[#allocation23_spill] sm:$0xff] }
 0x47c   : > { %v10496_v54 = vadd.f32 %v10495_v45, %v10494_v59  ;;  %8017 = vst.msk [vmem:[%s13964_s12 + $0x6bc] sm:$0xf] %vm7585_vm3, %v12364_v38  ;;  %v8957_v46 = vadd.f32 %v8956_v37, %v8955_v4  ;;  %v5457_v56 = vmax.f32 %v4707_v49, 0.0  ;;  %17968 = vst [vmem:[#allocation21_spill] sm:$0xff] %v17221_v60  ;;  %v9559_v14 = vmul.f32 %v5456_v13, %v5456_v13  ;;  %v17230_v45 = vpop.f32.mrb[242].mxu1 }
 0x47d   : > { %8015 = vst.msk [vmem:[%s13964_s12 + $0x6b4] sm:$0xf] %vm7585_vm3, %v12362_v1  ;;  %v10497_v32 = vsel %vm8098_vm4, %v9557_v16, 0.0  ;;  %v4718_v26 = vadd.f32 %v17145_v6, %v17969_v35  ;;  %v4710_v62 = vadd.f32 %v17145_v6, %v17970_v57  ;;  %17971 = vst [vmem:[#allocation22_spill] sm:$0xff] %v17230_v45  ;;  %v10499_v22 = vsel %vm8098_vm4, %v9558_v53, 0.0  ;;  %v17233_v38 = vpop.f32.mrb[243].mxu1 }
 0x47e   : > { %v8959_v49 = vadd.f32 %v8958_v21, %v8957_v46  ;;  %v10498_v59 = vadd.f32 %v10497_v32, %v10496_v54  ;;  %v12367_v4 = vpack.c.bf16 %v5459_v10, %v5459_v10  ;;  %v8960_v1 = vsel %vm8098_vm4, %v5456_v13, 0.0  ;;  %v17972_v54 = vld [vmem:[#allocation24_spill] sm:$0xff] }
 0x47f   : > { %v12365_v37 = vpack.c.bf16 %v5457_v56, %v5457_v56  ;;  %v8962_v16 = vsel %vm8098_vm4, %v5457_v56, 0.0  ;;  %v9560_v60 = vmul.f32 %v5457_v56, %v5457_v56  ;;  %v5460_v57 = vmax.f32 %v4718_v26, 0.0 }
 0x480   : > { %v8961_v35 = vadd.f32 %v8960_v1, %v8959_v49  ;;  %v10500_v39 = vadd.f32 %v10499_v22, %v10498_v59  ;;  %8020 = vst.msk [vmem:[%s13964_s12 + $0x6c8] sm:$0xf] %vm7585_vm3, %v12367_v4  ;;  %v5458_v45 = vmax.f32 %v4710_v62, 0.0  ;;  %v10501_v53 = vsel %vm8098_vm4, %v9559_v14, 0.0 }
 0x481   : > { %8018 = vst.msk [vmem:[%s13964_s12 + $0x6c0] sm:$0xf] %vm7585_vm3, %v12365_v37  ;;  %v10503_v21 = vsel %vm8098_vm4, %v9560_v60, 0.0  ;;  %v4731_v13 = vadd.f32 %v17145_v6, %v16732_v34  ;;  %v4723_v46 = vadd.f32 %v17145_v6, %v17972_v54  ;;  %v9562_v32 = vmul.f32 %v5459_v10, %v5459_v10 }
 0x482   : > { %v10502_v56 = vadd.f32 %v10501_v53, %v10500_v39  ;;  %v8963_v22 = vadd.f32 %v8962_v16, %v8961_v35  ;;  %v12368_v49 = vpack.c.bf16 %v5460_v57, %v5460_v57  ;;  %v8966_v26 = vsel %vm8098_vm4, %v5459_v10, 0.0  ;;  %v17249_v4 = vpop.f32.mrb[244].mxu1  ;;  %v17975_v16 = vld [vmem:[#allocation25_spill] sm:$0xff] }
 0x483   : > { %v12366_v62 = vpack.c.bf16 %v5458_v45, %v5458_v45  ;;  %v8964_v14 = vsel %vm8098_vm4, %v5458_v45, 0.0  ;;  %v9561_v59 = vmul.f32 %v5458_v45, %v5458_v45  ;;  %17973 = vst [vmem:[#allocation23_spill] sm:$0xff] %v17249_v4  ;;  %v5463_v1 = vmax.f32 %v4731_v13, 0.0  ;;  %v17253_v54 = vpop.f32.mrb[245].mxu1  ;;  %v17976_v45 = vld [vmem:[#allocation26_spill] sm:$0xff] }
 0x484   : > { %v10504_v60 = vadd.f32 %v10503_v21, %v10502_v56  ;;  %8021 = vst.msk [vmem:[%s13964_s12 + $0x6cc] sm:$0xf] %vm7585_vm3, %v12368_v49  ;;  %v8965_v34 = vadd.f32 %v8964_v14, %v8963_v22  ;;  %v5461_v37 = vmax.f32 %v4723_v46, 0.0  ;;  %17974 = vst [vmem:[#allocation24_spill] sm:$0xff] %v17253_v54  ;;  %v9563_v39 = vmul.f32 %v5460_v57, %v5460_v57  ;;  %v17262_v21 = vpop.f32.mrb[246].mxu1 }
 0x485   : > { %8019 = vst.msk [vmem:[%s13964_s12 + $0x6c4] sm:$0xf] %vm7585_vm3, %v12366_v62  ;;  %v10505_v10 = vsel %vm8098_vm4, %v9561_v59, 0.0  ;;  %v4734_v35 = vadd.f32 %v17145_v6, %v17975_v16  ;;  %v4726_v53 = vadd.f32 %v17145_v6, %v17976_v45  ;;  %17977 = vst [vmem:[#allocation25_spill] sm:$0xff] %v17262_v21  ;;  %v10507_v13 = vsel %vm8098_vm4, %v9562_v32, 0.0  ;;  %v17265_v49 = vpop.f32.mrb[247].mxu1 }
 0x486   : > { %v8967_v46 = vadd.f32 %v8966_v26, %v8965_v34  ;;  %v10506_v56 = vadd.f32 %v10505_v10, %v10504_v60  ;;  %v12371_v22 = vpack.c.bf16 %v5463_v1, %v5463_v1  ;;  %v8968_v62 = vsel %vm8098_vm4, %v5460_v57, 0.0  ;;  %v17978_v60 = vld [vmem:[#allocation27_spill] sm:$0xff] }
 0x487   : > { %v12369_v14 = vpack.c.bf16 %v5461_v37, %v5461_v37  ;;  %v8970_v59 = vsel %vm8098_vm4, %v5461_v37, 0.0  ;;  %v9564_v54 = vmul.f32 %v5461_v37, %v5461_v37  ;;  %v5464_v45 = vmax.f32 %v4734_v35, 0.0 }
 0x488   : > { %v8969_v16 = vadd.f32 %v8968_v62, %v8967_v46  ;;  %v10508_v4 = vadd.f32 %v10507_v13, %v10506_v56  ;;  %8024 = vst.msk [vmem:[%s13964_s12 + $0x6d8] sm:$0xf] %vm7585_vm3, %v12371_v22  ;;  %v5462_v21 = vmax.f32 %v4726_v53, 0.0  ;;  %v10509_v32 = vsel %vm8098_vm4, %v9563_v39, 0.0 }
 0x489   : > { %8022 = vst.msk [vmem:[%s13964_s12 + $0x6d0] sm:$0xf] %vm7585_vm3, %v12369_v14  ;;  %v10511_v26 = vsel %vm8098_vm4, %v9564_v54, 0.0  ;;  %v4747_v57 = vadd.f32 %v17145_v6, %v16764_v19  ;;  %v4739_v34 = vadd.f32 %v17145_v6, %v17978_v60  ;;  %v9566_v10 = vmul.f32 %v5463_v1, %v5463_v1 }
 0x48a   : > { %v10510_v37 = vadd.f32 %v10509_v32, %v10508_v4  ;;  %v8971_v13 = vadd.f32 %v8970_v59, %v8969_v16  ;;  %v12372_v46 = vpack.c.bf16 %v5464_v45, %v5464_v45  ;;  %v8974_v35 = vsel %vm8098_vm4, %v5463_v1, 0.0  ;;  %v17281_v22 = vpop.f32.mrb[248].mxu1  ;;  %v17980_v59 = vld [vmem:[#allocation28_spill] sm:$0xff] }
 0x48b   : > { %v12370_v53 = vpack.c.bf16 %v5462_v21, %v5462_v21  ;;  %v8972_v39 = vsel %vm8098_vm4, %v5462_v21, 0.0  ;;  %v9565_v56 = vmul.f32 %v5462_v21, %v5462_v21  ;;  %v5467_v62 = vmax.f32 %v4747_v57, 0.0  ;;  %v17285_v60 = vpop.f32.mrb[249].mxu1 }
 0x48c   : > { %v10512_v54 = vadd.f32 %v10511_v26, %v10510_v37  ;;  %8025 = vst.msk [vmem:[%s13964_s12 + $0x6dc] sm:$0xf] %vm7585_vm3, %v12372_v46  ;;  %v8973_v19 = vadd.f32 %v8972_v39, %v8971_v13  ;;  %v5465_v14 = vmax.f32 %v4739_v34, 0.0  ;;  %17979 = vst [vmem:[#allocation26_spill] sm:$0xff] %v17285_v60  ;;  %v9567_v4 = vmul.f32 %v5464_v45, %v5464_v45  ;;  %v17294_v32 = vpop.f32.mrb[250].mxu1 }
 0x48d   : > { %8023 = vst.msk [vmem:[%s13964_s12 + $0x6d4] sm:$0xf] %vm7585_vm3, %v12370_v53  ;;  %v10513_v1 = vsel %vm8098_vm4, %v9565_v56, 0.0  ;;  %v4750_v16 = vadd.f32 %v17145_v6, %v17980_v59  ;;  %v4742_v21 = vadd.f32 %v17145_v6, %v16780_v63  ;;  %17981 = vst [vmem:[#allocation27_spill] sm:$0xff] %v17294_v32  ;;  %v10515_v26 = vsel %vm8098_vm4, %v9566_v10, 0.0  ;;  %v17297_v13 = vpop.f32.mrb[251].mxu1 }
 0x48e   : > { %v8975_v57 = vadd.f32 %v8974_v35, %v8973_v19  ;;  %v10514_v34 = vadd.f32 %v10513_v1, %v10512_v54  ;;  %v12375_v37 = vpack.c.bf16 %v5467_v62, %v5467_v62  ;;  %v8976_v46 = vsel %vm8098_vm4, %v5464_v45, 0.0 }
 0x48f   : > { %v12373_v53 = vpack.c.bf16 %v5465_v14, %v5465_v14  ;;  %v8978_v39 = vsel %vm8098_vm4, %v5465_v14, 0.0  ;;  %v9568_v56 = vmul.f32 %v5465_v14, %v5465_v14  ;;  %v5468_v63 = vmax.f32 %v4750_v16, 0.0 }
 0x490   : > { %v8977_v59 = vadd.f32 %v8976_v46, %v8975_v57  ;;  %v10516_v60 = vadd.f32 %v10515_v26, %v10514_v34  ;;  %8028 = vst.msk [vmem:[%s13964_s12 + $0x6e8] sm:$0xf] %vm7585_vm3, %v12375_v37  ;;  %v5466_v32 = vmax.f32 %v4742_v21, 0.0  ;;  %v10517_v10 = vsel %vm8098_vm4, %v9567_v4, 0.0 }
 0x491   : > { %8026 = vst.msk [vmem:[%s13964_s12 + $0x6e0] sm:$0xf] %vm7585_vm3, %v12373_v53  ;;  %v10519_v35 = vsel %vm8098_vm4, %v9568_v56, 0.0  ;;  %v4763_v45 = vadd.f32 %v17145_v6, %v16796_v48  ;;  %v4755_v54 = vadd.f32 %v17145_v6, %v16800_v42  ;;  %v9570_v14 = vmul.f32 %v5467_v62, %v5467_v62 }
 0x492   : > { %v10518_v19 = vadd.f32 %v10517_v10, %v10516_v60  ;;  %v8979_v1 = vadd.f32 %v8978_v39, %v8977_v59  ;;  %v12376_v26 = vpack.c.bf16 %v5468_v63, %v5468_v63  ;;  %v8982_v16 = vsel %vm8098_vm4, %v5467_v62, 0.0  ;;  %v17313_v34 = vpop.f32.mrb[252].mxu1  ;;  %v17982_v39 = vld [vmem:[#allocation29_spill] sm:$0xff] }
 0x493   : > { %v12374_v21 = vpack.c.bf16 %v5466_v32, %v5466_v32  ;;  %v8980_v4 = vsel %vm8098_vm4, %v5466_v32, 0.0  ;;  %v9569_v57 = vmul.f32 %v5466_v32, %v5466_v32  ;;  %v5471_v46 = vmax.f32 %v4763_v45, 0.0  ;;  %v17317_v42 = vpop.f32.mrb[253].mxu1 }
 0x494   : > { %v10520_v37 = vadd.f32 %v10519_v35, %v10518_v19  ;;  %8029 = vst.msk [vmem:[%s13964_s12 + $0x6ec] sm:$0xf] %vm7585_vm3, %v12376_v26  ;;  %v8981_v48 = vadd.f32 %v8980_v4, %v8979_v1  ;;  %v5469_v53 = vmax.f32 %v4755_v54, 0.0  ;;  %v9571_v60 = vmul.f32 %v5468_v63, %v5468_v63  ;;  %v17326_v59 = vpop.f32.mrb[254].mxu1 }
 0x495   : > { %8027 = vst.msk [vmem:[%s13964_s12 + $0x6e4] sm:$0xf] %vm7585_vm3, %v12374_v21  ;;  %v10521_v62 = vsel %vm8098_vm4, %v9569_v57, 0.0  ;;  %v4766_v56 = vadd.f32 %v17145_v6, %v17982_v39  ;;  %v4758_v32 = vadd.f32 %v17145_v6, %v16812_v47  ;;  %17983 = vst [vmem:[#allocation28_spill] sm:$0xff] %v17326_v59  ;;  %v10523_v10 = vsel %vm8098_vm4, %v9570_v14, 0.0  ;;  %v17329_v19 = vpop.f32.mrb[255].mxu1 }
 0x496   : > { %v8983_v35 = vadd.f32 %v8982_v16, %v8981_v48  ;;  %v10522_v45 = vadd.f32 %v10521_v62, %v10520_v37  ;;  %v12379_v54 = vpack.c.bf16 %v5471_v46, %v5471_v46  ;;  %v8984_v1 = vsel %vm8098_vm4, %v5468_v63, 0.0 }
 0x497   : > { %v12377_v26 = vpack.c.bf16 %v5469_v53, %v5469_v53  ;;  %v8986_v21 = vsel %vm8098_vm4, %v5469_v53, 0.0  ;;  %v9572_v4 = vmul.f32 %v5469_v53, %v5469_v53  ;;  %v5472_v47 = vmax.f32 %v4766_v56, 0.0 }
 0x498   : > { %v8985_v57 = vadd.f32 %v8984_v1, %v8983_v35  ;;  %v10524_v39 = vadd.f32 %v10523_v10, %v10522_v45  ;;  %8032 = vst.msk [vmem:[%s13964_s12 + $0x6f8] sm:$0xf] %vm7585_vm3, %v12379_v54  ;;  %v5470_v59 = vmax.f32 %v4758_v32, 0.0  ;;  %v10525_v14 = vsel %vm8098_vm4, %v9571_v60, 0.0 }
 0x499   : > { %8030 = vst.msk [vmem:[%s13964_s12 + $0x6f0] sm:$0xf] %vm7585_vm3, %v12377_v26  ;;  %v10527_v16 = vsel %vm8098_vm4, %v9572_v4, 0.0  ;;  %v4779_v63 = vadd.f32 %v17145_v6, %v16828_v24  ;;  %v4771_v37 = vadd.f32 %v17145_v6, %v16832_v41  ;;  %v9574_v53 = vmul.f32 %v5471_v46, %v5471_v46 }
 0x49a   : > { %v10526_v48 = vadd.f32 %v10525_v14, %v10524_v39  ;;  %v8987_v62 = vadd.f32 %v8986_v21, %v8985_v57  ;;  %v12380_v10 = vpack.c.bf16 %v5472_v47, %v5472_v47  ;;  %v8990_v56 = vsel %vm8098_vm4, %v5471_v46, 0.0 }
 0x49b   : > { %v12378_v32 = vpack.c.bf16 %v5470_v59, %v5470_v59  ;;  %v8988_v60 = vsel %vm8098_vm4, %v5470_v59, 0.0  ;;  %v9573_v35 = vmul.f32 %v5470_v59, %v5470_v59  ;;  %v5475_v1 = vmax.f32 %v4779_v63, 0.0 }
 0x49c   : > { %v10528_v45 = vadd.f32 %v10527_v16, %v10526_v48  ;;  %8033 = vst.msk [vmem:[%s13964_s12 + $0x6fc] sm:$0xf] %vm7585_vm3, %v12380_v10  ;;  %v8989_v54 = vadd.f32 %v8988_v60, %v8987_v62  ;;  %v5473_v24 = vmax.f32 %v4771_v37, 0.0  ;;  %v9575_v26 = vmul.f32 %v5472_v47, %v5472_v47 }
 0x49d   : > { %8031 = vst.msk [vmem:[%s13964_s12 + $0x6f4] sm:$0xf] %vm7585_vm3, %v12378_v32  ;;  %v10529_v41 = vsel %vm8098_vm4, %v9573_v35, 0.0  ;;  %v4782_v21 = vadd.f32 %v17145_v6, %v16841_v33  ;;  %v4774_v46 = vadd.f32 %v17145_v6, %v16844_v17  ;;  %v10531_v59 = vsel %vm8098_vm4, %v9574_v53, 0.0 }
 0x49e   : > { %v8991_v4 = vadd.f32 %v8990_v56, %v8989_v54  ;;  %v10530_v57 = vadd.f32 %v10529_v41, %v10528_v45  ;;  %v12383_v39 = vpack.c.bf16 %v5475_v1, %v5475_v1  ;;  %v8992_v14 = vsel %vm8098_vm4, %v5472_v47, 0.0 }
 0x49f   : > { %v12381_v16 = vpack.c.bf16 %v5473_v24, %v5473_v24  ;;  %v8994_v63 = vsel %vm8098_vm4, %v5473_v24, 0.0  ;;  %v9576_v37 = vmul.f32 %v5473_v24, %v5473_v24  ;;  %v5476_v33 = vmax.f32 %v4782_v21, 0.0 }
 0x4a0   : > { %v8993_v48 = vadd.f32 %v8992_v14, %v8991_v4  ;;  %v10532_v62 = vadd.f32 %v10531_v59, %v10530_v57  ;;  %8036 = vst.msk [vmem:[%s13964_s12 + $0x708] sm:$0xf] %vm7585_vm3, %v12383_v39  ;;  %v5474_v10 = vmax.f32 %v4774_v46, 0.0  ;;  %v10533_v17 = vsel %vm8098_vm4, %v9575_v26, 0.0 }
 0x4a1   : > { %8034 = vst.msk [vmem:[%s13964_s12 + $0x700] sm:$0xf] %vm7585_vm3, %v12381_v16  ;;  %v10535_v53 = vsel %vm8098_vm4, %v9576_v37, 0.0  ;;  %v4795_v47 = vadd.f32 %v17145_v6, %v16860_v29  ;;  %v4787_v56 = vadd.f32 %v17145_v6, %v16864_v44  ;;  %v9578_v60 = vmul.f32 %v5475_v1, %v5475_v1 }
 0x4a2   : > { %v10534_v32 = vadd.f32 %v10533_v17, %v10532_v62  ;;  %v8995_v35 = vadd.f32 %v8994_v63, %v8993_v48  ;;  %v12384_v45 = vpack.c.bf16 %v5476_v33, %v5476_v33  ;;  %v8998_v54 = vsel %vm8098_vm4, %v5475_v1, 0.0 }
 0x4a3   : > { %v12382_v24 = vpack.c.bf16 %v5474_v10, %v5474_v10  ;;  %v8996_v26 = vsel %vm8098_vm4, %v5474_v10, 0.0  ;;  %v9577_v41 = vmul.f32 %v5474_v10, %v5474_v10  ;;  %v5479_v59 = vmax.f32 %v4795_v47, 0.0 }
 0x4a4   : > { %v10536_v21 = vadd.f32 %v10535_v53, %v10534_v32  ;;  %8037 = vst.msk [vmem:[%s13964_s12 + $0x70c] sm:$0xf] %vm7585_vm3, %v12384_v45  ;;  %v8997_v46 = vadd.f32 %v8996_v26, %v8995_v35  ;;  %v5477_v29 = vmax.f32 %v4787_v56, 0.0  ;;  %v9579_v4 = vmul.f32 %v5476_v33, %v5476_v33 }
 0x4a5   : > { %8035 = vst.msk [vmem:[%s13964_s12 + $0x704] sm:$0xf] %vm7585_vm3, %v12382_v24  ;;  %v10537_v44 = vsel %vm8098_vm4, %v9577_v41, 0.0  ;;  %v4798_v57 = vadd.f32 %v17145_v6, %v16873_v11  ;;  %v4790_v1 = vadd.f32 %v17145_v6, %v16876_v31  ;;  %v10539_v39 = vsel %vm8098_vm4, %v9578_v60, 0.0 }
 0x4a6   : > { %v8999_v14 = vadd.f32 %v8998_v54, %v8997_v46  ;;  %v10538_v16 = vadd.f32 %v10537_v44, %v10536_v21  ;;  %v12387_v63 = vpack.c.bf16 %v5479_v59, %v5479_v59  ;;  %v9000_v37 = vsel %vm8098_vm4, %v5476_v33, 0.0 }
 0x4a7   : > { %v12385_v48 = vpack.c.bf16 %v5477_v29, %v5477_v29  ;;  %v9002_v62 = vsel %vm8098_vm4, %v5477_v29, 0.0  ;;  %v9580_v10 = vmul.f32 %v5477_v29, %v5477_v29  ;;  %v5480_v11 = vmax.f32 %v4798_v57, 0.0 }
 0x4a8   : > { %v10540_v17 = vadd.f32 %v10539_v39, %v10538_v16  ;;  %8040 = vst.msk [vmem:[%s13964_s12 + $0x718] sm:$0xf] %vm7585_vm3, %v12387_v63  ;;  %v9001_v53 = vadd.f32 %v9000_v37, %v8999_v14  ;;  %v5478_v47 = vmax.f32 %v4790_v1, 0.0  ;;  %v10541_v31 = vsel %vm8098_vm4, %v9579_v4, 0.0 }
 0x4a9   : > { %8038 = vst.msk [vmem:[%s13964_s12 + $0x710] sm:$0xf] %vm7585_vm3, %v12385_v48  ;;  %v10543_v56 = vsel %vm8098_vm4, %v9580_v10, 0.0  ;;  %v4811_v33 = vadd.f32 %v17145_v6, %v16892_v55  ;;  %v4803_v32 = vadd.f32 %v17145_v6, %v16896_v27  ;;  %v9582_v60 = vmul.f32 %v5479_v59, %v5479_v59 }
 0x4aa   : > { %v9003_v35 = vadd.f32 %v9002_v62, %v9001_v53  ;;  %v10542_v45 = vadd.f32 %v10541_v31, %v10540_v17  ;;  %v12388_v54 = vpack.c.bf16 %v5480_v11, %v5480_v11  ;;  %v9006_v24 = vsel %vm8098_vm4, %v5479_v59, 0.0 }
 0x4ab   : > { %v12386_v26 = vpack.c.bf16 %v5478_v47, %v5478_v47  ;;  %v9004_v41 = vsel %vm8098_vm4, %v5478_v47, 0.0  ;;  %v9581_v21 = vmul.f32 %v5478_v47, %v5478_v47  ;;  %v5483_v4 = vmax.f32 %v4811_v33, 0.0 }
 0x4ac   : > { %v10544_v46 = vadd.f32 %v10543_v56, %v10542_v45  ;;  %8041 = vst.msk [vmem:[%s13964_s12 + $0x71c] sm:$0xf] %vm7585_vm3, %v12388_v54  ;;  %v9005_v29 = vadd.f32 %v9004_v41, %v9003_v35  ;;  %v5481_v55 = vmax.f32 %v4803_v32, 0.0  ;;  %v9583_v44 = vmul.f32 %v5480_v11, %v5480_v11 }
 0x4ad   : > { %8039 = vst.msk [vmem:[%s13964_s12 + $0x714] sm:$0xf] %vm7585_vm3, %v12386_v26  ;;  %v10545_v27 = vsel %vm8098_vm4, %v9581_v21, 0.0  ;;  %v4814_v57 = vadd.f32 %v17145_v6, %v16905_v43  ;;  %v4806_v59 = vadd.f32 %v17145_v6, %v16908_v28  ;;  %v10547_v1 = vsel %vm8098_vm4, %v9582_v60, 0.0 }
 0x4ae   : > { %v9007_v39 = vadd.f32 %v9006_v24, %v9005_v29  ;;  %v10546_v14 = vadd.f32 %v10545_v27, %v10544_v46  ;;  %v12391_v16 = vpack.c.bf16 %v5483_v4, %v5483_v4  ;;  %v9008_v63 = vsel %vm8098_vm4, %v5480_v11, 0.0 }
 0x4af   : > { %v12389_v37 = vpack.c.bf16 %v5481_v55, %v5481_v55  ;;  %v9010_v48 = vsel %vm8098_vm4, %v5481_v55, 0.0  ;;  %v9584_v62 = vmul.f32 %v5481_v55, %v5481_v55  ;;  %v5484_v43 = vmax.f32 %v4814_v57, 0.0 }
 0x4b0   : > { %v10548_v10 = vadd.f32 %v10547_v1, %v10546_v14  ;;  %8044 = vst.msk [vmem:[%s13964_s12 + $0x728] sm:$0xf] %vm7585_vm3, %v12391_v16  ;;  %v9009_v17 = vadd.f32 %v9008_v63, %v9007_v39  ;;  %v5482_v53 = vmax.f32 %v4806_v59, 0.0  ;;  %v10549_v28 = vsel %vm8098_vm4, %v9583_v44, 0.0 }
 0x4b1   : > { %8042 = vst.msk [vmem:[%s13964_s12 + $0x720] sm:$0xf] %vm7585_vm3, %v12389_v37  ;;  %v10551_v47 = vsel %vm8098_vm4, %v9584_v62, 0.0  ;;  %v4827_v11 = vadd.f32 %v17145_v6, %v16924_v12  ;;  %v4819_v31 = vadd.f32 %v17145_v6, %v16928_v58  ;;  %v9586_v56 = vmul.f32 %v5483_v4, %v5483_v4 }
 0x4b2   : > { %v9011_v33 = vadd.f32 %v9010_v48, %v9009_v17  ;;  %v10550_v32 = vadd.f32 %v10549_v28, %v10548_v10  ;;  %v12392_v60 = vpack.c.bf16 %v5484_v43, %v5484_v43  ;;  %v9014_v35 = vsel %vm8098_vm4, %v5483_v4, 0.0 }
 0x4b3   : > { %v12390_v45 = vpack.c.bf16 %v5482_v53, %v5482_v53  ;;  %v9012_v54 = vsel %vm8098_vm4, %v5482_v53, 0.0  ;;  %v9585_v24 = vmul.f32 %v5482_v53, %v5482_v53  ;;  %v5487_v21 = vmax.f32 %v4827_v11, 0.0 }
 0x4b4   : > { %v10552_v26 = vadd.f32 %v10551_v47, %v10550_v32  ;;  %8045 = vst.msk [vmem:[%s13964_s12 + $0x72c] sm:$0xf] %vm7585_vm3, %v12392_v60  ;;  %v9013_v41 = vadd.f32 %v9012_v54, %v9011_v33  ;;  %v5485_v12 = vmax.f32 %v4819_v31, 0.0  ;;  %v9587_v46 = vmul.f32 %v5484_v43, %v5484_v43 }
 0x4b5   : > { %8043 = vst.msk [vmem:[%s13964_s12 + $0x724] sm:$0xf] %vm7585_vm3, %v12390_v45  ;;  %v10553_v58 = vsel %vm8098_vm4, %v9585_v24, 0.0  ;;  %v4830_v29 = vadd.f32 %v17145_v6, %v16937_v2  ;;  %v4822_v4 = vadd.f32 %v17145_v6, %v16940_v40  ;;  %v10555_v55 = vsel %vm8098_vm4, %v9586_v56, 0.0 }
 0x4b6   : > { %v9015_v44 = vadd.f32 %v9014_v35, %v9013_v41  ;;  %v10554_v27 = vadd.f32 %v10553_v58, %v10552_v26  ;;  %v12395_v57 = vpack.c.bf16 %v5487_v21, %v5487_v21  ;;  %v9016_v59 = vsel %vm8098_vm4, %v5484_v43, 0.0 }
 0x4b7   : > { %v12393_v1 = vpack.c.bf16 %v5485_v12, %v5485_v12  ;;  %v9018_v39 = vsel %vm8098_vm4, %v5485_v12, 0.0  ;;  %v9588_v14 = vmul.f32 %v5485_v12, %v5485_v12  ;;  %v5488_v2 = vmax.f32 %v4830_v29, 0.0 }
 0x4b8   : > { %v10556_v16 = vadd.f32 %v10555_v55, %v10554_v27  ;;  %8048 = vst.msk [vmem:[%s13964_s12 + $0x738] sm:$0xf] %vm7585_vm3, %v12395_v57  ;;  %v9017_v63 = vadd.f32 %v9016_v59, %v9015_v44  ;;  %v5486_v37 = vmax.f32 %v4822_v4, 0.0  ;;  %v10557_v40 = vsel %vm8098_vm4, %v9587_v46, 0.0 }
 0x4b9   : > { %8046 = vst.msk [vmem:[%s13964_s12 + $0x730] sm:$0xf] %vm7585_vm3, %v12393_v1  ;;  %v10559_v48 = vsel %vm8098_vm4, %v9588_v14, 0.0  ;;  %v4843_v62 = vadd.f32 %v17145_v6, %v16956_v51  ;;  %v4835_v10 = vadd.f32 %v17145_v6, %v16960_v8  ;;  %v9590_v17 = vmul.f32 %v5487_v21, %v5487_v21 }
 0x4ba   : > { %v9019_v43 = vadd.f32 %v9018_v39, %v9017_v63  ;;  %v10558_v53 = vadd.f32 %v10557_v40, %v10556_v16  ;;  %v12396_v28 = vpack.c.bf16 %v5488_v2, %v5488_v2  ;;  %v9022_v47 = vsel %vm8098_vm4, %v5487_v21, 0.0 }
 0x4bb   : > { %v12394_v11 = vpack.c.bf16 %v5486_v37, %v5486_v37  ;;  %v9020_v31 = vsel %vm8098_vm4, %v5486_v37, 0.0  ;;  %v9589_v56 = vmul.f32 %v5486_v37, %v5486_v37  ;;  %v5491_v60 = vmax.f32 %v4843_v62, 0.0 }
 0x4bc   : > { %v10560_v33 = vadd.f32 %v10559_v48, %v10558_v53  ;;  %8049 = vst.msk [vmem:[%s13964_s12 + $0x73c] sm:$0xf] %vm7585_vm3, %v12396_v28  ;;  %v9021_v32 = vadd.f32 %v9020_v31, %v9019_v43  ;;  %v5489_v51 = vmax.f32 %v4835_v10, 0.0  ;;  %v9591_v35 = vmul.f32 %v5488_v2, %v5488_v2 }
 0x4bd   : > { %8047 = vst.msk [vmem:[%s13964_s12 + $0x734] sm:$0xf] %vm7585_vm3, %v12394_v11  ;;  %v10561_v8 = vsel %vm8098_vm4, %v9589_v56, 0.0  ;;  %v4846_v45 = vadd.f32 %v17145_v6, %v16969_v20  ;;  %v4838_v54 = vadd.f32 %v17145_v6, %v16972_v23  ;;  %v10563_v24 = vsel %vm8098_vm4, %v9590_v17, 0.0 }
 0x4be   : > { %v9023_v26 = vadd.f32 %v9022_v47, %v9021_v32  ;;  %v10562_v41 = vadd.f32 %v10561_v8, %v10560_v33  ;;  %v12399_v21 = vpack.c.bf16 %v5491_v60, %v5491_v60  ;;  %v9024_v12 = vsel %vm8098_vm4, %v5488_v2, 0.0 }
 0x4bf   : > { %v12397_v46 = vpack.c.bf16 %v5489_v51, %v5489_v51  ;;  %v9026_v58 = vsel %vm8098_vm4, %v5489_v51, 0.0  ;;  %v9592_v29 = vmul.f32 %v5489_v51, %v5489_v51  ;;  %v5492_v20 = vmax.f32 %v4846_v45, 0.0 }
 0x4c0   : > { %v10564_v4 = vadd.f32 %v10563_v24, %v10562_v41  ;;  %8052 = vst.msk [vmem:[%s13964_s12 + $0x748] sm:$0xf] %vm7585_vm3, %v12399_v21  ;;  %v9025_v55 = vadd.f32 %v9024_v12, %v9023_v26  ;;  %v5490_v44 = vmax.f32 %v4838_v54, 0.0  ;;  %v10565_v23 = vsel %vm8098_vm4, %v9591_v35, 0.0 }
 0x4c1   : > { %8050 = vst.msk [vmem:[%s13964_s12 + $0x740] sm:$0xf] %vm7585_vm3, %v12397_v46  ;;  %v10567_v27 = vsel %vm8098_vm4, %v9592_v29, 0.0  ;;  %v4859_v57 = vadd.f32 %v17145_v6, %v16988_v3  ;;  %v4851_v59 = vadd.f32 %v17145_v6, %v16992_v18  ;;  %v9594_v1 = vmul.f32 %v5491_v60, %v5491_v60 }
 0x4c2   : > { %v9027_v39 = vadd.f32 %v9026_v58, %v9025_v55  ;;  %v10566_v14 = vadd.f32 %v10565_v23, %v10564_v4  ;;  %v12400_v16 = vpack.c.bf16 %v5492_v20, %v5492_v20  ;;  %v9030_v63 = vsel %vm8098_vm4, %v5491_v60, 0.0 }
 0x4c3   : > { %v12398_v2 = vpack.c.bf16 %v5490_v44, %v5490_v44  ;;  %v9028_v37 = vsel %vm8098_vm4, %v5490_v44, 0.0  ;;  %v9593_v40 = vmul.f32 %v5490_v44, %v5490_v44  ;;  %v5495_v10 = vmax.f32 %v4859_v57, 0.0 }
 0x4c4   : > { %v10568_v48 = vadd.f32 %v10567_v27, %v10566_v14  ;;  %8053 = vst.msk [vmem:[%s13964_s12 + $0x74c] sm:$0xf] %vm7585_vm3, %v12400_v16  ;;  %v9029_v62 = vadd.f32 %v9028_v37, %v9027_v39  ;;  %v5493_v3 = vmax.f32 %v4851_v59, 0.0  ;;  %v9595_v17 = vmul.f32 %v5492_v20, %v5492_v20 }
 0x4c5   : > { %8051 = vst.msk [vmem:[%s13964_s12 + $0x744] sm:$0xf] %vm7585_vm3, %v12398_v2  ;;  %v10569_v18 = vsel %vm8098_vm4, %v9593_v40, 0.0  ;;  %v4862_v43 = vadd.f32 %v17145_v6, %v17001_v30  ;;  %v4854_v53 = vadd.f32 %v17145_v6, %v17004_v50  ;;  %v10571_v28 = vsel %vm8098_vm4, %v9594_v1, 0.0 }
 0x4c6   : > { %v9031_v47 = vadd.f32 %v9030_v63, %v9029_v62  ;;  %v10570_v11 = vadd.f32 %v10569_v18, %v10568_v48  ;;  %v12403_v31 = vpack.c.bf16 %v5495_v10, %v5495_v10  ;;  %v9032_v56 = vsel %vm8098_vm4, %v5492_v20, 0.0 }
 0x4c7   : > { %v12401_v33 = vpack.c.bf16 %v5493_v3, %v5493_v3  ;;  %v9034_v32 = vsel %vm8098_vm4, %v5493_v3, 0.0  ;;  %v9596_v60 = vmul.f32 %v5493_v3, %v5493_v3  ;;  %v5496_v30 = vmax.f32 %v4862_v43, 0.0 }
 0x4c8   : > { %v10572_v51 = vadd.f32 %v10571_v28, %v10570_v11  ;;  %8056 = vst.msk [vmem:[%s13964_s12 + $0x758] sm:$0xf] %vm7585_vm3, %v12403_v31  ;;  %v9033_v35 = vadd.f32 %v9032_v56, %v9031_v47  ;;  %v5494_v8 = vmax.f32 %v4854_v53, 0.0  ;;  %v10573_v50 = vsel %vm8098_vm4, %v9595_v17, 0.0 }
 0x4c9   : > { %8054 = vst.msk [vmem:[%s13964_s12 + $0x750] sm:$0xf] %vm7585_vm3, %v12401_v33  ;;  %v10575_v45 = vsel %vm8098_vm4, %v9596_v60, 0.0  ;;  %v4875_v54 = vadd.f32 %v17145_v6, %v17020_v25  ;;  %v4867_v24 = vadd.f32 %v17145_v6, %v17024_v7  ;;  %v9598_v26 = vmul.f32 %v5495_v10, %v5495_v10 }
 0x4ca   : > { %v9035_v41 = vadd.f32 %v9034_v32, %v9033_v35  ;;  %v10574_v21 = vadd.f32 %v10573_v50, %v10572_v51  ;;  %v12404_v12 = vpack.c.bf16 %v5496_v30, %v5496_v30  ;;  %v9038_v46 = vsel %vm8098_vm4, %v5495_v10, 0.0 }
 0x4cb   : > { %v12402_v58 = vpack.c.bf16 %v5494_v8, %v5494_v8  ;;  %v9036_v29 = vsel %vm8098_vm4, %v5494_v8, 0.0  ;;  %v9597_v4 = vmul.f32 %v5494_v8, %v5494_v8  ;;  %v5499_v44 = vmax.f32 %v4875_v54, 0.0 }
 0x4cc   : > { %v10576_v55 = vadd.f32 %v10575_v45, %v10574_v21  ;;  %8057 = vst.msk [vmem:[%s13964_s12 + $0x75c] sm:$0xf] %vm7585_vm3, %v12404_v12  ;;  %v9037_v20 = vadd.f32 %v9036_v29, %v9035_v41  ;;  %v5497_v25 = vmax.f32 %v4867_v24, 0.0  ;;  %v9599_v23 = vmul.f32 %v5496_v30, %v5496_v30  ;;  %v17534_v29 = vld [vmem:[%s17805_s2] ss:$0 sm:$0xff] }
 0x4cd   : > { %8055 = vst.msk [vmem:[%s13964_s12 + $0x754] sm:$0xf] %vm7585_vm3, %v12402_v58  ;;  %v10577_v7 = vsel %vm8098_vm4, %v9597_v4, 0.0  ;;  %v4878_v27 = vadd.f32 %v17145_v6, %v17033_v52  ;;  %v4870_v57 = vadd.f32 %v17145_v6, %v17036_v61  ;;  %v10579_v59 = vsel %vm8098_vm4, %v9598_v26, 0.0 }
 0x4ce   : > { %v9039_v1 = vadd.f32 %v9038_v46, %v9037_v20  ;;  %v10578_v39 = vadd.f32 %v10577_v7, %v10576_v55  ;;  %v12407_v14 = vpack.c.bf16 %v5499_v44, %v5499_v44  ;;  %v9040_v16 = vsel %vm8098_vm4, %v5496_v30, 0.0  ;;  %v17984_v55 = vld [vmem:[#allocation30_spill] sm:$0xff] }
 0x4cf   : > { %v12405_v63 = vpack.c.bf16 %v5497_v25, %v5497_v25  ;;  %v9042_v2 = vsel %vm8098_vm4, %v5497_v25, 0.0  ;;  %v9600_v37 = vmul.f32 %v5497_v25, %v5497_v25  ;;  %v5500_v52 = vmax.f32 %v4878_v27, 0.0 }
 0x4d0   : > { %v10580_v40 = vadd.f32 %v10579_v59, %v10578_v39  ;;  %8060 = vst.msk [vmem:[%s13964_s12 + $0x768] sm:$0xf] %vm7585_vm3, %v12407_v14  ;;  %v9041_v48 = vadd.f32 %v9040_v16, %v9039_v1  ;;  %v5498_v62 = vmax.f32 %v4870_v57, 0.0  ;;  %v10581_v61 = vsel %vm8098_vm4, %v9599_v23, 0.0 }
 0x4d1   : > { %8058 = vst.msk [vmem:[%s13964_s12 + $0x760] sm:$0xf] %vm7585_vm3, %v12405_v63  ;;  %v10583_v10 = vsel %vm8098_vm4, %v9600_v37, 0.0  ;;  %v4891_v3 = vadd.f32 %v17145_v6, %v17052_v15  ;;  %v4883_v17 = vadd.f32 %v17145_v6, %v17056_v9  ;;  %v9602_v18 = vmul.f32 %v5499_v44, %v5499_v44  ;;  %v17985_v37 = vld [vmem:[#allocation31_spill] sm:$0xff] }
 0x4d2   : > { %v9043_v43 = vadd.f32 %v9042_v2, %v9041_v48  ;;  %v10582_v53 = vadd.f32 %v10581_v61, %v10580_v40  ;;  %v12408_v28 = vpack.c.bf16 %v5500_v52, %v5500_v52  ;;  %v9046_v47 = vsel %vm8098_vm4, %v5499_v44, 0.0  ;;  %v17986_v48 = vld [vmem:[#allocation32_spill] sm:$0xff] }
 0x4d3   : > { %v12406_v11 = vpack.c.bf16 %v5498_v62, %v5498_v62  ;;  %v9044_v31 = vsel %vm8098_vm4, %v5498_v62, 0.0  ;;  %v9601_v56 = vmul.f32 %v5498_v62, %v5498_v62  ;;  %v5503_v60 = vmax.f32 %v4891_v3, 0.0 }
 0x4d4   : > { %v10584_v33 = vadd.f32 %v10583_v10, %v10582_v53  ;;  %8061 = vst.msk [vmem:[%s13964_s12 + $0x76c] sm:$0xf] %vm7585_vm3, %v12408_v28  ;;  %v9045_v32 = vadd.f32 %v9044_v31, %v9043_v43  ;;  %v5501_v15 = vmax.f32 %v4883_v17, 0.0  ;;  %v9603_v51 = vmul.f32 %v5500_v52, %v5500_v52 }
 0x4d5   : > { %8059 = vst.msk [vmem:[%s13964_s12 + $0x764] sm:$0xf] %vm7585_vm3, %v12406_v11  ;;  %v10585_v9 = vsel %vm8098_vm4, %v9601_v56, 0.0  ;;  %v4894_v35 = vadd.f32 %v17145_v6, %v17065_v5  ;;  %v4886_v30 = vadd.f32 %v17145_v6, %v17068_v0  ;;  %v10587_v8 = vsel %vm8098_vm4, %v9602_v18, 0.0 }
 0x4d6   : > { %v9047_v50 = vadd.f32 %v9046_v47, %v9045_v32  ;;  %v10586_v45 = vadd.f32 %v10585_v9, %v10584_v33  ;;  %v12411_v54 = vpack.c.bf16 %v5503_v60, %v5503_v60  ;;  %v9048_v24 = vsel %vm8098_vm4, %v5500_v52, 0.0  ;;  %v17987_v32 = vld [vmem:[#allocation8_spill] sm:$0xff] }
 0x4d7   : > { %v12409_v26 = vpack.c.bf16 %v5501_v15, %v5501_v15  ;;  %v9050_v41 = vsel %vm8098_vm4, %v5501_v15, 0.0  ;;  %v9604_v21 = vmul.f32 %v5501_v15, %v5501_v15  ;;  %v5504_v5 = vmax.f32 %v4894_v35, 0.0  ;;  %v17988_v15 = vld [vmem:[#allocation9_spill] sm:$0xff] }
 0x4d8   : > { %v10588_v12 = vadd.f32 %v10587_v8, %v10586_v45  ;;  %8064 = vst.msk [vmem:[%s13964_s12 + $0x778] sm:$0xf] %vm7585_vm3, %v12411_v54  ;;  %v9049_v46 = vadd.f32 %v9048_v24, %v9047_v50  ;;  %v5502_v58 = vmax.f32 %v4886_v30, 0.0  ;;  %v10589_v0 = vsel %vm8098_vm4, %v9603_v51, 0.0 }
 0x4d9   : > { %8062 = vst.msk [vmem:[%s13964_s12 + $0x770] sm:$0xf] %vm7585_vm3, %v12409_v26  ;;  %v10591_v6 = vsel %vm8098_vm4, %v9604_v21, 0.0  ;;  %v4907_v4 = vadd.f32 %v17534_v29, %v17084_v36  ;;  %v4899_v20 = vadd.f32 %v17534_v29, %v17984_v55  ;;  %v9606_v44 = vmul.f32 %v5503_v60, %v5503_v60 }
 0x4da   : > { %v9051_v25 = vadd.f32 %v9050_v41, %v9049_v46  ;;  %v10590_v23 = vadd.f32 %v10589_v0, %v10588_v12  ;;  %v12412_v7 = vpack.c.bf16 %v5504_v5, %v5504_v5  ;;  %v9054_v27 = vsel %vm8098_vm4, %v5503_v60, 0.0 }
 0x4db   : > { %v12410_v57 = vpack.c.bf16 %v5502_v58, %v5502_v58  ;;  %v9052_v59 = vsel %vm8098_vm4, %v5502_v58, 0.0  ;;  %v9605_v1 = vmul.f32 %v5502_v58, %v5502_v58  ;;  %v5507_v16 = vmax.f32 %v4907_v4, 0.0  ;;  %v17989_v58 = vld [vmem:[#allocation10_spill] sm:$0xff] }
 0x4dc   : > { %v10592_v39 = vadd.f32 %v10591_v6, %v10590_v23  ;;  %8065 = vst.msk [vmem:[%s13964_s12 + $0x77c] sm:$0xf] %vm7585_vm3, %v12412_v7  ;;  %v9053_v14 = vadd.f32 %v9052_v59, %v9051_v25  ;;  %v5505_v36 = vmax.f32 %v4899_v20, 0.0  ;;  %v9607_v63 = vmul.f32 %v5504_v5, %v5504_v5  ;;  %v17990_v6 = vld [vmem:[#allocation11_spill] sm:$0xff] }
 0x4dd   : > { %8063 = vst.msk [vmem:[%s13964_s12 + $0x774] sm:$0xf] %vm7585_vm3, %v12410_v57  ;;  %v10593_v2 = vsel %vm8098_vm4, %v9605_v1, 0.0  ;;  %v4910_v40 = vadd.f32 %v17534_v29, %v17985_v37  ;;  %v4902_v52 = vadd.f32 %v17534_v29, %v17986_v48  ;;  %v10595_v62 = vsel %vm8098_vm4, %v9606_v44, 0.0  ;;  %v17992_v37 = vld [vmem:[#allocation13_spill] sm:$0xff] }
 0x4de   : > { %v9055_v61 = vadd.f32 %v9054_v27, %v9053_v14  ;;  %v10594_v10 = vadd.f32 %v10593_v2, %v10592_v39  ;;  %v12415_v3 = vpack.c.bf16 %v5507_v16, %v5507_v16  ;;  %v9056_v17 = vsel %vm8098_vm4, %v5504_v5, 0.0 }
 0x4df   : > { %v12413_v18 = vpack.c.bf16 %v5505_v36, %v5505_v36  ;;  %v9058_v43 = vsel %vm8098_vm4, %v5505_v36, 0.0  ;;  %v9608_v53 = vmul.f32 %v5505_v36, %v5505_v36  ;;  %v5508_v11 = vmax.f32 %v4910_v40, 0.0 }
 0x4e0   : > { %v10596_v28 = vadd.f32 %v10595_v62, %v10594_v10  ;;  %8068 = vst.msk [vmem:[%s13964_s12 + $0x788] sm:$0xf] %vm7585_vm3, %v12415_v3  ;;  %v9057_v47 = vadd.f32 %v9056_v17, %v9055_v61  ;;  %v5506_v31 = vmax.f32 %v4902_v52, 0.0  ;;  %v10597_v56 = vsel %vm8098_vm4, %v9607_v63, 0.0  ;;  %v17991_v63 = vld [vmem:[#allocation12_spill] sm:$0xff] }
 0x4e1   : > { %8066 = vst.msk [vmem:[%s13964_s12 + $0x780] sm:$0xf] %vm7585_vm3, %v12413_v18  ;;  %v10599_v33 = vsel %vm8098_vm4, %v9608_v53, 0.0  ;;  %v4923_v60 = vadd.f32 %v17534_v29, %v17987_v32  ;;  %v4915_v51 = vadd.f32 %v17534_v29, %v17988_v15  ;;  %v9610_v9 = vmul.f32 %v5507_v16, %v5507_v16  ;;  %v17994_v32 = vld [vmem:[#allocation15_spill] sm:$0xff] }
 0x4e2   : > { %v9059_v35 = vadd.f32 %v9058_v43, %v9057_v47  ;;  %v10598_v30 = vadd.f32 %v10597_v56, %v10596_v28  ;;  %v12416_v8 = vpack.c.bf16 %v5508_v11, %v5508_v11  ;;  %v9062_v50 = vsel %vm8098_vm4, %v5507_v16, 0.0  ;;  %v17993_v56 = vld [vmem:[#allocation14_spill] sm:$0xff] }
 0x4e3   : > { %v12414_v45 = vpack.c.bf16 %v5506_v31, %v5506_v31  ;;  %v9060_v54 = vsel %vm8098_vm4, %v5506_v31, 0.0  ;;  %v9609_v24 = vmul.f32 %v5506_v31, %v5506_v31  ;;  %v5511_v21 = vmax.f32 %v4923_v60, 0.0 }
 0x4e4   : > { %v10600_v26 = vadd.f32 %v10599_v33, %v10598_v30  ;;  %8069 = vst.msk [vmem:[%s13964_s12 + $0x78c] sm:$0xf] %vm7585_vm3, %v12416_v8  ;;  %v9061_v41 = vadd.f32 %v9060_v54, %v9059_v35  ;;  %v5509_v12 = vmax.f32 %v4915_v51, 0.0  ;;  %v9611_v46 = vmul.f32 %v5508_v11, %v5508_v11 }
 0x4e5   : > { %8067 = vst.msk [vmem:[%s13964_s12 + $0x784] sm:$0xf] %vm7585_vm3, %v12414_v45  ;;  %v10601_v5 = vsel %vm8098_vm4, %v9609_v24, 0.0  ;;  %v4926_v0 = vadd.f32 %v17534_v29, %v17989_v58  ;;  %v4918_v4 = vadd.f32 %v17534_v29, %v17990_v6  ;;  %v10603_v55 = vsel %vm8098_vm4, %v9610_v9, 0.0  ;;  %v17996_v58 = vld [vmem:[#allocation17_spill] sm:$0xff] }
 0x4e6   : > { %v9063_v20 = vadd.f32 %v9062_v50, %v9061_v41  ;;  %v10602_v44 = vadd.f32 %v10601_v5, %v10600_v26  ;;  %v12419_v25 = vpack.c.bf16 %v5511_v21, %v5511_v21  ;;  %v9064_v23 = vsel %vm8098_vm4, %v5508_v11, 0.0 }
 0x4e7   : > { %v12417_v7 = vpack.c.bf16 %v5509_v12, %v5509_v12  ;;  %v9066_v27 = vsel %vm8098_vm4, %v5509_v12, 0.0  ;;  %v9612_v57 = vmul.f32 %v5509_v12, %v5509_v12  ;;  %v5512_v39 = vmax.f32 %v4926_v0, 0.0 }
 0x4e8   : > { %v10604_v59 = vadd.f32 %v10603_v55, %v10602_v44  ;;  %8072 = vst.msk [vmem:[%s13964_s12 + $0x798] sm:$0xf] %vm7585_vm3, %v12419_v25  ;;  %v9065_v1 = vadd.f32 %v9064_v23, %v9063_v20  ;;  %v5510_v14 = vmax.f32 %v4918_v4, 0.0  ;;  %v10605_v16 = vsel %vm8098_vm4, %v9611_v46, 0.0  ;;  %v17995_v46 = vld [vmem:[#allocation16_spill] sm:$0xff] }
 0x4e9   : > { %8070 = vst.msk [vmem:[%s13964_s12 + $0x790] sm:$0xf] %vm7585_vm3, %v12417_v7  ;;  %v10607_v36 = vsel %vm8098_vm4, %v9612_v57, 0.0  ;;  %v4939_v2 = vadd.f32 %v17534_v29, %v17991_v63  ;;  %v4931_v40 = vadd.f32 %v17534_v29, %v17992_v37  ;;  %v9614_v48 = vmul.f32 %v5511_v21, %v5511_v21  ;;  %v17998_v63 = vld [vmem:[#allocation19_spill] sm:$0xff] }
 0x4ea   : > { %v9067_v52 = vadd.f32 %v9066_v27, %v9065_v1  ;;  %v10606_v62 = vadd.f32 %v10605_v16, %v10604_v59  ;;  %v12420_v61 = vpack.c.bf16 %v5512_v39, %v5512_v39  ;;  %v9070_v10 = vsel %vm8098_vm4, %v5511_v21, 0.0  ;;  %v17997_v16 = vld [vmem:[#allocation18_spill] sm:$0xff] }
 0x4eb   : > { %v12418_v3 = vpack.c.bf16 %v5510_v14, %v5510_v14  ;;  %v9068_v17 = vsel %vm8098_vm4, %v5510_v14, 0.0  ;;  %v9613_v18 = vmul.f32 %v5510_v14, %v5510_v14  ;;  %v5515_v28 = vmax.f32 %v4939_v2, 0.0 }
 0x4ec   : > { %v10608_v43 = vadd.f32 %v10607_v36, %v10606_v62  ;;  %8073 = vst.msk [vmem:[%s13964_s12 + $0x79c] sm:$0xf] %vm7585_vm3, %v12420_v61  ;;  %v9069_v53 = vadd.f32 %v9068_v17, %v9067_v52  ;;  %v5513_v47 = vmax.f32 %v4931_v40, 0.0  ;;  %v9615_v11 = vmul.f32 %v5512_v39, %v5512_v39 }
 0x4ed   : > { %8071 = vst.msk [vmem:[%s13964_s12 + $0x794] sm:$0xf] %vm7585_vm3, %v12418_v3  ;;  %v10609_v31 = vsel %vm8098_vm4, %v9613_v18, 0.0  ;;  %v4942_v33 = vadd.f32 %v17534_v29, %v17993_v56  ;;  %v4934_v60 = vadd.f32 %v17534_v29, %v17994_v32  ;;  %v10611_v15 = vsel %vm8098_vm4, %v9614_v48, 0.0  ;;  %v18000_v56 = vld [vmem:[#allocation21_spill] sm:$0xff] }
 0x4ee   : > { %v9071_v51 = vadd.f32 %v9070_v10, %v9069_v53  ;;  %v10610_v9 = vadd.f32 %v10609_v31, %v10608_v43  ;;  %v12423_v35 = vpack.c.bf16 %v5515_v28, %v5515_v28  ;;  %v9072_v30 = vsel %vm8098_vm4, %v5512_v39, 0.0 }
 0x4ef   : > { %v12421_v8 = vpack.c.bf16 %v5513_v47, %v5513_v47  ;;  %v9074_v50 = vsel %vm8098_vm4, %v5513_v47, 0.0  ;;  %v9616_v45 = vmul.f32 %v5513_v47, %v5513_v47  ;;  %v5516_v26 = vmax.f32 %v4942_v33, 0.0 }
 0x4f0   : > { %v10612_v54 = vadd.f32 %v10611_v15, %v10610_v9  ;;  %8076 = vst.msk [vmem:[%s13964_s12 + $0x7a8] sm:$0xf] %vm7585_vm3, %v12423_v35  ;;  %v9073_v24 = vadd.f32 %v9072_v30, %v9071_v51  ;;  %v5514_v41 = vmax.f32 %v4934_v60, 0.0  ;;  %v10613_v21 = vsel %vm8098_vm4, %v9615_v11, 0.0  ;;  %v17999_v11 = vld [vmem:[#allocation20_spill] sm:$0xff] }
 0x4f1   : > { %8074 = vst.msk [vmem:[%s13964_s12 + $0x7a0] sm:$0xf] %vm7585_vm3, %v12421_v8  ;;  %v10615_v12 = vsel %vm8098_vm4, %v9616_v45, 0.0  ;;  %v4955_v5 = vadd.f32 %v17534_v29, %v17995_v46  ;;  %v4947_v0 = vadd.f32 %v17534_v29, %v17996_v58  ;;  %v9618_v6 = vmul.f32 %v5515_v28, %v5515_v28 }
 0x4f2   : > { %v9075_v4 = vadd.f32 %v9074_v50, %v9073_v24  ;;  %v10614_v55 = vadd.f32 %v10613_v21, %v10612_v54  ;;  %v12424_v20 = vpack.c.bf16 %v5516_v26, %v5516_v26  ;;  %v9078_v44 = vsel %vm8098_vm4, %v5515_v28, 0.0  ;;  %v18001_v21 = vld [vmem:[#allocation22_spill] sm:$0xff] }
 0x4f3   : > { %v12422_v25 = vpack.c.bf16 %v5514_v41, %v5514_v41  ;;  %v9076_v23 = vsel %vm8098_vm4, %v5514_v41, 0.0  ;;  %v9617_v7 = vmul.f32 %v5514_v41, %v5514_v41  ;;  %v5519_v59 = vmax.f32 %v4955_v5, 0.0 }
 0x4f4   : > { %v10616_v27 = vadd.f32 %v10615_v12, %v10614_v55  ;;  %8077 = vst.msk [vmem:[%s13964_s12 + $0x7ac] sm:$0xf] %vm7585_vm3, %v12424_v20  ;;  %v9077_v57 = vadd.f32 %v9076_v23, %v9075_v4  ;;  %v5517_v1 = vmax.f32 %v4947_v0, 0.0  ;;  %v9619_v39 = vmul.f32 %v5516_v26, %v5516_v26 }
 0x4f5   : > { %8075 = vst.msk [vmem:[%s13964_s12 + $0x7a4] sm:$0xf] %vm7585_vm3, %v12422_v25  ;;  %v10617_v14 = vsel %vm8098_vm4, %v9617_v7, 0.0  ;;  %v4958_v36 = vadd.f32 %v17534_v29, %v17997_v16  ;;  %v4950_v2 = vadd.f32 %v17534_v29, %v17998_v63  ;;  %v10619_v37 = vsel %vm8098_vm4, %v9618_v6, 0.0 }
 0x4f6   : > { %v9079_v40 = vadd.f32 %v9078_v44, %v9077_v57  ;;  %v10618_v48 = vadd.f32 %v10617_v14, %v10616_v27  ;;  %v12427_v52 = vpack.c.bf16 %v5519_v59, %v5519_v59  ;;  %v9080_v62 = vsel %vm8098_vm4, %v5516_v26, 0.0 }
 0x4f7   : > { %v12425_v61 = vpack.c.bf16 %v5517_v1, %v5517_v1  ;;  %v9082_v10 = vsel %vm8098_vm4, %v5517_v1, 0.0  ;;  %v9620_v3 = vmul.f32 %v5517_v1, %v5517_v1  ;;  %v5520_v43 = vmax.f32 %v4958_v36, 0.0 }
 0x4f8   : > { %v10620_v17 = vadd.f32 %v10619_v37, %v10618_v48  ;;  %8080 = vst.msk [vmem:[%s13964_s12 + $0x7b8] sm:$0xf] %vm7585_vm3, %v12427_v52  ;;  %v9081_v18 = vadd.f32 %v9080_v62, %v9079_v40  ;;  %v5518_v53 = vmax.f32 %v4950_v2, 0.0  ;;  %v10621_v28 = vsel %vm8098_vm4, %v9619_v39, 0.0  ;;  %v18003_v39 = vld [vmem:[#allocation24_spill] sm:$0xff] }
 0x4f9   : > { %8078 = vst.msk [vmem:[%s13964_s12 + $0x7b0] sm:$0xf] %vm7585_vm3, %v12425_v61  ;;  %v10623_v47 = vsel %vm8098_vm4, %v9620_v3, 0.0  ;;  %v4971_v31 = vadd.f32 %v17534_v29, %v17999_v11  ;;  %v4963_v33 = vadd.f32 %v17534_v29, %v18000_v56  ;;  %v9622_v32 = vmul.f32 %v5519_v59, %v5519_v59 }
 0x4fa   : > { %v9083_v60 = vadd.f32 %v9082_v10, %v9081_v18  ;;  %v10622_v15 = vadd.f32 %v10621_v28, %v10620_v17  ;;  %v12428_v51 = vpack.c.bf16 %v5520_v43, %v5520_v43  ;;  %v9086_v9 = vsel %vm8098_vm4, %v5519_v59, 0.0  ;;  %v18002_v59 = vld [vmem:[#allocation23_spill] sm:$0xff] }
 0x4fb   : > { %v12426_v35 = vpack.c.bf16 %v5518_v53, %v5518_v53  ;;  %v9084_v30 = vsel %vm8098_vm4, %v5518_v53, 0.0  ;;  %v9621_v8 = vmul.f32 %v5518_v53, %v5518_v53  ;;  %v5523_v54 = vmax.f32 %v4971_v31, 0.0 }
 0x4fc   : > { %v10624_v50 = vadd.f32 %v10623_v47, %v10622_v15  ;;  %8081 = vst.msk [vmem:[%s13964_s12 + $0x7bc] sm:$0xf] %vm7585_vm3, %v12428_v51  ;;  %v9085_v45 = vadd.f32 %v9084_v30, %v9083_v60  ;;  %v5521_v24 = vmax.f32 %v4963_v33, 0.0  ;;  %v9623_v26 = vmul.f32 %v5520_v43, %v5520_v43 }
 0x4fd   : > { %8079 = vst.msk [vmem:[%s13964_s12 + $0x7b4] sm:$0xf] %vm7585_vm3, %v12426_v35  ;;  %v10625_v41 = vsel %vm8098_vm4, %v9621_v8, 0.0  ;;  %v4974_v12 = vadd.f32 %v17534_v29, %v18001_v21  ;;  %v4966_v46 = vadd.f32 %v17534_v29, %v17233_v38  ;;  %v10627_v5 = vsel %vm8098_vm4, %v9622_v32, 0.0 }
 0x4fe   : > { %v9087_v58 = vadd.f32 %v9086_v9, %v9085_v45  ;;  %v10626_v0 = vadd.f32 %v10625_v41, %v10624_v50  ;;  %v12431_v6 = vpack.c.bf16 %v5523_v54, %v5523_v54  ;;  %v9088_v4 = vsel %vm8098_vm4, %v5520_v43, 0.0  ;;  %v18004_v43 = vld [vmem:[#allocation25_spill] sm:$0xff]  ;;  %v18005_v45 = vld [vmem:[#allocation26_spill] sm:$0xff] }
 0x4ff   : > { %v12429_v55 = vpack.c.bf16 %v5521_v24, %v5521_v24  ;;  %v9090_v20 = vsel %vm8098_vm4, %v5521_v24, 0.0  ;;  %v9624_v44 = vmul.f32 %v5521_v24, %v5521_v24  ;;  %v5524_v7 = vmax.f32 %v4974_v12, 0.0 }
 0x500   : > { %v10628_v25 = vadd.f32 %v10627_v5, %v10626_v0  ;;  %8084 = vst.msk [vmem:[%s13964_s12 + $0x7c8] sm:$0xf] %vm7585_vm3, %v12431_v6  ;;  %v9089_v23 = vadd.f32 %v9088_v4, %v9087_v58  ;;  %v5522_v27 = vmax.f32 %v4966_v46, 0.0  ;;  %v10629_v38 = vsel %vm8098_vm4, %v9623_v26, 0.0 }
 0x501   : > { %8082 = vst.msk [vmem:[%s13964_s12 + $0x7c0] sm:$0xf] %vm7585_vm3, %v12429_v55  ;;  %v10631_v57 = vsel %vm8098_vm4, %v9624_v44, 0.0  ;;  %v4987_v1 = vadd.f32 %v17534_v29, %v18002_v59  ;;  %v4979_v14 = vadd.f32 %v17534_v29, %v18003_v39  ;;  %v9626_v16 = vmul.f32 %v5523_v54, %v5523_v54  ;;  %v18006_v44 = vld [vmem:[#allocation27_spill] sm:$0xff] }
 0x502   : > { %v9091_v36 = vadd.f32 %v9090_v20, %v9089_v23  ;;  %v10630_v63 = vadd.f32 %v10629_v38, %v10628_v25  ;;  %v12432_v2 = vpack.c.bf16 %v5524_v7, %v5524_v7  ;;  %v9094_v37 = vsel %vm8098_vm4, %v5523_v54, 0.0 }
 0x503   : > { %v12430_v40 = vpack.c.bf16 %v5522_v27, %v5522_v27  ;;  %v9092_v48 = vsel %vm8098_vm4, %v5522_v27, 0.0  ;;  %v9625_v52 = vmul.f32 %v5522_v27, %v5522_v27  ;;  %v5527_v10 = vmax.f32 %v4987_v1, 0.0 }
 0x504   : > { %v10632_v62 = vadd.f32 %v10631_v57, %v10630_v63  ;;  %8085 = vst.msk [vmem:[%s13964_s12 + $0x7cc] sm:$0xf] %vm7585_vm3, %v12432_v2  ;;  %v9093_v61 = vadd.f32 %v9092_v48, %v9091_v36  ;;  %v5525_v3 = vmax.f32 %v4979_v14, 0.0  ;;  %v9627_v17 = vmul.f32 %v5524_v7, %v5524_v7 }
 0x505   : > { %8083 = vst.msk [vmem:[%s13964_s12 + $0x7c4] sm:$0xf] %vm7585_vm3, %v12430_v40  ;;  %v10633_v18 = vsel %vm8098_vm4, %v9625_v52, 0.0  ;;  %v4990_v53 = vadd.f32 %v17534_v29, %v18004_v43  ;;  %v4982_v28 = vadd.f32 %v17534_v29, %v17265_v49  ;;  %v10635_v47 = vsel %vm8098_vm4, %v9626_v16, 0.0 }
 0x506   : > { %v9095_v11 = vadd.f32 %v9094_v37, %v9093_v61  ;;  %v10634_v31 = vadd.f32 %v10633_v18, %v10632_v62  ;;  %v12435_v56 = vpack.c.bf16 %v5527_v10, %v5527_v10  ;;  %v9096_v33 = vsel %vm8098_vm4, %v5524_v7, 0.0 }
 0x507   : > { %v12433_v32 = vpack.c.bf16 %v5525_v3, %v5525_v3  ;;  %v9098_v60 = vsel %vm8098_vm4, %v5525_v3, 0.0  ;;  %v9628_v15 = vmul.f32 %v5525_v3, %v5525_v3  ;;  %v5528_v35 = vmax.f32 %v4990_v53, 0.0 }
 0x508   : > { %v10636_v51 = vadd.f32 %v10635_v47, %v10634_v31  ;;  %8088 = vst.msk [vmem:[%s13964_s12 + $0x7d8] sm:$0xf] %vm7585_vm3, %v12435_v56  ;;  %v9097_v9 = vadd.f32 %v9096_v33, %v9095_v11  ;;  %v5526_v30 = vmax.f32 %v4982_v28, 0.0  ;;  %v10637_v49 = vsel %vm8098_vm4, %v9627_v17, 0.0  ;;  %v18007_v31 = vld [vmem:[#allocation28_spill] sm:$0xff] }
 0x509   : > { %8086 = vst.msk [vmem:[%s13964_s12 + $0x7d0] sm:$0xf] %vm7585_vm3, %v12433_v32  ;;  %v10639_v8 = vsel %vm8098_vm4, %v9628_v15, 0.0  ;;  %v5003_v50 = vadd.f32 %v17534_v29, %v17281_v22  ;;  %v4995_v54 = vadd.f32 %v17534_v29, %v18005_v45  ;;  %v9630_v24 = vmul.f32 %v5527_v10, %v5527_v10 }
 0x50a   : > { %v9099_v26 = vadd.f32 %v9098_v60, %v9097_v9  ;;  %v10638_v41 = vadd.f32 %v10637_v49, %v10636_v51  ;;  %v12436_v21 = vpack.c.bf16 %v5528_v35, %v5528_v35  ;;  %v9102_v12 = vsel %vm8098_vm4, %v5527_v10, 0.0 }
 0x50b   : > { %v12434_v46 = vpack.c.bf16 %v5526_v30, %v5526_v30  ;;  %v9100_v5 = vsel %vm8098_vm4, %v5526_v30, 0.0  ;;  %v9629_v58 = vmul.f32 %v5526_v30, %v5526_v30  ;;  %v5531_v4 = vmax.f32 %v5003_v50, 0.0 }
 0x50c   : > { %v10640_v0 = vadd.f32 %v10639_v8, %v10638_v41  ;;  %8089 = vst.msk [vmem:[%s13964_s12 + $0x7dc] sm:$0xf] %vm7585_vm3, %v12436_v21  ;;  %v9101_v6 = vadd.f32 %v9100_v5, %v9099_v26  ;;  %v5529_v22 = vmax.f32 %v4995_v54, 0.0  ;;  %v9631_v55 = vmul.f32 %v5528_v35, %v5528_v35 }
 0x50d   : > { %8087 = vst.msk [vmem:[%s13964_s12 + $0x7d4] sm:$0xf] %vm7585_vm3, %v12434_v46  ;;  %v10641_v20 = vsel %vm8098_vm4, %v9629_v58, 0.0  ;;  %v5006_v25 = vadd.f32 %v17534_v29, %v18006_v44  ;;  %v4998_v23 = vadd.f32 %v17534_v29, %v17297_v13  ;;  %v10643_v7 = vsel %vm8098_vm4, %v9630_v24, 0.0 }
 0x50e   : > { %v9103_v27 = vadd.f32 %v9102_v12, %v9101_v6  ;;  %v10642_v38 = vadd.f32 %v10641_v20, %v10640_v0  ;;  %v12439_v57 = vpack.c.bf16 %v5531_v4, %v5531_v4  ;;  %v9104_v59 = vsel %vm8098_vm4, %v5528_v35, 0.0 }
 0x50f   : > { %v12437_v1 = vpack.c.bf16 %v5529_v22, %v5529_v22  ;;  %v9106_v39 = vsel %vm8098_vm4, %v5529_v22, 0.0  ;;  %v9632_v14 = vmul.f32 %v5529_v22, %v5529_v22  ;;  %v5532_v63 = vmax.f32 %v5006_v25, 0.0 }
 0x510   : > { %v10644_v16 = vadd.f32 %v10643_v7, %v10642_v38  ;;  %8092 = vst.msk [vmem:[%s13964_s12 + $0x7e8] sm:$0xf] %vm7585_vm3, %v12439_v57  ;;  %v9105_v36 = vadd.f32 %v9104_v59, %v9103_v27  ;;  %v5530_v2 = vmax.f32 %v4998_v23, 0.0  ;;  %v10645_v13 = vsel %vm8098_vm4, %v9631_v55, 0.0 }
 0x511   : > { %8090 = vst.msk [vmem:[%s13964_s12 + $0x7e0] sm:$0xf] %vm7585_vm3, %v12437_v1  ;;  %v10647_v37 = vsel %vm8098_vm4, %v9632_v14, 0.0  ;;  %v5019_v40 = vadd.f32 %v17534_v29, %v17313_v34  ;;  %v5011_v48 = vadd.f32 %v17534_v29, %v17317_v42  ;;  %v9634_v52 = vmul.f32 %v5531_v4, %v5531_v4 }
 0x512   : > { %v9107_v62 = vadd.f32 %v9106_v39, %v9105_v36  ;;  %v10646_v61 = vadd.f32 %v10645_v13, %v10644_v16  ;;  %v12440_v10 = vpack.c.bf16 %v5532_v63, %v5532_v63  ;;  %v9110_v3 = vsel %vm8098_vm4, %v5531_v4, 0.0 }
 0x513   : > { %v12438_v17 = vpack.c.bf16 %v5530_v2, %v5530_v2  ;;  %v9108_v18 = vsel %vm8098_vm4, %v5530_v2, 0.0  ;;  %v9633_v43 = vmul.f32 %v5530_v2, %v5530_v2  ;;  %v5535_v34 = vmax.f32 %v5019_v40, 0.0 }
 0x514   : > { %v10648_v53 = vadd.f32 %v10647_v37, %v10646_v61  ;;  %8093 = vst.msk [vmem:[%s13964_s12 + $0x7ec] sm:$0xf] %vm7585_vm3, %v12440_v10  ;;  %v9109_v28 = vadd.f32 %v9108_v18, %v9107_v62  ;;  %v5533_v47 = vmax.f32 %v5011_v48, 0.0  ;;  %v9635_v11 = vmul.f32 %v5532_v63, %v5532_v63 }
 0x515   : > { %8091 = vst.msk [vmem:[%s13964_s12 + $0x7e4] sm:$0xf] %vm7585_vm3, %v12438_v17  ;;  %v10649_v42 = vsel %vm8098_vm4, %v9633_v43, 0.0  ;;  %v5022_v56 = vadd.f32 %v17534_v29, %v18007_v31  ;;  %v5014_v33 = vadd.f32 %v17534_v29, %v17329_v19  ;;  %v10651_v32 = vsel %vm8098_vm4, %v9634_v52, 0.0 }
 0x516   : > { %v9111_v60 = vadd.f32 %v9110_v3, %v9109_v28  ;;  %v10650_v15 = vadd.f32 %v10649_v42, %v10648_v53  ;;  %v12443_v51 = vpack.c.bf16 %v5535_v34, %v5535_v34  ;;  %v9112_v9 = vsel %vm8098_vm4, %v5532_v63, 0.0 }
 0x517   : > { %v12441_v35 = vpack.c.bf16 %v5533_v47, %v5533_v47  ;;  %v9114_v30 = vsel %vm8098_vm4, %v5533_v47, 0.0  ;;  %v9636_v49 = vmul.f32 %v5533_v47, %v5533_v47  ;;  %v5536_v19 = vmax.f32 %v5022_v56, 0.0 }
 0x518   : > { %v10652_v8 = vadd.f32 %v10651_v32, %v10650_v15  ;;  %8096 = vst.msk [vmem:[%s13964_s12 + $0x7f8] sm:$0xf] %vm7585_vm3, %v12443_v51  ;;  %v9113_v50 = vadd.f32 %v9112_v9, %v9111_v60  ;;  %v5534_v29 = vmax.f32 %v5014_v33, 0.0  ;;  %v10653_v45 = vsel %vm8098_vm4, %v9635_v11, 0.0 }
 0x519   : > { %8094 = vst.msk [vmem:[%s13964_s12 + $0x7f0] sm:$0xf] %vm7585_vm3, %v12441_v35  ;;  %v10655_v54 = vsel %vm8098_vm4, %v9636_v49, 0.0  ;;  %v12444_v41 = vpack.c.bf16 %v5536_v19, %v5536_v19  ;;  %v9638_v21 = vmul.f32 %v5535_v34, %v5535_v34  ;;  %v9118_v6 = vsel %vm8098_vm4, %v5535_v34, 0.0 }
 0x51a   : > { %v9115_v24 = vadd.f32 %v9114_v30, %v9113_v50  ;;  %v10654_v26 = vadd.f32 %v10653_v45, %v10652_v8  ;;  %v12442_v12 = vpack.c.bf16 %v5534_v29, %v5534_v29  ;;  %v9116_v46 = vsel %vm8098_vm4, %v5534_v29, 0.0 }
 0x51b   : > { %v9637_v5 = vmul.f32 %v5534_v29, %v5534_v29  ;;  %8097 = vst.msk [vmem:[%s13964_s12 + $0x7fc] sm:$0xf] %vm7585_vm3, %v12444_v41  ;;  %v9639_v4 = vmul.f32 %v5536_v19, %v5536_v19 }
 0x51c   : > { %v10656_v58 = vadd.f32 %v10655_v54, %v10654_v26  ;;  %v9117_v0 = vadd.f32 %v9116_v46, %v9115_v24  ;;  %8095 = vst.msk [vmem:[%s13964_s12 + $0x7f4] sm:$0xf] %vm7585_vm3, %v12442_v12 }
 0x51d   : > { %v10657_v22 = vsel %vm8098_vm4, %v9637_v5, 0.0 }
 0x51e   : > { %v9119_v55 = vadd.f32 %v9118_v6, %v9117_v0  ;;  %v10658_v20 = vadd.f32 %v10657_v22, %v10656_v58 }
 0x51f   : > { %13602 = shalt.err (!%p13599_p3)
}
 0x520   : > { %s13603_s12 = scalar_lea.hbm %s17733_s9, 32768  ;;  %s13607_s14 = scalar_lea.hbm %s17806_s3, 1048576 }
 0x521   : > { %p13604_p4 = scmp.ne.s32.totalorder %s17733_s9, %s13603_s12  ;;  %p13608_p0 = scmp.lt.u32.totalorder %s17733_s9, %s17806_s3 }
 0x522   : > { %p13609_p2 = scmp.lt.u32.totalorder %s13607_s14, %s13603_s12  ;;  %p13611_p8 = scmp.lt.u32.totalorder %s13603_s12, %s17733_s9 }
 0x523   : > { %p13605_p6 = pnand %p13604_p4, %p18008_p9 }
 0x524   : > { %p13610_p5 = por %p13609_p2, %p13608_p0 }
 0x525   : > { %p13606_p7 = pneg %p13605_p6 }
 0x526   : > { %p13612_p11 = por %p13611_p8, %p13610_p5 }
 0x528   : > { %p13613_p13 = pnand %p13612_p11, %p13606_p7 }
 0x52a   : > { %13616 = shalt.err (!%p13613_p13)
}
 0x52b   : > { %s13678_s30 = smov 64   ;;  %s13679_s15 = smov 4   ;;  %v10659_v44 = vsel %vm8098_vm4, %v9638_v21, 0.0  ;;  %v9120_v25 = vsel %vm8098_vm4, %v5536_v19, 0.0  ;;  %v10661_v27 = vsel %vm8098_vm4, %v9639_v4, 0.0 }
 0x52c   : > { %13226 = dma.vmem_to_hbm [thread:$0]  (%p18008_p9), %s17735_s17, 32768, %s17733_s9, %s10672_s13, %s13678_s30, %s13678_s30, %s13679_s15   ;;  %v9121_v23 = vadd.f32 %v9120_v25, %v9119_v55  ;;  %v10660_v7 = vadd.f32 %v10659_v44, %v10658_v20 }
 0x52d   : > { %p339_p10 = scmp.lt.s32.totalorder %s13663_s21, 31 }
 0x52e   : > { %v9122_v38 = vrot.slane %v9121_v23, 4  ;;  %v10662_v57 = vadd.f32 %v10661_v27, %v10660_v7 }
 0x52f   : > { %s18018_s21 = smov (!%p339_p10, %s13663_s21), 31 }
 0x530   : > { %v9123_v59 = vadd.f32 %v9122_v38, %v9121_v23  ;;  %v10663_v1 = vrot.slane %v10662_v57, 4  ;;  %s10898_s11 = sshll.u32 %s18018_s21, 3 }
 0x531   : > { %s345_s17 = scalar_lea.vmem %s17807_s4, %s10898_s11  ;;  %s352_s25 = scalar_lea.vmem %s17808_s5, %s10898_s11 }
 0x532   : > { %v9124_v39 = vrot.slane %v9123_v59, 2  ;;  %v10664_v14 = vadd.f32 %v10663_v1, %v10662_v57 }
 0x534   : > { %v9125_v16 = vadd.f32 %v9124_v39, %v9123_v59  ;;  %v10665_v36 = vrot.slane %v10664_v14, 2 }
 0x536   : > { %v9126_v63 = vrot.slane %v9125_v16, 1  ;;  %v10666_v2 = vadd.f32 %v10665_v36, %v10664_v14 }
 0x538   : > { %v9127_v13 = vadd.f32 %v9126_v63, %v9125_v16  ;;  %v10667_v37 = vrot.slane %v10666_v2, 1 }
 0x53a   : > { %v10668_v40 = vadd.f32 %v10667_v37, %v10666_v2  ;;  %10669 = vst.msk [vmem:[%s345_s17] sm:$0xff] %vm8098_vm4, %v9127_v13 }
 0x53c   : > { %10670 = vst.msk [vmem:[%s352_s25] sm:$0xff] %vm8098_vm4, %v10668_v40 }
 0x53d PF: > { %p13237_p9 = scmp.ge.s32.totalorder %s13671_s23, 2  ;;  %s10721_s21 = sand.u32 1, %s13651_s18  }
 0x53e   : > { %p18009_p12 = scmp.ne.s32.totalorder %s17813_s8, 0  ;;  %s10722_s27 = scalar_lea.sflag [#allocation4], %s10721_s21 }
 0x540   : > { %p13233_p1 = pnand %p13237_p9, %p18009_p12 }
 0x542   : > { %13646 = dma.done.wait (!%p13233_p1), %s10722_s27, 32768  }
 0x543   : > { %13648 = vsyncadd (!%p13233_p1), %s10722_s27, 4294934528  ;;  %s22_s23 = sadd.s32 1, %s13671_s23   ;;  %s18010_s18 = smov %s13655_s19 }
 0x544   : > { %p19_p3 = scmp.ge.s32.totalorder %s22_s23, 34   ;;  %s18011_s19 = smov %s13659_s20 }
 0x545   : > { %s18012_s20 = smov %s13766_s7  ;;  %s18013_s21 = smov %s13667_s22 }
 0x546   : > { %s18014_s22 = smov %s18016_s26  ;;  %21 = sbr.rel (!%p19_p3) target bundleno = 6 (0x6), region = 107 }
 0x54d   :  { %10747 = vsyncpa [#allocation3], 1 }
 0x54e   :  { %10749 = vsyncpa [#allocation3 + $0x1], 1 }
 0x54f   :  { %10750 = vsyncpa [#allocation4], 1 }
 0x550   :  { %10752 = vsyncpa [#allocation4 + $0x1], 1 }

</bundles_post_ra>
